<compile_context>
chip_gen: v7x
topology: tpu7x:2x2x1
jax: 0.10.0
libtpu: 0.0.40
codegen_flags: <defaults>
</compile_context>

<pallas_src>
import jax
import jax.numpy as jnp
from jax.experimental import pallas as pl
from jax.experimental.pallas import tpu as pltpu  # noqa: F401  (kept for TPU-specific params if scaled up)

# ---- small BERT-style config ----
B = 8          # number of graph nodes == batch size
S = 8          # sequence length
H = 32         # hidden_size
NH = 4         # num_attention_heads
DH = H // NH   # attention head size
I = 64         # intermediate_size
L = 2          # num_hidden_layers
EPS = 1e-12    # BERT LayerNorm eps


def _layer_norm(x, gamma, beta):
    mu = jnp.mean(x, axis=-1, keepdims=True)
    var = jnp.mean((x - mu) ** 2, axis=-1, keepdims=True)
    return (x - mu) * jax.lax.rsqrt(var + EPS) * gamma + beta


def _gelu_tanh(x):
    # TODO(synk): HuggingFace BertIntermediate defaults to erf-based gelu; tanh
    # approximation differs at ~1e-3 (erf is not reliably lowerable in Mosaic).
    c = 0.7978845608028654
    return 0.5 * x * (1.0 + jnp.tanh(c * (x + 0.044715 * x * x * x)))


# ---------------- fused encoder kernel: L x (SAGE -> attention -> FFN) ----------------
def _encoder_kernel(adj_ref, mask_ref, x_ref,
                    sage_ws_ref, sage_wn_ref, sage_b_ref,
                    wq_ref, bq_ref, wk_ref, bk_ref, wv_ref, bv_ref,
                    wo_ref, bo_ref, ln1_g_ref, ln1_b_ref,
                    w1_ref, b1_ref, w2_ref, b2_ref, ln2_g_ref, ln2_b_ref,
                    out_ref):
    f32 = jnp.float32
    adj = adj_ref[...]        # (B, B)
    mask = mask_ref[...]      # (B, 1, S) additive attention mask (zeros == mask=None)
    h = x_ref[...]            # (B, S, H)

    # graph degree / mean normalization (reused by every layer)
    deg = jnp.sum(adj, axis=-1, keepdims=True)                       # (B, 1)
    inv_deg = pl.reciprocal(jnp.maximum(deg, 1.0), approx=True)      # EUP slot
    seq_iota = jax.lax.broadcasted_iota(jnp.int32, (B, S, H), 1)     # hoisted out of loop
    scale = 1.0 / (DH ** 0.5)

    for l in range(L):   # static unroll over the L GraphBertLayer's
        # ---- SAGEConv(mean) on CLS embeddings, fused row-0 update ----
        cls = h[:, 0, :]                                             # (B, H)
        neigh = jnp.dot(adj, cls, preferred_element_type=f32) * inv_deg
        cls_new = (jnp.dot(cls, sage_ws_ref[l], preferred_element_type=f32)
                   + jnp.dot(neigh, sage_wn_ref[l], preferred_element_type=f32)
                   + sage_b_ref[l])
        h = jnp.where(seq_iota == 0, cls_new[:, None, :], h)         # hidden[:, 0] = CLS'

        # ---- BertAttention: QKV projections on the flattened (B*S, H) slab ----
        x2 = h.reshape(B * S, H)
        q = jnp.dot(x2, wq_ref[l], preferred_element_type=f32) + bq_ref[l]
        k = jnp.dot(x2, wk_ref[l], preferred_element_type=f32) + bk_ref[l]
        v = jnp.dot(x2, wv_ref[l], preferred_element_type=f32) + bv_ref[l]
        q = q.reshape(B, S, H)
        k = k.reshape(B, S, H)
        v = v.reshape(B, S, H)

        # Per-head attention via static lane slices (no column masking, no redundant
        # full-H contraction).
        # TODO(synk): head_mask is treated as None (no per-head scaling).
        ctx_heads = []
        for hh in range(NH):
            lo, hi = hh * DH, (hh + 1) * DH
            s = jnp.einsum('bqd,bkd->bqk', q[..., lo:hi], k[..., lo:hi],
                           preferred_element_type=f32) * scale + mask       # (B, S, S)
            s = s - jnp.max(s, axis=-1, keepdims=True)
            p = jnp.exp(s)
            p = p * pl.reciprocal(jnp.sum(p, axis=-1, keepdims=True), approx=True)
            ctx_heads.append(jnp.einsum('bqk,bkd->bqd', p, v[..., lo:hi],
                                        preferred_element_type=f32))        # (B, S, DH)
        ctx = jnp.concatenate(ctx_heads, axis=-1).reshape(B * S, H)

        attn = jnp.dot(ctx, wo_ref[l], preferred_element_type=f32) + bo_ref[l]
        x_attn = _layer_norm(attn + x2, ln1_g_ref[l], ln1_b_ref[l])          # (B*S, H)

        # ---- BertIntermediate + BertOutput (FFN + residual + LayerNorm) ----
        mid = _gelu_tanh(jnp.dot(x_attn, w1_ref[l], preferred_element_type=f32)
                         + b1_ref[l])                                         # (B*S, I)
        y = jnp.dot(mid, w2_ref[l], preferred_element_type=f32) + b2_ref[l]   # (B*S, H)
        h = _layer_norm(y + x_attn, ln2_g_ref[l], ln2_b_ref[l]).reshape(B, S, H)

    out_ref[...] = h


PARAM_ORDER = ("sage_ws", "sage_wn", "sage_b",
               "wq", "bq", "wk", "bk", "wv", "bv",
               "wo", "bo", "ln1_g", "ln1_b",
               "w1", "b1", "w2", "b2", "ln2_g", "ln2_b")


@jax.jit
def graph_bert_encoder(hidden_states, adj, attention_mask, params):
    # Stack per-layer params along a leading L axis so the whole 2-layer weight
    # stack is resident in VMEM for the single fused kernel invocation.
    stacked = {k: jnp.stack([p[k] for p in params]) for k in PARAM_ORDER}

    def full_spec(shape):
        rank = len(shape)
        return pl.BlockSpec(shape, lambda i, _r=rank: (0,) * _r)

    in_specs = [
        full_spec((B, B)),          # adj
        full_spec((B, 1, S)),       # additive attention mask
        full_spec((B, S, H)),       # hidden_states
    ] + [full_spec(stacked[k].shape) for k in PARAM_ORDER]

    return pl.pallas_call(
        _encoder_kernel,
        out_shape=jax.ShapeDtypeStruct((B, S, H), jnp.float32),
        grid=(1,),
        in_specs=in_specs,
        out_specs=full_spec((B, S, H)),
    )(adj, attention_mask, hidden_states, *[stacked[k] for k in PARAM_ORDER])


def init_layer_params(key):
    std = 0.02
    ks = jax.random.split(key, 8)
    return dict(
        sage_ws=jax.random.normal(ks[0], (H, H), jnp.float32) * std,
        sage_wn=jax.random.normal(ks[1], (H, H), jnp.float32) * std,
        sage_b=jnp.zeros((1, H), jnp.float32),
        wq=jax.random.normal(ks[2], (H, H), jnp.float32) * std,
        bq=jnp.zeros((1, H), jnp.float32),
        wk=jax.random.normal(ks[3], (H, H), jnp.float32) * std,
        bk=jnp.zeros((1, H), jnp.float32),
        wv=jax.random.normal(ks[4], (H, H), jnp.float32) * std,
        bv=jnp.zeros((1, H), jnp.float32),
        wo=jax.random.normal(ks[5], (H, H), jnp.float32) * std,
        bo=jnp.zeros((1, H), jnp.float32),
        ln1_g=jnp.ones((1, H), jnp.float32),
        ln1_b=jnp.zeros((1, H), jnp.float32),
        w1=jax.random.normal(ks[6], (H, I), jnp.float32) * std,
        b1=jnp.zeros((1, I), jnp.float32),
        w2=jax.random.normal(ks[7], (I, H), jnp.float32) * std,
        b2=jnp.zeros((1, H), jnp.float32),
        ln2_g=jnp.ones((1, H), jnp.float32),
        ln2_b=jnp.zeros((1, H), jnp.float32),
    )


if __name__ == "__main__":
    key = jax.random.PRNGKey(0)
    k_h, k_p = jax.random.split(key)

    hidden_states = jax.random.normal(k_h, (B, S, H), jnp.float32)

    # Deterministic ring graph over the B nodes (each node has 2 neighbors).
    idx = jnp.arange(B)
    adj = jnp.zeros((B, B), jnp.float32)
    adj = adj.at[idx, (idx + 1) % B].set(1.0)
    adj = adj.at[idx, (idx - 1) % B].set(1.0)

    # attention_mask=None  ->  additive mask of zeros, shape (B, 1, S)
    attention_mask = jnp.zeros((B, 1, S), jnp.float32)

    params = [init_layer_params(k) for k in jax.random.split(k_p, L)]

    out = graph_bert_encoder(hidden_states, adj, attention_mask, params)
    jax.block_until_ready(out)
    assert out.shape == (B, S, H)
    assert bool(jnp.all(jnp.isfinite(out)))
    print("KERNEL_OK")
</pallas_src>

<mosaic_0001>
module attributes {stable_mosaic.version = 11 : i64} {
  func.func @_encoder_kernel(%arg0: i32, %arg1: memref<8x8xf32, #tpu.memory_space<vmem>>, %arg2: memref<8x1x8xf32, #tpu.memory_space<vmem>>, %arg3: memref<8x8x32xf32, #tpu.memory_space<vmem>>, %arg4: memref<2x32x32xf32, #tpu.memory_space<vmem>>, %arg5: memref<2x32x32xf32, #tpu.memory_space<vmem>>, %arg6: memref<2x1x32xf32, #tpu.memory_space<vmem>>, %arg7: memref<2x32x32xf32, #tpu.memory_space<vmem>>, %arg8: memref<2x1x32xf32, #tpu.memory_space<vmem>>, %arg9: memref<2x32x32xf32, #tpu.memory_space<vmem>>, %arg10: memref<2x1x32xf32, #tpu.memory_space<vmem>>, %arg11: memref<2x32x32xf32, #tpu.memory_space<vmem>>, %arg12: memref<2x1x32xf32, #tpu.memory_space<vmem>>, %arg13: memref<2x32x32xf32, #tpu.memory_space<vmem>>, %arg14: memref<2x1x32xf32, #tpu.memory_space<vmem>>, %arg15: memref<2x1x32xf32, #tpu.memory_space<vmem>>, %arg16: memref<2x1x32xf32, #tpu.memory_space<vmem>>, %arg17: memref<2x32x64xf32, #tpu.memory_space<vmem>>, %arg18: memref<2x1x64xf32, #tpu.memory_space<vmem>>, %arg19: memref<2x64x32xf32, #tpu.memory_space<vmem>>, %arg20: memref<2x1x32xf32, #tpu.memory_space<vmem>>, %arg21: memref<2x1x32xf32, #tpu.memory_space<vmem>>, %arg22: memref<2x1x32xf32, #tpu.memory_space<vmem>>, %arg23: memref<8x8x32xf32, #tpu.memory_space<vmem>>) attributes {dimension_semantics = [#tpu.dimension_semantics<arbitrary>], iteration_bounds = array<i64: 1>, scalar_prefetch = 0 : i64, scratch_operands = 0 : i64, tpu.core_type = #tpu.core_type<tc>, window_params = [{pipeline_mode = #tpu.pipeline_mode<synchronous>, transform_indices = @transform_0, window_bounds = array<i64: 8, 8>}, {pipeline_mode = #tpu.pipeline_mode<synchronous>, transform_indices = @transform_1, window_bounds = array<i64: 8, 1, 8>}, {pipeline_mode = #tpu.pipeline_mode<synchronous>, transform_indices = @transform_2, window_bounds = array<i64: 8, 8, 32>}, {pipeline_mode = #tpu.pipeline_mode<synchronous>, transform_indices = @transform_3, window_bounds = array<i64: 2, 32, 32>}, {pipeline_mode = #tpu.pipeline_mode<synchronous>, transform_indices = @transform_4, window_bounds = array<i64: 2, 32, 32>}, {pipeline_mode = #tpu.pipeline_mode<synchronous>, transform_indices = @transform_5, window_bounds = array<i64: 2, 1, 32>}, {pipeline_mode = #tpu.pipeline_mode<synchronous>, transform_indices = @transform_6, window_bounds = array<i64: 2, 32, 32>}, {pipeline_mode = #tpu.pipeline_mode<synchronous>, transform_indices = @transform_7, window_bounds = array<i64: 2, 1, 32>}, {pipeline_mode = #tpu.pipeline_mode<synchronous>, transform_indices = @transform_8, window_bounds = array<i64: 2, 32, 32>}, {pipeline_mode = #tpu.pipeline_mode<synchronous>, transform_indices = @transform_9, window_bounds = array<i64: 2, 1, 32>}, {pipeline_mode = #tpu.pipeline_mode<synchronous>, transform_indices = @transform_10, window_bounds = array<i64: 2, 32, 32>}, {pipeline_mode = #tpu.pipeline_mode<synchronous>, transform_indices = @transform_11, window_bounds = array<i64: 2, 1, 32>}, {pipeline_mode = #tpu.pipeline_mode<synchronous>, transform_indices = @transform_12, window_bounds = array<i64: 2, 32, 32>}, {pipeline_mode = #tpu.pipeline_mode<synchronous>, transform_indices = @transform_13, window_bounds = array<i64: 2, 1, 32>}, {pipeline_mode = #tpu.pipeline_mode<synchronous>, transform_indices = @transform_14, window_bounds = array<i64: 2, 1, 32>}, {pipeline_mode = #tpu.pipeline_mode<synchronous>, transform_indices = @transform_15, window_bounds = array<i64: 2, 1, 32>}, {pipeline_mode = #tpu.pipeline_mode<synchronous>, transform_indices = @transform_16, window_bounds = array<i64: 2, 32, 64>}, {pipeline_mode = #tpu.pipeline_mode<synchronous>, transform_indices = @transform_17, window_bounds = array<i64: 2, 1, 64>}, {pipeline_mode = #tpu.pipeline_mode<synchronous>, transform_indices = @transform_18, window_bounds = array<i64: 2, 64, 32>}, {pipeline_mode = #tpu.pipeline_mode<synchronous>, transform_indices = @transform_19, window_bounds = array<i64: 2, 1, 32>}, {pipeline_mode = #tpu.pipeline_mode<synchronous>, transform_indices = @transform_20, window_bounds = array<i64: 2, 1, 32>}, {pipeline_mode = #tpu.pipeline_mode<synchronous>, transform_indices = @transform_21, window_bounds = array<i64: 2, 1, 32>}, {pipeline_mode = #tpu.pipeline_mode<synchronous>, transform_indices = @transform_22, window_bounds = array<i64: 8, 8, 32>}]} {
    %c0 = arith.constant 0 : index
    %c0_0 = arith.constant 0 : index
    %0 = vector.load %arg1[%c0, %c0_0] : memref<8x8xf32, #tpu.memory_space<vmem>>, vector<8x8xf32>
    %c0_1 = arith.constant 0 : index
    %c0_2 = arith.constant 0 : index
    %c0_3 = arith.constant 0 : index
    %1 = vector.load %arg2[%c0_1, %c0_2, %c0_3] : memref<8x1x8xf32, #tpu.memory_space<vmem>>, vector<8x1x8xf32>
    %c0_4 = arith.constant 0 : index
    %c0_5 = arith.constant 0 : index
    %c0_6 = arith.constant 0 : index
    %2 = vector.load %arg3[%c0_4, %c0_5, %c0_6] : memref<8x8x32xf32, #tpu.memory_space<vmem>>, vector<8x8x32xf32>
    %cst = arith.constant dense<0.000000e+00> : vector<8xf32>
    %3 = vector.multi_reduction <add>, %0, %cst [1] : vector<8x8xf32> to vector<8xf32>
    %4 = vector.shape_cast %3 : vector<8xf32> to vector<8x1xf32>
    %cst_7 = arith.constant 1.000000e+00 : f32
    %5 = vector.broadcast %cst_7 : f32 to vector<8x1xf32>
    %6 = arith.maximumf %4, %5 : vector<8x1xf32>
    %7 = tpu.reciprocal %6 {approx = true} : vector<8x1xf32> -> vector<8x1xf32>
    %8 = tpu.iota {dimensions = array<i32: 1>} : vector<8x8x32xi32>
    %9 = vector.extract_strided_slice %2 {offsets = [0, 0, 0], sizes = [8, 1, 32], strides = [1, 1, 1]} : vector<8x8x32xf32> to vector<8x1x32xf32>
    %10 = vector.shape_cast %9 : vector<8x1x32xf32> to vector<8x32xf32>
    %cst_8 = arith.constant dense<0.000000e+00> : vector<8x32xf32>
    %11 = tpu.matmul %0, %10, %cst_8 {dimension_numbers = #tpu.dot_dimension_numbers<[1], [0], [0], [1], [0, 0, 1, 1], [], []>} : vector<8x8xf32>, vector<8x32xf32>, vector<8x32xf32> -> vector<8x32xf32>
    %12 = vector.broadcast %7 : vector<8x1xf32> to vector<8x32xf32>
    %13 = arith.mulf %11, %12 : vector<8x32xf32>
    %c0_9 = arith.constant 0 : index
    %c0_10 = arith.constant 0 : index
    %c0_11 = arith.constant 0 : index
    %14 = vector.load %arg4[%c0_9, %c0_10, %c0_11] : memref<2x32x32xf32, #tpu.memory_space<vmem>>, vector<1x32x32xf32>
    %15 = vector.shape_cast %14 : vector<1x32x32xf32> to vector<32x32xf32>
    %cst_12 = arith.constant dense<0.000000e+00> : vector<8x32xf32>
    %16 = tpu.matmul %10, %15, %cst_12 {dimension_numbers = #tpu.dot_dimension_numbers<[1], [0], [0], [1], [0, 0, 1, 1], [], []>} : vector<8x32xf32>, vector<32x32xf32>, vector<8x32xf32> -> vector<8x32xf32>
    %c0_13 = arith.constant 0 : index
    %c0_14 = arith.constant 0 : index
    %c0_15 = arith.constant 0 : index
    %17 = vector.load %arg5[%c0_13, %c0_14, %c0_15] : memref<2x32x32xf32, #tpu.memory_space<vmem>>, vector<1x32x32xf32>
    %18 = vector.shape_cast %17 : vector<1x32x32xf32> to vector<32x32xf32>
    %cst_16 = arith.constant dense<0.000000e+00> : vector<8x32xf32>
    %19 = tpu.matmul %13, %18, %cst_16 {dimension_numbers = #tpu.dot_dimension_numbers<[1], [0], [0], [1], [0, 0, 1, 1], [], []>} : vector<8x32xf32>, vector<32x32xf32>, vector<8x32xf32> -> vector<8x32xf32>
    %20 = arith.addf %16, %19 : vector<8x32xf32>
    %c0_17 = arith.constant 0 : index
    %c0_18 = arith.constant 0 : index
    %c0_19 = arith.constant 0 : index
    %21 = vector.load %arg6[%c0_17, %c0_18, %c0_19] : memref<2x1x32xf32, #tpu.memory_space<vmem>>, vector<1x1x32xf32>
    %22 = vector.shape_cast %21 : vector<1x1x32xf32> to vector<1x32xf32>
    %23 = vector.broadcast %22 : vector<1x32xf32> to vector<8x32xf32>
    %24 = arith.addf %20, %23 : vector<8x32xf32>
    %c0_i32 = arith.constant 0 : i32
    %25 = vector.broadcast %c0_i32 : i32 to vector<8x8x32xi32>
    %26 = arith.cmpi eq, %8, %25 : vector<8x8x32xi32>
    %27 = vector.shape_cast %24 : vector<8x32xf32> to vector<8x1x32xf32>
    %28 = vector.shape_cast %27 : vector<8x1x32xf32> to vector<8x1x32xf32>
    %29 = vector.broadcast %28 : vector<8x1x32xf32> to vector<8x8x32xf32>
    %30 = arith.select %26, %29, %2 : vector<8x8x32xi1>, vector<8x8x32xf32>
    %31 = vector.shape_cast %30 : vector<8x8x32xf32> to vector<64x32xf32>
    %c0_20 = arith.constant 0 : index
    %c0_21 = arith.constant 0 : index
    %c0_22 = arith.constant 0 : index
    %32 = vector.load %arg7[%c0_20, %c0_21, %c0_22] : memref<2x32x32xf32, #tpu.memory_space<vmem>>, vector<1x32x32xf32>
    %33 = vector.shape_cast %32 : vector<1x32x32xf32> to vector<32x32xf32>
    %cst_23 = arith.constant dense<0.000000e+00> : vector<64x32xf32>
    %34 = tpu.matmul %31, %33, %cst_23 {dimension_numbers = #tpu.dot_dimension_numbers<[1], [0], [0], [1], [0, 0, 1, 1], [], []>} : vector<64x32xf32>, vector<32x32xf32>, vector<64x32xf32> -> vector<64x32xf32>
    %c0_24 = arith.constant 0 : index
    %c0_25 = arith.constant 0 : index
    %c0_26 = arith.constant 0 : index
    %35 = vector.load %arg8[%c0_24, %c0_25, %c0_26] : memref<2x1x32xf32, #tpu.memory_space<vmem>>, vector<1x1x32xf32>
    %36 = vector.shape_cast %35 : vector<1x1x32xf32> to vector<1x32xf32>
    %37 = vector.broadcast %36 : vector<1x32xf32> to vector<64x32xf32>
    %38 = arith.addf %34, %37 : vector<64x32xf32>
    %c0_27 = arith.constant 0 : index
    %c0_28 = arith.constant 0 : index
    %c0_29 = arith.constant 0 : index
    %39 = vector.load %arg9[%c0_27, %c0_28, %c0_29] : memref<2x32x32xf32, #tpu.memory_space<vmem>>, vector<1x32x32xf32>
    %40 = vector.shape_cast %39 : vector<1x32x32xf32> to vector<32x32xf32>
    %cst_30 = arith.constant dense<0.000000e+00> : vector<64x32xf32>
    %41 = tpu.matmul %31, %40, %cst_30 {dimension_numbers = #tpu.dot_dimension_numbers<[1], [0], [0], [1], [0, 0, 1, 1], [], []>} : vector<64x32xf32>, vector<32x32xf32>, vector<64x32xf32> -> vector<64x32xf32>
    %c0_31 = arith.constant 0 : index
    %c0_32 = arith.constant 0 : index
    %c0_33 = arith.constant 0 : index
    %42 = vector.load %arg10[%c0_31, %c0_32, %c0_33] : memref<2x1x32xf32, #tpu.memory_space<vmem>>, vector<1x1x32xf32>
    %43 = vector.shape_cast %42 : vector<1x1x32xf32> to vector<1x32xf32>
    %44 = vector.broadcast %43 : vector<1x32xf32> to vector<64x32xf32>
    %45 = arith.addf %41, %44 : vector<64x32xf32>
    %c0_34 = arith.constant 0 : index
    %c0_35 = arith.constant 0 : index
    %c0_36 = arith.constant 0 : index
    %46 = vector.load %arg11[%c0_34, %c0_35, %c0_36] : memref<2x32x32xf32, #tpu.memory_space<vmem>>, vector<1x32x32xf32>
    %47 = vector.shape_cast %46 : vector<1x32x32xf32> to vector<32x32xf32>
    %cst_37 = arith.constant dense<0.000000e+00> : vector<64x32xf32>
    %48 = tpu.matmul %31, %47, %cst_37 {dimension_numbers = #tpu.dot_dimension_numbers<[1], [0], [0], [1], [0, 0, 1, 1], [], []>} : vector<64x32xf32>, vector<32x32xf32>, vector<64x32xf32> -> vector<64x32xf32>
    %c0_38 = arith.constant 0 : index
    %c0_39 = arith.constant 0 : index
    %c0_40 = arith.constant 0 : index
    %49 = vector.load %arg12[%c0_38, %c0_39, %c0_40] : memref<2x1x32xf32, #tpu.memory_space<vmem>>, vector<1x1x32xf32>
    %50 = vector.shape_cast %49 : vector<1x1x32xf32> to vector<1x32xf32>
    %51 = vector.broadcast %50 : vector<1x32xf32> to vector<64x32xf32>
    %52 = arith.addf %48, %51 : vector<64x32xf32>
    %53 = vector.shape_cast %38 : vector<64x32xf32> to vector<8x8x32xf32>
    %54 = vector.shape_cast %45 : vector<64x32xf32> to vector<8x8x32xf32>
    %55 = vector.shape_cast %52 : vector<64x32xf32> to vector<8x8x32xf32>
    %56 = vector.extract_strided_slice %53 {offsets = [0, 0, 0], sizes = [8, 8, 8], strides = [1, 1, 1]} : vector<8x8x32xf32> to vector<8x8x8xf32>
    %57 = vector.extract_strided_slice %54 {offsets = [0, 0, 0], sizes = [8, 8, 8], strides = [1, 1, 1]} : vector<8x8x32xf32> to vector<8x8x8xf32>
    "tpu.trace_start"() <{level = 10 : i32, message = "bqd,bkd->bqk"}> : () -> ()
    %cst_41 = arith.constant dense<0.000000e+00> : vector<8x8x8xf32>
    %58 = tpu.matmul %56, %57, %cst_41 {dimension_numbers = #tpu.dot_dimension_numbers<[2], [2], [1], [1], [0, 0, 0, 1, 1, 1], [0], [0]>} : vector<8x8x8xf32>, vector<8x8x8xf32>, vector<8x8x8xf32> -> vector<8x8x8xf32>
    "tpu.trace_stop"() : () -> ()
    %cst_42 = arith.constant 0.353553385 : f32
    %59 = vector.broadcast %cst_42 : f32 to vector<8x8x8xf32>
    %60 = arith.mulf %58, %59 : vector<8x8x8xf32>
    %61 = vector.broadcast %1 : vector<8x1x8xf32> to vector<8x8x8xf32>
    %62 = arith.addf %60, %61 : vector<8x8x8xf32>
    %cst_43 = arith.constant dense<0xFF800000> : vector<8x8xf32>
    %63 = vector.multi_reduction <maximumf>, %62, %cst_43 [2] : vector<8x8x8xf32> to vector<8x8xf32>
    %64 = vector.shape_cast %63 : vector<8x8xf32> to vector<8x8x1xf32>
    %65 = vector.broadcast %64 : vector<8x8x1xf32> to vector<8x8x8xf32>
    %66 = arith.subf %62, %65 : vector<8x8x8xf32>
    %67 = math.exp %66 : vector<8x8x8xf32>
    %cst_44 = arith.constant dense<0.000000e+00> : vector<8x8xf32>
    %68 = vector.multi_reduction <add>, %67, %cst_44 [2] : vector<8x8x8xf32> to vector<8x8xf32>
    %69 = vector.shape_cast %68 : vector<8x8xf32> to vector<8x8x1xf32>
    %70 = tpu.reciprocal %69 {approx = true} : vector<8x8x1xf32> -> vector<8x8x1xf32>
    %71 = vector.broadcast %70 : vector<8x8x1xf32> to vector<8x8x8xf32>
    %72 = arith.mulf %67, %71 : vector<8x8x8xf32>
    %73 = vector.extract_strided_slice %55 {offsets = [0, 0, 0], sizes = [8, 8, 8], strides = [1, 1, 1]} : vector<8x8x32xf32> to vector<8x8x8xf32>
    "tpu.trace_start"() <{level = 10 : i32, message = "bqk,bkd->bqd"}> : () -> ()
    %cst_45 = arith.constant dense<0.000000e+00> : vector<8x8x8xf32>
    %74 = tpu.matmul %72, %73, %cst_45 {dimension_numbers = #tpu.dot_dimension_numbers<[2], [1], [1], [2], [0, 0, 0, 1, 1, 2], [0], [0]>} : vector<8x8x8xf32>, vector<8x8x8xf32>, vector<8x8x8xf32> -> vector<8x8x8xf32>
    "tpu.trace_stop"() : () -> ()
    %75 = vector.extract_strided_slice %53 {offsets = [0, 0, 8], sizes = [8, 8, 8], strides = [1, 1, 1]} : vector<8x8x32xf32> to vector<8x8x8xf32>
    %76 = vector.extract_strided_slice %54 {offsets = [0, 0, 8], sizes = [8, 8, 8], strides = [1, 1, 1]} : vector<8x8x32xf32> to vector<8x8x8xf32>
    "tpu.trace_start"() <{level = 10 : i32, message = "bqd,bkd->bqk"}> : () -> ()
    %cst_46 = arith.constant dense<0.000000e+00> : vector<8x8x8xf32>
    %77 = tpu.matmul %75, %76, %cst_46 {dimension_numbers = #tpu.dot_dimension_numbers<[2], [2], [1], [1], [0, 0, 0, 1, 1, 1], [0], [0]>} : vector<8x8x8xf32>, vector<8x8x8xf32>, vector<8x8x8xf32> -> vector<8x8x8xf32>
    "tpu.trace_stop"() : () -> ()
    %cst_47 = arith.constant 0.353553385 : f32
    %78 = vector.broadcast %cst_47 : f32 to vector<8x8x8xf32>
    %79 = arith.mulf %77, %78 : vector<8x8x8xf32>
    %80 = vector.broadcast %1 : vector<8x1x8xf32> to vector<8x8x8xf32>
    %81 = arith.addf %79, %80 : vector<8x8x8xf32>
    %cst_48 = arith.constant dense<0xFF800000> : vector<8x8xf32>
    %82 = vector.multi_reduction <maximumf>, %81, %cst_48 [2] : vector<8x8x8xf32> to vector<8x8xf32>
    %83 = vector.shape_cast %82 : vector<8x8xf32> to vector<8x8x1xf32>
    %84 = vector.broadcast %83 : vector<8x8x1xf32> to vector<8x8x8xf32>
    %85 = arith.subf %81, %84 : vector<8x8x8xf32>
    %86 = math.exp %85 : vector<8x8x8xf32>
    %cst_49 = arith.constant dense<0.000000e+00> : vector<8x8xf32>
    %87 = vector.multi_reduction <add>, %86, %cst_49 [2] : vector<8x8x8xf32> to vector<8x8xf32>
    %88 = vector.shape_cast %87 : vector<8x8xf32> to vector<8x8x1xf32>
    %89 = tpu.reciprocal %88 {approx = true} : vector<8x8x1xf32> -> vector<8x8x1xf32>
    %90 = vector.broadcast %89 : vector<8x8x1xf32> to vector<8x8x8xf32>
    %91 = arith.mulf %86, %90 : vector<8x8x8xf32>
    %92 = vector.extract_strided_slice %55 {offsets = [0, 0, 8], sizes = [8, 8, 8], strides = [1, 1, 1]} : vector<8x8x32xf32> to vector<8x8x8xf32>
    "tpu.trace_start"() <{level = 10 : i32, message = "bqk,bkd->bqd"}> : () -> ()
    %cst_50 = arith.constant dense<0.000000e+00> : vector<8x8x8xf32>
    %93 = tpu.matmul %91, %92, %cst_50 {dimension_numbers = #tpu.dot_dimension_numbers<[2], [1], [1], [2], [0, 0, 0, 1, 1, 2], [0], [0]>} : vector<8x8x8xf32>, vector<8x8x8xf32>, vector<8x8x8xf32> -> vector<8x8x8xf32>
    "tpu.trace_stop"() : () -> ()
    %94 = vector.extract_strided_slice %53 {offsets = [0, 0, 16], sizes = [8, 8, 8], strides = [1, 1, 1]} : vector<8x8x32xf32> to vector<8x8x8xf32>
    %95 = vector.extract_strided_slice %54 {offsets = [0, 0, 16], sizes = [8, 8, 8], strides = [1, 1, 1]} : vector<8x8x32xf32> to vector<8x8x8xf32>
    "tpu.trace_start"() <{level = 10 : i32, message = "bqd,bkd->bqk"}> : () -> ()
    %cst_51 = arith.constant dense<0.000000e+00> : vector<8x8x8xf32>
    %96 = tpu.matmul %94, %95, %cst_51 {dimension_numbers = #tpu.dot_dimension_numbers<[2], [2], [1], [1], [0, 0, 0, 1, 1, 1], [0], [0]>} : vector<8x8x8xf32>, vector<8x8x8xf32>, vector<8x8x8xf32> -> vector<8x8x8xf32>
    "tpu.trace_stop"() : () -> ()
    %cst_52 = arith.constant 0.353553385 : f32
    %97 = vector.broadcast %cst_52 : f32 to vector<8x8x8xf32>
    %98 = arith.mulf %96, %97 : vector<8x8x8xf32>
    %99 = vector.broadcast %1 : vector<8x1x8xf32> to vector<8x8x8xf32>
    %100 = arith.addf %98, %99 : vector<8x8x8xf32>
    %cst_53 = arith.constant dense<0xFF800000> : vector<8x8xf32>
    %101 = vector.multi_reduction <maximumf>, %100, %cst_53 [2] : vector<8x8x8xf32> to vector<8x8xf32>
    %102 = vector.shape_cast %101 : vector<8x8xf32> to vector<8x8x1xf32>
    %103 = vector.broadcast %102 : vector<8x8x1xf32> to vector<8x8x8xf32>
    %104 = arith.subf %100, %103 : vector<8x8x8xf32>
    %105 = math.exp %104 : vector<8x8x8xf32>
    %cst_54 = arith.constant dense<0.000000e+00> : vector<8x8xf32>
    %106 = vector.multi_reduction <add>, %105, %cst_54 [2] : vector<8x8x8xf32> to vector<8x8xf32>
    %107 = vector.shape_cast %106 : vector<8x8xf32> to vector<8x8x1xf32>
    %108 = tpu.reciprocal %107 {approx = true} : vector<8x8x1xf32> -> vector<8x8x1xf32>
    %109 = vector.broadcast %108 : vector<8x8x1xf32> to vector<8x8x8xf32>
    %110 = arith.mulf %105, %109 : vector<8x8x8xf32>
    %111 = vector.extract_strided_slice %55 {offsets = [0, 0, 16], sizes = [8, 8, 8], strides = [1, 1, 1]} : vector<8x8x32xf32> to vector<8x8x8xf32>
    "tpu.trace_start"() <{level = 10 : i32, message = "bqk,bkd->bqd"}> : () -> ()
    %cst_55 = arith.constant dense<0.000000e+00> : vector<8x8x8xf32>
    %112 = tpu.matmul %110, %111, %cst_55 {dimension_numbers = #tpu.dot_dimension_numbers<[2], [1], [1], [2], [0, 0, 0, 1, 1, 2], [0], [0]>} : vector<8x8x8xf32>, vector<8x8x8xf32>, vector<8x8x8xf32> -> vector<8x8x8xf32>
    "tpu.trace_stop"() : () -> ()
    %113 = vector.extract_strided_slice %53 {offsets = [0, 0, 24], sizes = [8, 8, 8], strides = [1, 1, 1]} : vector<8x8x32xf32> to vector<8x8x8xf32>
    %114 = vector.extract_strided_slice %54 {offsets = [0, 0, 24], sizes = [8, 8, 8], strides = [1, 1, 1]} : vector<8x8x32xf32> to vector<8x8x8xf32>
    "tpu.trace_start"() <{level = 10 : i32, message = "bqd,bkd->bqk"}> : () -> ()
    %cst_56 = arith.constant dense<0.000000e+00> : vector<8x8x8xf32>
    %115 = tpu.matmul %113, %114, %cst_56 {dimension_numbers = #tpu.dot_dimension_numbers<[2], [2], [1], [1], [0, 0, 0, 1, 1, 1], [0], [0]>} : vector<8x8x8xf32>, vector<8x8x8xf32>, vector<8x8x8xf32> -> vector<8x8x8xf32>
    "tpu.trace_stop"() : () -> ()
    %cst_57 = arith.constant 0.353553385 : f32
    %116 = vector.broadcast %cst_57 : f32 to vector<8x8x8xf32>
    %117 = arith.mulf %115, %116 : vector<8x8x8xf32>
    %118 = vector.broadcast %1 : vector<8x1x8xf32> to vector<8x8x8xf32>
    %119 = arith.addf %117, %118 : vector<8x8x8xf32>
    %cst_58 = arith.constant dense<0xFF800000> : vector<8x8xf32>
    %120 = vector.multi_reduction <maximumf>, %119, %cst_58 [2] : vector<8x8x8xf32> to vector<8x8xf32>
    %121 = vector.shape_cast %120 : vector<8x8xf32> to vector<8x8x1xf32>
    %122 = vector.broadcast %121 : vector<8x8x1xf32> to vector<8x8x8xf32>
    %123 = arith.subf %119, %122 : vector<8x8x8xf32>
    %124 = math.exp %123 : vector<8x8x8xf32>
    %cst_59 = arith.constant dense<0.000000e+00> : vector<8x8xf32>
    %125 = vector.multi_reduction <add>, %124, %cst_59 [2] : vector<8x8x8xf32> to vector<8x8xf32>
    %126 = vector.shape_cast %125 : vector<8x8xf32> to vector<8x8x1xf32>
    %127 = tpu.reciprocal %126 {approx = true} : vector<8x8x1xf32> -> vector<8x8x1xf32>
    %128 = vector.broadcast %127 : vector<8x8x1xf32> to vector<8x8x8xf32>
    %129 = arith.mulf %124, %128 : vector<8x8x8xf32>
    %130 = vector.extract_strided_slice %55 {offsets = [0, 0, 24], sizes = [8, 8, 8], strides = [1, 1, 1]} : vector<8x8x32xf32> to vector<8x8x8xf32>
    "tpu.trace_start"() <{level = 10 : i32, message = "bqk,bkd->bqd"}> : () -> ()
    %cst_60 = arith.constant dense<0.000000e+00> : vector<8x8x8xf32>
    %131 = tpu.matmul %129, %130, %cst_60 {dimension_numbers = #tpu.dot_dimension_numbers<[2], [1], [1], [2], [0, 0, 0, 1, 1, 2], [0], [0]>} : vector<8x8x8xf32>, vector<8x8x8xf32>, vector<8x8x8xf32> -> vector<8x8x8xf32>
    "tpu.trace_stop"() : () -> ()
    %132 = tpu.concatenate %74, %93, %112, %131 in 2 : vector<8x8x8xf32>, vector<8x8x8xf32>, vector<8x8x8xf32>, vector<8x8x8xf32> -> vector<8x8x32xf32>
    %133 = vector.shape_cast %132 : vector<8x8x32xf32> to vector<64x32xf32>
    %c0_61 = arith.constant 0 : index
    %c0_62 = arith.constant 0 : index
    %c0_63 = arith.constant 0 : index
    %134 = vector.load %arg13[%c0_61, %c0_62, %c0_63] : memref<2x32x32xf32, #tpu.memory_space<vmem>>, vector<1x32x32xf32>
    %135 = vector.shape_cast %134 : vector<1x32x32xf32> to vector<32x32xf32>
    %cst_64 = arith.constant dense<0.000000e+00> : vector<64x32xf32>
    %136 = tpu.matmul %133, %135, %cst_64 {dimension_numbers = #tpu.dot_dimension_numbers<[1], [0], [0], [1], [0, 0, 1, 1], [], []>} : vector<64x32xf32>, vector<32x32xf32>, vector<64x32xf32> -> vector<64x32xf32>
    %c0_65 = arith.constant 0 : index
    %c0_66 = arith.constant 0 : index
    %c0_67 = arith.constant 0 : index
    %137 = vector.load %arg14[%c0_65, %c0_66, %c0_67] : memref<2x1x32xf32, #tpu.memory_space<vmem>>, vector<1x1x32xf32>
    %138 = vector.shape_cast %137 : vector<1x1x32xf32> to vector<1x32xf32>
    %139 = vector.broadcast %138 : vector<1x32xf32> to vector<64x32xf32>
    %140 = arith.addf %136, %139 : vector<64x32xf32>
    %141 = arith.addf %140, %31 : vector<64x32xf32>
    %c0_68 = arith.constant 0 : index
    %c0_69 = arith.constant 0 : index
    %c0_70 = arith.constant 0 : index
    %142 = vector.load %arg15[%c0_68, %c0_69, %c0_70] : memref<2x1x32xf32, #tpu.memory_space<vmem>>, vector<1x1x32xf32>
    %143 = vector.shape_cast %142 : vector<1x1x32xf32> to vector<1x32xf32>
    %c0_71 = arith.constant 0 : index
    %c0_72 = arith.constant 0 : index
    %c0_73 = arith.constant 0 : index
    %144 = vector.load %arg16[%c0_71, %c0_72, %c0_73] : memref<2x1x32xf32, #tpu.memory_space<vmem>>, vector<1x1x32xf32>
    %145 = vector.shape_cast %144 : vector<1x1x32xf32> to vector<1x32xf32>
    %cst_74 = arith.constant dense<0.000000e+00> : vector<64xf32>
    %146 = vector.multi_reduction <add>, %141, %cst_74 [1] : vector<64x32xf32> to vector<64xf32>
    %147 = vector.shape_cast %146 : vector<64xf32> to vector<64x1xf32>
    %cst_75 = arith.constant 3.200000e+01 : f32
    %148 = vector.broadcast %cst_75 : f32 to vector<64x1xf32>
    %149 = arith.divf %147, %148 : vector<64x1xf32>
    %150 = vector.broadcast %149 : vector<64x1xf32> to vector<64x32xf32>
    %151 = arith.subf %141, %150 : vector<64x32xf32>
    %152 = arith.mulf %151, %151 : vector<64x32xf32>
    %cst_76 = arith.constant dense<0.000000e+00> : vector<64xf32>
    %153 = vector.multi_reduction <add>, %152, %cst_76 [1] : vector<64x32xf32> to vector<64xf32>
    %154 = vector.shape_cast %153 : vector<64xf32> to vector<64x1xf32>
    %cst_77 = arith.constant 3.200000e+01 : f32
    %155 = vector.broadcast %cst_77 : f32 to vector<64x1xf32>
    %156 = arith.divf %154, %155 : vector<64x1xf32>
    %157 = vector.broadcast %149 : vector<64x1xf32> to vector<64x32xf32>
    %158 = arith.subf %141, %157 : vector<64x32xf32>
    %cst_78 = arith.constant 9.99999996E-13 : f32
    %159 = vector.broadcast %cst_78 : f32 to vector<64x1xf32>
    %160 = arith.addf %156, %159 : vector<64x1xf32>
    %161 = math.rsqrt %160 : vector<64x1xf32>
    %162 = vector.broadcast %161 : vector<64x1xf32> to vector<64x32xf32>
    %163 = arith.mulf %158, %162 : vector<64x32xf32>
    %164 = vector.broadcast %143 : vector<1x32xf32> to vector<64x32xf32>
    %165 = arith.mulf %163, %164 : vector<64x32xf32>
    %166 = vector.broadcast %145 : vector<1x32xf32> to vector<64x32xf32>
    %167 = arith.addf %165, %166 : vector<64x32xf32>
    %c0_79 = arith.constant 0 : index
    %c0_80 = arith.constant 0 : index
    %c0_81 = arith.constant 0 : index
    %168 = vector.load %arg17[%c0_79, %c0_80, %c0_81] : memref<2x32x64xf32, #tpu.memory_space<vmem>>, vector<1x32x64xf32>
    %169 = vector.shape_cast %168 : vector<1x32x64xf32> to vector<32x64xf32>
    %cst_82 = arith.constant dense<0.000000e+00> : vector<64x64xf32>
    %170 = tpu.matmul %167, %169, %cst_82 {dimension_numbers = #tpu.dot_dimension_numbers<[1], [0], [0], [1], [0, 0, 1, 1], [], []>} : vector<64x32xf32>, vector<32x64xf32>, vector<64x64xf32> -> vector<64x64xf32>
    %c0_83 = arith.constant 0 : index
    %c0_84 = arith.constant 0 : index
    %c0_85 = arith.constant 0 : index
    %171 = vector.load %arg18[%c0_83, %c0_84, %c0_85] : memref<2x1x64xf32, #tpu.memory_space<vmem>>, vector<1x1x64xf32>
    %172 = vector.shape_cast %171 : vector<1x1x64xf32> to vector<1x64xf32>
    %173 = vector.broadcast %172 : vector<1x64xf32> to vector<64x64xf32>
    %174 = arith.addf %170, %173 : vector<64x64xf32>
    %cst_86 = arith.constant 5.000000e-01 : f32
    %175 = vector.broadcast %cst_86 : f32 to vector<64x64xf32>
    %176 = arith.mulf %175, %174 : vector<64x64xf32>
    %cst_87 = arith.constant 4.471500e-02 : f32
    %177 = vector.broadcast %cst_87 : f32 to vector<64x64xf32>
    %178 = arith.mulf %177, %174 : vector<64x64xf32>
    %179 = arith.mulf %178, %174 : vector<64x64xf32>
    %180 = arith.mulf %179, %174 : vector<64x64xf32>
    %181 = arith.addf %174, %180 : vector<64x64xf32>
    %cst_88 = arith.constant 0.797884583 : f32
    %182 = vector.broadcast %cst_88 : f32 to vector<64x64xf32>
    %183 = arith.mulf %182, %181 : vector<64x64xf32>
    %184 = math.tanh %183 : vector<64x64xf32>
    %cst_89 = arith.constant 1.000000e+00 : f32
    %185 = vector.broadcast %cst_89 : f32 to vector<64x64xf32>
    %186 = arith.addf %185, %184 : vector<64x64xf32>
    %187 = arith.mulf %176, %186 : vector<64x64xf32>
    %c0_90 = arith.constant 0 : index
    %c0_91 = arith.constant 0 : index
    %c0_92 = arith.constant 0 : index
    %188 = vector.load %arg19[%c0_90, %c0_91, %c0_92] : memref<2x64x32xf32, #tpu.memory_space<vmem>>, vector<1x64x32xf32>
    %189 = vector.shape_cast %188 : vector<1x64x32xf32> to vector<64x32xf32>
    %cst_93 = arith.constant dense<0.000000e+00> : vector<64x32xf32>
    %190 = tpu.matmul %187, %189, %cst_93 {dimension_numbers = #tpu.dot_dimension_numbers<[1], [0], [0], [1], [0, 0, 1, 1], [], []>} : vector<64x64xf32>, vector<64x32xf32>, vector<64x32xf32> -> vector<64x32xf32>
    %c0_94 = arith.constant 0 : index
    %c0_95 = arith.constant 0 : index
    %c0_96 = arith.constant 0 : index
    %191 = vector.load %arg20[%c0_94, %c0_95, %c0_96] : memref<2x1x32xf32, #tpu.memory_space<vmem>>, vector<1x1x32xf32>
    %192 = vector.shape_cast %191 : vector<1x1x32xf32> to vector<1x32xf32>
    %193 = vector.broadcast %192 : vector<1x32xf32> to vector<64x32xf32>
    %194 = arith.addf %190, %193 : vector<64x32xf32>
    %195 = arith.addf %194, %167 : vector<64x32xf32>
    %c0_97 = arith.constant 0 : index
    %c0_98 = arith.constant 0 : index
    %c0_99 = arith.constant 0 : index
    %196 = vector.load %arg21[%c0_97, %c0_98, %c0_99] : memref<2x1x32xf32, #tpu.memory_space<vmem>>, vector<1x1x32xf32>
    %197 = vector.shape_cast %196 : vector<1x1x32xf32> to vector<1x32xf32>
    %c0_100 = arith.constant 0 : index
    %c0_101 = arith.constant 0 : index
    %c0_102 = arith.constant 0 : index
    %198 = vector.load %arg22[%c0_100, %c0_101, %c0_102] : memref<2x1x32xf32, #tpu.memory_space<vmem>>, vector<1x1x32xf32>
    %199 = vector.shape_cast %198 : vector<1x1x32xf32> to vector<1x32xf32>
    %cst_103 = arith.constant dense<0.000000e+00> : vector<64xf32>
    %200 = vector.multi_reduction <add>, %195, %cst_103 [1] : vector<64x32xf32> to vector<64xf32>
    %201 = vector.shape_cast %200 : vector<64xf32> to vector<64x1xf32>
    %cst_104 = arith.constant 3.200000e+01 : f32
    %202 = vector.broadcast %cst_104 : f32 to vector<64x1xf32>
    %203 = arith.divf %201, %202 : vector<64x1xf32>
    %204 = vector.broadcast %203 : vector<64x1xf32> to vector<64x32xf32>
    %205 = arith.subf %195, %204 : vector<64x32xf32>
    %206 = arith.mulf %205, %205 : vector<64x32xf32>
    %cst_105 = arith.constant dense<0.000000e+00> : vector<64xf32>
    %207 = vector.multi_reduction <add>, %206, %cst_105 [1] : vector<64x32xf32> to vector<64xf32>
    %208 = vector.shape_cast %207 : vector<64xf32> to vector<64x1xf32>
    %cst_106 = arith.constant 3.200000e+01 : f32
    %209 = vector.broadcast %cst_106 : f32 to vector<64x1xf32>
    %210 = arith.divf %208, %209 : vector<64x1xf32>
    %211 = vector.broadcast %203 : vector<64x1xf32> to vector<64x32xf32>
    %212 = arith.subf %195, %211 : vector<64x32xf32>
    %cst_107 = arith.constant 9.99999996E-13 : f32
    %213 = vector.broadcast %cst_107 : f32 to vector<64x1xf32>
    %214 = arith.addf %210, %213 : vector<64x1xf32>
    %215 = math.rsqrt %214 : vector<64x1xf32>
    %216 = vector.broadcast %215 : vector<64x1xf32> to vector<64x32xf32>
    %217 = arith.mulf %212, %216 : vector<64x32xf32>
    %218 = vector.broadcast %197 : vector<1x32xf32> to vector<64x32xf32>
    %219 = arith.mulf %217, %218 : vector<64x32xf32>
    %220 = vector.broadcast %199 : vector<1x32xf32> to vector<64x32xf32>
    %221 = arith.addf %219, %220 : vector<64x32xf32>
    %222 = vector.shape_cast %221 : vector<64x32xf32> to vector<8x8x32xf32>
    %223 = vector.extract_strided_slice %222 {offsets = [0, 0, 0], sizes = [8, 1, 32], strides = [1, 1, 1]} : vector<8x8x32xf32> to vector<8x1x32xf32>
    %224 = vector.shape_cast %223 : vector<8x1x32xf32> to vector<8x32xf32>
    %cst_108 = arith.constant dense<0.000000e+00> : vector<8x32xf32>
    %225 = tpu.matmul %0, %224, %cst_108 {dimension_numbers = #tpu.dot_dimension_numbers<[1], [0], [0], [1], [0, 0, 1, 1], [], []>} : vector<8x8xf32>, vector<8x32xf32>, vector<8x32xf32> -> vector<8x32xf32>
    %226 = vector.broadcast %7 : vector<8x1xf32> to vector<8x32xf32>
    %227 = arith.mulf %225, %226 : vector<8x32xf32>
    %c1 = arith.constant 1 : index
    %c0_109 = arith.constant 0 : index
    %c0_110 = arith.constant 0 : index
    %228 = vector.load %arg4[%c1, %c0_109, %c0_110] : memref<2x32x32xf32, #tpu.memory_space<vmem>>, vector<1x32x32xf32>
    %229 = vector.shape_cast %228 : vector<1x32x32xf32> to vector<32x32xf32>
    %cst_111 = arith.constant dense<0.000000e+00> : vector<8x32xf32>
    %230 = tpu.matmul %224, %229, %cst_111 {dimension_numbers = #tpu.dot_dimension_numbers<[1], [0], [0], [1], [0, 0, 1, 1], [], []>} : vector<8x32xf32>, vector<32x32xf32>, vector<8x32xf32> -> vector<8x32xf32>
    %c1_112 = arith.constant 1 : index
    %c0_113 = arith.constant 0 : index
    %c0_114 = arith.constant 0 : index
    %231 = vector.load %arg5[%c1_112, %c0_113, %c0_114] : memref<2x32x32xf32, #tpu.memory_space<vmem>>, vector<1x32x32xf32>
    %232 = vector.shape_cast %231 : vector<1x32x32xf32> to vector<32x32xf32>
    %cst_115 = arith.constant dense<0.000000e+00> : vector<8x32xf32>
    %233 = tpu.matmul %227, %232, %cst_115 {dimension_numbers = #tpu.dot_dimension_numbers<[1], [0], [0], [1], [0, 0, 1, 1], [], []>} : vector<8x32xf32>, vector<32x32xf32>, vector<8x32xf32> -> vector<8x32xf32>
    %234 = arith.addf %230, %233 : vector<8x32xf32>
    %c1_116 = arith.constant 1 : index
    %c0_117 = arith.constant 0 : index
    %c0_118 = arith.constant 0 : index
    %235 = vector.load %arg6[%c1_116, %c0_117, %c0_118] : memref<2x1x32xf32, #tpu.memory_space<vmem>>, vector<1x1x32xf32>
    %236 = vector.shape_cast %235 : vector<1x1x32xf32> to vector<1x32xf32>
    %237 = vector.broadcast %236 : vector<1x32xf32> to vector<8x32xf32>
    %238 = arith.addf %234, %237 : vector<8x32xf32>
    %c0_i32_119 = arith.constant 0 : i32
    %239 = vector.broadcast %c0_i32_119 : i32 to vector<8x8x32xi32>
    %240 = arith.cmpi eq, %8, %239 : vector<8x8x32xi32>
    %241 = vector.shape_cast %238 : vector<8x32xf32> to vector<8x1x32xf32>
    %242 = vector.shape_cast %241 : vector<8x1x32xf32> to vector<8x1x32xf32>
    %243 = vector.broadcast %242 : vector<8x1x32xf32> to vector<8x8x32xf32>
    %244 = arith.select %240, %243, %222 : vector<8x8x32xi1>, vector<8x8x32xf32>
    %245 = vector.shape_cast %244 : vector<8x8x32xf32> to vector<64x32xf32>
    %c1_120 = arith.constant 1 : index
    %c0_121 = arith.constant 0 : index
    %c0_122 = arith.constant 0 : index
    %246 = vector.load %arg7[%c1_120, %c0_121, %c0_122] : memref<2x32x32xf32, #tpu.memory_space<vmem>>, vector<1x32x32xf32>
    %247 = vector.shape_cast %246 : vector<1x32x32xf32> to vector<32x32xf32>
    %cst_123 = arith.constant dense<0.000000e+00> : vector<64x32xf32>
    %248 = tpu.matmul %245, %247, %cst_123 {dimension_numbers = #tpu.dot_dimension_numbers<[1], [0], [0], [1], [0, 0, 1, 1], [], []>} : vector<64x32xf32>, vector<32x32xf32>, vector<64x32xf32> -> vector<64x32xf32>
    %c1_124 = arith.constant 1 : index
    %c0_125 = arith.constant 0 : index
    %c0_126 = arith.constant 0 : index
    %249 = vector.load %arg8[%c1_124, %c0_125, %c0_126] : memref<2x1x32xf32, #tpu.memory_space<vmem>>, vector<1x1x32xf32>
    %250 = vector.shape_cast %249 : vector<1x1x32xf32> to vector<1x32xf32>
    %251 = vector.broadcast %250 : vector<1x32xf32> to vector<64x32xf32>
    %252 = arith.addf %248, %251 : vector<64x32xf32>
    %c1_127 = arith.constant 1 : index
    %c0_128 = arith.constant 0 : index
    %c0_129 = arith.constant 0 : index
    %253 = vector.load %arg9[%c1_127, %c0_128, %c0_129] : memref<2x32x32xf32, #tpu.memory_space<vmem>>, vector<1x32x32xf32>
    %254 = vector.shape_cast %253 : vector<1x32x32xf32> to vector<32x32xf32>
    %cst_130 = arith.constant dense<0.000000e+00> : vector<64x32xf32>
    %255 = tpu.matmul %245, %254, %cst_130 {dimension_numbers = #tpu.dot_dimension_numbers<[1], [0], [0], [1], [0, 0, 1, 1], [], []>} : vector<64x32xf32>, vector<32x32xf32>, vector<64x32xf32> -> vector<64x32xf32>
    %c1_131 = arith.constant 1 : index
    %c0_132 = arith.constant 0 : index
    %c0_133 = arith.constant 0 : index
    %256 = vector.load %arg10[%c1_131, %c0_132, %c0_133] : memref<2x1x32xf32, #tpu.memory_space<vmem>>, vector<1x1x32xf32>
    %257 = vector.shape_cast %256 : vector<1x1x32xf32> to vector<1x32xf32>
    %258 = vector.broadcast %257 : vector<1x32xf32> to vector<64x32xf32>
    %259 = arith.addf %255, %258 : vector<64x32xf32>
    %c1_134 = arith.constant 1 : index
    %c0_135 = arith.constant 0 : index
    %c0_136 = arith.constant 0 : index
    %260 = vector.load %arg11[%c1_134, %c0_135, %c0_136] : memref<2x32x32xf32, #tpu.memory_space<vmem>>, vector<1x32x32xf32>
    %261 = vector.shape_cast %260 : vector<1x32x32xf32> to vector<32x32xf32>
    %cst_137 = arith.constant dense<0.000000e+00> : vector<64x32xf32>
    %262 = tpu.matmul %245, %261, %cst_137 {dimension_numbers = #tpu.dot_dimension_numbers<[1], [0], [0], [1], [0, 0, 1, 1], [], []>} : vector<64x32xf32>, vector<32x32xf32>, vector<64x32xf32> -> vector<64x32xf32>
    %c1_138 = arith.constant 1 : index
    %c0_139 = arith.constant 0 : index
    %c0_140 = arith.constant 0 : index
    %263 = vector.load %arg12[%c1_138, %c0_139, %c0_140] : memref<2x1x32xf32, #tpu.memory_space<vmem>>, vector<1x1x32xf32>
    %264 = vector.shape_cast %263 : vector<1x1x32xf32> to vector<1x32xf32>
    %265 = vector.broadcast %264 : vector<1x32xf32> to vector<64x32xf32>
    %266 = arith.addf %262, %265 : vector<64x32xf32>
    %267 = vector.shape_cast %252 : vector<64x32xf32> to vector<8x8x32xf32>
    %268 = vector.shape_cast %259 : vector<64x32xf32> to vector<8x8x32xf32>
    %269 = vector.shape_cast %266 : vector<64x32xf32> to vector<8x8x32xf32>
    %270 = vector.extract_strided_slice %267 {offsets = [0, 0, 0], sizes = [8, 8, 8], strides = [1, 1, 1]} : vector<8x8x32xf32> to vector<8x8x8xf32>
    %271 = vector.extract_strided_slice %268 {offsets = [0, 0, 0], sizes = [8, 8, 8], strides = [1, 1, 1]} : vector<8x8x32xf32> to vector<8x8x8xf32>
    "tpu.trace_start"() <{level = 10 : i32, message = "bqd,bkd->bqk"}> : () -> ()
    %cst_141 = arith.constant dense<0.000000e+00> : vector<8x8x8xf32>
    %272 = tpu.matmul %270, %271, %cst_141 {dimension_numbers = #tpu.dot_dimension_numbers<[2], [2], [1], [1], [0, 0, 0, 1, 1, 1], [0], [0]>} : vector<8x8x8xf32>, vector<8x8x8xf32>, vector<8x8x8xf32> -> vector<8x8x8xf32>
    "tpu.trace_stop"() : () -> ()
    %cst_142 = arith.constant 0.353553385 : f32
    %273 = vector.broadcast %cst_142 : f32 to vector<8x8x8xf32>
    %274 = arith.mulf %272, %273 : vector<8x8x8xf32>
    %275 = vector.broadcast %1 : vector<8x1x8xf32> to vector<8x8x8xf32>
    %276 = arith.addf %274, %275 : vector<8x8x8xf32>
    %cst_143 = arith.constant dense<0xFF800000> : vector<8x8xf32>
    %277 = vector.multi_reduction <maximumf>, %276, %cst_143 [2] : vector<8x8x8xf32> to vector<8x8xf32>
    %278 = vector.shape_cast %277 : vector<8x8xf32> to vector<8x8x1xf32>
    %279 = vector.broadcast %278 : vector<8x8x1xf32> to vector<8x8x8xf32>
    %280 = arith.subf %276, %279 : vector<8x8x8xf32>
    %281 = math.exp %280 : vector<8x8x8xf32>
    %cst_144 = arith.constant dense<0.000000e+00> : vector<8x8xf32>
    %282 = vector.multi_reduction <add>, %281, %cst_144 [2] : vector<8x8x8xf32> to vector<8x8xf32>
    %283 = vector.shape_cast %282 : vector<8x8xf32> to vector<8x8x1xf32>
    %284 = tpu.reciprocal %283 {approx = true} : vector<8x8x1xf32> -> vector<8x8x1xf32>
    %285 = vector.broadcast %284 : vector<8x8x1xf32> to vector<8x8x8xf32>
    %286 = arith.mulf %281, %285 : vector<8x8x8xf32>
    %287 = vector.extract_strided_slice %269 {offsets = [0, 0, 0], sizes = [8, 8, 8], strides = [1, 1, 1]} : vector<8x8x32xf32> to vector<8x8x8xf32>
    "tpu.trace_start"() <{level = 10 : i32, message = "bqk,bkd->bqd"}> : () -> ()
    %cst_145 = arith.constant dense<0.000000e+00> : vector<8x8x8xf32>
    %288 = tpu.matmul %286, %287, %cst_145 {dimension_numbers = #tpu.dot_dimension_numbers<[2], [1], [1], [2], [0, 0, 0, 1, 1, 2], [0], [0]>} : vector<8x8x8xf32>, vector<8x8x8xf32>, vector<8x8x8xf32> -> vector<8x8x8xf32>
    "tpu.trace_stop"() : () -> ()
    %289 = vector.extract_strided_slice %267 {offsets = [0, 0, 8], sizes = [8, 8, 8], strides = [1, 1, 1]} : vector<8x8x32xf32> to vector<8x8x8xf32>
    %290 = vector.extract_strided_slice %268 {offsets = [0, 0, 8], sizes = [8, 8, 8], strides = [1, 1, 1]} : vector<8x8x32xf32> to vector<8x8x8xf32>
    "tpu.trace_start"() <{level = 10 : i32, message = "bqd,bkd->bqk"}> : () -> ()
    %cst_146 = arith.constant dense<0.000000e+00> : vector<8x8x8xf32>
    %291 = tpu.matmul %289, %290, %cst_146 {dimension_numbers = #tpu.dot_dimension_numbers<[2], [2], [1], [1], [0, 0, 0, 1, 1, 1], [0], [0]>} : vector<8x8x8xf32>, vector<8x8x8xf32>, vector<8x8x8xf32> -> vector<8x8x8xf32>
    "tpu.trace_stop"() : () -> ()
    %cst_147 = arith.constant 0.353553385 : f32
    %292 = vector.broadcast %cst_147 : f32 to vector<8x8x8xf32>
    %293 = arith.mulf %291, %292 : vector<8x8x8xf32>
    %294 = vector.broadcast %1 : vector<8x1x8xf32> to vector<8x8x8xf32>
    %295 = arith.addf %293, %294 : vector<8x8x8xf32>
    %cst_148 = arith.constant dense<0xFF800000> : vector<8x8xf32>
    %296 = vector.multi_reduction <maximumf>, %295, %cst_148 [2] : vector<8x8x8xf32> to vector<8x8xf32>
    %297 = vector.shape_cast %296 : vector<8x8xf32> to vector<8x8x1xf32>
    %298 = vector.broadcast %297 : vector<8x8x1xf32> to vector<8x8x8xf32>
    %299 = arith.subf %295, %298 : vector<8x8x8xf32>
    %300 = math.exp %299 : vector<8x8x8xf32>
    %cst_149 = arith.constant dense<0.000000e+00> : vector<8x8xf32>
    %301 = vector.multi_reduction <add>, %300, %cst_149 [2] : vector<8x8x8xf32> to vector<8x8xf32>
    %302 = vector.shape_cast %301 : vector<8x8xf32> to vector<8x8x1xf32>
    %303 = tpu.reciprocal %302 {approx = true} : vector<8x8x1xf32> -> vector<8x8x1xf32>
    %304 = vector.broadcast %303 : vector<8x8x1xf32> to vector<8x8x8xf32>
    %305 = arith.mulf %300, %304 : vector<8x8x8xf32>
    %306 = vector.extract_strided_slice %269 {offsets = [0, 0, 8], sizes = [8, 8, 8], strides = [1, 1, 1]} : vector<8x8x32xf32> to vector<8x8x8xf32>
    "tpu.trace_start"() <{level = 10 : i32, message = "bqk,bkd->bqd"}> : () -> ()
    %cst_150 = arith.constant dense<0.000000e+00> : vector<8x8x8xf32>
    %307 = tpu.matmul %305, %306, %cst_150 {dimension_numbers = #tpu.dot_dimension_numbers<[2], [1], [1], [2], [0, 0, 0, 1, 1, 2], [0], [0]>} : vector<8x8x8xf32>, vector<8x8x8xf32>, vector<8x8x8xf32> -> vector<8x8x8xf32>
    "tpu.trace_stop"() : () -> ()
    %308 = vector.extract_strided_slice %267 {offsets = [0, 0, 16], sizes = [8, 8, 8], strides = [1, 1, 1]} : vector<8x8x32xf32> to vector<8x8x8xf32>
    %309 = vector.extract_strided_slice %268 {offsets = [0, 0, 16], sizes = [8, 8, 8], strides = [1, 1, 1]} : vector<8x8x32xf32> to vector<8x8x8xf32>
    "tpu.trace_start"() <{level = 10 : i32, message = "bqd,bkd->bqk"}> : () -> ()
    %cst_151 = arith.constant dense<0.000000e+00> : vector<8x8x8xf32>
    %310 = tpu.matmul %308, %309, %cst_151 {dimension_numbers = #tpu.dot_dimension_numbers<[2], [2], [1], [1], [0, 0, 0, 1, 1, 1], [0], [0]>} : vector<8x8x8xf32>, vector<8x8x8xf32>, vector<8x8x8xf32> -> vector<8x8x8xf32>
    "tpu.trace_stop"() : () -> ()
    %cst_152 = arith.constant 0.353553385 : f32
    %311 = vector.broadcast %cst_152 : f32 to vector<8x8x8xf32>
    %312 = arith.mulf %310, %311 : vector<8x8x8xf32>
    %313 = vector.broadcast %1 : vector<8x1x8xf32> to vector<8x8x8xf32>
    %314 = arith.addf %312, %313 : vector<8x8x8xf32>
    %cst_153 = arith.constant dense<0xFF800000> : vector<8x8xf32>
    %315 = vector.multi_reduction <maximumf>, %314, %cst_153 [2] : vector<8x8x8xf32> to vector<8x8xf32>
    %316 = vector.shape_cast %315 : vector<8x8xf32> to vector<8x8x1xf32>
    %317 = vector.broadcast %316 : vector<8x8x1xf32> to vector<8x8x8xf32>
    %318 = arith.subf %314, %317 : vector<8x8x8xf32>
    %319 = math.exp %318 : vector<8x8x8xf32>
    %cst_154 = arith.constant dense<0.000000e+00> : vector<8x8xf32>
    %320 = vector.multi_reduction <add>, %319, %cst_154 [2] : vector<8x8x8xf32> to vector<8x8xf32>
    %321 = vector.shape_cast %320 : vector<8x8xf32> to vector<8x8x1xf32>
    %322 = tpu.reciprocal %321 {approx = true} : vector<8x8x1xf32> -> vector<8x8x1xf32>
    %323 = vector.broadcast %322 : vector<8x8x1xf32> to vector<8x8x8xf32>
    %324 = arith.mulf %319, %323 : vector<8x8x8xf32>
    %325 = vector.extract_strided_slice %269 {offsets = [0, 0, 16], sizes = [8, 8, 8], strides = [1, 1, 1]} : vector<8x8x32xf32> to vector<8x8x8xf32>
    "tpu.trace_start"() <{level = 10 : i32, message = "bqk,bkd->bqd"}> : () -> ()
    %cst_155 = arith.constant dense<0.000000e+00> : vector<8x8x8xf32>
    %326 = tpu.matmul %324, %325, %cst_155 {dimension_numbers = #tpu.dot_dimension_numbers<[2], [1], [1], [2], [0, 0, 0, 1, 1, 2], [0], [0]>} : vector<8x8x8xf32>, vector<8x8x8xf32>, vector<8x8x8xf32> -> vector<8x8x8xf32>
    "tpu.trace_stop"() : () -> ()
    %327 = vector.extract_strided_slice %267 {offsets = [0, 0, 24], sizes = [8, 8, 8], strides = [1, 1, 1]} : vector<8x8x32xf32> to vector<8x8x8xf32>
    %328 = vector.extract_strided_slice %268 {offsets = [0, 0, 24], sizes = [8, 8, 8], strides = [1, 1, 1]} : vector<8x8x32xf32> to vector<8x8x8xf32>
    "tpu.trace_start"() <{level = 10 : i32, message = "bqd,bkd->bqk"}> : () -> ()
    %cst_156 = arith.constant dense<0.000000e+00> : vector<8x8x8xf32>
    %329 = tpu.matmul %327, %328, %cst_156 {dimension_numbers = #tpu.dot_dimension_numbers<[2], [2], [1], [1], [0, 0, 0, 1, 1, 1], [0], [0]>} : vector<8x8x8xf32>, vector<8x8x8xf32>, vector<8x8x8xf32> -> vector<8x8x8xf32>
    "tpu.trace_stop"() : () -> ()
    %cst_157 = arith.constant 0.353553385 : f32
    %330 = vector.broadcast %cst_157 : f32 to vector<8x8x8xf32>
    %331 = arith.mulf %329, %330 : vector<8x8x8xf32>
    %332 = vector.broadcast %1 : vector<8x1x8xf32> to vector<8x8x8xf32>
    %333 = arith.addf %331, %332 : vector<8x8x8xf32>
    %cst_158 = arith.constant dense<0xFF800000> : vector<8x8xf32>
    %334 = vector.multi_reduction <maximumf>, %333, %cst_158 [2] : vector<8x8x8xf32> to vector<8x8xf32>
    %335 = vector.shape_cast %334 : vector<8x8xf32> to vector<8x8x1xf32>
    %336 = vector.broadcast %335 : vector<8x8x1xf32> to vector<8x8x8xf32>
    %337 = arith.subf %333, %336 : vector<8x8x8xf32>
    %338 = math.exp %337 : vector<8x8x8xf32>
    %cst_159 = arith.constant dense<0.000000e+00> : vector<8x8xf32>
    %339 = vector.multi_reduction <add>, %338, %cst_159 [2] : vector<8x8x8xf32> to vector<8x8xf32>
    %340 = vector.shape_cast %339 : vector<8x8xf32> to vector<8x8x1xf32>
    %341 = tpu.reciprocal %340 {approx = true} : vector<8x8x1xf32> -> vector<8x8x1xf32>
    %342 = vector.broadcast %341 : vector<8x8x1xf32> to vector<8x8x8xf32>
    %343 = arith.mulf %338, %342 : vector<8x8x8xf32>
    %344 = vector.extract_strided_slice %269 {offsets = [0, 0, 24], sizes = [8, 8, 8], strides = [1, 1, 1]} : vector<8x8x32xf32> to vector<8x8x8xf32>
    "tpu.trace_start"() <{level = 10 : i32, message = "bqk,bkd->bqd"}> : () -> ()
    %cst_160 = arith.constant dense<0.000000e+00> : vector<8x8x8xf32>
    %345 = tpu.matmul %343, %344, %cst_160 {dimension_numbers = #tpu.dot_dimension_numbers<[2], [1], [1], [2], [0, 0, 0, 1, 1, 2], [0], [0]>} : vector<8x8x8xf32>, vector<8x8x8xf32>, vector<8x8x8xf32> -> vector<8x8x8xf32>
    "tpu.trace_stop"() : () -> ()
    %346 = tpu.concatenate %288, %307, %326, %345 in 2 : vector<8x8x8xf32>, vector<8x8x8xf32>, vector<8x8x8xf32>, vector<8x8x8xf32> -> vector<8x8x32xf32>
    %347 = vector.shape_cast %346 : vector<8x8x32xf32> to vector<64x32xf32>
    %c1_161 = arith.constant 1 : index
    %c0_162 = arith.constant 0 : index
    %c0_163 = arith.constant 0 : index
    %348 = vector.load %arg13[%c1_161, %c0_162, %c0_163] : memref<2x32x32xf32, #tpu.memory_space<vmem>>, vector<1x32x32xf32>
    %349 = vector.shape_cast %348 : vector<1x32x32xf32> to vector<32x32xf32>
    %cst_164 = arith.constant dense<0.000000e+00> : vector<64x32xf32>
    %350 = tpu.matmul %347, %349, %cst_164 {dimension_numbers = #tpu.dot_dimension_numbers<[1], [0], [0], [1], [0, 0, 1, 1], [], []>} : vector<64x32xf32>, vector<32x32xf32>, vector<64x32xf32> -> vector<64x32xf32>
    %c1_165 = arith.constant 1 : index
    %c0_166 = arith.constant 0 : index
    %c0_167 = arith.constant 0 : index
    %351 = vector.load %arg14[%c1_165, %c0_166, %c0_167] : memref<2x1x32xf32, #tpu.memory_space<vmem>>, vector<1x1x32xf32>
    %352 = vector.shape_cast %351 : vector<1x1x32xf32> to vector<1x32xf32>
    %353 = vector.broadcast %352 : vector<1x32xf32> to vector<64x32xf32>
    %354 = arith.addf %350, %353 : vector<64x32xf32>
    %355 = arith.addf %354, %245 : vector<64x32xf32>
    %c1_168 = arith.constant 1 : index
    %c0_169 = arith.constant 0 : index
    %c0_170 = arith.constant 0 : index
    %356 = vector.load %arg15[%c1_168, %c0_169, %c0_170] : memref<2x1x32xf32, #tpu.memory_space<vmem>>, vector<1x1x32xf32>
    %357 = vector.shape_cast %356 : vector<1x1x32xf32> to vector<1x32xf32>
    %c1_171 = arith.constant 1 : index
    %c0_172 = arith.constant 0 : index
    %c0_173 = arith.constant 0 : index
    %358 = vector.load %arg16[%c1_171, %c0_172, %c0_173] : memref<2x1x32xf32, #tpu.memory_space<vmem>>, vector<1x1x32xf32>
    %359 = vector.shape_cast %358 : vector<1x1x32xf32> to vector<1x32xf32>
    %cst_174 = arith.constant dense<0.000000e+00> : vector<64xf32>
    %360 = vector.multi_reduction <add>, %355, %cst_174 [1] : vector<64x32xf32> to vector<64xf32>
    %361 = vector.shape_cast %360 : vector<64xf32> to vector<64x1xf32>
    %cst_175 = arith.constant 3.200000e+01 : f32
    %362 = vector.broadcast %cst_175 : f32 to vector<64x1xf32>
    %363 = arith.divf %361, %362 : vector<64x1xf32>
    %364 = vector.broadcast %363 : vector<64x1xf32> to vector<64x32xf32>
    %365 = arith.subf %355, %364 : vector<64x32xf32>
    %366 = arith.mulf %365, %365 : vector<64x32xf32>
    %cst_176 = arith.constant dense<0.000000e+00> : vector<64xf32>
    %367 = vector.multi_reduction <add>, %366, %cst_176 [1] : vector<64x32xf32> to vector<64xf32>
    %368 = vector.shape_cast %367 : vector<64xf32> to vector<64x1xf32>
    %cst_177 = arith.constant 3.200000e+01 : f32
    %369 = vector.broadcast %cst_177 : f32 to vector<64x1xf32>
    %370 = arith.divf %368, %369 : vector<64x1xf32>
    %371 = vector.broadcast %363 : vector<64x1xf32> to vector<64x32xf32>
    %372 = arith.subf %355, %371 : vector<64x32xf32>
    %cst_178 = arith.constant 9.99999996E-13 : f32
    %373 = vector.broadcast %cst_178 : f32 to vector<64x1xf32>
    %374 = arith.addf %370, %373 : vector<64x1xf32>
    %375 = math.rsqrt %374 : vector<64x1xf32>
    %376 = vector.broadcast %375 : vector<64x1xf32> to vector<64x32xf32>
    %377 = arith.mulf %372, %376 : vector<64x32xf32>
    %378 = vector.broadcast %357 : vector<1x32xf32> to vector<64x32xf32>
    %379 = arith.mulf %377, %378 : vector<64x32xf32>
    %380 = vector.broadcast %359 : vector<1x32xf32> to vector<64x32xf32>
    %381 = arith.addf %379, %380 : vector<64x32xf32>
    %c1_179 = arith.constant 1 : index
    %c0_180 = arith.constant 0 : index
    %c0_181 = arith.constant 0 : index
    %382 = vector.load %arg17[%c1_179, %c0_180, %c0_181] : memref<2x32x64xf32, #tpu.memory_space<vmem>>, vector<1x32x64xf32>
    %383 = vector.shape_cast %382 : vector<1x32x64xf32> to vector<32x64xf32>
    %cst_182 = arith.constant dense<0.000000e+00> : vector<64x64xf32>
    %384 = tpu.matmul %381, %383, %cst_182 {dimension_numbers = #tpu.dot_dimension_numbers<[1], [0], [0], [1], [0, 0, 1, 1], [], []>} : vector<64x32xf32>, vector<32x64xf32>, vector<64x64xf32> -> vector<64x64xf32>
    %c1_183 = arith.constant 1 : index
    %c0_184 = arith.constant 0 : index
    %c0_185 = arith.constant 0 : index
    %385 = vector.load %arg18[%c1_183, %c0_184, %c0_185] : memref<2x1x64xf32, #tpu.memory_space<vmem>>, vector<1x1x64xf32>
    %386 = vector.shape_cast %385 : vector<1x1x64xf32> to vector<1x64xf32>
    %387 = vector.broadcast %386 : vector<1x64xf32> to vector<64x64xf32>
    %388 = arith.addf %384, %387 : vector<64x64xf32>
    %cst_186 = arith.constant 5.000000e-01 : f32
    %389 = vector.broadcast %cst_186 : f32 to vector<64x64xf32>
    %390 = arith.mulf %389, %388 : vector<64x64xf32>
    %cst_187 = arith.constant 4.471500e-02 : f32
    %391 = vector.broadcast %cst_187 : f32 to vector<64x64xf32>
    %392 = arith.mulf %391, %388 : vector<64x64xf32>
    %393 = arith.mulf %392, %388 : vector<64x64xf32>
    %394 = arith.mulf %393, %388 : vector<64x64xf32>
    %395 = arith.addf %388, %394 : vector<64x64xf32>
    %cst_188 = arith.constant 0.797884583 : f32
    %396 = vector.broadcast %cst_188 : f32 to vector<64x64xf32>
    %397 = arith.mulf %396, %395 : vector<64x64xf32>
    %398 = math.tanh %397 : vector<64x64xf32>
    %cst_189 = arith.constant 1.000000e+00 : f32
    %399 = vector.broadcast %cst_189 : f32 to vector<64x64xf32>
    %400 = arith.addf %399, %398 : vector<64x64xf32>
    %401 = arith.mulf %390, %400 : vector<64x64xf32>
    %c1_190 = arith.constant 1 : index
    %c0_191 = arith.constant 0 : index
    %c0_192 = arith.constant 0 : index
    %402 = vector.load %arg19[%c1_190, %c0_191, %c0_192] : memref<2x64x32xf32, #tpu.memory_space<vmem>>, vector<1x64x32xf32>
    %403 = vector.shape_cast %402 : vector<1x64x32xf32> to vector<64x32xf32>
    %cst_193 = arith.constant dense<0.000000e+00> : vector<64x32xf32>
    %404 = tpu.matmul %401, %403, %cst_193 {dimension_numbers = #tpu.dot_dimension_numbers<[1], [0], [0], [1], [0, 0, 1, 1], [], []>} : vector<64x64xf32>, vector<64x32xf32>, vector<64x32xf32> -> vector<64x32xf32>
    %c1_194 = arith.constant 1 : index
    %c0_195 = arith.constant 0 : index
    %c0_196 = arith.constant 0 : index
    %405 = vector.load %arg20[%c1_194, %c0_195, %c0_196] : memref<2x1x32xf32, #tpu.memory_space<vmem>>, vector<1x1x32xf32>
    %406 = vector.shape_cast %405 : vector<1x1x32xf32> to vector<1x32xf32>
    %407 = vector.broadcast %406 : vector<1x32xf32> to vector<64x32xf32>
    %408 = arith.addf %404, %407 : vector<64x32xf32>
    %409 = arith.addf %408, %381 : vector<64x32xf32>
    %c1_197 = arith.constant 1 : index
    %c0_198 = arith.constant 0 : index
    %c0_199 = arith.constant 0 : index
    %410 = vector.load %arg21[%c1_197, %c0_198, %c0_199] : memref<2x1x32xf32, #tpu.memory_space<vmem>>, vector<1x1x32xf32>
    %411 = vector.shape_cast %410 : vector<1x1x32xf32> to vector<1x32xf32>
    %c1_200 = arith.constant 1 : index
    %c0_201 = arith.constant 0 : index
    %c0_202 = arith.constant 0 : index
    %412 = vector.load %arg22[%c1_200, %c0_201, %c0_202] : memref<2x1x32xf32, #tpu.memory_space<vmem>>, vector<1x1x32xf32>
    %413 = vector.shape_cast %412 : vector<1x1x32xf32> to vector<1x32xf32>
    %cst_203 = arith.constant dense<0.000000e+00> : vector<64xf32>
    %414 = vector.multi_reduction <add>, %409, %cst_203 [1] : vector<64x32xf32> to vector<64xf32>
    %415 = vector.shape_cast %414 : vector<64xf32> to vector<64x1xf32>
    %cst_204 = arith.constant 3.200000e+01 : f32
    %416 = vector.broadcast %cst_204 : f32 to vector<64x1xf32>
    %417 = arith.divf %415, %416 : vector<64x1xf32>
    %418 = vector.broadcast %417 : vector<64x1xf32> to vector<64x32xf32>
    %419 = arith.subf %409, %418 : vector<64x32xf32>
    %420 = arith.mulf %419, %419 : vector<64x32xf32>
    %cst_205 = arith.constant dense<0.000000e+00> : vector<64xf32>
    %421 = vector.multi_reduction <add>, %420, %cst_205 [1] : vector<64x32xf32> to vector<64xf32>
    %422 = vector.shape_cast %421 : vector<64xf32> to vector<64x1xf32>
    %cst_206 = arith.constant 3.200000e+01 : f32
    %423 = vector.broadcast %cst_206 : f32 to vector<64x1xf32>
    %424 = arith.divf %422, %423 : vector<64x1xf32>
    %425 = vector.broadcast %417 : vector<64x1xf32> to vector<64x32xf32>
    %426 = arith.subf %409, %425 : vector<64x32xf32>
    %cst_207 = arith.constant 9.99999996E-13 : f32
    %427 = vector.broadcast %cst_207 : f32 to vector<64x1xf32>
    %428 = arith.addf %424, %427 : vector<64x1xf32>
    %429 = math.rsqrt %428 : vector<64x1xf32>
    %430 = vector.broadcast %429 : vector<64x1xf32> to vector<64x32xf32>
    %431 = arith.mulf %426, %430 : vector<64x32xf32>
    %432 = vector.broadcast %411 : vector<1x32xf32> to vector<64x32xf32>
    %433 = arith.mulf %431, %432 : vector<64x32xf32>
    %434 = vector.broadcast %413 : vector<1x32xf32> to vector<64x32xf32>
    %435 = arith.addf %433, %434 : vector<64x32xf32>
    %436 = vector.shape_cast %435 : vector<64x32xf32> to vector<8x8x32xf32>
    %c0_208 = arith.constant 0 : index
    %c0_209 = arith.constant 0 : index
    %c0_210 = arith.constant 0 : index
    %437 = vector.load %arg23[%c0_208, %c0_209, %c0_210] : memref<8x8x32xf32, #tpu.memory_space<vmem>>, vector<8x8x32xf32>
    tpu.vector_store %arg23[%c0_208, %c0_209, %c0_210], %436 {strides = array<i32>} : memref<8x8x32xf32, #tpu.memory_space<vmem>>, vector<8x8x32xf32>,
    return
  }
  func.func @transform_0(%arg0: i32) -> (i32, i32) {
    %c0_i32 = arith.constant 0 : i32
    %c0_i32_0 = arith.constant 0 : i32
    %c0_i32_1 = arith.constant 0 : i32
    return %c0_i32, %c0_i32_0 : i32, i32
  }
  func.func @transform_1(%arg0: i32) -> (i32, i32, i32) {
    %c0_i32 = arith.constant 0 : i32
    %c0_i32_0 = arith.constant 0 : i32
    %c0_i32_1 = arith.constant 0 : i32
    %c0_i32_2 = arith.constant 0 : i32
    return %c0_i32, %c0_i32_0, %c0_i32_1 : i32, i32, i32
  }
  func.func @transform_2(%arg0: i32) -> (i32, i32, i32) {
    %c0_i32 = arith.constant 0 : i32
    %c0_i32_0 = arith.constant 0 : i32
    %c0_i32_1 = arith.constant 0 : i32
    %c0_i32_2 = arith.constant 0 : i32
    return %c0_i32, %c0_i32_0, %c0_i32_1 : i32, i32, i32
  }
  func.func @transform_3(%arg0: i32) -> (i32, i32, i32) {
    %c0_i32 = arith.constant 0 : i32
    %c0_i32_0 = arith.constant 0 : i32
    %c0_i32_1 = arith.constant 0 : i32
    %c0_i32_2 = arith.constant 0 : i32
    return %c0_i32, %c0_i32_0, %c0_i32_1 : i32, i32, i32
  }
  func.func @transform_4(%arg0: i32) -> (i32, i32, i32) {
    %c0_i32 = arith.constant 0 : i32
    %c0_i32_0 = arith.constant 0 : i32
    %c0_i32_1 = arith.constant 0 : i32
    %c0_i32_2 = arith.constant 0 : i32
    return %c0_i32, %c0_i32_0, %c0_i32_1 : i32, i32, i32
  }
  func.func @transform_5(%arg0: i32) -> (i32, i32, i32) {
    %c0_i32 = arith.constant 0 : i32
    %c0_i32_0 = arith.constant 0 : i32
    %c0_i32_1 = arith.constant 0 : i32
    %c0_i32_2 = arith.constant 0 : i32
    return %c0_i32, %c0_i32_0, %c0_i32_1 : i32, i32, i32
  }
  func.func @transform_6(%arg0: i32) -> (i32, i32, i32) {
    %c0_i32 = arith.constant 0 : i32
    %c0_i32_0 = arith.constant 0 : i32
    %c0_i32_1 = arith.constant 0 : i32
    %c0_i32_2 = arith.constant 0 : i32
    return %c0_i32, %c0_i32_0, %c0_i32_1 : i32, i32, i32
  }
  func.func @transform_7(%arg0: i32) -> (i32, i32, i32) {
    %c0_i32 = arith.constant 0 : i32
    %c0_i32_0 = arith.constant 0 : i32
    %c0_i32_1 = arith.constant 0 : i32
    %c0_i32_2 = arith.constant 0 : i32
    return %c0_i32, %c0_i32_0, %c0_i32_1 : i32, i32, i32
  }
  func.func @transform_8(%arg0: i32) -> (i32, i32, i32) {
    %c0_i32 = arith.constant 0 : i32
    %c0_i32_0 = arith.constant 0 : i32
    %c0_i32_1 = arith.constant 0 : i32
    %c0_i32_2 = arith.constant 0 : i32
    return %c0_i32, %c0_i32_0, %c0_i32_1 : i32, i32, i32
  }
  func.func @transform_9(%arg0: i32) -> (i32, i32, i32) {
    %c0_i32 = arith.constant 0 : i32
    %c0_i32_0 = arith.constant 0 : i32
    %c0_i32_1 = arith.constant 0 : i32
    %c0_i32_2 = arith.constant 0 : i32
    return %c0_i32, %c0_i32_0, %c0_i32_1 : i32, i32, i32
  }
  func.func @transform_10(%arg0: i32) -> (i32, i32, i32) {
    %c0_i32 = arith.constant 0 : i32
    %c0_i32_0 = arith.constant 0 : i32
    %c0_i32_1 = arith.constant 0 : i32
    %c0_i32_2 = arith.constant 0 : i32
    return %c0_i32, %c0_i32_0, %c0_i32_1 : i32, i32, i32
  }
  func.func @transform_11(%arg0: i32) -> (i32, i32, i32) {
    %c0_i32 = arith.constant 0 : i32
    %c0_i32_0 = arith.constant 0 : i32
    %c0_i32_1 = arith.constant 0 : i32
    %c0_i32_2 = arith.constant 0 : i32
    return %c0_i32, %c0_i32_0, %c0_i32_1 : i32, i32, i32
  }
  func.func @transform_12(%arg0: i32) -> (i32, i32, i32) {
    %c0_i32 = arith.constant 0 : i32
    %c0_i32_0 = arith.constant 0 : i32
    %c0_i32_1 = arith.constant 0 : i32
    %c0_i32_2 = arith.constant 0 : i32
    return %c0_i32, %c0_i32_0, %c0_i32_1 : i32, i32, i32
  }
  func.func @transform_13(%arg0: i32) -> (i32, i32, i32) {
    %c0_i32 = arith.constant 0 : i32
    %c0_i32_0 = arith.constant 0 : i32
    %c0_i32_1 = arith.constant 0 : i32
    %c0_i32_2 = arith.constant 0 : i32
    return %c0_i32, %c0_i32_0, %c0_i32_1 : i32, i32, i32
  }
  func.func @transform_14(%arg0: i32) -> (i32, i32, i32) {
    %c0_i32 = arith.constant 0 : i32
    %c0_i32_0 = arith.constant 0 : i32
    %c0_i32_1 = arith.constant 0 : i32
    %c0_i32_2 = arith.constant 0 : i32
    return %c0_i32, %c0_i32_0, %c0_i32_1 : i32, i32, i32
  }
  func.func @transform_15(%arg0: i32) -> (i32, i32, i32) {
    %c0_i32 = arith.constant 0 : i32
    %c0_i32_0 = arith.constant 0 : i32
    %c0_i32_1 = arith.constant 0 : i32
    %c0_i32_2 = arith.constant 0 : i32
    return %c0_i32, %c0_i32_0, %c0_i32_1 : i32, i32, i32
  }
  func.func @transform_16(%arg0: i32) -> (i32, i32, i32) {
    %c0_i32 = arith.constant 0 : i32
    %c0_i32_0 = arith.constant 0 : i32
    %c0_i32_1 = arith.constant 0 : i32
    %c0_i32_2 = arith.constant 0 : i32
    return %c0_i32, %c0_i32_0, %c0_i32_1 : i32, i32, i32
  }
  func.func @transform_17(%arg0: i32) -> (i32, i32, i32) {
    %c0_i32 = arith.constant 0 : i32
    %c0_i32_0 = arith.constant 0 : i32
    %c0_i32_1 = arith.constant 0 : i32
    %c0_i32_2 = arith.constant 0 : i32
    return %c0_i32, %c0_i32_0, %c0_i32_1 : i32, i32, i32
  }
  func.func @transform_18(%arg0: i32) -> (i32, i32, i32) {
    %c0_i32 = arith.constant 0 : i32
    %c0_i32_0 = arith.constant 0 : i32
    %c0_i32_1 = arith.constant 0 : i32
    %c0_i32_2 = arith.constant 0 : i32
    return %c0_i32, %c0_i32_0, %c0_i32_1 : i32, i32, i32
  }
  func.func @transform_19(%arg0: i32) -> (i32, i32, i32) {
    %c0_i32 = arith.constant 0 : i32
    %c0_i32_0 = arith.constant 0 : i32
    %c0_i32_1 = arith.constant 0 : i32
    %c0_i32_2 = arith.constant 0 : i32
    return %c0_i32, %c0_i32_0, %c0_i32_1 : i32, i32, i32
  }
  func.func @transform_20(%arg0: i32) -> (i32, i32, i32) {
    %c0_i32 = arith.constant 0 : i32
    %c0_i32_0 = arith.constant 0 : i32
    %c0_i32_1 = arith.constant 0 : i32
    %c0_i32_2 = arith.constant 0 : i32
    return %c0_i32, %c0_i32_0, %c0_i32_1 : i32, i32, i32
  }
  func.func @transform_21(%arg0: i32) -> (i32, i32, i32) {
    %c0_i32 = arith.constant 0 : i32
    %c0_i32_0 = arith.constant 0 : i32
    %c0_i32_1 = arith.constant 0 : i32
    %c0_i32_2 = arith.constant 0 : i32
    return %c0_i32, %c0_i32_0, %c0_i32_1 : i32, i32, i32
  }
  func.func @transform_22(%arg0: i32) -> (i32, i32, i32) {
    %c0_i32 = arith.constant 0 : i32
    %c0_i32_0 = arith.constant 0 : i32
    %c0_i32_1 = arith.constant 0 : i32
    %c0_i32_2 = arith.constant 0 : i32
    return %c0_i32, %c0_i32_0, %c0_i32_1 : i32, i32, i32
  }
}

</mosaic_0001>

<bundles_post_ra>
// kernel: graph_bert_encoder.1
= control target key start
LH: loop header
LB: loop body
LE: loop exit
PB: predicated region body
PF: predicated region fallthrough
CT: control target
= control target key end

     0   :  { %s19585_s0 = inlined_call_operand.vmem [shape: f32[8,8], index: 0, kind: input, shape index: {}]   ;;  %s19586_s1 = inlined_call_operand.vmem [shape: f32[8,1,8], index: 1, kind: input, shape index: {}]   ;;  %s19587_s2 = inlined_call_operand.vmem [shape: f32[8,8,32], index: 2, kind: input, shape index: {}]   ;;  %s19588_s3 = inlined_call_operand.vmem [shape: f32[2,32,32], index: 3, kind: input, shape index: {}]   ;;  %s19589_s4 = inlined_call_operand.vmem [shape: f32[2,32,32], index: 4, kind: input, shape index: {}]   ;;  %s19590_s5 = inlined_call_operand.vmem [shape: f32[2,1,32], index: 5, kind: input, shape index: {}]   ;;  %s19591_s6 = inlined_call_operand.vmem [shape: f32[2,32,32], index: 6, kind: input, shape index: {}]   ;;  %s19592_s7 = inlined_call_operand.vmem [shape: f32[2,1,32], index: 7, kind: input, shape index: {}]   ;;  %s19593_s8 = inlined_call_operand.vmem [shape: f32[2,32,32], index: 8, kind: input, shape index: {}]   ;;  %s19594_s9 = inlined_call_operand.vmem [shape: f32[2,1,32], index: 9, kind: input, shape index: {}]   ;;  %s19595_s10 = inlined_call_operand.vmem [shape: f32[2,32,32], index: 10, kind: input, shape index: {}]   ;;  %s19596_s11 = inlined_call_operand.vmem [shape: f32[2,1,32], index: 11, kind: input, shape index: {}]   ;;  %s19597_s12 = inlined_call_operand.vmem [shape: f32[2,32,32], index: 12, kind: input, shape index: {}]   ;;  %s19598_s13 = inlined_call_operand.vmem [shape: f32[2,1,32], index: 13, kind: input, shape index: {}]   ;;  %s19599_s14 = inlined_call_operand.vmem [shape: f32[2,1,32], index: 14, kind: input, shape index: {}]   ;;  %s19600_s15 = inlined_call_operand.vmem [shape: f32[2,1,32], index: 15, kind: input, shape index: {}]   ;;  %s19601_s16 = inlined_call_operand.vmem [shape: f32[2,32,64], index: 16, kind: input, shape index: {}]   ;;  %s19602_s17 = inlined_call_operand.vmem [shape: f32[2,1,64], index: 17, kind: input, shape index: {}]   ;;  %s19603_s18 = inlined_call_operand.vmem [shape: f32[2,64,32], index: 18, kind: input, shape index: {}]   ;;  %s19604_s19 = inlined_call_operand.vmem [shape: f32[2,1,32], index: 19, kind: input, shape index: {}]   ;;  %s19605_s20 = inlined_call_operand.vmem [shape: f32[2,1,32], index: 20, kind: input, shape index: {}]   ;;  %s19606_s21 = inlined_call_operand.vmem [shape: f32[2,1,32], index: 21, kind: input, shape index: {}]   ;;  %s19607_s22 = inlined_call_operand.hbm [shape: f32[8,8,32], index: 22, kind: output, shape index: {}]  }
   0x1   :  { %19652 = sst [smem:[#allocation30_spill]] %s19585_s0 }
   0x2   :  { %19653 = sst [smem:[#allocation31_spill]] %s19586_s1 }
   0x3   :  { %19654 = sst [smem:[#allocation32_spill]] %s19587_s2 }
   0x4   :  { %19655 = sst [smem:[#allocation33_spill]] %s19588_s3 }
   0x5   :  { %19656 = sst [smem:[#allocation34_spill]] %s19589_s4 }
   0x6   :  { %19657 = sst [smem:[#allocation35_spill]] %s19590_s5 }
   0x7   :  { %19658 = sst [smem:[#allocation36_spill]] %s19591_s6 }
   0x8   :  { %s19659_s29 = sld [smem:[#allocation32_spill]]  ;;  %vm106_vm0 = vcmask 1041409   ;;  %v19617_v3 = vmov 0.0   ;;  %vm109_vm1 = vcmask 1042434   ;;  %vm112_vm2 = vcmask 1043459  }
   0x9   :  { %14881 = vmatprep.subr.mxu0 %v19617_v3  ;;  %vm115_vm3 = vcmask 1044484  }
   0xe   :  { %v16512_v0 = vld [vmem:[%s19659_s29] sm:$0xff]  ;;  %v16517_v1 = vld [vmem:[%s19659_s29 + $0x8] sm:$0xff]  ;;  %v16522_v2 = vld [vmem:[%s19659_s29 + $0x10] sm:$0xff] }
   0xf   :  { %v16528_v4 = vld [vmem:[%s19659_s29 + $0x18] sm:$0xff]  ;;  %v16533_v5 = vld [vmem:[%s19659_s29 + $0x20] sm:$0xff]  ;;  %v16538_v6 = vld [vmem:[%s19659_s29 + $0x28] sm:$0xff]  ;;  %v105_v7 = vrot.slane %v16517_v1, 7  ;;  %v108_v8 = vrot.slane %v16522_v2, 6 }
  0x10   :  { %v16545_v9 = vld [vmem:[%s19659_s29 + $0x30] sm:$0xff]  ;;  %v16550_v10 = vld [vmem:[%s19659_s29 + $0x38] sm:$0xff]  ;;  %v111_v11 = vrot.slane %v16528_v4, 5  ;;  %v114_v12 = vrot.slane %v16533_v5, 4  ;;  %v117_v14 = vrot.slane %v16538_v6, 3 }
  0x11   :  { %v107_v13 = vsel %vm106_vm0, %v105_v7, %v16512_v0 }
  0x12   :  { %27 = vsyncpa [#allocation3], 0  ;;  %v110_v15 = vsel %vm109_vm1, %v108_v8, %v107_v13  ;;  %vm118_vm4 = vcmask 1045509   ;;  %v120_v16 = vrot.slane %v16545_v9, 2  ;;  %vm121_vm5 = vcmask 1046534   ;;  %s19660_s4 = sld [smem:[#allocation30_spill]] }
  0x13   :  { %v113_v17 = vsel %vm112_vm2, %v111_v11, %v110_v15  ;;  %v123_v18 = vrot.slane %v16550_v10, 1  ;;  %vm16383_vm6 = vmmov 0   ;;  %vm89_vm7 = vcmask 64512   ;;  %s19661_s1 = sld [smem:[#allocation34_spill]]  ;;  %s19662_s28 = sld [smem:[#allocation33_spill]]  ;;  %v602_v46 = vld [vmem:[%s19593_s8] sm:$0xff] }
  0x14   :  { %14883 = vmatprep.mubr.msk.f32.mxu0 %vm16383_vm6, %v19617_v3  ;;  %v116_v20 = vsel %vm115_vm3, %v114_v12, %v113_v17  ;;  %vm124_vm8 = vcmask 1047559   ;;  %v19615_v28 = vmov 0.0|0.0   ;;  %vm209_vm9 = vcmask 261120   ;;  %s19664_s26 = sld [smem:[#allocation36_spill]]  ;;  %v603_v48 = vld [vmem:[%s19593_s8 + $0x8] sm:$0xff]  ;;  %v604_v52 = vld [vmem:[%s19593_s8 + $0x10] sm:$0xff] }
  0x15   :  { %v119_v22 = vsel %vm118_vm4, %v117_v14, %v116_v20  ;;  %v15851_v49 = vpack.c.bf16 %v603_v48, %v602_v46  ;;  %v605_v54 = vld [vmem:[%s19593_s8 + $0x18] sm:$0xff]  ;;  %v718_v56 = vld [vmem:[%s19595_s10] sm:$0xff]  ;;  %v719_v57 = vld [vmem:[%s19595_s10 + $0x8] sm:$0xff]  ;;  %v95_v61 = vlaneseq  ;;  %v16385_v62 = vmov 1966171168   ;;  %s19666_s6 = sld [smem:[#allocation35_spill]] }
  0x16   :  { %v122_v23 = vsel %vm121_vm5, %v120_v16, %v119_v22  ;;  %v15855_v55 = vpack.c.bf16 %v605_v54, %v604_v52  ;;  %v15859_v58 = vpack.c.bf16 %v719_v57, %v718_v56  ;;  %v367_v63 = vunpack.c.l.s4 %v16385_v62  ;;  %s19677_s27 = sld [smem:[#allocation31_spill]]  ;;  %s16386_s5 = smov 120  }
  0x17   :  { %v125_v24 = vsel %vm124_vm8, %v123_v18, %v122_v23  ;;  %v16640_v7 = vshrl.u32 %v95_v61, 7  ;;  %s19640_s24 = smov 112   ;;  %s19638_s25 = smov 104   ;;  %vm6298_vm11 = vcmask 130048   ;;  %vm6307_vm12 = vcmask 195584  }
  0x18   :  { %v72_v19 = vld [vmem:[%s19660_s4] sm:$0xff]  ;;  %14882 = vmatpush3.msra.mxu0 %v125_v24  ;;  %v368_v8 = vunpack.c.0.s8 %v367_v63  ;;  %s19636_s0 = smov 8   ;;  %s19634_s23 = smov 16   ;;  %vm6826_vm13 = vcmask 523264  }
  0x19   :  { %v90_v21 = vsel %vm89_vm7, %v72_v19, 0.0  ;;  %14884 = vmatmul.mubr.msk.f32.vlgmr.msra.gmra.mrb[0].mxu0 %vm89_vm7, %v72_v19  ;;  %v205_v25 = vld [vmem:[%s19661_s1] sm:$0xff]  ;;  %v206_v26 = vld [vmem:[%s19661_s1 + $0x8] sm:$0xff]  ;;  %v207_v27 = vld [vmem:[%s19661_s1 + $0x10] sm:$0xff]  ;;  %15831 = vmatprep.subr.bf16.mxu0 %v19615_v28  ;;  %19665 = vst [vmem:[#allocation6_spill] sm:$0xff] %v16640_v7  ;;  %v16650_v19 = vsub.s32 0, %v16640_v7 }
  0x1a   :  { %91 = vadd.xlane.f32.xlu0 %v90_v21  ;;  %14894 = vmatprep.mubr.msk.f32.mxu0 %vm16383_vm6, %v19617_v3  ;;  %v15832_v29 = vpack.c.bf16 %v206_v26, %v205_v25  ;;  %v208_v30 = vld [vmem:[%s19661_s1 + $0x18] sm:$0xff]  ;;  %v201_v34 = vld [vmem:[%s19662_s28] sm:$0xff]  ;;  %v202_v35 = vld [vmem:[%s19662_s28 + $0x8] sm:$0xff]  ;;  %v16646_v14 = vsub.s32 %v368_v8, %v16640_v7  ;;  %vm363_vm10 = vcmp.eq.s32.totalorder %v16640_v7, 0  ;;  %s19642_s2 = smov 24  }
  0x1b   :  { %v15835_v31 = vpack.c.bf16 %v208_v30, %v207_v27  ;;  %v15838_v38 = vpack.c.bf16 %v202_v35, %v201_v34  ;;  %v203_v41 = vld [vmem:[%s19662_s28 + $0x10] sm:$0xff]  ;;  %v204_v42 = vld [vmem:[%s19662_s28 + $0x18] sm:$0xff]  ;;  %v462_v44 = vld [vmem:[%s19664_s26] sm:$0xff]  ;;  %19668 = vst [vmem:[#allocation8_spill] sm:$0xff] %v16650_v19 }
  0x1c   :  { %15833 = vmatpush3.bf16.msra.mxu0 %v15832_v29  ;;  %v15841_v43 = vpack.c.bf16 %v204_v42, %v203_v41  ;;  %v463_v45 = vld [vmem:[%s19664_s26 + $0x8] sm:$0xff]  ;;  %v464_v50 = vld [vmem:[%s19664_s26 + $0x10] sm:$0xff]  ;;  %v465_v51 = vld [vmem:[%s19664_s26 + $0x18] sm:$0xff]  ;;  %19667 = vst [vmem:[#allocation7_spill] sm:$0xff] %v16646_v14 }
  0x1d   :  { %15834 = vmatprep.subr.bf16.mxu0 %v19615_v28  ;;  %v15843_v47 = vpack.c.bf16 %v463_v45, %v462_v44  ;;  %v15847_v53 = vpack.c.bf16 %v465_v51, %v464_v50  ;;  %v14081_v12 = vld [vmem:[%s19666_s6] ss:$0 sm:$0xff]  ;;  %v720_v26 = vld [vmem:[%s19595_s10 + $0x10] sm:$0xff]  ;;  %v721_v27 = vld [vmem:[%s19595_s10 + $0x18] sm:$0xff] }
  0x1f   :  { %15844 = vmatprep.subr.bf16.mxu1 %v15843_v47 }
  0x20   :  { %15836 = vmatpush3.bf16.msra.mxu0 %v15835_v31  ;;  %15846 = vmatpush3.bf16.msra.mxu1 %v15843_v47 }
  0x21   :  { %15837 = vmatprep.subr.bf16.mxu0 %v19615_v28  ;;  %15848 = vmatprep.subr.bf16.mxu1 %v15847_v53 }
  0x24   :  { %15850 = vmatpush3.bf16.msra.mxu1 %v15847_v53 }
  0x25   :  { %15860 = vmatprep.subr.bf16.mxu1 %v15859_v58 }
  0xa7   :  { %v92_v32 = vpop.xlane.xlu0 %91 }
  0xa8   :  { %v93_v33 = vmax.f32 %v92_v32, 1.0 }
  0xaa   :  { %15979 = vrcp.f32 %v93_v33 }
  0xb4   :  { %v16595_v36 = vpop.eup %15979 }
  0xb5   :  { %19663 = vst [vmem:[#allocation5_spill] sm:$0xff] %v16595_v36 }
  0xec   :  { %v196_v37 = vpop.f32.mrb[0].mxu0 }
  0xed   :  { %v200_v39 = vmul.f32 %v16595_v36, %v196_v37  ;;  %v14885_v40 = vpop.f32.mrb[1].mxu0  ;;  %v15863_v37 = vpack.c.bf16 %v721_v27, %v720_v26 }
  0xef   :  { %14895 = vmatmul.mubr.msk.f32.vlgmr.msra.gmra.mrb[2].mxu0 %vm209_vm9, %v200_v39 }
  0xf0   :  { %15839 = vmatpush3.bf16.msra.mxu0 %v15838_v38  ;;  %14905 = vmatprep.mubr.msk.f32.mxu0 %vm16383_vm6, %v19617_v3 }
  0xf1   :  { %15840 = vmatprep.subr.bf16.mxu0 %v19615_v28 }
  0xf4   :  { %15842 = vmatpush3.bf16.msra.mxu0 %v15841_v43 }
  0xf5   :  { %15852 = vmatprep.subr.bf16.mxu0 %v15851_v49 }
  0xf7   :  { %14906 = vmatmul.mubr.msk.f32.vlgmr.msra.gmra.mrb[4].mxu0 %vm209_vm9, %v125_v24 }
  0xf8   :  { %15854 = vmatpush3.bf16.msra.mxu0 %v15851_v49  ;;  %v16773_v49 = vld [vmem:[%s19592_s7] ss:$0 sm:$0xff] }
  0xf9   :  { %15856 = vmatprep.subr.bf16.mxu0 %v15855_v55 }
  0xfc   :  { %15858 = vmatpush3.bf16.msra.mxu0 %v15855_v55 }
  0xfd   :  { %14968 = vmatprep.subr.mxu0 %v19617_v3 }
 0x1c2   :  { %v279_v59 = vpop.f32.mrb[2].mxu0 }
 0x1c3   :  { %v14896_v60 = vpop.f32.mrb[3].mxu0 }
 0x1ca   :  { %v351_v11 = vpop.f32.mrb[4].mxu0 }
 0x1cb   :  { %v352_v13 = vadd.f32 %v351_v11, %v279_v59  ;;  %v14907_v15 = vpop.f32.mrb[5].mxu0 }
 0x1cd   :  { %v362_v16 = vadd.f32 %v14081_v12, %v352_v13 }
 0x1cf   :  { %v365_v17 = vcombine.high %v362_v16, %v362_v16  ;;  %v372_v18 = vrot.slane %v362_v16, %v16646_v14 }
 0x1d1   :  { %v379_v20 = vrot.slane %v365_v17, %v16646_v14  ;;  %v380_v21 = vcombine.high %v372_v18, %v372_v18  ;;  %v388_v22 = vrot.slane %v372_v18, %v16646_v14 }
 0x1d3   :  { %v381_v23 = vcombine.high %v379_v20, %v379_v20  ;;  %v402_v24 = vrot.slane %v380_v21, %v16646_v14  ;;  %v410_v25 = vcombine.high %v388_v22, %v388_v22  ;;  %v395_v29 = vrot.slane %v379_v20, %v16646_v14  ;;  %v14100_v20 = vld [vmem:[%s19596_s11] ss:$0 sm:$0xff] }
 0x1d4   :  { %v417_v30 = vrot.slane %v388_v22, %v16650_v19 }
 0x1d5   :  { %v421_v31 = vrot.slane %v402_v24, %v16650_v19  ;;  %v425_v32 = vrot.slane %v410_v25, %v16650_v19  ;;  %v412_v33 = vcombine.high %v402_v24, %v402_v24  ;;  %v409_v35 = vrot.slane %v381_v23, %v16646_v14 }
 0x1d6   :  { %v16669_v34 = vsel %vm363_vm10, %v417_v30, %v16512_v0  ;;  %v433_v40 = vrot.slane %v395_v29, %v16650_v19  ;;  %v411_v41 = vcombine.high %v395_v29, %v395_v29 }
 0x1d7   :  { %19669 = vst [vmem:[#allocation9_spill] sm:$0xff] %v16669_v34  ;;  %14916 = vmatprep.mubr.msk.f32.mxu1 %vm209_vm9, %v16669_v34  ;;  %14936 = vmatprep.mubr.msk.f32.mxu0 %vm209_vm9, %v16669_v34  ;;  %v16679_v38 = vsel %vm363_vm10, %v421_v31, %v16517_v1  ;;  %v16684_v39 = vsel %vm363_vm10, %v425_v32, %v16522_v2 }
 0x1d8   :  { %19670 = vst [vmem:[#allocation10_spill] sm:$0xff] %v16679_v38  ;;  %19671 = vst [vmem:[#allocation11_spill] sm:$0xff] %v16684_v39  ;;  %v429_v0 = vrot.slane %v412_v33, %v16650_v19  ;;  %14917 = vmatmul.mubr.msk.f32.vlgmr.msra.gmra.mrb[0].mxu1 %vm209_vm9, %v16679_v38  ;;  %14937 = vmatmul.mubr.msk.f32.vlgmr.msra.gmra.mrb[6].mxu0 %vm209_vm9, %v16679_v38  ;;  %v437_v2 = vrot.slane %v409_v35, %v16650_v19 }
 0x1d9   :  { %14919 = vmatprep.mubr.msk.f32.mxu1 %vm209_vm9, %v16684_v39  ;;  %14939 = vmatprep.mubr.msk.f32.mxu0 %vm209_vm9, %v16684_v39  ;;  %v413_v42 = vcombine.high %v409_v35, %v409_v35  ;;  %v16709_v43 = vsel %vm363_vm10, %v433_v40, %v16533_v5  ;;  %v441_v44 = vrot.slane %v411_v41, %v16650_v19 }
 0x1da   :  { %15862 = vmatpush3.bf16.msra.mxu1 %v15859_v58  ;;  %v16699_v1 = vsel %vm363_vm10, %v429_v0, %v16528_v4  ;;  %19673 = vst [vmem:[#allocation13_spill] sm:$0xff] %v16709_v43  ;;  %v16719_v4 = vsel %vm363_vm10, %v437_v2, %v16538_v6 }
 0x1db   :  { %19672 = vst [vmem:[#allocation12_spill] sm:$0xff] %v16699_v1  ;;  %15864 = vmatprep.subr.bf16.mxu1 %v15863_v37  ;;  %19674 = vst [vmem:[#allocation14_spill] sm:$0xff] %v16719_v4  ;;  %v445_v45 = vrot.slane %v413_v42, %v16650_v19  ;;  %v16730_v5 = vsel %vm363_vm10, %v441_v44, %v16545_v9  ;;  %v16768_v9 = vld [vmem:[%s19594_s9] ss:$0 sm:$0xff] }
 0x1dc   :  { %14920 = vmatmul.mubr.msk.f32.gmra.mrb[2].mxu1 %vm209_vm9, %v16699_v1  ;;  %14940 = vmatmul.mubr.msk.f32.gmra.mrb[8].mxu0 %vm209_vm9, %v16699_v1  ;;  %19675 = vst [vmem:[#allocation15_spill] sm:$0xff] %v16730_v5 }
 0x1dd   :  { %14922 = vmatprep.mubr.msk.f32.mxu1 %vm209_vm9, %v16709_v43  ;;  %14942 = vmatprep.mubr.msk.f32.mxu0 %vm209_vm9, %v16709_v43  ;;  %v16739_v6 = vsel %vm363_vm10, %v445_v45, %v16550_v10 }
 0x1de   :  { %15866 = vmatpush3.bf16.msra.mxu1 %v15863_v37  ;;  %19676 = vst [vmem:[#allocation16_spill] sm:$0xff] %v16739_v6 }
 0x1df   :  { %14988 = vmatprep.subr.mxu1 %v19617_v3 }
 0x1e0   :  { %14923 = vmatmul.mubr.msk.f32.gmra.mrb[4].mxu1 %vm209_vm9, %v16719_v4  ;;  %14943 = vmatmul.mubr.msk.f32.gmra.mrb[10].mxu0 %vm209_vm9, %v16719_v4 }
 0x1e1   :  { %14925 = vmatprep.mubr.msk.f32.mxu1 %vm209_vm9, %v16730_v5  ;;  %14945 = vmatprep.mubr.msk.f32.mxu0 %vm209_vm9, %v16730_v5 }
 0x1e4   :  { %14926 = vmatmul.mubr.msk.f32.gmra.mrb[6].mxu1 %vm209_vm9, %v16739_v6  ;;  %14946 = vmatmul.mubr.msk.f32.gmra.mrb[12].mxu0 %vm209_vm9, %v16739_v6 }
 0x1e5   :  { %14956 = vmatprep.mubr.msk.f32.mxu1 %vm209_vm9, %v16669_v34  ;;  %14970 = vmatprep.mubr.msk.f32.mxu0 %vm16383_vm6, %v19617_v3 }
 0x1e8   :  { %14957 = vmatmul.mubr.msk.f32.vlgmr.msra.gmra.mrb[8].mxu1 %vm209_vm9, %v16679_v38 }
 0x1e9   :  { %14959 = vmatprep.mubr.msk.f32.mxu1 %vm209_vm9, %v16684_v39 }
 0x1ec   :  { %14960 = vmatmul.mubr.msk.f32.gmra.mrb[10].mxu1 %vm209_vm9, %v16699_v1 }
 0x1ed   :  { %14962 = vmatprep.mubr.msk.f32.mxu1 %vm209_vm9, %v16709_v43 }
 0x1f0   :  { %14963 = vmatmul.mubr.msk.f32.gmra.mrb[12].mxu1 %vm209_vm9, %v16719_v4 }
 0x1f1   :  { %14965 = vmatprep.mubr.msk.f32.mxu1 %vm209_vm9, %v16730_v5 }
 0x1f4   :  { %14966 = vmatmul.mubr.msk.f32.gmra.mrb[14].mxu1 %vm209_vm9, %v16739_v6 }
 0x1f5   :  { %14990 = vmatprep.mubr.msk.f32.mxu1 %vm16383_vm6, %v19617_v3 }
 0x2ab   :  { %v14918_v10 = vpop.f32.mrb[0].mxu1  ;;  %v14938_v46 = vpop.f32.mrb[6].mxu0 }
 0x2ac   :  { %v563_v47 = vpop.f32.mrb[1].mxu1  ;;  %v679_v48 = vpop.f32.mrb[7].mxu0  ;;  %v16785_v56 = vadd.f32 %v14938_v46, %v16768_v9  ;;  %v16794_v59 = vadd.f32 %v14918_v10, %v16773_v49  ;;  %v16905_v46 = vld [vmem:[%s19677_s27] ss:$0 sm:$0xff] }
 0x2ad   :  { %v16776_v50 = vadd.f32 %v16768_v9, %v679_v48  ;;  %v16781_v53 = vadd.f32 %v16773_v49, %v563_v47 }
 0x2af   :  { %v14921_v51 = vpop.f32.mrb[2].mxu1  ;;  %v14941_v52 = vpop.f32.mrb[8].mxu0  ;;  %14969 = vmatpush3.xpose.msk.msra.mxu0 %vm89_vm7, %v16776_v50 }
 0x2b0   :  { %v573_v54 = vpop.f32.mrb[3].mxu1  ;;  %v689_v55 = vpop.f32.mrb[9].mxu0  ;;  %14973 = vmatprep.subr.mxu0 %v19617_v3  ;;  %v16819_v17 = vadd.f32 %v14941_v52, %v16768_v9  ;;  %v16837_v22 = vadd.f32 %v14921_v51, %v16773_v49  ;;  %v16911_v52 = vld [vmem:[%s19677_s27 + $0x1] ss:$0 sm:$0xff] }
 0x2b1   :  { %v16798_v62 = vadd.f32 %v16768_v9, %v689_v55  ;;  %v16810_v12 = vadd.f32 %v16773_v49, %v573_v54 }
 0x2b2   :  { %14971 = vmatmul.mubr.msk.f32.vlgmr.msra.gmra.mrb[14].mxu0 %vm89_vm7, %v16781_v53 }
 0x2b3   :  { %v14924_v57 = vpop.f32.mrb[4].mxu1  ;;  %v14944_v58 = vpop.f32.mrb[10].mxu0  ;;  %14974 = vmatpush3.xpose.msk.msra.mxu0 %vm89_vm7, %v16785_v56  ;;  %14975 = vmatprep.mubr.msk.f32.mxu0 %vm16383_vm6, %v19617_v3 }
 0x2b4   :  { %v583_v60 = vpop.f32.mrb[5].mxu1  ;;  %v699_v61 = vpop.f32.mrb[11].mxu0  ;;  %14978 = vmatprep.subr.mxu0 %v19617_v3  ;;  %v16847_v25 = vadd.f32 %v14944_v58, %v16768_v9  ;;  %v16861_v29 = vadd.f32 %v14924_v57, %v16773_v49 }
 0x2b5   :  { %v16801_v63 = vadd.f32 %v16768_v9, %v699_v61  ;;  %v16813_v13 = vadd.f32 %v16773_v49, %v583_v60 }
 0x2b6   :  { %14976 = vmatmul.mubr.msk.f32.vlgmr.msra.gmra.mrb[16].mxu0 %vm89_vm7, %v16794_v59 }
 0x2b7   :  { %v14927_v8 = vpop.f32.mrb[6].mxu1  ;;  %v14947_v11 = vpop.f32.mrb[12].mxu0  ;;  %14979 = vmatpush3.xpose.msk.msra.mxu0 %vm89_vm7, %v16798_v62  ;;  %14989 = vmatpush3.xpose.msk.msra.mxu1 %vm89_vm7, %v16801_v63 }
 0x2b8   :  { %v593_v15 = vpop.f32.mrb[7].mxu1  ;;  %v709_v16 = vpop.f32.mrb[13].mxu0  ;;  %14980 = vmatprep.mubr.msk.f32.mxu0 %vm16383_vm6, %v19617_v3  ;;  %14983 = vmatprep.subr.mxu0 %v19617_v3  ;;  %v16869_v32 = vadd.f32 %v14947_v11, %v16768_v9  ;;  %v16883_v37 = vadd.f32 %v14927_v8, %v16773_v49  ;;  %v16918_v8 = vld [vmem:[%s19677_s27 + $0x2] ss:$0 sm:$0xff] }
 0x2b9   :  { %v16822_v18 = vadd.f32 %v16768_v9, %v709_v16  ;;  %14998 = vmatprep.subr.mxu1 %v19617_v3  ;;  %v16840_v23 = vadd.f32 %v16773_v49, %v593_v15 }
 0x2ba   :  { %14981 = vmatmul.mubr.msk.f32.vlgmr.msra.gmra.mrb[18].mxu0 %vm89_vm7, %v16810_v12  ;;  %14991 = vmatmul.mubr.msk.f32.vlgmr.msra.gmra.mrb[16].mxu1 %vm89_vm7, %v16813_v13 }
 0x2bb   :  { %v14958_v21 = vpop.f32.mrb[8].mxu1  ;;  %14984 = vmatpush3.xpose.msk.msra.mxu0 %vm89_vm7, %v16819_v17  ;;  %14999 = vmatpush3.xpose.msk.msra.mxu1 %vm89_vm7, %v16822_v18 }
 0x2bc   :  { %v795_v24 = vpop.f32.mrb[9].mxu1  ;;  %14985 = vmatprep.mubr.msk.f32.mxu0 %vm16383_vm6, %v19617_v3  ;;  %15000 = vmatprep.mubr.msk.f32.mxu1 %vm16383_vm6, %v19617_v3  ;;  %v16888_v41 = vadd.f32 %v14958_v21, %v14100_v20 }
 0x2bd   :  { %v16849_v26 = vadd.f32 %v14100_v20, %v795_v24  ;;  %14993 = vmatprep.subr.mxu0 %v19617_v3  ;;  %15008 = vmatprep.subr.mxu1 %v19617_v3 }
 0x2be   :  { %14986 = vmatmul.mubr.msk.f32.vlgmr.msra.gmra.mrb[20].mxu0 %vm89_vm7, %v16837_v22  ;;  %15001 = vmatmul.mubr.msk.f32.vlgmr.msra.gmra.mrb[18].mxu1 %vm89_vm7, %v16840_v23 }
 0x2bf   :  { %v14961_v27 = vpop.f32.mrb[10].mxu1  ;;  %14994 = vmatpush3.xpose.msk.msra.mxu0 %vm89_vm7, %v16847_v25  ;;  %15009 = vmatpush3.msra.mxu1 %v16849_v26 }
 0x2c0   :  { %v16863_v30 = vadd.f32 %v14961_v27, %v14100_v20  ;;  %v805_v31 = vpop.f32.mrb[11].mxu1  ;;  %14995 = vmatprep.mubr.msk.f32.mxu0 %vm16383_vm6, %v19617_v3  ;;  %15003 = vmatprep.subr.mxu0 %v19617_v3  ;;  %v16925_v27 = vld [vmem:[%s19677_s27 + $0x4] ss:$0 sm:$0xff] }
 0x2c1   :  { %v16871_v33 = vadd.f32 %v14100_v20, %v805_v31  ;;  %15010 = vmatprep.mubr.msk.f32.mxu1 %vm16383_vm6, %v19617_v3  ;;  %15018 = vmatprep.subr.mxu1 %v19617_v3 }
 0x2c2   :  { %14996 = vmatmul.mubr.msk.f32.vlgmr.msra.gmra.mrb[22].mxu0 %vm89_vm7, %v16861_v29 }
 0x2c3   :  { %v14964_v35 = vpop.f32.mrb[12].mxu1  ;;  %15004 = vmatpush3.xpose.msk.msra.mxu0 %vm89_vm7, %v16869_v32  ;;  %15005 = vmatprep.mubr.msk.f32.mxu0 %vm16383_vm6, %v19617_v3 }
 0x2c4   :  { %v16885_v0 = vadd.f32 %v14964_v35, %v14100_v20  ;;  %v815_v40 = vpop.f32.mrb[13].mxu1  ;;  %15013 = vmatprep.subr.mxu0 %v19617_v3 }
 0x2c5   :  { %v16890_v2 = vadd.f32 %v14100_v20, %v815_v40  ;;  %v16930_v40 = vld [vmem:[%s19677_s27 + $0x3] ss:$0 sm:$0xff] }
 0x2c6   :  { %15006 = vmatmul.mubr.msk.f32.vlgmr.msra.gmra.mrb[24].mxu0 %vm89_vm7, %v16883_v37 }
 0x2c7   :  { %v14967_v42 = vpop.f32.mrb[14].mxu1  ;;  %15014 = vmatpush3.msra.mxu0 %v16888_v41  ;;  %15015 = vmatprep.mubr.msk.f32.mxu0 %vm16383_vm6, %v19617_v3 }
 0x2c8   :  { %v16897_v44 = vadd.f32 %v14967_v42, %v14100_v20  ;;  %v825_v45 = vpop.f32.mrb[15].mxu1  ;;  %15023 = vmatprep.subr.mxu0 %v19617_v3 }
 0x2c9   :  { %v16900_v9 = vadd.f32 %v14100_v20, %v825_v45 }
 0x385   :  { %v906_v10 = vpop.f32.mrb[14].mxu0 }
 0x386   :  { %v1442_v47 = vmul.f32 0.35355338, %v906_v10  ;;  %v14972_v48 = vpop.f32.mrb[15].mxu0 }
 0x388   :  { %v1498_v49 = vadd.f32 %v16905_v46, %v1442_v47 }
 0x389   :  { %v982_v51 = vpop.f32.mrb[16].mxu0 }
 0x38a   :  { %v1443_v54 = vmul.f32 0.35355338, %v982_v51  ;;  %v14977_v55 = vpop.f32.mrb[17].mxu0  ;;  %v1506_v57 = vsel %vm89_vm7, %v1498_v49, -inf }
 0x38b   :  { %1507 = vmax.xlane.f32.xlu0 %v1506_v57  ;;  %v16938_v55 = vld [vmem:[%s19677_s27 + $0x6] ss:$0 sm:$0xff] }
 0x38c   :  { %v1499_v58 = vadd.f32 %v16911_v52, %v1443_v54 }
 0x38d   :  { %v1058_v60 = vpop.f32.mrb[18].mxu0  ;;  %v1210_v61 = vpop.f32.mrb[16].mxu1 }
 0x38e   :  { %v1444_v11 = vmul.f32 0.35355338, %v1058_v60  ;;  %v14982_v15 = vpop.f32.mrb[19].mxu0  ;;  %v14992_v16 = vpop.f32.mrb[17].mxu1  ;;  %v1446_v20 = vmul.f32 0.35355338, %v1210_v61 }
 0x38f   :  { %v1509_v21 = vsel %vm89_vm7, %v1499_v58, -inf  ;;  %v16943_v60 = vld [vmem:[%s19677_s27 + $0x5] ss:$0 sm:$0xff] }
 0x390   :  { %1510 = vmax.xlane.f32.xlu1 %v1509_v21  ;;  %v1500_v24 = vadd.f32 %v16918_v8, %v1444_v11  ;;  %v1502_v51 = vadd.f32 %v16925_v27, %v1446_v20 }
 0x391   :  { %v1134_v31 = vpop.f32.mrb[20].mxu0  ;;  %v1362_v35 = vpop.f32.mrb[18].mxu1 }
 0x392   :  { %v1445_v42 = vmul.f32 0.35355338, %v1134_v31  ;;  %v14987_v45 = vpop.f32.mrb[21].mxu0  ;;  %v15002_v10 = vpop.f32.mrb[19].mxu1  ;;  %v1448_v47 = vmul.f32 0.35355338, %v1362_v35 }
 0x393   :  { %v1512_v48 = vsel %vm89_vm7, %v1500_v24, -inf  ;;  %v1518_v16 = vsel %vm89_vm7, %v1502_v51, -inf  ;;  %v16952_v35 = vld [vmem:[%s19677_s27 + $0x7] ss:$0 sm:$0xff] }
 0x394   :  { %1513 = vmax.xlane.f32.xlu1 %v1512_v48  ;;  %v1501_v54 = vadd.f32 %v16930_v40, %v1445_v42  ;;  %v1504_v20 = vadd.f32 %v16938_v55, %v1448_v47 }
 0x395   :  { %v1286_v57 = vpop.f32.mrb[22].mxu0 }
 0x396   :  { %v1447_v61 = vmul.f32 0.35355338, %v1286_v57  ;;  %v14997_v11 = vpop.f32.mrb[23].mxu0  ;;  %v1515_v15 = vsel %vm89_vm7, %v1501_v54, -inf  ;;  %v1524_v48 = vsel %vm89_vm7, %v1504_v20, -inf }
 0x397   :  { %1516 = vmax.xlane.f32.xlu0 %v1515_v15 }
 0x398   :  { %1519 = vmax.xlane.f32.xlu1 %v1518_v16  ;;  %v1503_v21 = vadd.f32 %v16943_v60, %v1447_v61 }
 0x399   :  { %v1438_v31 = vpop.f32.mrb[24].mxu0 }
 0x39a   :  { %v1449_v42 = vmul.f32 0.35355338, %v1438_v31  ;;  %v15007_v45 = vpop.f32.mrb[25].mxu0  ;;  %v1521_v10 = vsel %vm89_vm7, %v1503_v21, -inf }
 0x39b   :  { %1522 = vmax.xlane.f32.xlu0 %v1521_v10 }
 0x39c   :  { %1525 = vmax.xlane.f32.xlu1 %v1524_v48  ;;  %v1505_v57 = vadd.f32 %v16952_v35, %v1449_v42 }
 0x39e   :  { %v1527_v47 = vsel %vm89_vm7, %v1505_v57, -inf }
 0x39f   :  { %1528 = vmax.xlane.f32.xlu0 %v1527_v47 }
 0x3ad   :  { %2180 = vrot.lane.b32.xlu1 %v16776_v50, %s16386_s5 }
 0x3b1   :  { %2178 = vrot.lane.b32.xlu1 %v16781_v53, %s16386_s5 }
 0x3b5   :  { %2256 = vrot.lane.b32.xlu1 %v16794_v59, %s16386_s5  ;;  %2258 = vrot.lane.b32.xlu0 %v16785_v56, %s16386_s5 }
 0x3b9   :  { %2336 = vrot.lane.b32.xlu1 %v16798_v62, %s16386_s5  ;;  %2414 = vrot.lane.b32.xlu0 %v16819_v17, %s16386_s5 }
 0x3bd   :  { %2334 = vrot.lane.b32.xlu1 %v16810_v12, %s16386_s5 }
 0x418   :  { %v1508_v61 = vpop.xlane.xlu0 %1507 }
 0x419   :  { %v1530_v11 = vsub.f32 %v1498_v49, %v1508_v61 }
 0x41b   :  { %v1538_v15 = vmul.f32 1.442695, %v1530_v11 }
 0x41d   :  { %15981 = vpow2.f32 %v1538_v15  ;;  %v1511_v16 = vpop.xlane.xlu1 %1510 }
 0x41e   :  { %v1531_v31 = vsub.f32 %v1499_v58, %v1511_v16 }
 0x420   :  { %v1540_v42 = vmul.f32 1.442695, %v1531_v31 }
 0x421   :  { %v1514_v45 = vpop.xlane.xlu1 %1513 }
 0x422   :  { %15983 = vpow2.f32 %v1540_v42  ;;  %v1532_v10 = vsub.f32 %v1500_v24, %v1514_v45 }
 0x424   :  { %v1542_v48 = vmul.f32 1.442695, %v1532_v10  ;;  %v1517_v47 = vpop.xlane.xlu0 %1516 }
 0x425   :  { %v1520_v28 = vpop.xlane.xlu1 %1519  ;;  %v1533_v3 = vsub.f32 %v1501_v54, %v1517_v47 }
 0x426   :  { %15985 = vpow2.f32 %v1542_v48  ;;  %v1534_v7 = vsub.f32 %v1502_v51, %v1520_v28 }
 0x427   :  { %v16972_v19 = vpop.eup %15981  ;;  %v1544_v14 = vmul.f32 1.442695, %v1533_v3 }
 0x428   :  { %v1546_v36 = vmul.f32 1.442695, %v1534_v7  ;;  %v1523_v6 = vpop.xlane.xlu0 %1522  ;;  %v1554_v49 = vsel %vm89_vm7, %v16972_v19, 0.0 }
 0x429   :  { %15987 = vpow2.f32 %v1544_v14  ;;  %v1526_v58 = vpop.xlane.xlu1 %1525  ;;  %v1535_v61 = vsub.f32 %v1503_v21, %v1523_v6  ;;  %1555 = vadd.xlane.f32.xlu1 %v1554_v49 }
 0x42a   :  { %15989 = vpow2.f32 %v1546_v36  ;;  %v1536_v24 = vsub.f32 %v1504_v20, %v1526_v58 }
 0x42b   :  { %v1548_v11 = vmul.f32 1.442695, %v1535_v61 }
 0x42c   :  { %v16976_v15 = vpop.eup %15983  ;;  %v1550_v54 = vmul.f32 1.442695, %v1536_v24  ;;  %v1529_v16 = vpop.xlane.xlu0 %1528 }
 0x42d   :  { %15991 = vpow2.f32 %v1548_v11  ;;  %v1537_v28 = vsub.f32 %v1505_v57, %v1529_v16  ;;  %v1557_v3 = vsel %vm89_vm7, %v16976_v15, 0.0  ;;  %v17022_v47 = vpop.permute.xlu1 %2180 }
 0x42e   :  { %15993 = vpow2.f32 %v1550_v54  ;;  %1558 = vadd.xlane.f32.xlu0 %v1557_v3 }
 0x42f   :  { %v1552_v7 = vmul.f32 1.442695, %v1537_v28 }
 0x430   :  { %v16980_v51 = vpop.eup %15985  ;;  %v17030_v24 = vpop.permute.xlu0 %2258 }
 0x431   :  { %15995 = vpow2.f32 %v1552_v7  ;;  %v1560_v36 = vsel %vm89_vm7, %v16980_v51, 0.0  ;;  %v17024_v49 = vpop.permute.xlu1 %2178 }
 0x432   :  { %1561 = vadd.xlane.f32.xlu1 %v1560_v36 }
 0x433   :  { %v16984_v14 = vpop.eup %15987 }
 0x434   :  { %v16986_v6 = vpop.eup %15989  ;;  %v1563_v20 = vsel %vm89_vm7, %v16984_v14, 0.0  ;;  %v17034_v16 = vpop.permute.xlu0 %2414 }
 0x435   :  { %v1566_v21 = vsel %vm89_vm7, %v16986_v6, 0.0  ;;  %1564 = vadd.xlane.f32.xlu0 %v1563_v20  ;;  %v17026_v58 = vpop.permute.xlu1 %2256 }
 0x436   :  { %1567 = vadd.xlane.f32.xlu1 %v1566_v21 }
 0x437   :  { %v16992_v57 = vpop.eup %15991 }
 0x438   :  { %v16994_v31 = vpop.eup %15993  ;;  %v1569_v42 = vsel %vm89_vm7, %v16992_v57, 0.0 }
 0x439   :  { %v1572_v45 = vsel %vm89_vm7, %v16994_v31, 0.0  ;;  %1570 = vadd.xlane.f32.xlu0 %v1569_v42  ;;  %v17028_v61 = vpop.permute.xlu1 %2336  ;;  %v19678_v42 = vmov 0.0  }
 0x43a   :  { %1573 = vadd.xlane.f32.xlu1 %v1572_v45 }
 0x43b   :  { %v17000_v10 = vpop.eup %15995 }
 0x43c   :  { %v1575_v48 = vsel %vm89_vm7, %v17000_v10, 0.0 }
 0x43d   :  { %1576 = vadd.xlane.f32.xlu0 %v1575_v48  ;;  %v17032_v11 = vpop.permute.xlu1 %2334 }
 0x44b   :  { %2492 = vrot.lane.b32.xlu1 %v16801_v63, %s16386_s5 }
 0x44f   :  { %2490 = vrot.lane.b32.xlu1 %v16813_v13, %s16386_s5 }
 0x453   :  { %2648 = vrot.lane.b32.xlu1 %v16822_v18, %s16386_s5  ;;  %2412 = vrot.lane.b32.xlu0 %v16837_v22, %s16386_s5 }
 0x457   :  { %2646 = vrot.lane.b32.xlu1 %v16840_v23, %s16386_s5  ;;  %2570 = vrot.lane.b32.xlu0 %v16847_v25, %s16386_s5 }
 0x45b   :  { %2568 = vrot.lane.b32.xlu0 %v16861_v29, %s16386_s5 }
 0x45f   :  { %2726 = vrot.lane.b32.xlu0 %v16869_v32, %s16386_s5 }
 0x463   :  { %2724 = vrot.lane.b32.xlu0 %v16883_v37, %s16386_s5 }
 0x4b6   :  { %v1556_v54 = vpop.xlane.xlu1 %1555 }
 0x4b7   :  { %15997 = vrcp.f32 %v1556_v54 }
 0x4bb   :  { %v1559_v28 = vpop.xlane.xlu0 %1558 }
 0x4bc   :  { %15999 = vrcp.f32 %v1559_v28 }
 0x4bf   :  { %v1562_v3 = vpop.xlane.xlu1 %1561 }
 0x4c0   :  { %16001 = vrcp.f32 %v1562_v3 }
 0x4c1   :  { %v15998_v7 = vpop.eup %15997 }
 0x4c2   :  { %v1565_v36 = vpop.xlane.xlu0 %1564  ;;  %v1586_v20 = vmul.f32 %v15998_v7, %v16972_v19 }
 0x4c3   :  { %v1568_v21 = vpop.xlane.xlu1 %1567  ;;  %16003 = vrcp.f32 %v1565_v36 }
 0x4c4   :  { %16005 = vrcp.f32 %v1568_v21  ;;  %15011 = vmatmul.mubr.msk.f32.vlgmr.msra.gmra.mrb[20].mxu1 %vm89_vm7, %v1586_v20 }
 0x4c5   :  { %15019 = vmatpush3.msra.mxu1 %v16871_v33  ;;  %15020 = vmatprep.mubr.msk.f32.mxu1 %vm16383_vm6, %v19678_v42 }
 0x4c6   :  { %v16000_v45 = vpop.eup %15999  ;;  %v1571_v48 = vpop.xlane.xlu0 %1570  ;;  %15028 = vmatprep.subr.mxu1 %v19678_v42 }
 0x4c7   :  { %v1574_v54 = vpop.xlane.xlu1 %1573  ;;  %16007 = vrcp.f32 %v1571_v48  ;;  %v1587_v28 = vmul.f32 %v16000_v45, %v16976_v15 }
 0x4c8   :  { %16009 = vrcp.f32 %v1574_v54 }
 0x4c9   :  { %15016 = vmatmul.mubr.msk.f32.vlgmr.msra.gmra.mrb[26].mxu0 %vm89_vm7, %v1587_v28 }
 0x4ca   :  { %v16002_v19 = vpop.eup %16001  ;;  %15024 = vmatpush3.msra.mxu0 %v16863_v30  ;;  %v1577_v3 = vpop.xlane.xlu0 %1576  ;;  %15025 = vmatprep.mubr.msk.f32.mxu0 %vm16383_vm6, %v19678_v42 }
 0x4cb   :  { %16011 = vrcp.f32 %v1577_v3  ;;  %v1588_v7 = vmul.f32 %v16002_v19, %v16980_v51  ;;  %15033 = vmatprep.subr.mxu0 %v19678_v42  ;;  %v2493_v28 = vpop.permute.xlu1 %2492 }
 0x4cd   :  { %v16004_v36 = vpop.eup %16003  ;;  %15021 = vmatmul.mubr.msk.f32.vlgmr.msra.gmra.mrb[22].mxu1 %vm89_vm7, %v1588_v7 }
 0x4ce   :  { %v16006_v20 = vpop.eup %16005  ;;  %15029 = vmatpush3.msra.mxu1 %v16890_v2  ;;  %15030 = vmatprep.mubr.msk.f32.mxu1 %vm16383_vm6, %v19678_v42  ;;  %v1589_v15 = vmul.f32 %v16004_v36, %v16984_v14  ;;  %v2413_v48 = vpop.permute.xlu0 %2412 }
 0x4cf   :  { %15038 = vmatprep.subr.mxu1 %v19678_v42  ;;  %v1590_v21 = vmul.f32 %v16006_v20, %v16986_v6  ;;  %v2491_v19 = vpop.permute.xlu1 %2490 }
 0x4d0   :  { %15026 = vmatmul.mubr.msk.f32.vlgmr.msra.gmra.mrb[28].mxu0 %vm89_vm7, %v1589_v15 }
 0x4d1   :  { %v16008_v51 = vpop.eup %16007  ;;  %15031 = vmatmul.mubr.msk.f32.vlgmr.msra.gmra.mrb[24].mxu1 %vm89_vm7, %v1590_v21  ;;  %15034 = vmatpush3.msra.mxu0 %v16885_v0 }
 0x4d2   :  { %v16010_v45 = vpop.eup %16009  ;;  %15039 = vmatpush3.msra.mxu1 %v16900_v9  ;;  %15035 = vmatprep.mubr.msk.f32.mxu0 %vm16383_vm6, %v19678_v42  ;;  %v1591_v14 = vmul.f32 %v16008_v51, %v16992_v57 }
 0x4d3   :  { %15040 = vmatprep.mubr.msk.f32.mxu1 %vm16383_vm6, %v19678_v42  ;;  %15043 = vmatprep.subr.mxu0 %v19678_v42  ;;  %v1592_v6 = vmul.f32 %v16010_v45, %v16994_v31  ;;  %v2571_v31 = vpop.permute.xlu0 %2570 }
 0x4d4   :  { %15036 = vmatmul.mubr.msk.f32.vlgmr.msra.gmra.mrb[30].mxu0 %vm89_vm7, %v1591_v14  ;;  %15048 = vmatprep.subr.mxu1 %v19678_v42 }
 0x4d5   :  { %v16012_v54 = vpop.eup %16011  ;;  %15041 = vmatmul.mubr.msk.f32.vlgmr.msra.gmra.mrb[26].mxu1 %vm89_vm7, %v1592_v6  ;;  %15044 = vmatpush3.msra.mxu0 %v16897_v44 }
 0x4d6   :  { %15045 = vmatprep.mubr.msk.f32.mxu0 %vm16383_vm6, %v19678_v42  ;;  %v1593_v57 = vmul.f32 %v16012_v54, %v17000_v10  ;;  %15050 = vmatprep.mubr.msk.f32.mxu1 %vm16383_vm6, %v19678_v42 }
 0x4d7   :  { %15053 = vmatprep.subr.mxu0 %v19678_v42  ;;  %v2569_v10 = vpop.permute.xlu0 %2568 }
 0x4d8   :  { %15046 = vmatmul.mubr.msk.f32.vlgmr.msra.gmra.mrb[32].mxu0 %vm89_vm7, %v1593_v57 }
 0x4d9   :  { %15049 = vmatpush3.xpose.msk.msra.mxu1 %vm89_vm7, %v17022_v47  ;;  %15055 = vmatprep.mubr.msk.f32.mxu0 %vm16383_vm6, %v19678_v42  ;;  %v2649_v47 = vpop.permute.xlu1 %2648 }
 0x4da   :  { %15058 = vmatprep.subr.mxu1 %v19678_v42 }
 0x4dc   :  { %15051 = vmatmul.mubr.msk.f32.vlgmr.msra.gmra.mrb[28].mxu1 %vm89_vm7, %v17024_v49  ;;  %15054 = vmatpush3.xpose.msk.msra.mxu0 %vm89_vm7, %v17030_v24  ;;  %v2727_v49 = vpop.permute.xlu0 %2726 }
 0x4dd   :  { %15059 = vmatpush3.xpose.msk.msra.mxu1 %vm89_vm7, %v17028_v61  ;;  %15060 = vmatprep.mubr.msk.f32.mxu1 %vm16383_vm6, %v19678_v42 }
 0x4de   :  { %15063 = vmatprep.subr.mxu0 %v19678_v42  ;;  %15068 = vmatprep.subr.mxu1 %v19678_v42 }
 0x4df   :  { %15056 = vmatmul.mubr.msk.f32.vlgmr.msra.gmra.mrb[34].mxu0 %vm89_vm7, %v17026_v58  ;;  %v2647_v58 = vpop.permute.xlu1 %2646 }
 0x4e0   :  { %15061 = vmatmul.mubr.msk.f32.vlgmr.msra.gmra.mrb[30].mxu1 %vm89_vm7, %v17032_v11  ;;  %15064 = vmatpush3.xpose.msk.msra.mxu0 %vm89_vm7, %v17034_v16  ;;  %v2725_v61 = vpop.permute.xlu0 %2724 }
 0x4e1   :  { %15069 = vmatpush3.xpose.msk.msra.mxu1 %vm89_vm7, %v2493_v28  ;;  %15065 = vmatprep.mubr.msk.f32.mxu0 %vm16383_vm6, %v19678_v42 }
 0x4e2   :  { %15070 = vmatprep.mubr.msk.f32.mxu1 %vm16383_vm6, %v19678_v42  ;;  %15073 = vmatprep.subr.mxu0 %v19678_v42 }
 0x4e3   :  { %15066 = vmatmul.mubr.msk.f32.vlgmr.msra.gmra.mrb[36].mxu0 %vm89_vm7, %v2413_v48  ;;  %15078 = vmatprep.subr.mxu1 %v19678_v42 }
 0x4e4   :  { %15071 = vmatmul.mubr.msk.f32.vlgmr.msra.gmra.mrb[32].mxu1 %vm89_vm7, %v2491_v19  ;;  %15074 = vmatpush3.xpose.msk.msra.mxu0 %vm89_vm7, %v2571_v31 }
 0x4e5   :  { %15079 = vmatpush3.xpose.msk.msra.mxu1 %vm89_vm7, %v2649_v47  ;;  %15075 = vmatprep.mubr.msk.f32.mxu0 %vm16383_vm6, %v19678_v42 }
 0x4e6   :  { %15080 = vmatprep.mubr.msk.f32.mxu1 %vm16383_vm6, %v19678_v42  ;;  %15083 = vmatprep.subr.mxu0 %v19678_v42 }
 0x4e7   :  { %15076 = vmatmul.mubr.msk.f32.vlgmr.msra.gmra.mrb[38].mxu0 %vm89_vm7, %v2569_v10  ;;  %15088 = vmatprep.subr.mxu1 %v19678_v42 }
 0x4e8   :  { %15081 = vmatmul.mubr.msk.f32.vlgmr.msra.gmra.mrb[34].mxu1 %vm89_vm7, %v2647_v58  ;;  %15084 = vmatpush3.xpose.msk.msra.mxu0 %vm89_vm7, %v2727_v49 }
 0x4e9   :  { %15085 = vmatprep.mubr.msk.f32.mxu0 %vm16383_vm6, %v19678_v42  ;;  %15093 = vmatprep.subr.mxu0 %v19678_v42 }
 0x4ea   :  { %15090 = vmatprep.mubr.msk.f32.mxu1 %vm16383_vm6, %v19678_v42 }
 0x4eb   :  { %15086 = vmatmul.mubr.msk.f32.vlgmr.msra.gmra.mrb[40].mxu0 %vm89_vm7, %v2725_v61 }
 0x4ec   :  { %15095 = vmatprep.mubr.msk.f32.mxu0 %vm16383_vm6, %v19678_v42 }
 0x597   :  { %v17127_v24 = vpop.f32.mrb[20].mxu1 }
 0x598   :  { %19679 = vst [vmem:[#allocation17_spill] sm:$0xff] %v17127_v24  ;;  %v15012_v11 = vpop.f32.mrb[21].mxu1 }
 0x59c   :  { %v17129_v16 = vpop.f32.mrb[26].mxu0 }
 0x59d   :  { %19680 = vst [vmem:[#allocation18_spill] sm:$0xff] %v17129_v16  ;;  %v15017_v3 = vpop.f32.mrb[27].mxu0 }
 0x5a0   :  { %v17131_v7 = vpop.f32.mrb[22].mxu1 }
 0x5a1   :  { %19681 = vst [vmem:[#allocation19_spill] sm:$0xff] %v17131_v7  ;;  %v15022_v36 = vpop.f32.mrb[23].mxu1 }
 0x5a3   :  { %v17133_v20 = vpop.f32.mrb[28].mxu0 }
 0x5a4   :  { %19682 = vst [vmem:[#allocation20_spill] sm:$0xff] %v17133_v20  ;;  %v17135_v15 = vpop.f32.mrb[24].mxu1  ;;  %v15027_v21 = vpop.f32.mrb[29].mxu0 }
 0x5a5   :  { %19683 = vst [vmem:[#allocation21_spill] sm:$0xff] %v17135_v15  ;;  %v15032_v51 = vpop.f32.mrb[25].mxu1 }
 0x5a7   :  { %v17137_v45 = vpop.f32.mrb[30].mxu0 }
 0x5a8   :  { %19684 = vst [vmem:[#allocation22_spill] sm:$0xff] %v17137_v45  ;;  %v17139_v48 = vpop.f32.mrb[26].mxu1  ;;  %v15037_v14 = vpop.f32.mrb[31].mxu0 }
 0x5a9   :  { %19685 = vst [vmem:[#allocation23_spill] sm:$0xff] %v17139_v48  ;;  %v15042_v6 = vpop.f32.mrb[27].mxu1 }
 0x5ab   :  { %v17141_v54 = vpop.f32.mrb[32].mxu0 }
 0x5ac   :  { %19686 = vst [vmem:[#allocation24_spill] sm:$0xff] %v17141_v54  ;;  %v15047_v28 = vpop.f32.mrb[33].mxu0 }
 0x5af   :  { %v2252_v57 = vpop.f32.mrb[28].mxu1 }
 0x5b0   :  { %v2802_v31 = vmul.f32 0.35355338, %v2252_v57  ;;  %v15052_v19 = vpop.f32.mrb[29].mxu1 }
 0x5b2   :  { %v2330_v10 = vpop.f32.mrb[34].mxu0  ;;  %v2810_v47 = vadd.f32 %v16905_v46, %v2802_v31 }
 0x5b3   :  { %v2803_v49 = vmul.f32 0.35355338, %v2330_v10  ;;  %v2408_v58 = vpop.f32.mrb[30].mxu1  ;;  %v15057_v61 = vpop.f32.mrb[35].mxu0 }
 0x5b4   :  { %v2804_v11 = vmul.f32 0.35355338, %v2408_v58  ;;  %v15062_v3 = vpop.f32.mrb[31].mxu1  ;;  %v2818_v36 = vsel %vm89_vm7, %v2810_v47, -inf }
 0x5b5   :  { %2819 = vmax.xlane.f32.xlu1 %v2818_v36  ;;  %v2811_v21 = vadd.f32 %v16911_v52, %v2803_v49 }
 0x5b6   :  { %v2486_v51 = vpop.f32.mrb[36].mxu0  ;;  %v2812_v19 = vadd.f32 %v16918_v8, %v2804_v11 }
 0x5b7   :  { %v2805_v14 = vmul.f32 0.35355338, %v2486_v51  ;;  %v2564_v6 = vpop.f32.mrb[32].mxu1  ;;  %v15067_v28 = vpop.f32.mrb[37].mxu0  ;;  %v2821_v57 = vsel %vm89_vm7, %v2811_v21, -inf }
 0x5b8   :  { %v2806_v5 = vmul.f32 0.35355338, %v2564_v6  ;;  %v15072_v46 = vpop.f32.mrb[33].mxu1  ;;  %2822 = vmax.xlane.f32.xlu0 %v2821_v57  ;;  %v2824_v36 = vsel %vm89_vm7, %v2812_v19, -inf }
 0x5b9   :  { %v2813_v52 = vadd.f32 %v16930_v40, %v2805_v14 }
 0x5ba   :  { %v2642_v31 = vpop.f32.mrb[38].mxu0  ;;  %v2814_v10 = vadd.f32 %v16925_v27, %v2806_v5 }
 0x5bb   :  { %v2807_v58 = vmul.f32 0.35355338, %v2642_v31  ;;  %v2720_v61 = vpop.f32.mrb[34].mxu1  ;;  %v15077_v3 = vpop.f32.mrb[39].mxu0  ;;  %v2827_v5 = vsel %vm89_vm7, %v2813_v52, -inf }
 0x5bc   :  { %v2808_v49 = vmul.f32 0.35355338, %v2720_v61  ;;  %v15082_v51 = vpop.f32.mrb[35].mxu1  ;;  %v2830_v28 = vsel %vm89_vm7, %v2814_v10, -inf  ;;  %2825 = vmax.xlane.f32.xlu0 %v2824_v36 }
 0x5bd   :  { %2831 = vmax.xlane.f32.xlu1 %v2830_v28  ;;  %v2815_v27 = vadd.f32 %v16943_v60, %v2807_v58 }
 0x5be   :  { %v2798_v8 = vpop.f32.mrb[40].mxu0  ;;  %v2816_v11 = vadd.f32 %v16938_v55, %v2808_v49 }
 0x5bf   :  { %v2809_v6 = vmul.f32 0.35355338, %v2798_v8  ;;  %v15087_v57 = vpop.f32.mrb[41].mxu0  ;;  %v2833_v40 = vsel %vm89_vm7, %v2815_v27, -inf }
 0x5c0   :  { %v2836_v46 = vsel %vm89_vm7, %v2816_v11, -inf  ;;  %2828 = vmax.xlane.f32.xlu0 %v2827_v5 }
 0x5c1   :  { %2837 = vmax.xlane.f32.xlu1 %v2836_v46  ;;  %v2817_v14 = vadd.f32 %v16952_v35, %v2809_v6 }
 0x5c3   :  { %v2839_v31 = vsel %vm89_vm7, %v2817_v14, -inf }
 0x5c4   :  { %2834 = vmax.xlane.f32.xlu0 %v2833_v40 }
 0x5c8   :  { %2840 = vmax.xlane.f32.xlu0 %v2839_v31 }
 0x5d2   :  { %2907 = vrot.lane.b32.xlu1 %v16849_v26, %s16386_s5 }
 0x5d6   :  { %3061 = vrot.lane.b32.xlu1 %v16871_v33, %s16386_s5 }
 0x5da   :  { %3138 = vrot.lane.b32.xlu1 %v16863_v30, %s16386_s5 }
 0x5de   :  { %3215 = vrot.lane.b32.xlu1 %v16890_v2, %s16386_s5  ;;  %2984 = vrot.lane.b32.xlu0 %v16888_v41, %s16386_s5 }
 0x5e2   :  { %3369 = vrot.lane.b32.xlu1 %v16900_v9, %s16386_s5  ;;  %3292 = vrot.lane.b32.xlu0 %v16885_v0, %s16386_s5 }
 0x5e6   :  { %3524 = vrot.lane.b32.xlu1 %v16776_v50, %s19640_s24  ;;  %3446 = vrot.lane.b32.xlu0 %v16897_v44, %s16386_s5 }
 0x5ea   :  { %3522 = vrot.lane.b32.xlu1 %v16781_v53, %s19640_s24  ;;  %3602 = vrot.lane.b32.xlu0 %v16785_v56, %s19640_s24 }
 0x5ee   :  { %3680 = vrot.lane.b32.xlu1 %v16798_v62, %s19640_s24  ;;  %3600 = vrot.lane.b32.xlu0 %v16794_v59, %s19640_s24 }
 0x5f2   :  { %3678 = vrot.lane.b32.xlu1 %v16810_v12, %s19640_s24  ;;  %3758 = vrot.lane.b32.xlu0 %v16819_v17, %s19640_s24 }
 0x642   :  { %v2820_v55 = vpop.xlane.xlu1 %2819 }
 0x643   :  { %v2842_v60 = vsub.f32 %v2810_v47, %v2820_v55 }
 0x645   :  { %v2850_v35 = vmul.f32 1.442695, %v2842_v60  ;;  %v2823_v58 = vpop.xlane.xlu0 %2822 }
 0x646   :  { %v2843_v61 = vsub.f32 %v2811_v21, %v2823_v58 }
 0x647   :  { %16013 = vpow2.f32 %v2850_v35 }
 0x648   :  { %v2852_v3 = vmul.f32 1.442695, %v2843_v61 }
 0x649   :  { %v2826_v36 = vpop.xlane.xlu0 %2825 }
 0x64a   :  { %16015 = vpow2.f32 %v2852_v3  ;;  %v2832_v49 = vpop.xlane.xlu1 %2831  ;;  %v2844_v51 = vsub.f32 %v2812_v19, %v2826_v36 }
 0x64b   :  { %v2846_v28 = vsub.f32 %v2814_v10, %v2832_v49 }
 0x64c   :  { %v2854_v8 = vmul.f32 1.442695, %v2844_v51 }
 0x64d   :  { %v2858_v6 = vmul.f32 1.442695, %v2846_v28  ;;  %v2829_v57 = vpop.xlane.xlu0 %2828 }
 0x64e   :  { %16017 = vpow2.f32 %v2854_v8  ;;  %v2838_v5 = vpop.xlane.xlu1 %2837  ;;  %v2845_v46 = vsub.f32 %v2813_v52, %v2829_v57 }
 0x64f   :  { %v2848_v40 = vsub.f32 %v2816_v11, %v2838_v5  ;;  %16019 = vpow2.f32 %v2858_v6 }
 0x650   :  { %v2856_v31 = vmul.f32 1.442695, %v2845_v46 }
 0x651   :  { %v17189_v47 = vpop.eup %16013  ;;  %v2862_v55 = vmul.f32 1.442695, %v2848_v40  ;;  %v2835_v21 = vpop.xlane.xlu0 %2834 }
 0x652   :  { %16021 = vpow2.f32 %v2856_v31  ;;  %v2908_v60 = vpop.permute.xlu1 %2907  ;;  %v2847_v35 = vsub.f32 %v2815_v27, %v2835_v21  ;;  %v2866_v19 = vsel %vm89_vm7, %v17189_v47, 0.0 }
 0x653   :  { %2867 = vadd.xlane.f32.xlu1 %v2866_v19  ;;  %15089 = vmatpush3.msra.mxu1 %v2908_v60  ;;  %16023 = vpow2.f32 %v2862_v55 }
 0x654   :  { %v17193_v10 = vpop.eup %16015  ;;  %v2860_v58 = vmul.f32 1.442695, %v2847_v35  ;;  %15098 = vmatprep.subr.mxu1 %v19678_v42 }
 0x655   :  { %v2841_v52 = vpop.xlane.xlu0 %2840  ;;  %v2869_v11 = vsel %vm89_vm7, %v17193_v10, 0.0 }
 0x656   :  { %16025 = vpow2.f32 %v2860_v58  ;;  %v2849_v61 = vsub.f32 %v2817_v14, %v2841_v52  ;;  %2870 = vadd.xlane.f32.xlu0 %v2869_v11  ;;  %v3062_v55 = vpop.permute.xlu1 %3061 }
 0x658   :  { %v17198_v3 = vpop.eup %16017  ;;  %v2864_v27 = vmul.f32 1.442695, %v2849_v61 }
 0x659   :  { %v2985_v36 = vpop.permute.xlu0 %2984  ;;  %v2872_v49 = vsel %vm89_vm7, %v17198_v3, 0.0  ;;  %v17202_v51 = vpop.eup %16019 }
 0x65a   :  { %16027 = vpow2.f32 %v2864_v27  ;;  %2873 = vadd.xlane.f32.xlu1 %v2872_v49  ;;  %15094 = vmatpush3.msra.mxu0 %v2985_v36  ;;  %v2878_v14 = vsel %vm89_vm7, %v17202_v51, 0.0  ;;  %v3139_v21 = vpop.permute.xlu1 %3138 }
 0x65b   :  { %15103 = vmatprep.subr.mxu0 %v19678_v42 }
 0x65c   :  { %v17205_v28 = vpop.eup %16021 }
 0x65d   :  { %v2875_v8 = vsel %vm89_vm7, %v17205_v28, 0.0  ;;  %v17211_v6 = vpop.eup %16023 }
 0x65e   :  { %2879 = vadd.xlane.f32.xlu1 %v2878_v14  ;;  %2876 = vadd.xlane.f32.xlu0 %v2875_v8  ;;  %v2884_v5 = vsel %vm89_vm7, %v17211_v6, 0.0  ;;  %v3216_v60 = vpop.permute.xlu1 %3215 }
 0x660   :  { %v17213_v57 = vpop.eup %16025 }
 0x661   :  { %v2881_v46 = vsel %vm89_vm7, %v17213_v57, 0.0 }
 0x662   :  { %2885 = vadd.xlane.f32.xlu1 %v2884_v5  ;;  %2882 = vadd.xlane.f32.xlu0 %v2881_v46  ;;  %v3370_v35 = vpop.permute.xlu1 %3369 }
 0x664   :  { %v17219_v40 = vpop.eup %16027 }
 0x665   :  { %v2887_v31 = vsel %vm89_vm7, %v17219_v40, 0.0 }
 0x666   :  { %2888 = vadd.xlane.f32.xlu0 %v2887_v31  ;;  %v17267_v19 = vpop.permute.xlu1 %3524 }
 0x66a   :  { %v17271_v52 = vpop.permute.xlu1 %3522 }
 0x673   :  { %3836 = vrot.lane.b32.xlu1 %v16801_v63, %s19640_s24 }
 0x677   :  { %3834 = vrot.lane.b32.xlu1 %v16813_v13, %s19640_s24 }
 0x67b   :  { %3992 = vrot.lane.b32.xlu1 %v16822_v18, %s19640_s24 }
 0x67c   :  { %3756 = vrot.lane.b32.xlu0 %v16837_v22, %s19640_s24 }
 0x67f   :  { %3990 = vrot.lane.b32.xlu1 %v16840_v23, %s19640_s24 }
 0x680   :  { %3914 = vrot.lane.b32.xlu0 %v16847_v25, %s19640_s24 }
 0x683   :  { %4250 = vrot.lane.b32.xlu1 %v16849_v26, %s19640_s24 }
 0x684   :  { %3912 = vrot.lane.b32.xlu0 %v16861_v29, %s19640_s24 }
 0x687   :  { %4402 = vrot.lane.b32.xlu1 %v16871_v33, %s19640_s24 }
 0x688   :  { %4070 = vrot.lane.b32.xlu0 %v16869_v32, %s19640_s24 }
 0x68b   :  { %4478 = vrot.lane.b32.xlu1 %v16863_v30, %s19640_s24 }
 0x68c   :  { %4068 = vrot.lane.b32.xlu0 %v16883_v37, %s19640_s24 }
 0x68f   :  { %4554 = vrot.lane.b32.xlu1 %v16890_v2, %s19640_s24 }
 0x690   :  { %4326 = vrot.lane.b32.xlu0 %v16888_v41, %s19640_s24 }
 0x693   :  { %4706 = vrot.lane.b32.xlu1 %v16900_v9, %s19640_s24 }
 0x694   :  { %4630 = vrot.lane.b32.xlu0 %v16885_v0, %s19640_s24 }
 0x697   :  { %4860 = vrot.lane.b32.xlu1 %v16776_v50, %s19638_s25  ;;  %v3293_v50 = vpop.permute.xlu0 %3292 }
 0x698   :  { %4782 = vrot.lane.b32.xlu0 %v16897_v44, %s19640_s24  ;;  %s19741_s24 = smov 16  }
 0x69b   :  { %4858 = vrot.lane.b32.xlu1 %v16781_v53, %s19638_s25  ;;  %v17269_v58 = vpop.permute.xlu0 %3446 }
 0x69c   :  { %4938 = vrot.lane.b32.xlu0 %v16785_v56, %s19638_s25  ;;  %v17275_v56 = vpop.permute.xlu1 %3680 }
 0x69f   :  { %5016 = vrot.lane.b32.xlu1 %v16798_v62, %s19638_s25  ;;  %v17273_v53 = vpop.permute.xlu0 %3602 }
 0x6a0   :  { %4936 = vrot.lane.b32.xlu0 %v16794_v59, %s19638_s25  ;;  %v17279_v62 = vpop.permute.xlu1 %3678 }
 0x6a3   :  { %v17277_v11 = vpop.permute.xlu0 %3600 }
 0x6a7   :  { %v17281_v59 = vpop.permute.xlu0 %3758 }
 0x6e0   :  { %v2868_v61 = vpop.xlane.xlu1 %2867 }
 0x6e1   :  { %16029 = vrcp.f32 %v2868_v61 }
 0x6e3   :  { %v2871_v27 = vpop.xlane.xlu0 %2870 }
 0x6e4   :  { %16031 = vrcp.f32 %v2871_v27 }
 0x6e7   :  { %v2874_v36 = vpop.xlane.xlu1 %2873 }
 0x6e8   :  { %16033 = vrcp.f32 %v2874_v36 }
 0x6eb   :  { %v16030_v49 = vpop.eup %16029  ;;  %v2880_v14 = vpop.xlane.xlu1 %2879 }
 0x6ec   :  { %v2877_v8 = vpop.xlane.xlu0 %2876  ;;  %16035 = vrcp.f32 %v2880_v14  ;;  %v2898_v5 = vmul.f32 %v16030_v49, %v17189_v47 }
 0x6ed   :  { %16037 = vrcp.f32 %v2877_v8 }
 0x6ee   :  { %v16032_v46 = vpop.eup %16031  ;;  %15091 = vmatmul.mubr.msk.f32.vlgmr.msra.gmra.mrb[36].mxu1 %vm89_vm7, %v2898_v5 }
 0x6ef   :  { %15099 = vmatpush3.msra.mxu1 %v3062_v55  ;;  %v2886_v31 = vpop.xlane.xlu1 %2885  ;;  %v2899_v43 = vmul.f32 %v16032_v46, %v17193_v10  ;;  %15100 = vmatprep.mubr.msk.f32.mxu1 %vm16383_vm6, %v19678_v42 }
 0x6f0   :  { %v2883_v4 = vpop.xlane.xlu0 %2882  ;;  %16039 = vrcp.f32 %v2886_v31  ;;  %15108 = vmatprep.subr.mxu1 %v19678_v42 }
 0x6f1   :  { %16041 = vrcp.f32 %v2883_v4  ;;  %15096 = vmatmul.mubr.msk.f32.vlgmr.msra.gmra.mrb[42].mxu0 %vm89_vm7, %v2899_v43 }
 0x6f2   :  { %v16034_v61 = vpop.eup %16033  ;;  %15104 = vmatpush3.msra.mxu0 %v3139_v21  ;;  %15105 = vmatprep.mubr.msk.f32.mxu0 %vm16383_vm6, %v19678_v42 }
 0x6f3   :  { %v2900_v55 = vmul.f32 %v16034_v61, %v17198_v3  ;;  %15113 = vmatprep.subr.mxu0 %v19678_v42  ;;  %v3837_v27 = vpop.permute.xlu1 %3836 }
 0x6f4   :  { %v2889_v47 = vpop.xlane.xlu0 %2888 }
 0x6f5   :  { %16043 = vrcp.f32 %v2889_v47  ;;  %15101 = vmatmul.mubr.msk.f32.vlgmr.msra.gmra.mrb[38].mxu1 %vm89_vm7, %v2900_v55 }
 0x6f6   :  { %v16036_v10 = vpop.eup %16035  ;;  %15109 = vmatpush3.msra.mxu1 %v3216_v60  ;;  %15110 = vmatprep.mubr.msk.f32.mxu1 %vm16383_vm6, %v19678_v42 }
 0x6f7   :  { %v16038_v4 = vpop.eup %16037  ;;  %15118 = vmatprep.subr.mxu1 %v19678_v42  ;;  %v2902_v21 = vmul.f32 %v16036_v10, %v17202_v51  ;;  %v3835_v14 = vpop.permute.xlu1 %3834 }
 0x6f8   :  { %v3757_v43 = vpop.permute.xlu0 %3756  ;;  %v2901_v36 = vmul.f32 %v16038_v4, %v17205_v28 }
 0x6f9   :  { %15111 = vmatmul.mubr.msk.f32.vlgmr.msra.gmra.mrb[40].mxu1 %vm89_vm7, %v2902_v21 }
 0x6fa   :  { %v16040_v3 = vpop.eup %16039  ;;  %15106 = vmatmul.mubr.msk.f32.vlgmr.msra.gmra.mrb[44].mxu0 %vm89_vm7, %v2901_v36  ;;  %15119 = vmatpush3.msra.mxu1 %v3370_v35 }
 0x6fb   :  { %v16042_v49 = vpop.eup %16041  ;;  %15114 = vmatpush3.msra.mxu0 %v3293_v50  ;;  %15115 = vmatprep.mubr.msk.f32.mxu0 %vm16383_vm6, %v19678_v42  ;;  %v2904_v60 = vmul.f32 %v16040_v3, %v17211_v6  ;;  %v3993_v50 = vpop.permute.xlu1 %3992 }
 0x6fc   :  { %15120 = vmatprep.mubr.msk.f32.mxu1 %vm16383_vm6, %v19678_v42  ;;  %15123 = vmatprep.subr.mxu0 %v19678_v42  ;;  %v2903_v51 = vmul.f32 %v16042_v49, %v17213_v57  ;;  %v3915_v28 = vpop.permute.xlu0 %3914 }
 0x6fd   :  { %15121 = vmatmul.mubr.msk.f32.vlgmr.msra.gmra.mrb[42].mxu1 %vm89_vm7, %v2904_v60  ;;  %15128 = vmatprep.subr.mxu1 %v19678_v42  ;;  %v17390_v60 = vld [vmem:[%s19677_s27] ss:$0 sm:$0xff] }
 0x6fe   :  { %15116 = vmatmul.mubr.msk.f32.vlgmr.msra.gmra.mrb[46].mxu0 %vm89_vm7, %v2903_v51  ;;  %15130 = vmatprep.mubr.msk.f32.mxu1 %vm16383_vm6, %v19678_v42 }
 0x6ff   :  { %v16044_v35 = vpop.eup %16043  ;;  %15124 = vmatpush3.msra.mxu0 %v17269_v58  ;;  %15125 = vmatprep.mubr.msk.f32.mxu0 %vm16383_vm6, %v19678_v42 }
 0x700   :  { %v2905_v6 = vmul.f32 %v16044_v35, %v17219_v40  ;;  %15133 = vmatprep.subr.mxu0 %v19678_v42  ;;  %v3913_v57 = vpop.permute.xlu0 %3912 }
 0x701   :  { %15129 = vmatpush3.xpose.msk.msra.mxu1 %vm89_vm7, %v17267_v19  ;;  %v3991_v19 = vpop.permute.xlu1 %3990 }
 0x702   :  { %15126 = vmatmul.mubr.msk.f32.vlgmr.msra.gmra.mrb[48].mxu0 %vm89_vm7, %v2905_v6  ;;  %15138 = vmatprep.subr.mxu1 %v19678_v42 }
 0x703   :  { %15135 = vmatprep.mubr.msk.f32.mxu0 %vm16383_vm6, %v19678_v42 }
 0x704   :  { %15131 = vmatmul.mubr.msk.f32.vlgmr.msra.gmra.mrb[44].mxu1 %vm89_vm7, %v17271_v52  ;;  %v4071_v40 = vpop.permute.xlu0 %4070 }
 0x705   :  { %15139 = vmatpush3.xpose.msk.msra.mxu1 %vm89_vm7, %v17275_v56  ;;  %15140 = vmatprep.mubr.msk.f32.mxu1 %vm16383_vm6, %v19678_v42  ;;  %v4251_v52 = vpop.permute.xlu1 %4250 }
 0x706   :  { %15134 = vmatpush3.xpose.msk.msra.mxu0 %vm89_vm7, %v17273_v53  ;;  %15148 = vmatprep.subr.mxu1 %v19678_v42 }
 0x707   :  { %15143 = vmatprep.subr.mxu0 %v19678_v42 }
 0x708   :  { %15141 = vmatmul.mubr.msk.f32.vlgmr.msra.gmra.mrb[46].mxu1 %vm89_vm7, %v17279_v62  ;;  %v4069_v58 = vpop.permute.xlu0 %4068 }
 0x709   :  { %15136 = vmatmul.mubr.msk.f32.vlgmr.msra.gmra.mrb[50].mxu0 %vm89_vm7, %v17277_v11  ;;  %15149 = vmatpush3.xpose.msk.msra.mxu1 %vm89_vm7, %v3837_v27 }
 0x70a   :  { %15144 = vmatpush3.xpose.msk.msra.mxu0 %vm89_vm7, %v17281_v59  ;;  %15145 = vmatprep.mubr.msk.f32.mxu0 %vm16383_vm6, %v19678_v42 }
 0x70b   :  { %15150 = vmatprep.mubr.msk.f32.mxu1 %vm16383_vm6, %v19678_v42  ;;  %15158 = vmatprep.subr.mxu1 %v19678_v42 }
 0x70c   :  { %15151 = vmatmul.mubr.msk.f32.vlgmr.msra.gmra.mrb[48].mxu1 %vm89_vm7, %v3835_v14  ;;  %15153 = vmatprep.subr.mxu0 %v19678_v42  ;;  %v4327_v53 = vpop.permute.xlu0 %4326 }
 0x70d   :  { %15146 = vmatmul.mubr.msk.f32.vlgmr.msra.gmra.mrb[52].mxu0 %vm89_vm7, %v3757_v43  ;;  %15159 = vmatpush3.xpose.msk.msra.mxu1 %vm89_vm7, %v3993_v50 }
 0x70e   :  { %15154 = vmatpush3.xpose.msk.msra.mxu0 %vm89_vm7, %v3915_v28  ;;  %15155 = vmatprep.mubr.msk.f32.mxu0 %vm16383_vm6, %v19678_v42 }
 0x70f   :  { %15160 = vmatprep.mubr.msk.f32.mxu1 %vm16383_vm6, %v19678_v42  ;;  %15168 = vmatprep.subr.mxu1 %v19678_v42 }
 0x710   :  { %15161 = vmatmul.mubr.msk.f32.vlgmr.msra.gmra.mrb[50].mxu1 %vm89_vm7, %v3991_v19  ;;  %15163 = vmatprep.subr.mxu0 %v19678_v42 }
 0x711   :  { %15156 = vmatmul.mubr.msk.f32.vlgmr.msra.gmra.mrb[54].mxu0 %vm89_vm7, %v3913_v57  ;;  %15169 = vmatpush3.msra.mxu1 %v4251_v52 }
 0x712   :  { %15164 = vmatpush3.xpose.msk.msra.mxu0 %vm89_vm7, %v4071_v40  ;;  %15165 = vmatprep.mubr.msk.f32.mxu0 %vm16383_vm6, %v19678_v42 }
 0x713   :  { %15173 = vmatprep.subr.mxu0 %v19678_v42  ;;  %15170 = vmatprep.mubr.msk.f32.mxu1 %vm16383_vm6, %v19678_v42 }
 0x714   :  { %15178 = vmatprep.subr.mxu1 %v19678_v42 }
 0x715   :  { %15166 = vmatmul.mubr.msk.f32.vlgmr.msra.gmra.mrb[56].mxu0 %vm89_vm7, %v4069_v58  ;;  %v17400_v58 = vld [vmem:[%s19677_s27 + $0x1] ss:$0 sm:$0xff] }
 0x716   :  { %15174 = vmatpush3.msra.mxu0 %v4327_v53  ;;  %15175 = vmatprep.mubr.msk.f32.mxu0 %vm16383_vm6, %v19678_v42 }
 0x717   :  { %15183 = vmatprep.subr.mxu0 %v19678_v42 }
 0x7c1   :  { %v17371_v56 = vpop.f32.mrb[36].mxu1 }
 0x7c2   :  { %v15092_v11 = vpop.f32.mrb[37].mxu1 }
 0x7c4   :  { %v17373_v62 = vpop.f32.mrb[42].mxu0 }
 0x7c5   :  { %v15097_v59 = vpop.f32.mrb[43].mxu0 }
 0x7c8   :  { %v17375_v8 = vpop.f32.mrb[38].mxu1 }
 0x7c9   :  { %v15102_v5 = vpop.f32.mrb[39].mxu1 }
 0x7cc   :  { %v17377_v46 = vpop.f32.mrb[40].mxu1 }
 0x7cd   :  { %19687 = vst [vmem:[#allocation25_spill] sm:$0xff] %v17377_v46  ;;  %v17379_v31 = vpop.f32.mrb[44].mxu0  ;;  %v15112_v61 = vpop.f32.mrb[41].mxu1 }
 0x7ce   :  { %19688 = vst [vmem:[#allocation26_spill] sm:$0xff] %v17379_v31  ;;  %v15107_v47 = vpop.f32.mrb[45].mxu0 }
 0x7d0   :  { %v17381_v55 = vpop.f32.mrb[42].mxu1 }
 0x7d1   :  { %19689 = vst [vmem:[#allocation27_spill] sm:$0xff] %v17381_v55  ;;  %v17383_v10 = vpop.f32.mrb[46].mxu0  ;;  %v15122_v4 = vpop.f32.mrb[43].mxu1 }
 0x7d2   :  { %19690 = vst [vmem:[#allocation28_spill] sm:$0xff] %v17383_v10  ;;  %v15117_v43 = vpop.f32.mrb[47].mxu0  ;;  %v17407_v4 = vld [vmem:[%s19677_s27 + $0x2] ss:$0 sm:$0xff] }
 0x7d5   :  { %v17385_v21 = vpop.f32.mrb[48].mxu0 }
 0x7d6   :  { %19691 = vst [vmem:[#allocation29_spill] sm:$0xff] %v17385_v21  ;;  %v15127_v27 = vpop.f32.mrb[49].mxu0 }
 0x7d7   :  { %v3596_v36 = vpop.f32.mrb[44].mxu1  ;;  %v17413_v27 = vld [vmem:[%s19677_s27 + $0x4] ss:$0 sm:$0xff] }
 0x7d8   :  { %v4146_v3 = vmul.f32 0.35355338, %v3596_v36  ;;  %v15132_v49 = vpop.f32.mrb[45].mxu1 }
 0x7da   :  { %v17393_v51 = vadd.f32 %v17390_v60, %v4146_v3 }
 0x7db   :  { %v3752_v28 = vpop.f32.mrb[46].mxu1 }
 0x7dc   :  { %v3674_v35 = vpop.f32.mrb[50].mxu0  ;;  %v15142_v14 = vpop.f32.mrb[47].mxu1  ;;  %v4162_v6 = vsel %vm89_vm7, %v17393_v51, -inf  ;;  %v4148_v50 = vmul.f32 0.35355338, %v3752_v28 }
 0x7dd   :  { %v4147_v57 = vmul.f32 0.35355338, %v3674_v35  ;;  %v15137_v40 = vpop.f32.mrb[51].mxu0  ;;  %4163 = vmax.xlane.f32.xlu1 %v4162_v6 }
 0x7de   :  { %v4156_v43 = vadd.f32 %v17407_v4, %v4148_v50  ;;  %v17421_v50 = vld [vmem:[%s19677_s27 + $0x3] ss:$0 sm:$0xff] }
 0x7df   :  { %v3908_v19 = vpop.f32.mrb[48].mxu1  ;;  %v4155_v52 = vadd.f32 %v17400_v58, %v4147_v57 }
 0x7e0   :  { %v3830_v53 = vpop.f32.mrb[52].mxu0  ;;  %v4150_v11 = vmul.f32 0.35355338, %v3908_v19  ;;  %v15152_v59 = vpop.f32.mrb[49].mxu1  ;;  %v4168_v40 = vsel %vm89_vm7, %v4156_v43, -inf }
 0x7e1   :  { %v4149_v5 = vmul.f32 0.35355338, %v3830_v53  ;;  %v15147_v61 = vpop.f32.mrb[53].mxu0  ;;  %v4165_v47 = vsel %vm89_vm7, %v4155_v52, -inf  ;;  %v17427_v53 = vld [vmem:[%s19677_s27 + $0x6] ss:$0 sm:$0xff] }
 0x7e2   :  { %4166 = vmax.xlane.f32.xlu0 %v4165_v47  ;;  %v4158_v36 = vadd.f32 %v17413_v27, %v4150_v11 }
 0x7e3   :  { %v4064_v3 = vpop.f32.mrb[50].mxu1  ;;  %v4157_v19 = vadd.f32 %v17421_v50, %v4149_v5  ;;  %v17438_v5 = vld [vmem:[%s19677_s27 + $0x5] ss:$0 sm:$0xff] }
 0x7e4   :  { %v3986_v49 = vpop.f32.mrb[54].mxu0  ;;  %v4152_v28 = vmul.f32 0.35355338, %v4064_v3  ;;  %v15162_v35 = vpop.f32.mrb[51].mxu1  ;;  %v4174_v14 = vsel %vm89_vm7, %v4158_v36, -inf }
 0x7e5   :  { %v4151_v6 = vmul.f32 0.35355338, %v3986_v49  ;;  %v15157_v57 = vpop.f32.mrb[55].mxu0  ;;  %4175 = vmax.xlane.f32.xlu1 %v4174_v14  ;;  %v4171_v49 = vsel %vm89_vm7, %v4157_v19, -inf  ;;  %v17445_v14 = vld [vmem:[%s19677_s27 + $0x7] ss:$0 sm:$0xff] }
 0x7e6   :  { %4169 = vmax.xlane.f32.xlu0 %v4168_v40  ;;  %v17430_v11 = vadd.f32 %v17427_v53, %v4152_v28 }
 0x7e7   :  { %v4159_v35 = vadd.f32 %v17438_v5, %v4151_v6  ;;  %v17456_v6 = vpop.permute.xlu1 %4402 }
 0x7e8   :  { %v4142_v59 = vpop.f32.mrb[56].mxu0  ;;  %v4180_v61 = vsel %vm89_vm7, %v17430_v11, -inf }
 0x7e9   :  { %v4153_v47 = vmul.f32 0.35355338, %v4142_v59  ;;  %v15167_v3 = vpop.f32.mrb[57].mxu0  ;;  %4181 = vmax.xlane.f32.xlu1 %v4180_v61  ;;  %v4177_v28 = vsel %vm89_vm7, %v4159_v35, -inf }
 0x7ea   :  { %4172 = vmax.xlane.f32.xlu0 %v4171_v49 }
 0x7eb   :  { %v17448_v57 = vadd.f32 %v17445_v14, %v4153_v47  ;;  %v17458_v59 = vpop.permute.xlu1 %4478  ;;  %v17464_v47 = vpop.permute.xlu0 %4630 }
 0x7ed   :  { %v4183_v40 = vsel %vm89_vm7, %v17448_v57, -inf }
 0x7ee   :  { %4178 = vmax.xlane.f32.xlu0 %v4177_v28 }
 0x7ef   :  { %v17460_v61 = vpop.permute.xlu1 %4554  ;;  %v17468_v28 = vpop.permute.xlu0 %4782 }
 0x7f2   :  { %4184 = vmax.xlane.f32.xlu0 %v4183_v40 }
 0x7f3   :  { %v17462_v3 = vpop.permute.xlu1 %4706 }
 0x7f7   :  { %v17466_v49 = vpop.permute.xlu1 %4860 }
 0x7fa   :  { %5014 = vrot.lane.b32.xlu1 %v16810_v12, %s19638_s25  ;;  %v17472_v12 = vpop.permute.xlu0 %4938 }
 0x7fb   :  { %v17470_v40 = vpop.permute.xlu1 %4858 }
 0x7fe   :  { %v17476_v39 = vpop.permute.xlu0 %4936 }
 0x7ff   :  { %v17474_v1 = vpop.permute.xlu1 %5016 }
 0x808   :  { %5094 = vrot.lane.b32.xlu0 %v16819_v17, %s19638_s25 }
 0x86a   :  { %v4164_v17 = vpop.xlane.xlu1 %4163 }
 0x86b   :  { %v4186_v34 = vsub.f32 %v17393_v51, %v4164_v17 }
 0x86d   :  { %v4194_v38 = vmul.f32 1.442695, %v4186_v34 }
 0x86f   :  { %16045 = vpow2.f32 %v4194_v38  ;;  %v4167_v54 = vpop.xlane.xlu0 %4166 }
 0x870   :  { %v4187_v45 = vsub.f32 %v4155_v52, %v4167_v54 }
 0x872   :  { %v4196_v48 = vmul.f32 1.442695, %v4187_v45  ;;  %v4176_v20 = vpop.xlane.xlu1 %4175 }
 0x873   :  { %v4190_v15 = vsub.f32 %v4158_v36, %v4176_v20  ;;  %v4170_v7 = vpop.xlane.xlu0 %4169 }
 0x874   :  { %16047 = vpow2.f32 %v4196_v48  ;;  %v4188_v16 = vsub.f32 %v4156_v43, %v4170_v7 }
 0x875   :  { %v4202_v24 = vmul.f32 1.442695, %v4190_v15 }
 0x876   :  { %v4198_v21 = vmul.f32 1.442695, %v4188_v16 }
 0x877   :  { %v4173_v10 = vpop.xlane.xlu0 %4172 }
 0x878   :  { %16049 = vpow2.f32 %v4198_v21  ;;  %v4189_v55 = vsub.f32 %v4157_v19, %v4173_v10  ;;  %v4182_v21 = vpop.xlane.xlu1 %4181 }
 0x879   :  { %v16046_v31 = vpop.eup %16045  ;;  %16051 = vpow2.f32 %v4202_v24  ;;  %v4192_v52 = vsub.f32 %v17430_v11, %v4182_v21 }
 0x87a   :  { %v4200_v46 = vmul.f32 1.442695, %v4189_v55  ;;  %v4210_v51 = vsel %vm89_vm7, %v16046_v31, 0.0 }
 0x87b   :  { %v4179_v34 = vpop.xlane.xlu0 %4178  ;;  %4211 = vadd.xlane.f32.xlu1 %v4210_v51  ;;  %v4206_v36 = vmul.f32 1.442695, %v4192_v52 }
 0x87c   :  { %16053 = vpow2.f32 %v4200_v46  ;;  %v4191_v38 = vsub.f32 %v4159_v35, %v4179_v34 }
 0x87e   :  { %v16048_v45 = vpop.eup %16047  ;;  %v4204_v54 = vmul.f32 1.442695, %v4191_v38 }
 0x87f   :  { %v4213_v20 = vsel %vm89_vm7, %v16048_v45, 0.0  ;;  %v4185_v43 = vpop.xlane.xlu0 %4184 }
 0x880   :  { %16055 = vpow2.f32 %v4204_v54  ;;  %4214 = vadd.xlane.f32.xlu0 %v4213_v20  ;;  %v4193_v19 = vsub.f32 %v17448_v57, %v4185_v43 }
 0x881   :  { %16057 = vpow2.f32 %v4206_v36 }
 0x882   :  { %v16050_v7 = vpop.eup %16049  ;;  %v4208_v35 = vmul.f32 1.442695, %v4193_v19 }
 0x883   :  { %v4216_v16 = vsel %vm89_vm7, %v16050_v7, 0.0  ;;  %v17482_v15 = vpop.eup %16051  ;;  %v17524_v11 = vpop.permute.xlu0 %5094 }
 0x884   :  { %4217 = vadd.xlane.f32.xlu1 %v4216_v16  ;;  %v4222_v48 = vsel %vm89_vm7, %v17482_v15, 0.0  ;;  %16059 = vpow2.f32 %v4208_v35 }
 0x886   :  { %v17484_v24 = vpop.eup %16053 }
 0x887   :  { %v4219_v46 = vsel %vm89_vm7, %v17484_v24, 0.0 }
 0x888   :  { %4223 = vadd.xlane.f32.xlu1 %v4222_v48  ;;  %4220 = vadd.xlane.f32.xlu0 %v4219_v46 }
 0x88a   :  { %v17490_v55 = vpop.eup %16055 }
 0x88b   :  { %v4225_v10 = vsel %vm89_vm7, %v17490_v55, 0.0  ;;  %v17500_v17 = vpop.eup %16057 }
 0x88c   :  { %4226 = vadd.xlane.f32.xlu0 %v4225_v10  ;;  %v4228_v51 = vsel %vm89_vm7, %v17500_v17, 0.0 }
 0x88e   :  { %v17504_v34 = vpop.eup %16059 }
 0x899   :  { %5172 = vrot.lane.b32.xlu1 %v16801_v63, %s19638_s25  ;;  %v4231_v63 = vsel %vm89_vm7, %v17504_v34, 0.0 }
 0x8a2   :  { %5092 = vrot.lane.b32.xlu0 %v16837_v22, %s19638_s25  ;;  %v17522_v22 = vpop.permute.xlu1 %5014 }
 0x8bd   :  { %4229 = vadd.xlane.f32.xlu1 %v4228_v51 }
 0x8c1   :  { %4232 = vadd.xlane.f32.xlu0 %v4231_v63 }
 0x8ce   :  { %5170 = vrot.lane.b32.xlu1 %v16813_v13, %s19638_s25 }
 0x8d2   :  { %5328 = vrot.lane.b32.xlu1 %v16822_v18, %s19638_s25 }
 0x8d6   :  { %5326 = vrot.lane.b32.xlu1 %v16840_v23, %s19638_s25 }
 0x8d7   :  { %5250 = vrot.lane.b32.xlu0 %v16847_v25, %s19638_s25 }
 0x8db   :  { %5248 = vrot.lane.b32.xlu0 %v16861_v29, %s19638_s25 }
 0x8df   :  { %5406 = vrot.lane.b32.xlu0 %v16869_v32, %s19638_s25 }
 0x8e3   :  { %5404 = vrot.lane.b32.xlu0 %v16883_v37, %s19638_s25 }
 0x908   :  { %v4212_v13 = vpop.xlane.xlu1 %4211 }
 0x909   :  { %16061 = vrcp.f32 %v4212_v13 }
 0x90d   :  { %v4215_v18 = vpop.xlane.xlu0 %4214 }
 0x90e   :  { %16063 = vrcp.f32 %v4215_v18 }
 0x911   :  { %v4218_v23 = vpop.xlane.xlu1 %4217 }
 0x912   :  { %16065 = vrcp.f32 %v4218_v23 }
 0x913   :  { %v16062_v25 = vpop.eup %16061 }
 0x914   :  { %v4242_v57 = vmul.f32 %v16062_v25, %v16046_v31 }
 0x915   :  { %v4224_v38 = vpop.xlane.xlu1 %4223  ;;  %v4221_v29 = vpop.xlane.xlu0 %4220 }
 0x916   :  { %16067 = vrcp.f32 %v4224_v38  ;;  %15171 = vmatmul.mubr.msk.f32.vlgmr.msra.gmra.mrb[52].mxu1 %vm89_vm7, %v4242_v57 }
 0x917   :  { %16069 = vrcp.f32 %v4221_v29  ;;  %15179 = vmatpush3.msra.mxu1 %v17456_v6  ;;  %15180 = vmatprep.mubr.msk.f32.mxu1 %vm16383_vm6, %v19678_v42 }
 0x918   :  { %v16064_v32 = vpop.eup %16063  ;;  %15188 = vmatprep.subr.mxu1 %v19678_v42 }
 0x919   :  { %v4227_v37 = vpop.xlane.xlu0 %4226  ;;  %v4243_v54 = vmul.f32 %v16064_v32, %v16048_v45 }
 0x91a   :  { %16071 = vrcp.f32 %v4227_v37 }
 0x91b   :  { %15176 = vmatmul.mubr.msk.f32.vlgmr.msra.gmra.mrb[58].mxu0 %vm89_vm7, %v4243_v54 }
 0x91c   :  { %v16066_v31 = vpop.eup %16065  ;;  %15184 = vmatpush3.msra.mxu0 %v17458_v59  ;;  %15185 = vmatprep.mubr.msk.f32.mxu0 %vm16383_vm6, %v19678_v42 }
 0x91d   :  { %v4244_v20 = vmul.f32 %v16066_v31, %v16050_v7  ;;  %15193 = vmatprep.subr.mxu0 %v19678_v42 }
 0x91f   :  { %15181 = vmatmul.mubr.msk.f32.vlgmr.msra.gmra.mrb[54].mxu1 %vm89_vm7, %v4244_v20 }
 0x920   :  { %v16068_v6 = vpop.eup %16067  ;;  %15189 = vmatpush3.msra.mxu1 %v17460_v61  ;;  %15190 = vmatprep.mubr.msk.f32.mxu1 %vm16383_vm6, %v19678_v42 }
 0x921   :  { %v16070_v45 = vpop.eup %16069  ;;  %15198 = vmatprep.subr.mxu1 %v19678_v42  ;;  %v4246_v16 = vmul.f32 %v16068_v6, %v17482_v15 }
 0x922   :  { %v4245_v59 = vmul.f32 %v16070_v45, %v17484_v24 }
 0x923   :  { %15191 = vmatmul.mubr.msk.f32.vlgmr.msra.gmra.mrb[56].mxu1 %vm89_vm7, %v4246_v16 }
 0x924   :  { %v16072_v7 = vpop.eup %16071  ;;  %15186 = vmatmul.mubr.msk.f32.vlgmr.msra.gmra.mrb[60].mxu0 %vm89_vm7, %v4245_v59  ;;  %15199 = vmatpush3.msra.mxu1 %v17462_v3  ;;  %v5173_v3 = vpop.permute.xlu1 %5172 }
 0x925   :  { %15194 = vmatpush3.msra.mxu0 %v17464_v47  ;;  %15195 = vmatprep.mubr.msk.f32.mxu0 %vm16383_vm6, %v19678_v42  ;;  %v4247_v61 = vmul.f32 %v16072_v7, %v17490_v55  ;;  %v5093_v47 = vpop.permute.xlu0 %5092 }
 0x926   :  { %15203 = vmatprep.subr.mxu0 %v19678_v42  ;;  %15200 = vmatprep.mubr.msk.f32.mxu1 %vm16383_vm6, %v19678_v42 }
 0x927   :  { %15208 = vmatprep.subr.mxu1 %v19678_v42 }
 0x928   :  { %15196 = vmatmul.mubr.msk.f32.vlgmr.msra.gmra.mrb[62].mxu0 %vm89_vm7, %v4247_v61 }
 0x929   :  { %15204 = vmatpush3.msra.mxu0 %v17468_v28  ;;  %15205 = vmatprep.mubr.msk.f32.mxu0 %vm16383_vm6, %v19678_v42 }
 0x92a   :  { %15213 = vmatprep.subr.mxu0 %v19678_v42 }
 0x94a   :  { %v4230_v15 = vpop.xlane.xlu1 %4229 }
 0x94b   :  { %16073 = vrcp.f32 %v4230_v15 }
 0x94e   :  { %v4233_v24 = vpop.xlane.xlu0 %4232  ;;  %v5171_v21 = vpop.permute.xlu1 %5170 }
 0x94f   :  { %16075 = vrcp.f32 %v4233_v24 }
 0x952   :  { %v5251_v10 = vpop.permute.xlu0 %5250 }
 0x955   :  { %v16074_v48 = vpop.eup %16073 }
 0x956   :  { %v4248_v46 = vmul.f32 %v16074_v48, %v17500_v17 }
 0x958   :  { %15201 = vmatmul.mubr.msk.f32.vlgmr.msra.gmra.mrb[58].mxu1 %vm89_vm7, %v4248_v46 }
 0x959   :  { %v16076_v55 = vpop.eup %16075  ;;  %15209 = vmatpush3.xpose.msk.msra.mxu1 %vm89_vm7, %v17466_v49  ;;  %15210 = vmatprep.mubr.msk.f32.mxu1 %vm16383_vm6, %v19678_v42  ;;  %v5249_v49 = vpop.permute.xlu0 %5248 }
 0x95a   :  { %15218 = vmatprep.subr.mxu1 %v19678_v42  ;;  %v4249_v28 = vmul.f32 %v16076_v55, %v17504_v34 }
 0x95c   :  { %15206 = vmatmul.mubr.msk.f32.vlgmr.msra.gmra.mrb[64].mxu0 %vm89_vm7, %v4249_v28  ;;  %15211 = vmatmul.mubr.msk.f32.vlgmr.msra.gmra.mrb[60].mxu1 %vm89_vm7, %v17470_v40  ;;  %v5329_v40 = vpop.permute.xlu1 %5328 }
 0x95d   :  { %15214 = vmatpush3.xpose.msk.msra.mxu0 %vm89_vm7, %v17472_v12  ;;  %15219 = vmatpush3.xpose.msk.msra.mxu1 %vm89_vm7, %v17474_v1 }
 0x95e   :  { %15215 = vmatprep.mubr.msk.f32.mxu0 %vm16383_vm6, %v19678_v42  ;;  %15220 = vmatprep.mubr.msk.f32.mxu1 %vm16383_vm6, %v19678_v42 }
 0x95f   :  { %15223 = vmatprep.subr.mxu0 %v19678_v42  ;;  %15228 = vmatprep.subr.mxu1 %v19678_v42 }
 0x960   :  { %15216 = vmatmul.mubr.msk.f32.vlgmr.msra.gmra.mrb[66].mxu0 %vm89_vm7, %v17476_v39  ;;  %15221 = vmatmul.mubr.msk.f32.vlgmr.msra.gmra.mrb[62].mxu1 %vm89_vm7, %v17522_v22  ;;  %v5407_v39 = vpop.permute.xlu0 %5406  ;;  %v5327_v1 = vpop.permute.xlu1 %5326 }
 0x961   :  { %15224 = vmatpush3.xpose.msk.msra.mxu0 %vm89_vm7, %v17524_v11  ;;  %15229 = vmatpush3.xpose.msk.msra.mxu1 %vm89_vm7, %v5173_v3 }
 0x962   :  { %15225 = vmatprep.mubr.msk.f32.mxu0 %vm16383_vm6, %v19678_v42  ;;  %15230 = vmatprep.mubr.msk.f32.mxu1 %vm16383_vm6, %v19678_v42 }
 0x963   :  { %15233 = vmatprep.subr.mxu0 %v19678_v42  ;;  %15238 = vmatprep.subr.mxu1 %v19678_v42 }
 0x964   :  { %15226 = vmatmul.mubr.msk.f32.vlgmr.msra.gmra.mrb[68].mxu0 %vm89_vm7, %v5093_v47  ;;  %15231 = vmatmul.mubr.msk.f32.vlgmr.msra.gmra.mrb[64].mxu1 %vm89_vm7, %v5171_v21  ;;  %v5405_v12 = vpop.permute.xlu0 %5404 }
 0x965   :  { %15234 = vmatpush3.xpose.msk.msra.mxu0 %vm89_vm7, %v5251_v10  ;;  %15239 = vmatpush3.xpose.msk.msra.mxu1 %vm89_vm7, %v5329_v40 }
 0x966   :  { %15235 = vmatprep.mubr.msk.f32.mxu0 %vm16383_vm6, %v19678_v42  ;;  %15240 = vmatprep.mubr.msk.f32.mxu1 %vm16383_vm6, %v19678_v42 }
 0x967   :  { %15243 = vmatprep.subr.mxu0 %v19678_v42  ;;  %15248 = vmatprep.subr.mxu1 %v19678_v42 }
 0x968   :  { %15236 = vmatmul.mubr.msk.f32.vlgmr.msra.gmra.mrb[70].mxu0 %vm89_vm7, %v5249_v49  ;;  %15241 = vmatmul.mubr.msk.f32.vlgmr.msra.gmra.mrb[66].mxu1 %vm89_vm7, %v5327_v1 }
 0x969   :  { %15244 = vmatpush3.xpose.msk.msra.mxu0 %vm89_vm7, %v5407_v39  ;;  %15245 = vmatprep.mubr.msk.f32.mxu0 %vm16383_vm6, %v19678_v42 }
 0x96a   :  { %15253 = vmatprep.subr.mxu0 %v19678_v42  ;;  %15250 = vmatprep.mubr.msk.f32.mxu1 %vm16383_vm6, %v19678_v42 }
 0x96c   :  { %15246 = vmatmul.mubr.msk.f32.vlgmr.msra.gmra.mrb[72].mxu0 %vm89_vm7, %v5405_v12 }
 0x96d   :  { %15255 = vmatprep.mubr.msk.f32.mxu0 %vm16383_vm6, %v19678_v42 }
 0x9e9   :  { %v17614_v52 = vpop.f32.mrb[52].mxu1 }
 0x9ea   :  { %v15172_v43 = vpop.f32.mrb[53].mxu1 }
 0x9ee   :  { %v17616_v36 = vpop.f32.mrb[58].mxu0 }
 0x9ef   :  { %v15177_v19 = vpop.f32.mrb[59].mxu0 }
 0x9f2   :  { %v17618_v35 = vpop.f32.mrb[54].mxu1 }
 0x9f3   :  { %v15182_v17 = vpop.f32.mrb[55].mxu1 }
 0x9f6   :  { %v17620_v51 = vpop.f32.mrb[56].mxu1 }
 0x9f7   :  { %v17622_v34 = vpop.f32.mrb[60].mxu0  ;;  %v15192_v63 = vpop.f32.mrb[57].mxu1 }
 0x9f8   :  { %v15187_v22 = vpop.f32.mrb[61].mxu0 }
 0x9fb   :  { %v17624_v13 = vpop.f32.mrb[62].mxu0 }
 0x9fc   :  { %v15197_v11 = vpop.f32.mrb[63].mxu0 }
 0xa2b   :  { %v17626_v18 = vpop.f32.mrb[58].mxu1 }
 0xa2c   :  { %v15202_v23 = vpop.f32.mrb[59].mxu1 }
 0xa2f   :  { %v17628_v25 = vpop.f32.mrb[64].mxu0  ;;  %v4932_v57 = vpop.f32.mrb[60].mxu1 }
 0xa30   :  { %v5482_v38 = vmul.f32 0.35355338, %v4932_v57  ;;  %v15207_v29 = vpop.f32.mrb[65].mxu0  ;;  %v15212_v32 = vpop.f32.mrb[61].mxu1 }
 0xa32   :  { %v5490_v37 = vadd.f32 %v17390_v60, %v5482_v38 }
 0xa33   :  { %v5010_v54 = vpop.f32.mrb[66].mxu0  ;;  %v5088_v31 = vpop.f32.mrb[62].mxu1 }
 0xa34   :  { %v5483_v20 = vmul.f32 0.35355338, %v5010_v54  ;;  %v15217_v6 = vpop.f32.mrb[67].mxu0  ;;  %v15222_v45 = vpop.f32.mrb[63].mxu1  ;;  %v5484_v16 = vmul.f32 0.35355338, %v5088_v31 }
 0xa35   :  { %v5498_v59 = vsel %vm89_vm7, %v5490_v37, -inf }
 0xa36   :  { %v5491_v7 = vadd.f32 %v17400_v58, %v5483_v20  ;;  %5499 = vmax.xlane.f32.xlu1 %v5498_v59  ;;  %v5492_v48 = vadd.f32 %v17407_v4, %v5484_v16 }
 0xa37   :  { %v5166_v61 = vpop.f32.mrb[68].mxu0  ;;  %v5244_v3 = vpop.f32.mrb[64].mxu1 }
 0xa38   :  { %v5486_v47 = vmul.f32 0.35355338, %v5244_v3  ;;  %v15227_v15 = vpop.f32.mrb[69].mxu0  ;;  %v15232_v24 = vpop.f32.mrb[65].mxu1  ;;  %v5485_v46 = vmul.f32 0.35355338, %v5166_v61 }
 0xa39   :  { %v5501_v60 = vsel %vm89_vm7, %v5491_v7, -inf  ;;  %v5504_v12 = vsel %vm89_vm7, %v5492_v48, -inf }
 0xa3a   :  { %v5494_v55 = vadd.f32 %v17413_v27, %v5486_v47  ;;  %5502 = vmax.xlane.f32.xlu0 %v5501_v60  ;;  %v5493_v58 = vadd.f32 %v17421_v50, %v5485_v46 }
 0xa3b   :  { %v5322_v10 = vpop.f32.mrb[70].mxu0  ;;  %v5400_v28 = vpop.f32.mrb[66].mxu1 }
 0xa3c   :  { %v5488_v21 = vmul.f32 0.35355338, %v5400_v28  ;;  %v15237_v49 = vpop.f32.mrb[71].mxu0  ;;  %v15242_v40 = vpop.f32.mrb[67].mxu1  ;;  %v5487_v39 = vmul.f32 0.35355338, %v5322_v10 }
 0xa3d   :  { %v5510_v1 = vsel %vm89_vm7, %v5494_v55, -inf  ;;  %v5507_v22 = vsel %vm89_vm7, %v5493_v58, -inf }
 0xa3e   :  { %v5496_v4 = vadd.f32 %v17427_v53, %v5488_v21  ;;  %5511 = vmax.xlane.f32.xlu1 %v5510_v1  ;;  %5505 = vmax.xlane.f32.xlu0 %v5504_v12  ;;  %v5495_v17 = vadd.f32 %v17438_v5, %v5487_v39 }
 0xa3f   :  { %v5478_v43 = vpop.f32.mrb[72].mxu0 }
 0xa40   :  { %v15247_v19 = vpop.f32.mrb[73].mxu0  ;;  %v5516_v27 = vsel %vm89_vm7, %v5496_v4, -inf  ;;  %v5489_v63 = vmul.f32 0.35355338, %v5478_v43  ;;  %v5513_v11 = vsel %vm89_vm7, %v5495_v17, -inf }
 0xa42   :  { %5517 = vmax.xlane.f32.xlu1 %v5516_v27  ;;  %5508 = vmax.xlane.f32.xlu0 %v5507_v22  ;;  %v5497_v50 = vadd.f32 %v17445_v14, %v5489_v63 }
 0xa44   :  { %v5519_v53 = vsel %vm89_vm7, %v5497_v50, -inf }
 0xa46   :  { %5514 = vmax.xlane.f32.xlu0 %v5513_v11 }
 0xa4a   :  { %5520 = vmax.xlane.f32.xlu0 %v5519_v53 }
 0xa53   :  { %5586 = vrot.lane.b32.xlu1 %v16849_v26, %s19638_s25 }
 0xa57   :  { %5738 = vrot.lane.b32.xlu1 %v16871_v33, %s19638_s25 }
 0xa5b   :  { %5814 = vrot.lane.b32.xlu1 %v16863_v30, %s19638_s25 }
 0xa5f   :  { %5890 = vrot.lane.b32.xlu1 %v16890_v2, %s19638_s25 }
 0xa60   :  { %5662 = vrot.lane.b32.xlu0 %v16888_v41, %s19638_s25 }
 0xa64   :  { %5966 = vrot.lane.b32.xlu0 %v16885_v0, %s19638_s25 }
 0xac3   :  { %v5500_v5 = vpop.xlane.xlu1 %5499 }
 0xac4   :  { %v5522_v14 = vsub.f32 %v5490_v37, %v5500_v5 }
 0xac6   :  { %v5530_v23 = vmul.f32 1.442695, %v5522_v14 }
 0xac7   :  { %v5503_v57 = vpop.xlane.xlu0 %5502 }
 0xac8   :  { %16077 = vpow2.f32 %v5530_v23  ;;  %v5523_v26 = vsub.f32 %v5491_v7, %v5503_v57 }
 0xaca   :  { %v5532_v38 = vmul.f32 1.442695, %v5523_v26 }
 0xacb   :  { %v5512_v33 = vpop.xlane.xlu1 %5511  ;;  %v5506_v29 = vpop.xlane.xlu0 %5505 }
 0xacc   :  { %16079 = vpow2.f32 %v5532_v38  ;;  %v5526_v30 = vsub.f32 %v5494_v55, %v5512_v33  ;;  %v5524_v32 = vsub.f32 %v5492_v48, %v5506_v29 }
 0xace   :  { %v5534_v54 = vmul.f32 1.442695, %v5524_v32  ;;  %v5538_v2 = vmul.f32 1.442695, %v5526_v30 }
 0xacf   :  { %v5518_v31 = vpop.xlane.xlu1 %5517  ;;  %v5509_v20 = vpop.xlane.xlu0 %5508 }
 0xad0   :  { %v5528_v41 = vsub.f32 %v5496_v4, %v5518_v31  ;;  %v5525_v6 = vsub.f32 %v5493_v58, %v5509_v20  ;;  %16081 = vpow2.f32 %v5534_v54 }
 0xad1   :  { %16083 = vpow2.f32 %v5538_v2 }
 0xad2   :  { %v17658_v0 = vpop.eup %16077  ;;  %v5536_v37 = vmul.f32 1.442695, %v5525_v6  ;;  %v5542_v45 = vmul.f32 1.442695, %v5528_v41  ;;  %v6316_v41 = vld [vmem:[%s19597_s12] sm:$0xff]  ;;  %v6317_v6 = vld [vmem:[%s19597_s12 + $0x8] sm:$0xff] }
 0xad3   :  { %v5587_v16 = vpop.permute.xlu1 %5586  ;;  %v5515_v59 = vpop.xlane.xlu0 %5514  ;;  %v5546_v7 = vsel %vm89_vm7, %v17658_v0, 0.0 }
 0xad4   :  { %v5527_v61 = vsub.f32 %v5495_v17, %v5515_v59  ;;  %5547 = vadd.xlane.f32.xlu1 %v5546_v7  ;;  %15249 = vmatpush3.msra.mxu1 %v5587_v16  ;;  %16085 = vpow2.f32 %v5536_v37  ;;  %v6318_v37 = vld [vmem:[%s19597_s12 + $0x10] sm:$0xff] }
 0xad5   :  { %15258 = vmatprep.subr.mxu1 %v19678_v42  ;;  %16087 = vpow2.f32 %v5542_v45  ;;  %v6319_v45 = vld [vmem:[%s19597_s12 + $0x18] sm:$0xff] }
 0xad6   :  { %v17663_v3 = vpop.eup %16079  ;;  %v5540_v47 = vmul.f32 1.442695, %v5527_v61  ;;  %v15871_v16 = vpack.c.bf16 %v6319_v45, %v6318_v37 }
 0xad7   :  { %v5521_v15 = vpop.xlane.xlu0 %5520  ;;  %v5549_v24 = vsel %vm89_vm7, %v17663_v3, 0.0 }
 0xad8   :  { %16089 = vpow2.f32 %v5540_v47  ;;  %v5529_v48 = vsub.f32 %v5497_v50, %v5521_v15  ;;  %5550 = vadd.xlane.f32.xlu0 %v5549_v24 }
 0xada   :  { %v5544_v46 = vmul.f32 1.442695, %v5529_v48  ;;  %v17667_v60 = vpop.eup %16081 }
 0xadb   :  { %v5663_v55 = vpop.permute.xlu0 %5662  ;;  %v5552_v10 = vsel %vm89_vm7, %v17667_v60, 0.0  ;;  %v17671_v28 = vpop.eup %16083 }
 0xadc   :  { %16091 = vpow2.f32 %v5544_v46  ;;  %15254 = vmatpush3.msra.mxu0 %v5663_v55  ;;  %5553 = vadd.xlane.f32.xlu1 %v5552_v10  ;;  %v5558_v49 = vsel %vm89_vm7, %v17671_v28, 0.0 }
 0xadd   :  { %15263 = vmatprep.subr.mxu0 %v19678_v42 }
 0xade   :  { %v17674_v21 = vpop.eup %16085 }
 0xadf   :  { %v5555_v40 = vsel %vm89_vm7, %v17674_v21, 0.0  ;;  %v17680_v58 = vpop.eup %16087 }
 0xae0   :  { %5559 = vadd.xlane.f32.xlu1 %v5558_v49  ;;  %5556 = vadd.xlane.f32.xlu0 %v5555_v40  ;;  %v5564_v12 = vsel %vm89_vm7, %v17680_v58, 0.0 }
 0xae2   :  { %v17682_v39 = vpop.eup %16089 }
 0xae3   :  { %v5561_v1 = vsel %vm89_vm7, %v17682_v39, 0.0 }
 0xae4   :  { %5565 = vadd.xlane.f32.xlu1 %v5564_v12  ;;  %5562 = vadd.xlane.f32.xlu0 %v5561_v1 }
 0xae6   :  { %v17688_v4 = vpop.eup %16091 }
 0xae7   :  { %v5567_v43 = vsel %vm89_vm7, %v17688_v4, 0.0 }
 0xae8   :  { %5568 = vadd.xlane.f32.xlu0 %v5567_v43 }
 0xaf5   :  { %6042 = vrot.lane.b32.xlu1 %v16900_v9, %s19638_s25  ;;  %v19692_v9 = vld [vmem:[#allocation25_spill] sm:$0xff] }
 0xaf9   :  { %6202 = vrot.lane.b32.xlu1 %v17371_v56, %s19636_s0  ;;  %v19693_v56 = vld [vmem:[#allocation26_spill] sm:$0xff] }
 0xafd   :  { %6234 = vrot.lane.b32.xlu1 %v17614_v52, %s19634_s23  ;;  %v5739_v52 = vpop.permute.xlu1 %5738 }
 0xafe   :  { %6118 = vrot.lane.b32.xlu0 %v16897_v44, %s19638_s25  ;;  %v19694_v44 = vld [vmem:[#allocation27_spill] sm:$0xff] }
 0xb01   :  { %6206 = vrot.lane.b32.xlu1 %v17375_v8, %s19636_s0  ;;  %v19696_v8 = vld [vmem:[#allocation29_spill] sm:$0xff] }
 0xb02   :  { %6204 = vrot.lane.b32.xlu0 %v17373_v62, %s19636_s0  ;;  %v19695_v62 = vld [vmem:[#allocation28_spill] sm:$0xff] }
 0xb05   :  { %6238 = vrot.lane.b32.xlu1 %v17618_v35, %s19634_s23 }
 0xb06   :  { %6236 = vrot.lane.b32.xlu0 %v17616_v36, %s19634_s23  ;;  %v5815_v36 = vpop.permute.xlu1 %5814 }
 0xb09   :  { %6210 = vrot.lane.b32.xlu1 %v19692_v9, %s19636_s0 }
 0xb0a   :  { %6208 = vrot.lane.b32.xlu0 %v19693_v56, %s19636_s0  ;;  %v5891_v35 = vpop.permute.xlu1 %5890 }
 0xb0d   :  { %6242 = vrot.lane.b32.xlu1 %v17620_v51, %s19634_s23  ;;  %v5967_v51 = vpop.permute.xlu0 %5966 }
 0xb0e   :  { %6240 = vrot.lane.b32.xlu0 %v17622_v34, %s19634_s23 }
 0xb11   :  { %6214 = vrot.lane.b32.xlu1 %v19694_v44, %s19636_s0 }
 0xb12   :  { %6212 = vrot.lane.b32.xlu0 %v19695_v62, %s19636_s0 }
 0xb15   :  { %6246 = vrot.lane.b32.xlu1 %v17626_v18, %s19634_s23 }
 0xb16   :  { %6244 = vrot.lane.b32.xlu0 %v17624_v13, %s19634_s23 }
 0xb1a   :  { %6216 = vrot.lane.b32.xlu0 %v19696_v8, %s19636_s0 }
 0xb1e   :  { %6248 = vrot.lane.b32.xlu0 %v17628_v25, %s19634_s23 }
 0xb61   :  { %v5548_v34 = vpop.xlane.xlu1 %5547 }
 0xb62   :  { %16093 = vrcp.f32 %v5548_v34  ;;  %v19697_v34 = vld [vmem:[#allocation17_spill] sm:$0xff] }
 0xb65   :  { %v5551_v19 = vpop.xlane.xlu0 %5550 }
 0xb66   :  { %16095 = vrcp.f32 %v5551_v19 }
 0xb69   :  { %v5554_v27 = vpop.xlane.xlu1 %5553 }
 0xb6a   :  { %16097 = vrcp.f32 %v5554_v27 }
 0xb6c   :  { %v16094_v18 = vpop.eup %16093 }
 0xb6d   :  { %v5578_v17 = vmul.f32 %v16094_v18, %v17658_v0  ;;  %v5560_v13 = vpop.xlane.xlu1 %5559  ;;  %v5557_v63 = vpop.xlane.xlu0 %5556  ;;  %v15867_v0 = vpack.c.bf16 %v6317_v6, %v6316_v41  ;;  %v19702_v41 = vld [vmem:[#allocation23_spill] sm:$0xff] }
 0xb6e   :  { %16099 = vrcp.f32 %v5560_v13 }
 0xb6f   :  { %15251 = vmatmul.mubr.msk.f32.vlgmr.msra.gmra.mrb[68].mxu1 %vm89_vm7, %v5578_v17  ;;  %16101 = vrcp.f32 %v5557_v63  ;;  %v19698_v63 = vld [vmem:[#allocation18_spill] sm:$0xff] }
 0xb70   :  { %v16096_v22 = vpop.eup %16095  ;;  %15259 = vmatpush3.msra.mxu1 %v5739_v52  ;;  %15260 = vmatprep.mubr.msk.f32.mxu1 %vm16383_vm6, %v19678_v42 }
 0xb71   :  { %v5579_v25 = vmul.f32 %v16096_v22, %v17663_v3  ;;  %15268 = vmatprep.subr.mxu1 %v19678_v42  ;;  %v5566_v50 = vpop.xlane.xlu1 %5565  ;;  %v5563_v11 = vpop.xlane.xlu0 %5562 }
 0xb72   :  { %16103 = vrcp.f32 %v5566_v50 }
 0xb73   :  { %15256 = vmatmul.mubr.msk.f32.vlgmr.msra.gmra.mrb[74].mxu0 %vm89_vm7, %v5579_v25  ;;  %16105 = vrcp.f32 %v5563_v11 }
 0xb74   :  { %15264 = vmatpush3.msra.mxu0 %v5815_v36  ;;  %15265 = vmatprep.mubr.msk.f32.mxu0 %vm16383_vm6, %v19678_v42  ;;  %v16098_v53 = vpop.eup %16097 }
 0xb75   :  { %15273 = vmatprep.subr.mxu0 %v19678_v42  ;;  %v5569_v5 = vpop.xlane.xlu0 %5568  ;;  %v5580_v14 = vmul.f32 %v16098_v53, %v17667_v60  ;;  %v6043_v33 = vpop.permute.xlu1 %6042  ;;  %v19699_v53 = vld [vmem:[#allocation19_spill] sm:$0xff] }
 0xb76   :  { %16107 = vrcp.f32 %v5569_v5 }
 0xb77   :  { %15261 = vmatmul.mubr.msk.f32.vlgmr.msra.gmra.mrb[70].mxu1 %vm89_vm7, %v5580_v14 }
 0xb78   :  { %v16100_v23 = vpop.eup %16099  ;;  %15269 = vmatpush3.msra.mxu1 %v5891_v35  ;;  %15270 = vmatprep.mubr.msk.f32.mxu1 %vm16383_vm6, %v19678_v42 }
 0xb79   :  { %v16102_v57 = vpop.eup %16101  ;;  %15278 = vmatprep.subr.mxu1 %v19678_v42  ;;  %v5582_v26 = vmul.f32 %v16100_v23, %v17671_v28  ;;  %v6119_v31 = vpop.permute.xlu0 %6118 }
 0xb7a   :  { %v5581_v38 = vmul.f32 %v16102_v57, %v17674_v21 }
 0xb7b   :  { %15271 = vmatmul.mubr.msk.f32.vlgmr.msra.gmra.mrb[72].mxu1 %vm89_vm7, %v5582_v26  ;;  %v19700_v26 = vld [vmem:[#allocation21_spill] sm:$0xff] }
 0xb7c   :  { %v16104_v29 = vpop.eup %16103  ;;  %15266 = vmatmul.mubr.msk.f32.vlgmr.msra.gmra.mrb[76].mxu0 %vm89_vm7, %v5581_v38  ;;  %15279 = vmatpush3.msra.mxu1 %v6043_v33  ;;  %v19701_v33 = vld [vmem:[#allocation20_spill] sm:$0xff] }
 0xb7d   :  { %v16106_v30 = vpop.eup %16105  ;;  %15274 = vmatpush3.msra.mxu0 %v5967_v51  ;;  %15275 = vmatprep.mubr.msk.f32.mxu0 %vm16383_vm6, %v19678_v42  ;;  %v5584_v32 = vmul.f32 %v16104_v29, %v17680_v58  ;;  %v6203_v58 = vpop.permute.xlu1 %6202 }
 0xb7e   :  { %15280 = vmatprep.mubr.msk.f32.mxu1 %vm16383_vm6, %v19678_v42  ;;  %15283 = vmatprep.subr.mxu0 %v19678_v42  ;;  %v5583_v54 = vmul.f32 %v16106_v30, %v17682_v39  ;;  %v6205_v39 = vpop.permute.xlu0 %6204  ;;  %v6290_v19 = vsel %vm89_vm7, %v19697_v34, %v6203_v58  ;;  %v19706_v58 = vld [vmem:[#allocation9_spill] sm:$0xff] }
 0xb7f   :  { %15281 = vmatmul.mubr.msk.f32.vlgmr.msra.gmra.mrb[74].mxu1 %vm89_vm7, %v5584_v32  ;;  %15868 = vmatprep.subr.bf16.mxu1 %v15867_v0  ;;  %v6291_v22 = vsel %vm89_vm7, %v19698_v63, %v6205_v39 }
 0xb80   :  { %v16108_v2 = vpop.eup %16107  ;;  %15276 = vmatmul.mubr.msk.f32.vlgmr.msra.gmra.mrb[78].mxu0 %vm89_vm7, %v5583_v54  ;;  %15870 = vmatpush3.bf16.msra.mxu1 %v15867_v0  ;;  %v19703_v0 = vld [vmem:[#allocation22_spill] sm:$0xff] }
 0xb81   :  { %15284 = vmatpush3.msra.mxu0 %v6119_v31  ;;  %15285 = vmatprep.mubr.msk.f32.mxu0 %vm16383_vm6, %v19678_v42  ;;  %v5585_v20 = vmul.f32 %v16108_v2, %v17688_v4  ;;  %v6235_v1 = vpop.permute.xlu1 %6234 }
 0xb82   :  { %15872 = vmatprep.subr.bf16.mxu1 %v15871_v16  ;;  %v6237_v12 = vpop.permute.xlu0 %6236  ;;  %v6299_v27 = vsel %vm6298_vm11, %v6290_v19, %v6235_v1 }
 0xb83   :  { %v6300_v25 = vsel %vm6298_vm11, %v6291_v22, %v6237_v12  ;;  %v19710_v22 = vld [vmem:[#allocation14_spill] sm:$0xff] }
 0xb84   :  { %15286 = vmatmul.mubr.msk.f32.vlgmr.msra.gmra.mrb[80].mxu0 %vm89_vm7, %v5585_v20  ;;  %15874 = vmatpush3.bf16.msra.mxu1 %v15871_v16 }
 0xb85   :  { %v6207_v4 = vpop.permute.xlu1 %6206 }
 0xb86   :  { %v6209_v43 = vpop.permute.xlu0 %6208  ;;  %v6292_v5 = vsel %vm89_vm7, %v19699_v53, %v6207_v4 }
 0xb87   :  { %v6293_v29 = vsel %vm89_vm7, %v19701_v33, %v6209_v43 }
 0xb89   :  { %v6239_v9 = vpop.permute.xlu1 %6238 }
 0xb8a   :  { %v6241_v56 = vpop.permute.xlu0 %6240  ;;  %v6301_v14 = vsel %vm6298_vm11, %v6292_v5, %v6239_v9  ;;  %v19711_v5 = vld [vmem:[#allocation15_spill] sm:$0xff] }
 0xb8b   :  { %v6302_v54 = vsel %vm6298_vm11, %v6293_v29, %v6241_v56 }
 0xb8d   :  { %v6211_v44 = vpop.permute.xlu1 %6210 }
 0xb8e   :  { %v6213_v62 = vpop.permute.xlu0 %6212  ;;  %v6294_v38 = vsel %vm89_vm7, %v19700_v26, %v6211_v44  ;;  %v19707_v44 = vld [vmem:[#allocation11_spill] sm:$0xff] }
 0xb8f   :  { %v6295_v37 = vsel %vm89_vm7, %v19703_v0, %v6213_v62 }
 0xb91   :  { %v6243_v8 = vpop.permute.xlu1 %6242 }
 0xb92   :  { %v6245_v52 = vpop.permute.xlu0 %6244  ;;  %v6303_v30 = vsel %vm6298_vm11, %v6294_v38, %v6243_v8 }
 0xb95   :  { %v6215_v36 = vpop.permute.xlu1 %6214 }
 0xb96   :  { %v6217_v35 = vpop.permute.xlu0 %6216  ;;  %v6296_v6 = vsel %vm89_vm7, %v19702_v41, %v6215_v36 }
 0xb99   :  { %v6247_v51 = vpop.permute.xlu1 %6246 }
 0xb9a   :  { %v6249_v18 = vpop.permute.xlu0 %6248  ;;  %v6305_v45 = vsel %vm6298_vm11, %v6296_v6, %v6247_v51 }
 0xc42   :  { %v5658_v59 = vpop.f32.mrb[68].mxu1 }
 0xc43   :  { %v15252_v7 = vpop.f32.mrb[69].mxu1  ;;  %6266 = vrot.lane.b32.xlu1 %v5658_v59, %s19642_s2  ;;  %v6304_v59 = vsel %vm6298_vm11, %v6295_v37, %v6245_v52  ;;  %v19708_v52 = vld [vmem:[#allocation12_spill] sm:$0xff] }
 0xc46   :  { %v5734_v61 = vpop.f32.mrb[74].mxu0 }
 0xc47   :  { %6268 = vrot.lane.b32.xlu0 %v5734_v61, %s19642_s2  ;;  %v15257_v3 = vpop.f32.mrb[75].mxu0 }
 0xc4a   :  { %v5810_v47 = vpop.f32.mrb[70].mxu1 }
 0xc4b   :  { %6270 = vrot.lane.b32.xlu1 %v5810_v47, %s19642_s2  ;;  %v15262_v15 = vpop.f32.mrb[71].mxu1  ;;  %v19704_v47 = vld [vmem:[#allocation24_spill] sm:$0xff] }
 0xc4c   :  { %v6297_v15 = vsel %vm89_vm7, %v19704_v47, %v6217_v35 }
 0xc4e   :  { %v5962_v24 = vpop.f32.mrb[72].mxu1 }
 0xc4f   :  { %v5886_v48 = vpop.f32.mrb[76].mxu0  ;;  %6274 = vrot.lane.b32.xlu1 %v5962_v24, %s19642_s2  ;;  %v15272_v46 = vpop.f32.mrb[73].mxu1  ;;  %v6306_v24 = vsel %vm6298_vm11, %v6297_v15, %v6249_v18 }
 0xc50   :  { %6272 = vrot.lane.b32.xlu0 %v5886_v48, %s19642_s2  ;;  %v15267_v60 = vpop.f32.mrb[77].mxu0 }
 0xc51   :  { %v14213_v60 = vld [vmem:[%s19598_s13] ss:$0 sm:$0xff] }
 0xc52   :  { %v6114_v55 = vpop.f32.mrb[74].mxu1 }
 0xc53   :  { %v6038_v10 = vpop.f32.mrb[78].mxu0  ;;  %6278 = vrot.lane.b32.xlu1 %v6114_v55, %s19642_s2  ;;  %v15282_v28 = vpop.f32.mrb[75].mxu1 }
 0xc54   :  { %6276 = vrot.lane.b32.xlu0 %v6038_v10, %s19642_s2  ;;  %v15277_v21 = vpop.f32.mrb[79].mxu0 }
 0xc57   :  { %v6190_v49 = vpop.f32.mrb[80].mxu0 }
 0xc58   :  { %6280 = vrot.lane.b32.xlu0 %v6190_v49, %s19642_s2  ;;  %v15287_v40 = vpop.f32.mrb[81].mxu0  ;;  %v19705_v49 = vld [vmem:[#allocation10_spill] sm:$0xff]  ;;  %s19746_s2 = smov 24  }
 0xcb5   :  { %v6267_v17 = vpop.permute.xlu1 %6266 }
 0xcb6   :  { %v6308_v13 = vsel %vm6307_vm12, %v6299_v27, %v6267_v17  ;;  %v19709_v27 = vld [vmem:[#allocation13_spill] sm:$0xff] }
 0xcb7   :  { %15296 = vmatprep.mubr.msk.f32.mxu1 %vm209_vm9, %v6308_v13 }
 0xcb9   :  { %v6269_v50 = vpop.permute.xlu0 %6268 }
 0xcba   :  { %v6309_v11 = vsel %vm6307_vm12, %v6300_v25, %v6269_v50 }
 0xcbb   :  { %15297 = vmatmul.mubr.msk.f32.vlgmr.msra.gmra.mrb[76].mxu1 %vm209_vm9, %v6309_v11 }
 0xcbd   :  { %v6271_v23 = vpop.permute.xlu1 %6270 }
 0xcbe   :  { %v6310_v57 = vsel %vm6307_vm12, %v6301_v14, %v6271_v23  ;;  %v19712_v23 = vld [vmem:[#allocation16_spill] sm:$0xff] }
 0xcbf   :  { %15299 = vmatprep.mubr.msk.f32.mxu1 %vm209_vm9, %v6310_v57 }
 0xcc1   :  { %v6275_v32 = vpop.permute.xlu1 %6274 }
 0xcc2   :  { %v6312_v2 = vsel %vm6307_vm12, %v6303_v30, %v6275_v32  ;;  %v6273_v31 = vpop.permute.xlu0 %6272 }
 0xcc3   :  { %v6311_v20 = vsel %vm6307_vm12, %v6302_v54, %v6273_v31 }
 0xcc4   :  { %15300 = vmatmul.mubr.msk.f32.gmra.mrb[78].mxu1 %vm209_vm9, %v6311_v20 }
 0xcc5   :  { %15302 = vmatprep.mubr.msk.f32.mxu1 %vm209_vm9, %v6312_v2  ;;  %v6279_v16 = vpop.permute.xlu1 %6278 }
 0xcc6   :  { %v6314_v7 = vsel %vm6307_vm12, %v6305_v45, %v6279_v16  ;;  %v6277_v61 = vpop.permute.xlu0 %6276 }
 0xcc7   :  { %v6313_v3 = vsel %vm6307_vm12, %v6304_v59, %v6277_v61 }
 0xcc8   :  { %15303 = vmatmul.mubr.msk.f32.gmra.mrb[80].mxu1 %vm209_vm9, %v6313_v3 }
 0xcc9   :  { %15305 = vmatprep.mubr.msk.f32.mxu1 %vm209_vm9, %v6314_v7 }
 0xcca   :  { %v6281_v48 = vpop.permute.xlu0 %6280 }
 0xccb   :  { %v6315_v46 = vsel %vm6307_vm12, %v6306_v24, %v6281_v48 }
 0xccc   :  { %15306 = vmatmul.mubr.msk.f32.gmra.mrb[82].mxu1 %vm209_vm9, %v6315_v46 }
 0xd8e   :  { %v15298_v55 = vpop.f32.mrb[76].mxu1 }
 0xd8f   :  { %v6423_v10 = vadd.f32 %v15298_v55, %v14213_v60  ;;  %v6417_v28 = vpop.f32.mrb[77].mxu1 }
 0xd90   :  { %v6418_v21 = vadd.f32 %v14213_v60, %v6417_v28 }
 0xd91   :  { %v6457_v40 = vadd.f32 %v6423_v10, %v19705_v49 }
 0xd92   :  { %v6456_v39 = vadd.f32 %v6418_v21, %v19706_v58 }
 0xd93   :  { %v6469_v1 = vsel %vm209_vm9, %v6457_v40, 0.0 }
 0xd94   :  { %6470 = vadd.xlane.f32.xlu0 %v6469_v1  ;;  %v6466_v12 = vsel %vm209_vm9, %v6456_v39, 0.0 }
 0xd95   :  { %6467 = vadd.xlane.f32.xlu1 %v6466_v12 }
 0xd97   :  { %v15301_v4 = vpop.f32.mrb[78].mxu1 }
 0xd98   :  { %v6433_v43 = vadd.f32 %v15301_v4, %v14213_v60  ;;  %v6427_v9 = vpop.f32.mrb[79].mxu1 }
 0xd99   :  { %v6428_v56 = vadd.f32 %v14213_v60, %v6427_v9 }
 0xd9a   :  { %v6459_v36 = vadd.f32 %v6433_v43, %v19708_v52  ;;  %v6599_v52 = vld [vmem:[%s19601_s16] sm:$0xff] }
 0xd9b   :  { %v6458_v62 = vadd.f32 %v6428_v56, %v19707_v44  ;;  %v15304_v8 = vpop.f32.mrb[80].mxu1 }
 0xd9c   :  { %v6437_v35 = vpop.f32.mrb[81].mxu1  ;;  %v6443_v51 = vadd.f32 %v15304_v8, %v14213_v60  ;;  %v6475_v63 = vsel %vm209_vm9, %v6459_v36, 0.0 }
 0xd9d   :  { %v6438_v34 = vadd.f32 %v14213_v60, %v6437_v35  ;;  %v6472_v19 = vsel %vm209_vm9, %v6458_v62, 0.0 }
 0xd9e   :  { %6473 = vadd.xlane.f32.xlu0 %v6472_v19  ;;  %v6461_v25 = vadd.f32 %v6443_v51, %v19710_v22  ;;  %v6601_v51 = vld [vmem:[%s19601_s16 + $0x10] sm:$0xff] }
 0xd9f   :  { %v6460_v18 = vadd.f32 %v6438_v34, %v19709_v27  ;;  %v15307_v17 = vpop.f32.mrb[82].mxu1  ;;  %v6602_v34 = vld [vmem:[%s19601_s16 + $0x18] sm:$0xff] }
 0xda0   :  { %v6447_v13 = vpop.f32.mrb[83].mxu1  ;;  %v6453_v50 = vadd.f32 %v15307_v17, %v14213_v60  ;;  %v6481_v26 = vsel %vm209_vm9, %v6461_v25, 0.0  ;;  %v15879_v19 = vpack.c.bf16 %v6602_v34, %v6601_v51  ;;  %v6813_v34 = vld [vmem:[%s19603_s18 + $0x10] sm:$0xff] }
 0xda1   :  { %v6448_v11 = vadd.f32 %v14213_v60, %v6447_v13  ;;  %v6478_v53 = vsel %vm209_vm9, %v6460_v18, 0.0 }
 0xda2   :  { %6479 = vadd.xlane.f32.xlu1 %v6478_v53  ;;  %6476 = vadd.xlane.f32.xlu0 %v6475_v63  ;;  %v6463_v57 = vadd.f32 %v6453_v50, %v19712_v23  ;;  %v14222_v23 = vld [vmem:[%s19599_s14] ss:$0 sm:$0xff] }
 0xda3   :  { %v6462_v14 = vadd.f32 %v6448_v11, %v19711_v5 }
 0xda4   :  { %v6487_v33 = vsel %vm209_vm9, %v6463_v57, 0.0 }
 0xda5   :  { %v6484_v38 = vsel %vm209_vm9, %v6462_v14, 0.0 }
 0xda6   :  { %6482 = vadd.xlane.f32.xlu0 %v6481_v26  ;;  %6485 = vadd.xlane.f32.xlu1 %v6484_v38 }
 0xdaa   :  { %6488 = vadd.xlane.f32.xlu0 %v6487_v33 }
 0xe21   :  { %v6471_v29 = vpop.xlane.xlu0 %6470 }
 0xe22   :  { %v6492_v30 = vmul.f32 0.03125, %v6471_v29  ;;  %v6468_v32 = vpop.xlane.xlu1 %6467 }
 0xe23   :  { %v6491_v54 = vmul.f32 0.03125, %v6468_v32 }
 0xe24   :  { %v17839_v2 = vsub.f32 %v6457_v40, %v6492_v30 }
 0xe25   :  { %v17841_v31 = vsub.f32 %v6456_v39, %v6491_v54  ;;  %v14223_v54 = vld [vmem:[%s19600_s15] ss:$0 sm:$0xff] }
 0xe26   :  { %v6508_v20 = vmul.f32 %v17839_v2, %v17839_v2 }
 0xe27   :  { %v6507_v41 = vmul.f32 %v17841_v31, %v17841_v31 }
 0xe28   :  { %v6518_v6 = vsel %vm209_vm9, %v6508_v20, 0.0 }
 0xe29   :  { %6519 = vadd.xlane.f32.xlu0 %v6518_v6  ;;  %v6515_v0 = vsel %vm209_vm9, %v6507_v41, 0.0 }
 0xe2a   :  { %6516 = vadd.xlane.f32.xlu1 %v6515_v0 }
 0xe2b   :  { %v6474_v37 = vpop.xlane.xlu0 %6473 }
 0xe2c   :  { %v6493_v45 = vmul.f32 0.03125, %v6474_v37 }
 0xe2e   :  { %v17849_v16 = vsub.f32 %v6458_v62, %v6493_v45 }
 0xe2f   :  { %v6480_v59 = vpop.xlane.xlu1 %6479  ;;  %v6477_v7 = vpop.xlane.xlu0 %6476 }
 0xe30   :  { %v6495_v61 = vmul.f32 0.03125, %v6480_v59  ;;  %v6494_v3 = vmul.f32 0.03125, %v6477_v7  ;;  %v6509_v47 = vmul.f32 %v17849_v16, %v17849_v16 }
 0xe32   :  { %v17853_v15 = vsub.f32 %v6460_v18, %v6495_v61  ;;  %v17855_v24 = vsub.f32 %v6459_v36, %v6494_v3  ;;  %v6521_v48 = vsel %vm209_vm9, %v6509_v47, 0.0  ;;  %v6600_v36 = vld [vmem:[%s19601_s16 + $0x8] sm:$0xff] }
 0xe33   :  { %v6486_v46 = vpop.xlane.xlu1 %6485  ;;  %6522 = vadd.xlane.f32.xlu1 %v6521_v48  ;;  %v6483_v60 = vpop.xlane.xlu0 %6482  ;;  %v15875_v35 = vpack.c.bf16 %v6600_v36, %v6599_v52 }
 0xe34   :  { %v6497_v55 = vmul.f32 0.03125, %v6486_v46  ;;  %v6496_v10 = vmul.f32 0.03125, %v6483_v60  ;;  %v6511_v28 = vmul.f32 %v17853_v15, %v17853_v15  ;;  %v6510_v21 = vmul.f32 %v17855_v24, %v17855_v24 }
 0xe35   :  { %15876 = vmatprep.subr.bf16.mxu0 %v15875_v35 }
 0xe36   :  { %v17862_v49 = vsub.f32 %v6462_v14, %v6497_v55  ;;  %v17864_v40 = vsub.f32 %v6461_v25, %v6496_v10  ;;  %v6527_v58 = vsel %vm209_vm9, %v6511_v28, 0.0  ;;  %v6524_v39 = vsel %vm209_vm9, %v6510_v21, 0.0  ;;  %15878 = vmatpush3.bf16.msra.mxu0 %v15875_v35  ;;  %v6812_v35 = vld [vmem:[%s19603_s18 + $0x8] sm:$0xff] }
 0xe37   :  { %6528 = vadd.xlane.f32.xlu1 %v6527_v58  ;;  %6525 = vadd.xlane.f32.xlu0 %v6524_v39  ;;  %v6489_v1 = vpop.xlane.xlu0 %6488 }
 0xe38   :  { %v6498_v12 = vmul.f32 0.03125, %v6489_v1  ;;  %v6513_v4 = vmul.f32 %v17862_v49, %v17862_v49  ;;  %v6512_v43 = vmul.f32 %v17864_v40, %v17864_v40  ;;  %15880 = vmatprep.subr.bf16.mxu0 %v15879_v19 }
 0xe3a   :  { %v17872_v9 = vsub.f32 %v6463_v57, %v6498_v12  ;;  %v6533_v56 = vsel %vm209_vm9, %v6513_v4, 0.0  ;;  %v6530_v44 = vsel %vm209_vm9, %v6512_v43, 0.0  ;;  %15882 = vmatpush3.bf16.msra.mxu0 %v15879_v19  ;;  %v6814_v19 = vld [vmem:[%s19603_s18 + $0x18] sm:$0xff] }
 0xe3b   :  { %6534 = vadd.xlane.f32.xlu1 %v6533_v56  ;;  %6531 = vadd.xlane.f32.xlu0 %v6530_v44 }
 0xe3c   :  { %v6514_v62 = vmul.f32 %v17872_v9, %v17872_v9  ;;  %15356 = vmatprep.subr.mxu0 %v19678_v42 }
 0xe3e   :  { %v6536_v8 = vsel %vm209_vm9, %v6514_v62, 0.0 }
 0xe3f   :  { %6537 = vadd.xlane.f32.xlu0 %v6536_v8 }
 0xeb6   :  { %v6520_v27 = vpop.xlane.xlu0 %6519 }
 0xeb7   :  { %v6540_v18 = vmul.f32 0.03125, %v6520_v27  ;;  %v6517_v17 = vpop.xlane.xlu1 %6516  ;;  %v15887_v27 = vpack.c.bf16 %v6814_v19, %v6813_v34 }
 0xeb8   :  { %v6539_v13 = vmul.f32 0.03125, %v6517_v17  ;;  %v6816_v17 = vld [vmem:[%s19603_s18 + $0x28] sm:$0xff] }
 0xeb9   :  { %v6548_v63 = vadd.f32 1e-12, %v6540_v18  ;;  %v6815_v18 = vld [vmem:[%s19603_s18 + $0x20] sm:$0xff] }
 0xeba   :  { %v6547_v22 = vadd.f32 1e-12, %v6539_v13  ;;  %v15891_v13 = vpack.c.bf16 %v6816_v17, %v6815_v18 }
 0xebb   :  { %16109 = vrsqrt.f32 %v6548_v63  ;;  %v6817_v63 = vld [vmem:[%s19603_s18 + $0x30] sm:$0xff] }
 0xebc   :  { %16111 = vrsqrt.f32 %v6547_v22  ;;  %v6818_v22 = vld [vmem:[%s19603_s18 + $0x38] sm:$0xff] }
 0xec0   :  { %v6523_v25 = vpop.xlane.xlu1 %6522 }
 0xec1   :  { %v6541_v50 = vmul.f32 0.03125, %v6523_v25  ;;  %v15895_v25 = vpack.c.bf16 %v6818_v22, %v6817_v63 }
 0xec3   :  { %v6549_v11 = vadd.f32 1e-12, %v6541_v50  ;;  %v19713_v50 = vmov 0.0|0.0  }
 0xec4   :  { %v6529_v5 = vpop.xlane.xlu1 %6528  ;;  %v6526_v14 = vpop.xlane.xlu0 %6525 }
 0xec5   :  { %v16110_v53 = vpop.eup %16109  ;;  %16113 = vrsqrt.f32 %v6549_v11  ;;  %v6543_v38 = vmul.f32 0.03125, %v6529_v5  ;;  %v6542_v33 = vmul.f32 0.03125, %v6526_v14  ;;  %v14224_v11 = vld [vmem:[%s19602_s17] ss:$0 sm:$0xff] }
 0xec6   :  { %v16112_v57 = vpop.eup %16111  ;;  %v6564_v26 = vmul.f32 %v16110_v53, %v17839_v2 }
 0xec7   :  { %v6563_v29 = vmul.f32 %v16112_v57, %v17841_v31  ;;  %v6551_v30 = vadd.f32 1e-12, %v6543_v38  ;;  %v6550_v32 = vadd.f32 1e-12, %v6542_v33 }
 0xec8   :  { %v6578_v20 = vmul.f32 %v14222_v23, %v6564_v26  ;;  %v6535_v41 = vpop.xlane.xlu1 %6534  ;;  %v6532_v6 = vpop.xlane.xlu0 %6531 }
 0xec9   :  { %v6577_v0 = vmul.f32 %v14222_v23, %v6563_v29  ;;  %16115 = vrsqrt.f32 %v6551_v30  ;;  %v6545_v37 = vmul.f32 0.03125, %v6535_v41  ;;  %v6544_v45 = vmul.f32 0.03125, %v6532_v6 }
 0xeca   :  { %16117 = vrsqrt.f32 %v6550_v32  ;;  %v17902_v61 = vadd.f32 %v14223_v54, %v6578_v20 }
 0xecb   :  { %v17900_v2 = vadd.f32 %v14223_v54, %v6577_v0  ;;  %v6553_v59 = vadd.f32 1e-12, %v6545_v37  ;;  %v6552_v7 = vadd.f32 1e-12, %v6544_v45 }
 0xecc   :  { %v6538_v31 = vpop.xlane.xlu0 %6537 }
 0xecd   :  { %15316 = vmatprep.mubr.msk.f32.mxu0 %vm209_vm9, %v17900_v2  ;;  %16119 = vrsqrt.f32 %v6553_v59  ;;  %v6546_v3 = vmul.f32 0.03125, %v6538_v31 }
 0xece   :  { %15317 = vmatmul.mubr.msk.f32.vlgmr.msra.gmra.mrb[82].mxu0 %vm209_vm9, %v17902_v61  ;;  %16121 = vrsqrt.f32 %v6552_v7 }
 0xecf   :  { %v16114_v47 = vpop.eup %16113  ;;  %v6554_v48 = vadd.f32 1e-12, %v6546_v3 }
 0xed0   :  { %v6565_v46 = vmul.f32 %v16114_v47, %v17849_v16 }
 0xed1   :  { %16123 = vrsqrt.f32 %v6554_v48 }
 0xed2   :  { %v6579_v60 = vmul.f32 %v14222_v23, %v6565_v46 }
 0xed3   :  { %v16116_v55 = vpop.eup %16115 }
 0xed4   :  { %v16118_v10 = vpop.eup %16117  ;;  %v17909_v28 = vadd.f32 %v14223_v54, %v6579_v60  ;;  %v6567_v21 = vmul.f32 %v16116_v55, %v17853_v15 }
 0xed5   :  { %v6566_v58 = vmul.f32 %v16118_v10, %v17855_v24 }
 0xed6   :  { %15319 = vmatprep.mubr.msk.f32.mxu0 %vm209_vm9, %v17909_v28  ;;  %v6581_v39 = vmul.f32 %v14222_v23, %v6567_v21 }
 0xed7   :  { %v16120_v1 = vpop.eup %16119  ;;  %v6580_v12 = vmul.f32 %v14222_v23, %v6566_v58 }
 0xed8   :  { %v16122_v4 = vpop.eup %16121  ;;  %v17915_v43 = vadd.f32 %v14223_v54, %v6581_v39  ;;  %v6569_v16 = vmul.f32 %v16120_v1, %v17862_v49 }
 0xed9   :  { %v17918_v56 = vadd.f32 %v14223_v54, %v6580_v12  ;;  %v6568_v44 = vmul.f32 %v16122_v4, %v17864_v40 }
 0xeda   :  { %v6583_v62 = vmul.f32 %v14222_v23, %v6569_v16 }
 0xedb   :  { %v16124_v8 = vpop.eup %16123  ;;  %15320 = vmatmul.mubr.msk.f32.gmra.mrb[84].mxu0 %vm209_vm9, %v17918_v56  ;;  %v6582_v15 = vmul.f32 %v14222_v23, %v6568_v44 }
 0xedc   :  { %15322 = vmatprep.mubr.msk.f32.mxu0 %vm209_vm9, %v17915_v43  ;;  %v17925_v24 = vadd.f32 %v14223_v54, %v6583_v62  ;;  %v6570_v52 = vmul.f32 %v16124_v8, %v17872_v9  ;;  %v6811_v9 = vld [vmem:[%s19603_s18] sm:$0xff] }
 0xedd   :  { %v17928_v36 = vadd.f32 %v14223_v54, %v6582_v15  ;;  %v15883_v51 = vpack.c.bf16 %v6812_v35, %v6811_v9 }
 0xede   :  { %v6584_v49 = vmul.f32 %v14222_v23, %v6570_v52 }
 0xedf   :  { %15323 = vmatmul.mubr.msk.f32.gmra.mrb[86].mxu0 %vm209_vm9, %v17928_v36  ;;  %15884 = vmatprep.subr.bf16.mxu1 %v15883_v51 }
 0xee0   :  { %15325 = vmatprep.mubr.msk.f32.mxu0 %vm209_vm9, %v17925_v24  ;;  %v17934_v40 = vadd.f32 %v14223_v54, %v6584_v49  ;;  %15886 = vmatpush3.bf16.msra.mxu1 %v15883_v51 }
 0xee1   :  { %15888 = vmatprep.subr.bf16.mxu1 %v15887_v27 }
 0xee3   :  { %15326 = vmatmul.mubr.msk.f32.gmra.mrb[88].mxu0 %vm209_vm9, %v17934_v40 }
 0xee4   :  { %15358 = vmatprep.mubr.msk.f32.mxu0 %vm16383_vm6, %v19678_v42  ;;  %15890 = vmatpush3.bf16.msra.mxu1 %v15887_v27 }
 0xee5   :  { %15892 = vmatprep.subr.bf16.mxu1 %v15891_v13 }
 0xee8   :  { %15894 = vmatpush3.bf16.msra.mxu1 %v15891_v13 }
 0xee9   :  { %15896 = vmatprep.subr.bf16.mxu1 %v15895_v25 }
 0xeec   :  { %15898 = vmatpush3.bf16.msra.mxu1 %v15895_v25 }
 0xeed   :  { %15905 = vmatprep.subr.bf16.mxu1 %v19713_v50 }
 0xfa1   :  { %v15318_v53 = vpop.f32.mrb[82].mxu0 }
 0xfa2   :  { %v6706_v5 = vadd.f32 %v15318_v53, %v14224_v11  ;;  %v6700_v14 = vpop.f32.mrb[83].mxu0 }
 0xfa3   :  { %v6701_v23 = vadd.f32 %v14224_v11, %v6700_v14 }
 0xfa4   :  { %v6748_v57 = vmul.f32 0.044715, %v6706_v5  ;;  %v6740_v27 = vmul.f32 0.5, %v6706_v5 }
 0xfa5   :  { %v6747_v26 = vmul.f32 0.044715, %v6701_v23  ;;  %v6739_v62 = vmul.f32 0.5, %v6701_v23 }
 0xfa6   :  { %v6756_v38 = vmul.f32 %v6748_v57, %v6706_v5 }
 0xfa7   :  { %v6755_v33 = vmul.f32 %v6747_v26, %v6701_v23 }
 0xfa8   :  { %v6764_v29 = vmul.f32 %v6756_v38, %v6706_v5 }
 0xfa9   :  { %v6763_v30 = vmul.f32 %v6755_v33, %v6701_v23 }
 0xfaa   :  { %v6772_v32 = vadd.f32 %v6764_v29, %v6706_v5 }
 0xfab   :  { %v6771_v54 = vadd.f32 %v6763_v30, %v6701_v23 }
 0xfac   :  { %v6780_v20 = vmul.f32 0.7978846, %v6772_v32 }
 0xfad   :  { %v6779_v41 = vmul.f32 0.7978846, %v6771_v54 }
 0xfae   :  { %16125 = vtanh.f32 %v6780_v20  ;;  %v15321_v6 = vpop.f32.mrb[84].mxu0 }
 0xfaf   :  { %16127 = vtanh.f32 %v6779_v41  ;;  %v6716_v0 = vadd.f32 %v15321_v6, %v14224_v11  ;;  %v6710_v37 = vpop.f32.mrb[85].mxu0 }
 0xfb0   :  { %v6711_v45 = vadd.f32 %v14224_v11, %v6710_v37 }
 0xfb1   :  { %v6750_v59 = vmul.f32 0.044715, %v6716_v0  ;;  %v6742_v37 = vmul.f32 0.5, %v6716_v0 }
 0xfb2   :  { %v6749_v7 = vmul.f32 0.044715, %v6711_v45  ;;  %v15324_v31 = vpop.f32.mrb[86].mxu0  ;;  %v6741_v41 = vmul.f32 0.5, %v6711_v45 }
 0xfb3   :  { %v6758_v3 = vmul.f32 %v6750_v59, %v6716_v0  ;;  %v17968_v47 = vadd.f32 %v15324_v31, %v14224_v11  ;;  %v6720_v48 = vpop.f32.mrb[87].mxu0 }
 0xfb4   :  { %v6757_v46 = vmul.f32 %v6749_v7, %v6711_v45  ;;  %v6721_v60 = vadd.f32 %v14224_v11, %v6720_v48 }
 0xfb5   :  { %v6766_v55 = vmul.f32 %v6758_v3, %v6716_v0  ;;  %v6752_v10 = vmul.f32 0.044715, %v17968_v47 }
 0xfb6   :  { %v6765_v21 = vmul.f32 %v6757_v46, %v6711_v45  ;;  %v6751_v58 = vmul.f32 0.044715, %v6721_v60  ;;  %v15327_v39 = vpop.f32.mrb[88].mxu0  ;;  %v6743_v46 = vmul.f32 0.5, %v6721_v60 }
 0xfb7   :  { %v6774_v12 = vadd.f32 %v6766_v55, %v6716_v0  ;;  %v6760_v4 = vmul.f32 %v6752_v10, %v17968_v47  ;;  %v17972_v16 = vadd.f32 %v15327_v39, %v14224_v11  ;;  %v6730_v44 = vpop.f32.mrb[89].mxu0  ;;  %v6744_v10 = vmul.f32 0.5, %v17968_v47 }
 0xfb8   :  { %v16126_v1 = vpop.eup %16125  ;;  %v6773_v52 = vadd.f32 %v6765_v21, %v6711_v45  ;;  %v6759_v49 = vmul.f32 %v6751_v58, %v6721_v60  ;;  %v6731_v9 = vadd.f32 %v14224_v11, %v6730_v44 }
 0xfb9   :  { %v16128_v8 = vpop.eup %16127  ;;  %v6796_v15 = vadd.f32 1.0, %v16126_v1  ;;  %v6768_v35 = vmul.f32 %v6760_v4, %v17968_v47  ;;  %v6754_v51 = vmul.f32 0.044715, %v17972_v16  ;;  %v6782_v19 = vmul.f32 0.7978846, %v6774_v12 }
 0xfba   :  { %v6795_v34 = vadd.f32 1.0, %v16128_v8  ;;  %v6767_v18 = vmul.f32 %v6759_v49, %v6721_v60  ;;  %v6753_v17 = vmul.f32 0.044715, %v6731_v9  ;;  %v6781_v13 = vmul.f32 0.7978846, %v6773_v52 }
 0xfbb   :  { %v6776_v63 = vadd.f32 %v6768_v35, %v17968_v47  ;;  %v6762_v22 = vmul.f32 %v6754_v51, %v17972_v16  ;;  %16129 = vtanh.f32 %v6782_v19  ;;  %v6804_v53 = vmul.f32 %v6796_v15, %v6740_v27  ;;  %v14233_v47 = vld [vmem:[%s19604_s19] ss:$0 sm:$0xff] }
 0xfbc   :  { %v6803_v25 = vmul.f32 %v6795_v34, %v6739_v62  ;;  %v6775_v14 = vadd.f32 %v6767_v18, %v6721_v60  ;;  %v6761_v23 = vmul.f32 %v6753_v17, %v6731_v9  ;;  %16131 = vtanh.f32 %v6781_v13 }
 0xfbd   :  { %v6770_v11 = vmul.f32 %v6762_v22, %v17972_v16  ;;  %v6784_v57 = vmul.f32 0.7978846, %v6776_v63  ;;  %v6745_v0 = vmul.f32 0.5, %v6731_v9  ;;  %v6746_v4 = vmul.f32 0.5, %v17972_v16 }
 0xfbe   :  { %15344 = vmatprep.mubr.msk.f32.mxu1 %vm6826_vm13, %v6803_v25  ;;  %v6769_v26 = vmul.f32 %v6761_v23, %v6731_v9  ;;  %v6783_v5 = vmul.f32 0.7978846, %v6775_v14 }
 0xfbf   :  { %15345 = vmatmul.mubr.msk.f32.vlgmr.msra.gmra.mrb[84].mxu1 %vm6826_vm13, %v6804_v53  ;;  %v6778_v38 = vadd.f32 %v6770_v11, %v17972_v16  ;;  %16133 = vtanh.f32 %v6784_v57 }
 0xfc0   :  { %v6777_v33 = vadd.f32 %v6769_v26, %v6731_v9  ;;  %16135 = vtanh.f32 %v6783_v5 }
 0xfc1   :  { %v6786_v29 = vmul.f32 0.7978846, %v6778_v38 }
 0xfc2   :  { %v6785_v30 = vmul.f32 0.7978846, %v6777_v33 }
 0xfc3   :  { %16137 = vtanh.f32 %v6786_v29 }
 0xfc4   :  { %16139 = vtanh.f32 %v6785_v30 }
 0xfc5   :  { %v16130_v32 = vpop.eup %16129 }
 0xfc6   :  { %v16132_v54 = vpop.eup %16131  ;;  %v6798_v20 = vadd.f32 1.0, %v16130_v32 }
 0xfc7   :  { %v6797_v6 = vadd.f32 1.0, %v16132_v54 }
 0xfc8   :  { %v6806_v3 = vmul.f32 %v6798_v20, %v6742_v37 }
 0xfc9   :  { %v16134_v59 = vpop.eup %16133  ;;  %v6805_v7 = vmul.f32 %v6797_v6, %v6741_v41 }
 0xfca   :  { %v16136_v31 = vpop.eup %16135  ;;  %v6800_v48 = vadd.f32 1.0, %v16134_v59 }
 0xfcb   :  { %15347 = vmatprep.mubr.msk.f32.mxu1 %vm6826_vm13, %v6805_v7  ;;  %v6799_v55 = vadd.f32 1.0, %v16136_v31 }
 0xfcc   :  { %15348 = vmatmul.mubr.msk.f32.gmra.mrb[86].mxu1 %vm6826_vm13, %v6806_v3  ;;  %v6808_v1 = vmul.f32 %v6800_v48, %v6744_v10 }
 0xfcd   :  { %v16138_v21 = vpop.eup %16137  ;;  %v6807_v58 = vmul.f32 %v6799_v55, %v6743_v46 }
 0xfce   :  { %v16140_v39 = vpop.eup %16139  ;;  %v6802_v45 = vadd.f32 1.0, %v16138_v21 }
 0xfcf   :  { %15350 = vmatprep.mubr.msk.f32.mxu1 %vm6826_vm13, %v6807_v58  ;;  %v6801_v12 = vadd.f32 1.0, %v16140_v39 }
 0xfd0   :  { %15351 = vmatmul.mubr.msk.f32.gmra.mrb[88].mxu1 %vm6826_vm13, %v6808_v1  ;;  %v6810_v60 = vmul.f32 %v6802_v45, %v6746_v4 }
 0xfd1   :  { %v6809_v44 = vmul.f32 %v6801_v12, %v6745_v0 }
 0xfd3   :  { %15353 = vmatprep.mubr.msk.f32.mxu1 %vm6826_vm13, %v6809_v44 }
 0xfd4   :  { %15354 = vmatmul.mubr.msk.f32.gmra.mrb[90].mxu1 %vm6826_vm13, %v6810_v60 }
 0xfd5   :  { %15380 = vmatprep.mubr.msk.f32.mxu1 %vm16383_vm6, %v19678_v42 }
0x1092   :  { %v15346_v62 = vpop.f32.mrb[84].mxu1 }
0x1093   :  { %v6923_v8 = vadd.f32 %v15346_v62, %v14233_v47  ;;  %v6917_v15 = vpop.f32.mrb[85].mxu1 }
0x1094   :  { %v6918_v52 = vadd.f32 %v14233_v47, %v6917_v15 }
0x1095   :  { %v6957_v49 = vadd.f32 %v6923_v8, %v17902_v61 }
0x1096   :  { %v6956_v16 = vadd.f32 %v6918_v52, %v17900_v2 }
0x1097   :  { %v6969_v9 = vsel %vm209_vm9, %v6957_v49, 0.0 }
0x1098   :  { %6970 = vadd.xlane.f32.xlu1 %v6969_v9  ;;  %v6966_v35 = vsel %vm209_vm9, %v6956_v16, 0.0 }
0x109c   :  { %6967 = vadd.xlane.f32.xlu1 %v6966_v35 }
0x109f   :  { %v15349_v51 = vpop.f32.mrb[86].mxu1 }
0x10a0   :  { %v6933_v34 = vadd.f32 %v15349_v51, %v14233_v47  ;;  %v6927_v19 = vpop.f32.mrb[87].mxu1 }
0x10a1   :  { %v6928_v27 = vadd.f32 %v14233_v47, %v6927_v19  ;;  %v14245_v19 = vld [vmem:[%s19662_s28 + $0x20] sm:$0xff] }
0x10a2   :  { %v6959_v18 = vadd.f32 %v6933_v34, %v17918_v56 }
0x10a3   :  { %v15352_v17 = vpop.f32.mrb[88].mxu1  ;;  %v6958_v13 = vadd.f32 %v6928_v27, %v17909_v28  ;;  %v14246_v27 = vld [vmem:[%s19662_s28 + $0x28] sm:$0xff] }
0x10a4   :  { %v6943_v63 = vadd.f32 %v15352_v17, %v14233_v47  ;;  %v6937_v22 = vpop.f32.mrb[89].mxu1  ;;  %v6975_v61 = vsel %vm209_vm9, %v6959_v18, 0.0  ;;  %v15906_v17 = vpack.c.bf16 %v14246_v27, %v14245_v19 }
0x10a5   :  { %v6938_v2 = vadd.f32 %v14233_v47, %v6937_v22  ;;  %6976 = vadd.xlane.f32.xlu0 %v6975_v61  ;;  %v6972_v57 = vsel %vm209_vm9, %v6958_v13, 0.0 }
0x10a6   :  { %v6961_v14 = vadd.f32 %v6943_v63, %v17928_v36  ;;  %15907 = vmatpush3.bf16.msra.mxu1 %v15906_v17 }
0x10a7   :  { %v6960_v25 = vadd.f32 %v6938_v2, %v17915_v43  ;;  %v15355_v53 = vpop.f32.mrb[90].mxu1  ;;  %15908 = vmatprep.subr.bf16.mxu1 %v19713_v50 }
0x10a8   :  { %v6953_v23 = vadd.f32 %v15355_v53, %v14233_v47  ;;  %v6947_v11 = vpop.f32.mrb[91].mxu1  ;;  %v6981_v38 = vsel %vm209_vm9, %v6961_v14, 0.0 }
0x10a9   :  { %v6948_v26 = vadd.f32 %v14233_v47, %v6947_v11  ;;  %6973 = vadd.xlane.f32.xlu0 %v6972_v57  ;;  %v6978_v56 = vsel %vm209_vm9, %v6960_v25, 0.0 }
0x10aa   :  { %6979 = vadd.xlane.f32.xlu1 %v6978_v56  ;;  %v6963_v5 = vadd.f32 %v6953_v23, %v17934_v40 }
0x10ab   :  { %v6962_v28 = vadd.f32 %v6948_v26, %v17925_v24 }
0x10ac   :  { %v6987_v36 = vsel %vm209_vm9, %v6963_v5, 0.0 }
0x10ad   :  { %6982 = vadd.xlane.f32.xlu0 %v6981_v38  ;;  %v6984_v43 = vsel %vm209_vm9, %v6962_v28, 0.0 }
0x10ae   :  { %6985 = vadd.xlane.f32.xlu1 %v6984_v43 }
0x10b1   :  { %6988 = vadd.xlane.f32.xlu0 %v6987_v36 }
0x1125   :  { %v6971_v33 = vpop.xlane.xlu1 %6970 }
0x1126   :  { %v6991_v29 = vmul.f32 0.03125, %v6971_v33 }
0x1128   :  { %v18011_v30 = vsub.f32 %v6957_v49, %v6991_v29 }
0x1129   :  { %v6968_v32 = vpop.xlane.xlu1 %6967 }
0x112a   :  { %v6990_v54 = vmul.f32 0.03125, %v6968_v32  ;;  %v7007_v24 = vmul.f32 %v18011_v30, %v18011_v30 }
0x112c   :  { %v18015_v20 = vsub.f32 %v6956_v16, %v6990_v54  ;;  %v7017_v40 = vsel %vm209_vm9, %v7007_v24, 0.0 }
0x112d   :  { %7018 = vadd.xlane.f32.xlu1 %v7017_v40 }
0x112e   :  { %v7006_v41 = vmul.f32 %v18015_v20, %v18015_v20 }
0x1130   :  { %v7014_v6 = vsel %vm209_vm9, %v7006_v41, 0.0 }
0x1131   :  { %7015 = vadd.xlane.f32.xlu1 %v7014_v6 }
0x1132   :  { %v6977_v37 = vpop.xlane.xlu0 %6976 }
0x1133   :  { %v6993_v59 = vmul.f32 0.03125, %v6977_v37 }
0x1135   :  { %v18021_v7 = vsub.f32 %v6959_v18, %v6993_v59  ;;  %v14247_v18 = vld [vmem:[%s19662_s28 + $0x30] sm:$0xff] }
0x1136   :  { %v6974_v31 = vpop.xlane.xlu0 %6973 }
0x1137   :  { %v6992_v3 = vmul.f32 0.03125, %v6974_v31  ;;  %v6980_v48 = vpop.xlane.xlu1 %6979  ;;  %v7009_v46 = vmul.f32 %v18021_v7, %v18021_v7  ;;  %v14242_v31 = vld [vmem:[%s19605_s20] ss:$0 sm:$0xff] }
0x1138   :  { %v6994_v55 = vmul.f32 0.03125, %v6980_v48 }
0x1139   :  { %v18025_v10 = vsub.f32 %v6958_v13, %v6992_v3  ;;  %v7023_v21 = vsel %vm209_vm9, %v7009_v46, 0.0  ;;  %v14248_v13 = vld [vmem:[%s19662_s28 + $0x38] sm:$0xff] }
0x113a   :  { %v18028_v58 = vsub.f32 %v6960_v25, %v6994_v55  ;;  %7024 = vadd.xlane.f32.xlu0 %v7023_v21  ;;  %v6983_v39 = vpop.xlane.xlu0 %6982  ;;  %v15909_v63 = vpack.c.bf16 %v14248_v13, %v14247_v18 }
0x113b   :  { %v6995_v1 = vmul.f32 0.03125, %v6983_v39  ;;  %v6986_v45 = vpop.xlane.xlu1 %6985  ;;  %v7008_v0 = vmul.f32 %v18025_v10, %v18025_v10  ;;  %v14243_v39 = vld [vmem:[%s19606_s21] ss:$0 sm:$0xff] }
0x113c   :  { %v6996_v12 = vmul.f32 0.03125, %v6986_v45  ;;  %v7010_v4 = vmul.f32 %v18028_v58, %v18028_v58  ;;  %15910 = vmatpush3.bf16.msra.mxu1 %v15909_v63 }
0x113d   :  { %v18034_v44 = vsub.f32 %v6961_v14, %v6995_v1  ;;  %v7020_v60 = vsel %vm209_vm9, %v7008_v0, 0.0 }
0x113e   :  { %v18037_v47 = vsub.f32 %v6962_v28, %v6996_v12  ;;  %7021 = vadd.xlane.f32.xlu0 %v7020_v60  ;;  %v6989_v62 = vpop.xlane.xlu0 %6988  ;;  %v7026_v8 = vsel %vm209_vm9, %v7010_v4, 0.0 }
0x113f   :  { %v6997_v15 = vmul.f32 0.03125, %v6989_v62  ;;  %7027 = vadd.xlane.f32.xlu1 %v7026_v8  ;;  %v7011_v52 = vmul.f32 %v18034_v44, %v18034_v44 }
0x1140   :  { %v7012_v49 = vmul.f32 %v18037_v47, %v18037_v47 }
0x1141   :  { %v18044_v16 = vsub.f32 %v6963_v5, %v6997_v15  ;;  %v7029_v9 = vsel %vm209_vm9, %v7011_v52, 0.0 }
0x1142   :  { %7030 = vadd.xlane.f32.xlu0 %v7029_v9  ;;  %v7032_v35 = vsel %vm209_vm9, %v7012_v49, 0.0 }
0x1143   :  { %7033 = vadd.xlane.f32.xlu1 %v7032_v35  ;;  %v7013_v51 = vmul.f32 %v18044_v16, %v18044_v16 }
0x1145   :  { %v7035_v34 = vsel %vm209_vm9, %v7013_v51, 0.0 }
0x1146   :  { %7036 = vadd.xlane.f32.xlu0 %v7035_v34 }
0x11ba   :  { %v7019_v22 = vpop.xlane.xlu1 %7018 }
0x11bb   :  { %v7039_v2 = vmul.f32 0.03125, %v7019_v22 }
0x11bd   :  { %v7047_v53 = vadd.f32 1e-12, %v7039_v2 }
0x11be   :  { %v7016_v61 = vpop.xlane.xlu1 %7015 }
0x11bf   :  { %v7038_v25 = vmul.f32 0.03125, %v7016_v61  ;;  %16141 = vrsqrt.f32 %v7047_v53 }
0x11c1   :  { %v7046_v14 = vadd.f32 1e-12, %v7038_v25 }
0x11c3   :  { %16143 = vrsqrt.f32 %v7046_v14 }
0x11c7   :  { %v7025_v23 = vpop.xlane.xlu0 %7024 }
0x11c8   :  { %v7041_v11 = vmul.f32 0.03125, %v7025_v23 }
0x11c9   :  { %v16142_v32 = vpop.eup %16141 }
0x11ca   :  { %v7049_v57 = vadd.f32 1e-12, %v7041_v11  ;;  %v7063_v37 = vmul.f32 %v16142_v32, %v18011_v30 }
0x11cb   :  { %v7022_v26 = vpop.xlane.xlu0 %7021 }
0x11cc   :  { %16145 = vrsqrt.f32 %v7049_v57  ;;  %v7040_v56 = vmul.f32 0.03125, %v7022_v26  ;;  %v7028_v28 = vpop.xlane.xlu1 %7027  ;;  %v7077_v21 = vmul.f32 %v14242_v31, %v7063_v37  ;;  %v14250_v57 = vld [vmem:[%s19661_s1 + $0x28] sm:$0xff]  ;;  %v14271_v37 = vld [vmem:[%s19593_s8 + $0x20] sm:$0xff] }
0x11cd   :  { %v7042_v5 = vmul.f32 0.03125, %v7028_v28  ;;  %v16144_v40 = vpop.eup %16143 }
0x11ce   :  { %v7048_v38 = vadd.f32 1e-12, %v7040_v56  ;;  %v7062_v48 = vmul.f32 %v16144_v40, %v18015_v20  ;;  %v18074_v4 = vadd.f32 %v14243_v39, %v7077_v21 }
0x11cf   :  { %v7050_v43 = vadd.f32 1e-12, %v7042_v5  ;;  %v7031_v36 = vpop.xlane.xlu0 %7030 }
0x11d0   :  { %16147 = vrsqrt.f32 %v7048_v38  ;;  %v7043_v33 = vmul.f32 0.03125, %v7031_v36  ;;  %v7034_v29 = vpop.xlane.xlu1 %7033  ;;  %v7076_v1 = vmul.f32 %v14242_v31, %v7062_v48  ;;  %v7106_v35 = vrot.slane %v18074_v4, 7  ;;  %v16341_v38 = vld [vmem:[%s19660_s4] sm:$0xff]  ;;  %v14252_v36 = vld [vmem:[%s19661_s1 + $0x38] sm:$0xff]  ;;  %v14259_v48 = vld [vmem:[%s19664_s26 + $0x30] sm:$0xff] }
0x11d1   :  { %16149 = vrsqrt.f32 %v7050_v43  ;;  %v7044_v54 = vmul.f32 0.03125, %v7034_v29  ;;  %v14251_v43 = vld [vmem:[%s19661_s1 + $0x30] sm:$0xff] }
0x11d2   :  { %v7051_v24 = vadd.f32 1e-12, %v7043_v33  ;;  %v18077_v8 = vadd.f32 %v14243_v39, %v7076_v1  ;;  %v15903_v33 = vpack.c.bf16 %v14252_v36, %v14251_v43  ;;  %v14285_v1 = vld [vmem:[%s19595_s10 + $0x20] sm:$0xff] }
0x11d3   :  { %v7052_v41 = vadd.f32 1e-12, %v7044_v54  ;;  %v7037_v6 = vpop.xlane.xlu0 %7036 }
0x11d4   :  { %16151 = vrsqrt.f32 %v7051_v24  ;;  %v7045_v59 = vmul.f32 0.03125, %v7037_v6  ;;  %v7107_v18 = vsel %vm106_vm0, %v7106_v35, %v18077_v8  ;;  %v19714_v24 = vld [vmem:[#allocation5_spill] sm:$0xff]  ;;  %v14258_v6 = vld [vmem:[%s19664_s26 + $0x28] sm:$0xff] }
0x11d5   :  { %16153 = vrsqrt.f32 %v7052_v41 }
0x11d6   :  { %v16146_v3 = vpop.eup %16145  ;;  %v7053_v46 = vadd.f32 1e-12, %v7045_v59 }
0x11d7   :  { %v7065_v55 = vmul.f32 %v16146_v3, %v18021_v7 }
0x11d8   :  { %16155 = vrsqrt.f32 %v7053_v46  ;;  %v14260_v46 = vld [vmem:[%s19664_s26 + $0x38] sm:$0xff] }
0x11d9   :  { %v7079_v45 = vmul.f32 %v14242_v31, %v7065_v55  ;;  %v14273_v55 = vld [vmem:[%s19593_s8 + $0x30] sm:$0xff]  ;;  %v15915_v21 = vpack.c.bf16 %v14260_v46, %v14259_v48 }
0x11da   :  { %v16148_v30 = vpop.eup %16147 }
0x11db   :  { %v16150_v0 = vpop.eup %16149  ;;  %v7064_v12 = vmul.f32 %v16148_v30, %v18025_v10  ;;  %v18079_v7 = vadd.f32 %v14243_v39, %v7079_v45  ;;  %v14286_v45 = vld [vmem:[%s19595_s10 + $0x28] sm:$0xff] }
0x11dc   :  { %v7066_v60 = vmul.f32 %v16150_v0, %v18028_v58  ;;  %v15927_v0 = vpack.c.bf16 %v14286_v45, %v14285_v1 }
0x11dd   :  { %v7078_v20 = vmul.f32 %v14242_v31, %v7064_v12  ;;  %v7110_v17 = vrot.slane %v18079_v7, 5 }
0x11de   :  { %v16152_v62 = vpop.eup %16151  ;;  %v7080_v15 = vmul.f32 %v14242_v31, %v7066_v60  ;;  %v14256_v60 = vld [vmem:[%s19666_s6 + $0x1] ss:$0 sm:$0xff] }
0x11df   :  { %v16154_v52 = vpop.eup %16153  ;;  %v18081_v49 = vadd.f32 %v14243_v39, %v7078_v20  ;;  %v7067_v9 = vmul.f32 %v16152_v62, %v18034_v44 }
0x11e0   :  { %v7068_v10 = vmul.f32 %v16154_v52, %v18037_v47  ;;  %v18086_v51 = vadd.f32 %v14243_v39, %v7080_v15 }
0x11e1   :  { %v7081_v34 = vmul.f32 %v14242_v31, %v7067_v9  ;;  %v7108_v58 = vrot.slane %v18081_v49, 6  ;;  %v19715_v9 = vld [vmem:[#allocation7_spill] sm:$0xff] }
0x11e2   :  { %v16156_v19 = vpop.eup %16155  ;;  %v7082_v27 = vmul.f32 %v14242_v31, %v7068_v10  ;;  %v7112_v13 = vrot.slane %v18086_v51, 4 }
0x11e3   :  { %v7069_v44 = vmul.f32 %v16156_v19, %v18044_v16  ;;  %v18094_v63 = vadd.f32 %v14243_v39, %v7081_v34  ;;  %v7109_v47 = vsel %vm109_vm1, %v7108_v58, %v7107_v18  ;;  %v14249_v16 = vld [vmem:[%s19661_s1 + $0x20] sm:$0xff] }
0x11e4   :  { %v18097_v22 = vadd.f32 %v14243_v39, %v7082_v27  ;;  %v7111_v61 = vsel %vm112_vm2, %v7110_v17, %v7109_v47  ;;  %v15900_v28 = vpack.c.bf16 %v14250_v57, %v14249_v16  ;;  %v14287_v17 = vld [vmem:[%s19595_s10 + $0x30] sm:$0xff]  ;;  %v19716_v47 = vld [vmem:[#allocation8_spill] sm:$0xff] }
0x11e5   :  { %v7083_v2 = vmul.f32 %v14242_v31, %v7069_v44  ;;  %v7113_v25 = vsel %vm115_vm3, %v7112_v13, %v7111_v61  ;;  %v7114_v53 = vrot.slane %v18094_v63, 3  ;;  %v14272_v31 = vld [vmem:[%s19593_s8 + $0x28] sm:$0xff]  ;;  %v14288_v13 = vld [vmem:[%s19595_s10 + $0x38] sm:$0xff] }
0x11e6   :  { %v7116_v14 = vrot.slane %v18097_v22, 2  ;;  %v15919_v3 = vpack.c.bf16 %v14272_v31, %v14271_v37  ;;  %v15931_v57 = vpack.c.bf16 %v14288_v13, %v14287_v17 }
0x11e7   :  { %v18103_v23 = vadd.f32 %v14243_v39, %v7083_v2  ;;  %v7115_v11 = vsel %vm118_vm4, %v7114_v53, %v7113_v25  ;;  %v14274_v39 = vld [vmem:[%s19593_s8 + $0x38] sm:$0xff] }
0x11e8   :  { %v7117_v56 = vsel %vm121_vm5, %v7116_v14, %v7115_v11  ;;  %15920 = vmatprep.subr.bf16.mxu1 %v15919_v3  ;;  %v15923_v30 = vpack.c.bf16 %v14274_v39, %v14273_v55 }
0x11e9   :  { %v7118_v26 = vrot.slane %v18103_v23, 1 }
0x11eb   :  { %v7119_v5 = vsel %vm124_vm8, %v7118_v26, %v7117_v56 }
0x11ec   :  { %15357 = vmatpush3.msra.mxu0 %v7119_v5  ;;  %15381 = vmatmul.mubr.msk.f32.vlgmr.msra.gmra.mrb[92].mxu1 %vm209_vm9, %v7119_v5 }
0x11ed   :  { %15359 = vmatmul.mubr.msk.f32.vlgmr.msra.gmra.mrb[90].mxu0 %vm89_vm7, %v16341_v38  ;;  %15899 = vmatprep.subr.bf16.mxu0 %v19713_v50 }
0x11ee   :  { %15901 = vmatpush3.bf16.msra.mxu0 %v15900_v28  ;;  %15369 = vmatprep.mubr.msk.f32.mxu0 %vm16383_vm6, %v19678_v42 }
0x11ef   :  { %15902 = vmatprep.subr.bf16.mxu0 %v19713_v50  ;;  %v14257_v50 = vld [vmem:[%s19664_s26 + $0x20] sm:$0xff]  ;;  %15922 = vmatpush3.bf16.msra.mxu1 %v15919_v3 }
0x11f0   :  { %v15911_v59 = vpack.c.bf16 %v14258_v6, %v14257_v50  ;;  %15924 = vmatprep.subr.bf16.mxu1 %v15923_v30 }
0x11f2   :  { %15904 = vmatpush3.bf16.msra.mxu0 %v15903_v33 }
0x11f3   :  { %15912 = vmatprep.subr.bf16.mxu0 %v15911_v59  ;;  %15926 = vmatpush3.bf16.msra.mxu1 %v15923_v30 }
0x11f4   :  { %15443 = vmatprep.subr.mxu1 %v19678_v42 }
0x12bf   :  { %v7343_v29 = vpop.f32.mrb[92].mxu1 }
0x12c0   :  { %v7187_v32 = vpop.f32.mrb[90].mxu0  ;;  %v15382_v54 = vpop.f32.mrb[93].mxu1 }
0x12c1   :  { %v7191_v40 = vmul.f32 %v19714_v24, %v7187_v32  ;;  %v15360_v41 = vpop.f32.mrb[91].mxu0  ;;  %v18285_v24 = vld [vmem:[%s19592_s7 + $0x1] ss:$0 sm:$0xff]  ;;  %s19734_s7 = smov 112  }
0x12c3   :  { %15370 = vmatmul.mubr.msk.f32.vlgmr.msra.gmra.mrb[92].mxu0 %vm209_vm9, %v7191_v40 }
0x12c4   :  { %15914 = vmatpush3.bf16.msra.mxu0 %v15911_v59 }
0x12c5   :  { %15916 = vmatprep.subr.bf16.mxu0 %v15915_v21 }
0x12c8   :  { %15918 = vmatpush3.bf16.msra.mxu0 %v15915_v21 }
0x12c9   :  { %15928 = vmatprep.subr.bf16.mxu0 %v15927_v0 }
0x1396   :  { %v7271_v12 = vpop.f32.mrb[92].mxu0 }
0x1397   :  { %v7344_v20 = vadd.f32 %v7343_v29, %v7271_v12  ;;  %v15371_v62 = vpop.f32.mrb[93].mxu0 }
0x1399   :  { %v7355_v15 = vadd.f32 %v14256_v60, %v7344_v20 }
0x139b   :  { %v7357_v52 = vcombine.high %v7355_v15, %v7355_v15  ;;  %v7364_v35 = vrot.slane %v7355_v15, %v19715_v9 }
0x139d   :  { %v7371_v10 = vrot.slane %v7357_v52, %v19715_v9  ;;  %v7372_v34 = vcombine.high %v7364_v35, %v7364_v35  ;;  %v7380_v58 = vrot.slane %v7364_v35, %v19715_v9  ;;  %v14290_v35 = vld [vmem:[%s19596_s11 + $0x1] ss:$0 sm:$0xff] }
0x139f   :  { %v7373_v19 = vcombine.high %v7371_v10, %v7371_v10  ;;  %v7394_v27 = vrot.slane %v7372_v34, %v19715_v9  ;;  %v7402_v18 = vcombine.high %v7380_v58, %v7380_v58  ;;  %v7387_v44 = vrot.slane %v7371_v10, %v19715_v9 }
0x13a0   :  { %v7409_v61 = vrot.slane %v7380_v58, %v19716_v47 }
0x13a1   :  { %v7413_v2 = vrot.slane %v7394_v27, %v19716_v47  ;;  %v7417_v25 = vrot.slane %v7402_v18, %v19716_v47  ;;  %v7404_v53 = vcombine.high %v7394_v27, %v7394_v27  ;;  %v7401_v16 = vrot.slane %v7373_v19, %v19715_v9 }
0x13a2   :  { %v18183_v11 = vsel %vm363_vm10, %v7409_v61, %v18077_v8  ;;  %v7425_v28 = vrot.slane %v7387_v44, %v19716_v47  ;;  %v7403_v5 = vcombine.high %v7387_v44, %v7387_v44 }
0x13a3   :  { %19718 = vst [vmem:[#allocation25_spill] sm:$0xff] %v18183_v11  ;;  %15391 = vmatprep.mubr.msk.f32.mxu0 %vm209_vm9, %v18183_v11  ;;  %15411 = vmatprep.mubr.msk.f32.mxu1 %vm209_vm9, %v18183_v11  ;;  %v18193_v26 = vsel %vm363_vm10, %v7413_v2, %v18074_v4  ;;  %v18198_v56 = vsel %vm363_vm10, %v7417_v25, %v18081_v49 }
0x13a4   :  { %19719 = vst [vmem:[#allocation26_spill] sm:$0xff] %v18193_v26  ;;  %19720 = vst [vmem:[#allocation27_spill] sm:$0xff] %v18198_v56  ;;  %v7421_v8 = vrot.slane %v7404_v53, %v19716_v47  ;;  %15392 = vmatmul.mubr.msk.f32.vlgmr.msra.gmra.mrb[94].mxu0 %vm209_vm9, %v18193_v26  ;;  %15412 = vmatmul.mubr.msk.f32.vlgmr.msra.gmra.mrb[94].mxu1 %vm209_vm9, %v18193_v26  ;;  %v7429_v49 = vrot.slane %v7401_v16, %v19716_v47 }
0x13a5   :  { %15394 = vmatprep.mubr.msk.f32.mxu0 %vm209_vm9, %v18198_v56  ;;  %15414 = vmatprep.mubr.msk.f32.mxu1 %vm209_vm9, %v18198_v56  ;;  %v7405_v38 = vcombine.high %v7401_v16, %v7401_v16  ;;  %v18223_v43 = vsel %vm363_vm10, %v7425_v28, %v18086_v51  ;;  %v7433_v36 = vrot.slane %v7403_v5, %v19716_v47 }
0x13a6   :  { %15930 = vmatpush3.bf16.msra.mxu0 %v15927_v0  ;;  %v18213_v4 = vsel %vm363_vm10, %v7421_v8, %v18079_v7  ;;  %19722 = vst [vmem:[#allocation29_spill] sm:$0xff] %v18223_v43  ;;  %v18233_v7 = vsel %vm363_vm10, %v7429_v49, %v18094_v63 }
0x13a7   :  { %19721 = vst [vmem:[#allocation28_spill] sm:$0xff] %v18213_v4  ;;  %15932 = vmatprep.subr.bf16.mxu0 %v15931_v57  ;;  %19723 = vst [vmem:[#allocation17_spill] sm:$0xff] %v18233_v7  ;;  %v7437_v33 = vrot.slane %v7405_v38, %v19716_v47  ;;  %v18244_v51 = vsel %vm363_vm10, %v7433_v36, %v18097_v22  ;;  %v14276_v22 = vld [vmem:[%s19594_s9 + $0x1] ss:$0 sm:$0xff] }
0x13a8   :  { %15395 = vmatmul.mubr.msk.f32.gmra.mrb[96].mxu0 %vm209_vm9, %v18213_v4  ;;  %15415 = vmatmul.mubr.msk.f32.gmra.mrb[96].mxu1 %vm209_vm9, %v18213_v4  ;;  %19724 = vst [vmem:[#allocation18_spill] sm:$0xff] %v18244_v51 }
0x13a9   :  { %15397 = vmatprep.mubr.msk.f32.mxu0 %vm209_vm9, %v18223_v43  ;;  %15417 = vmatprep.mubr.msk.f32.mxu1 %vm209_vm9, %v18223_v43  ;;  %v18253_v63 = vsel %vm363_vm10, %v7437_v33, %v18103_v23  ;;  %v18411_v33 = vld [vmem:[%s19677_s27] ss:$0 sm:$0xff] }
0x13aa   :  { %15934 = vmatpush3.bf16.msra.mxu0 %v15931_v57  ;;  %19725 = vst [vmem:[#allocation19_spill] sm:$0xff] %v18253_v63 }
0x13ab   :  { %15458 = vmatprep.subr.mxu0 %v19678_v42 }
0x13ac   :  { %15398 = vmatmul.mubr.msk.f32.gmra.mrb[98].mxu0 %vm209_vm9, %v18233_v7  ;;  %15418 = vmatmul.mubr.msk.f32.gmra.mrb[98].mxu1 %vm209_vm9, %v18233_v7 }
0x13ad   :  { %15400 = vmatprep.mubr.msk.f32.mxu0 %vm209_vm9, %v18244_v51  ;;  %15420 = vmatprep.mubr.msk.f32.mxu1 %vm209_vm9, %v18244_v51 }
0x13b0   :  { %15401 = vmatmul.mubr.msk.f32.gmra.mrb[100].mxu0 %vm209_vm9, %v18253_v63  ;;  %15421 = vmatmul.mubr.msk.f32.gmra.mrb[100].mxu1 %vm209_vm9, %v18253_v63 }
0x13b1   :  { %15431 = vmatprep.mubr.msk.f32.mxu0 %vm209_vm9, %v18183_v11  ;;  %15445 = vmatprep.mubr.msk.f32.mxu1 %vm16383_vm6, %v19678_v42 }
0x13b4   :  { %15432 = vmatmul.mubr.msk.f32.vlgmr.msra.gmra.mrb[102].mxu0 %vm209_vm9, %v18193_v26 }
0x13b5   :  { %15434 = vmatprep.mubr.msk.f32.mxu0 %vm209_vm9, %v18198_v56 }
0x13b8   :  { %15435 = vmatmul.mubr.msk.f32.gmra.mrb[104].mxu0 %vm209_vm9, %v18213_v4 }
0x13b9   :  { %15437 = vmatprep.mubr.msk.f32.mxu0 %vm209_vm9, %v18223_v43 }
0x13bc   :  { %15438 = vmatmul.mubr.msk.f32.gmra.mrb[106].mxu0 %vm209_vm9, %v18233_v7 }
0x13bd   :  { %15440 = vmatprep.mubr.msk.f32.mxu0 %vm209_vm9, %v18244_v51 }
0x13c0   :  { %15441 = vmatmul.mubr.msk.f32.gmra.mrb[108].mxu0 %vm209_vm9, %v18253_v63 }
0x13c1   :  { %15460 = vmatprep.mubr.msk.f32.mxu0 %vm16383_vm6, %v19678_v42 }
0x1477   :  { %v15393_v23 = vpop.f32.mrb[94].mxu0  ;;  %v15413_v29 = vpop.f32.mrb[94].mxu1 }
0x1478   :  { %v7557_v32 = vpop.f32.mrb[95].mxu0  ;;  %v7675_v54 = vpop.f32.mrb[95].mxu1  ;;  %v18299_v3 = vadd.f32 %v15413_v29, %v14276_v22  ;;  %v18313_v21 = vadd.f32 %v15393_v23, %v18285_v24 }
0x1479   :  { %v18287_v40 = vadd.f32 %v14276_v22, %v7675_v54  ;;  %v18294_v6 = vadd.f32 %v18285_v24, %v7557_v32 }
0x147b   :  { %9130 = vrot.lane.b32.xlu1 %v18287_v40, %s16386_s5  ;;  %v15396_v41 = vpop.f32.mrb[96].mxu0  ;;  %v15416_v50 = vpop.f32.mrb[96].mxu1  ;;  %15444 = vmatpush3.xpose.msk.msra.mxu1 %vm89_vm7, %v18287_v40 }
0x147c   :  { %v18296_v37 = vadd.f32 %v15416_v50, %v14276_v22  ;;  %v7567_v59 = vpop.f32.mrb[97].mxu0  ;;  %v7685_v31 = vpop.f32.mrb[97].mxu1  ;;  %15448 = vmatprep.subr.mxu1 %v19678_v42  ;;  %v18306_v48 = vadd.f32 %v15396_v41, %v18285_v24 }
0x147d   :  { %v18319_v45 = vadd.f32 %v14276_v22, %v7685_v31  ;;  %v18335_v20 = vadd.f32 %v18285_v24, %v7567_v59  ;;  %v18418_v59 = vld [vmem:[%s19677_s27 + $0x3] ss:$0 sm:$0xff] }
0x147e   :  { %15446 = vmatmul.mubr.msk.f32.vlgmr.msra.gmra.mrb[102].mxu1 %vm89_vm7, %v18294_v6  ;;  %15459 = vmatpush3.xpose.msk.msra.mxu0 %vm89_vm7, %v18296_v37 }
0x147f   :  { %v15399_v46 = vpop.f32.mrb[98].mxu0  ;;  %v15419_v55 = vpop.f32.mrb[98].mxu1  ;;  %15449 = vmatpush3.xpose.msk.msra.mxu1 %vm89_vm7, %v18299_v3  ;;  %15450 = vmatprep.mubr.msk.f32.mxu1 %vm16383_vm6, %v19678_v42 }
0x1480   :  { %v18315_v39 = vadd.f32 %v15419_v55, %v14276_v22  ;;  %v7577_v30 = vpop.f32.mrb[99].mxu0  ;;  %v7695_v1 = vpop.f32.mrb[99].mxu1  ;;  %15468 = vmatprep.subr.mxu0 %v19678_v42  ;;  %15453 = vmatprep.subr.mxu1 %v19678_v42  ;;  %v18328_v0 = vadd.f32 %v15399_v46, %v18285_v24  ;;  %v18424_v55 = vld [vmem:[%s19677_s27 + $0x1] ss:$0 sm:$0xff] }
0x1481   :  { %15461 = vmatmul.mubr.msk.f32.vlgmr.msra.gmra.mrb[110].mxu0 %vm89_vm7, %v18306_v48  ;;  %v18342_v9 = vadd.f32 %v14276_v22, %v7695_v1  ;;  %v18362_v58 = vadd.f32 %v18285_v24, %v7577_v30 }
0x1482   :  { %15451 = vmatmul.mubr.msk.f32.vlgmr.msra.gmra.mrb[104].mxu1 %vm89_vm7, %v18313_v21  ;;  %15469 = vmatpush3.xpose.msk.msra.mxu0 %vm89_vm7, %v18315_v39 }
0x1483   :  { %v15402_v12 = vpop.f32.mrb[100].mxu0  ;;  %v15422_v60 = vpop.f32.mrb[100].mxu1  ;;  %15454 = vmatpush3.xpose.msk.msra.mxu1 %vm89_vm7, %v18319_v45  ;;  %15470 = vmatprep.mubr.msk.f32.mxu0 %vm16383_vm6, %v19678_v42 }
0x1484   :  { %v18337_v62 = vadd.f32 %v15422_v60, %v14276_v22  ;;  %v7587_v15 = vpop.f32.mrb[101].mxu0  ;;  %v7705_v52 = vpop.f32.mrb[101].mxu1  ;;  %15455 = vmatprep.mubr.msk.f32.mxu1 %vm16383_vm6, %v19678_v42  ;;  %15478 = vmatprep.subr.mxu0 %v19678_v42  ;;  %v18355_v10 = vadd.f32 %v15402_v12, %v18285_v24 }
0x1485   :  { %15471 = vmatmul.mubr.msk.f32.vlgmr.msra.gmra.mrb[112].mxu0 %vm89_vm7, %v18328_v0  ;;  %15463 = vmatprep.subr.mxu1 %v19678_v42  ;;  %v18369_v18 = vadd.f32 %v14276_v22, %v7705_v52  ;;  %v18382_v13 = vadd.f32 %v18285_v24, %v7587_v15 }
0x1486   :  { %15456 = vmatmul.mubr.msk.f32.vlgmr.msra.gmra.mrb[106].mxu1 %vm89_vm7, %v18335_v20  ;;  %15479 = vmatpush3.xpose.msk.msra.mxu0 %vm89_vm7, %v18337_v62 }
0x1487   :  { %v15433_v34 = vpop.f32.mrb[102].mxu0  ;;  %15464 = vmatpush3.xpose.msk.msra.mxu1 %vm89_vm7, %v18342_v9  ;;  %15480 = vmatprep.mubr.msk.f32.mxu0 %vm16383_vm6, %v19678_v42 }
0x1488   :  { %v18364_v19 = vadd.f32 %v15433_v34, %v14290_v35  ;;  %v7793_v27 = vpop.f32.mrb[103].mxu0  ;;  %15465 = vmatprep.mubr.msk.f32.mxu1 %vm16383_vm6, %v19678_v42  ;;  %15488 = vmatprep.subr.mxu0 %v19678_v42  ;;  %v18431_v34 = vld [vmem:[%s19677_s27 + $0x2] ss:$0 sm:$0xff] }
0x1489   :  { %15481 = vmatmul.mubr.msk.f32.vlgmr.msra.gmra.mrb[114].mxu0 %vm89_vm7, %v18355_v10  ;;  %15473 = vmatprep.subr.mxu1 %v19678_v42  ;;  %v18389_v61 = vadd.f32 %v14290_v35, %v7793_v27 }
0x148a   :  { %15466 = vmatmul.mubr.msk.f32.vlgmr.msra.gmra.mrb[108].mxu1 %vm89_vm7, %v18362_v58  ;;  %15489 = vmatpush3.msra.mxu0 %v18364_v19 }
0x148b   :  { %v15436_v17 = vpop.f32.mrb[104].mxu0  ;;  %15474 = vmatpush3.xpose.msk.msra.mxu1 %vm89_vm7, %v18369_v18  ;;  %15475 = vmatprep.mubr.msk.f32.mxu1 %vm16383_vm6, %v19678_v42 }
0x148c   :  { %v18384_v44 = vadd.f32 %v15436_v17, %v14290_v35  ;;  %v7803_v47 = vpop.f32.mrb[105].mxu0  ;;  %15483 = vmatprep.subr.mxu1 %v19678_v42  ;;  %15490 = vmatprep.mubr.msk.f32.mxu0 %vm16383_vm6, %v19678_v42 }
0x148d   :  { %v18391_v2 = vadd.f32 %v14290_v35, %v7803_v47  ;;  %15498 = vmatprep.subr.mxu0 %v19678_v42  ;;  %v18437_v47 = vld [vmem:[%s19677_s27 + $0x5] ss:$0 sm:$0xff] }
0x148e   :  { %15476 = vmatmul.mubr.msk.f32.vlgmr.msra.gmra.mrb[110].mxu1 %vm89_vm7, %v18382_v13 }
0x148f   :  { %v15439_v25 = vpop.f32.mrb[106].mxu0  ;;  %15484 = vmatpush3.msra.mxu1 %v18389_v61  ;;  %15485 = vmatprep.mubr.msk.f32.mxu1 %vm16383_vm6, %v19678_v42 }
0x1490   :  { %v18399_v53 = vadd.f32 %v15439_v25, %v14290_v35  ;;  %v7813_v14 = vpop.f32.mrb[107].mxu0  ;;  %15493 = vmatprep.subr.mxu1 %v19678_v42 }
0x1491   :  { %v18402_v16 = vadd.f32 %v14290_v35, %v7813_v14 }
0x1493   :  { %v15442_v57 = vpop.f32.mrb[108].mxu0 }
0x1494   :  { %v18404_v8 = vadd.f32 %v15442_v57, %v14290_v35  ;;  %v7823_v28 = vpop.f32.mrb[109].mxu0 }
0x1495   :  { %v18406_v5 = vadd.f32 %v14290_v35, %v7823_v28 }
0x1551   :  { %v7904_v49 = vpop.f32.mrb[102].mxu1 }
0x1552   :  { %v8440_v38 = vmul.f32 0.35355338, %v7904_v49  ;;  %v15447_v36 = vpop.f32.mrb[103].mxu1 }
0x1554   :  { %v8448_v22 = vadd.f32 %v18411_v33, %v8440_v38  ;;  %v8132_v23 = vpop.f32.mrb[110].mxu0 }
0x1555   :  { %v8443_v29 = vmul.f32 0.35355338, %v8132_v23  ;;  %v7980_v32 = vpop.f32.mrb[104].mxu1  ;;  %v15462_v54 = vpop.f32.mrb[111].mxu0  ;;  %v18447_v23 = vld [vmem:[%s19677_s27 + $0x7] ss:$0 sm:$0xff] }
0x1556   :  { %v8441_v24 = vmul.f32 0.35355338, %v7980_v32  ;;  %v15452_v41 = vpop.f32.mrb[105].mxu1  ;;  %v8456_v50 = vsel %vm89_vm7, %v8448_v22, -inf }
0x1557   :  { %v8451_v31 = vadd.f32 %v18418_v59, %v8443_v29  ;;  %8457 = vmax.xlane.f32.xlu1 %v8456_v50 }
0x1558   :  { %v8284_v46 = vpop.f32.mrb[112].mxu0  ;;  %v8449_v30 = vadd.f32 %v18424_v55, %v8441_v24 }
0x1559   :  { %v8445_v1 = vmul.f32 0.35355338, %v8284_v46  ;;  %v8056_v12 = vpop.f32.mrb[106].mxu1  ;;  %v15472_v60 = vpop.f32.mrb[113].mxu0  ;;  %v8465_v15 = vsel %vm89_vm7, %v8451_v31, -inf }
0x155a   :  { %v8442_v52 = vmul.f32 0.35355338, %v8056_v12  ;;  %8466 = vmax.xlane.f32.xlu0 %v8465_v15  ;;  %v15457_v35 = vpop.f32.mrb[107].mxu1  ;;  %v8459_v49 = vsel %vm89_vm7, %v8449_v30, -inf  ;;  %v18462_v46 = vld [vmem:[%s19677_s27 + $0x4] ss:$0 sm:$0xff] }
0x155b   :  { %v18440_v25 = vadd.f32 %v18437_v47, %v8445_v1  ;;  %v18468_v60 = vld [vmem:[%s19677_s27 + $0x6] ss:$0 sm:$0xff] }
0x155c   :  { %v8450_v27 = vadd.f32 %v18431_v34, %v8442_v52  ;;  %v8436_v17 = vpop.f32.mrb[114].mxu0 }
0x155d   :  { %v8447_v14 = vmul.f32 0.35355338, %v8436_v17  ;;  %v8208_v57 = vpop.f32.mrb[108].mxu1  ;;  %v15482_v28 = vpop.f32.mrb[115].mxu0  ;;  %v8471_v54 = vsel %vm89_vm7, %v18440_v25, -inf }
0x155e   :  { %8460 = vmax.xlane.f32.xlu0 %v8459_v49  ;;  %v15467_v38 = vpop.f32.mrb[109].mxu1  ;;  %v8462_v36 = vsel %vm89_vm7, %v8450_v27, -inf  ;;  %v8444_v50 = vmul.f32 0.35355338, %v8208_v57  ;;  %v18475_v17 = vpop.permute.xlu1 %9130 }
0x155f   :  { %8463 = vmax.xlane.f32.xlu1 %v8462_v36  ;;  %v8455_v29 = vadd.f32 %v18447_v23, %v8447_v14 }
0x1560   :  { %v8452_v1 = vadd.f32 %v18462_v46, %v8444_v50 }
0x1561   :  { %v8360_v32 = vpop.f32.mrb[110].mxu1  ;;  %v8477_v41 = vsel %vm89_vm7, %v8455_v29, -inf }
0x1562   :  { %8472 = vmax.xlane.f32.xlu0 %v8471_v54  ;;  %v15477_v24 = vpop.f32.mrb[111].mxu1  ;;  %v8446_v12 = vmul.f32 0.35355338, %v8360_v32  ;;  %v8468_v52 = vsel %vm89_vm7, %v8452_v1, -inf }
0x1564   :  { %v8454_v15 = vadd.f32 %v18468_v60, %v8446_v12 }
0x1566   :  { %8478 = vmax.xlane.f32.xlu0 %v8477_v41  ;;  %v8474_v35 = vsel %vm89_vm7, %v8454_v15, -inf }
0x1570   :  { %9128 = vrot.lane.b32.xlu1 %v18294_v6, %s16386_s5 }
0x1574   :  { %9206 = vrot.lane.b32.xlu1 %v18313_v21, %s16386_s5 }
0x157c   :  { %9208 = vrot.lane.b32.xlu0 %v18299_v3, %s16386_s5 }
0x1598   :  { %8469 = vmax.xlane.f32.xlu1 %v8468_v52 }
0x159c   :  { %8475 = vmax.xlane.f32.xlu1 %v8474_v35 }
0x15ad   :  { %9286 = vrot.lane.b32.xlu1 %v18319_v45, %s16386_s5 }
0x15e4   :  { %v8458_v14 = vpop.xlane.xlu1 %8457 }
0x15e5   :  { %v8480_v57 = vsub.f32 %v8448_v22, %v8458_v14 }
0x15e7   :  { %v8488_v28 = vmul.f32 1.442695, %v8480_v57  ;;  %v8467_v49 = vpop.xlane.xlu0 %8466 }
0x15e8   :  { %v8483_v38 = vsub.f32 %v8451_v31, %v8467_v49 }
0x15e9   :  { %16157 = vpow2.f32 %v8488_v28 }
0x15ea   :  { %v8494_v36 = vmul.f32 1.442695, %v8483_v38 }
0x15eb   :  { %v8461_v32 = vpop.xlane.xlu0 %8460 }
0x15ec   :  { %16159 = vpow2.f32 %v8494_v36  ;;  %v8481_v54 = vsub.f32 %v8449_v30, %v8461_v32  ;;  %v8464_v30 = vpop.xlane.xlu1 %8463 }
0x15ed   :  { %v8482_v35 = vsub.f32 %v8450_v27, %v8464_v30 }
0x15ee   :  { %v8490_v24 = vmul.f32 1.442695, %v8481_v54 }
0x15ef   :  { %v8473_v14 = vpop.xlane.xlu0 %8472  ;;  %v8492_v57 = vmul.f32 1.442695, %v8482_v35 }
0x15f0   :  { %16161 = vpow2.f32 %v8490_v24  ;;  %v8485_v28 = vsub.f32 %v18440_v25, %v8473_v14  ;;  %v18494_v49 = vpop.permute.xlu1 %9128 }
0x15f1   :  { %16163 = vpow2.f32 %v8492_v57 }
0x15f2   :  { %v8498_v36 = vmul.f32 1.442695, %v8485_v28 }
0x15f3   :  { %v18477_v41 = vpop.eup %16157  ;;  %v8479_v38 = vpop.xlane.xlu0 %8478 }
0x15f4   :  { %v8504_v50 = vsel %vm89_vm7, %v18477_v41, 0.0  ;;  %v8487_v32 = vsub.f32 %v8455_v29, %v8479_v38  ;;  %v18496_v54 = vpop.permute.xlu1 %9206  ;;  %16165 = vpow2.f32 %v8498_v36 }
0x15f5   :  { %8505 = vadd.xlane.f32.xlu1 %v8504_v50 }
0x15f6   :  { %v18481_v12 = vpop.eup %16159  ;;  %v8502_v24 = vmul.f32 1.442695, %v8487_v32 }
0x15f7   :  { %v8513_v22 = vsel %vm89_vm7, %v18481_v12, 0.0 }
0x15f8   :  { %8514 = vadd.xlane.f32.xlu0 %v8513_v22  ;;  %16167 = vpow2.f32 %v8502_v24 }
0x15fa   :  { %v18485_v31 = vpop.eup %16161 }
0x15fb   :  { %v8507_v52 = vsel %vm89_vm7, %v18485_v31, 0.0  ;;  %v18498_v22 = vpop.eup %16163 }
0x15fc   :  { %8508 = vadd.xlane.f32.xlu0 %v8507_v52  ;;  %v8510_v25 = vsel %vm89_vm7, %v18498_v22, 0.0 }
0x15fe   :  { %v18502_v57 = vpop.eup %16165 }
0x15ff   :  { %v8519_v29 = vsel %vm89_vm7, %v18502_v57, 0.0 }
0x1602   :  { %v18506_v28 = vpop.eup %16167 }
0x1603   :  { %v8525_v38 = vsel %vm89_vm7, %v18506_v28, 0.0 }
0x1606   :  { %9284 = vrot.lane.b32.xlu1 %v18335_v20, %s16386_s5 }
0x1612   :  { %9364 = vrot.lane.b32.xlu0 %v18296_v37, %s16386_s5 }
0x1625   :  { %v8470_v50 = vpop.xlane.xlu1 %8469 }
0x1626   :  { %v8484_v52 = vsub.f32 %v8452_v1, %v8470_v50  ;;  %v18538_v50 = vpop.permute.xlu0 %9208 }
0x1628   :  { %v8496_v27 = vmul.f32 1.442695, %v8484_v52 }
0x1629   :  { %v8476_v30 = vpop.xlane.xlu1 %8475 }
0x162a   :  { %16169 = vpow2.f32 %v8496_v27  ;;  %v8486_v35 = vsub.f32 %v8454_v15, %v8476_v30  ;;  %8511 = vadd.xlane.f32.xlu1 %v8510_v25 }
0x162c   :  { %v8500_v14 = vmul.f32 1.442695, %v8486_v35 }
0x162d   :  { %v18536_v24 = vpop.permute.xlu1 %9286 }
0x162e   :  { %16171 = vpow2.f32 %v8500_v14 }
0x1631   :  { %8520 = vadd.xlane.f32.xlu0 %v8519_v29 }
0x1634   :  { %v18508_v1 = vpop.eup %16169 }
0x1635   :  { %8526 = vadd.xlane.f32.xlu0 %v8525_v38  ;;  %v8516_v15 = vsel %vm89_vm7, %v18508_v1, 0.0 }
0x1636   :  { %8517 = vadd.xlane.f32.xlu1 %v8516_v15 }
0x1638   :  { %v18514_v36 = vpop.eup %16171 }
0x1639   :  { %v8522_v32 = vsel %vm89_vm7, %v18514_v36, 0.0 }
0x163a   :  { %8523 = vadd.xlane.f32.xlu1 %v8522_v32 }
0x164b   :  { %9362 = vrot.lane.b32.xlu0 %v18306_v48, %s16386_s5  ;;  %9442 = vrot.lane.b32.xlu1 %v18342_v9, %s16386_s5 }
0x164f   :  { %9520 = vrot.lane.b32.xlu0 %v18315_v39, %s16386_s5  ;;  %9440 = vrot.lane.b32.xlu1 %v18362_v58, %s16386_s5 }
0x1653   :  { %9518 = vrot.lane.b32.xlu0 %v18328_v0, %s16386_s5  ;;  %9598 = vrot.lane.b32.xlu1 %v18369_v18, %s16386_s5 }
0x1657   :  { %9676 = vrot.lane.b32.xlu0 %v18337_v62, %s16386_s5  ;;  %9596 = vrot.lane.b32.xlu1 %v18382_v13, %s16386_s5 }
0x165b   :  { %9674 = vrot.lane.b32.xlu0 %v18355_v10, %s16386_s5 }
0x1682   :  { %v8506_v52 = vpop.xlane.xlu1 %8505 }
0x1683   :  { %16173 = vrcp.f32 %v8506_v52 }
0x1685   :  { %v8515_v27 = vpop.xlane.xlu0 %8514 }
0x1689   :  { %v8509_v30 = vpop.xlane.xlu0 %8508 }
0x168a   :  { %16175 = vrcp.f32 %v8509_v30 }
0x168b   :  { %16177 = vrcp.f32 %v8515_v27 }
0x168d   :  { %v16174_v25 = vpop.eup %16173  ;;  %v9365_v32 = vpop.permute.xlu0 %9364 }
0x168e   :  { %v8536_v35 = vmul.f32 %v16174_v25, %v18477_v41 }
0x1690   :  { %15486 = vmatmul.mubr.msk.f32.vlgmr.msra.gmra.mrb[112].mxu1 %vm89_vm7, %v8536_v35 }
0x1691   :  { %15494 = vmatpush3.msra.mxu1 %v18391_v2  ;;  %15495 = vmatprep.mubr.msk.f32.mxu1 %vm16383_vm6, %v19678_v42 }
0x1692   :  { %15503 = vmatprep.subr.mxu1 %v19678_v42 }
0x1694   :  { %v16176_v14 = vpop.eup %16175 }
0x1695   :  { %v8537_v29 = vmul.f32 %v16176_v14, %v18485_v31  ;;  %v16178_v38 = vpop.eup %16177  ;;  %v9285_v31 = vpop.permute.xlu1 %9284 }
0x1696   :  { %v8539_v41 = vmul.f32 %v16178_v38, %v18481_v12 }
0x1697   :  { %15491 = vmatmul.mubr.msk.f32.vlgmr.msra.gmra.mrb[116].mxu0 %vm89_vm7, %v8537_v29 }
0x1698   :  { %15499 = vmatpush3.msra.mxu0 %v18384_v44  ;;  %15500 = vmatprep.mubr.msk.f32.mxu0 %vm16383_vm6, %v19678_v42 }
0x1699   :  { %15508 = vmatprep.subr.mxu0 %v19678_v42 }
0x169b   :  { %15501 = vmatmul.mubr.msk.f32.vlgmr.msra.gmra.mrb[118].mxu0 %vm89_vm7, %v8539_v41 }
0x169c   :  { %15509 = vmatpush3.msra.mxu0 %v18399_v53  ;;  %15510 = vmatprep.mubr.msk.f32.mxu0 %vm16383_vm6, %v19678_v42 }
0x169d   :  { %15518 = vmatprep.subr.mxu0 %v19678_v42 }
0x16b7   :  { %v8512_v15 = vpop.xlane.xlu1 %8511 }
0x16b8   :  { %16179 = vrcp.f32 %v8512_v15 }
0x16be   :  { %v8521_v52 = vpop.xlane.xlu0 %8520 }
0x16bf   :  { %16181 = vrcp.f32 %v8521_v52 }
0x16c2   :  { %v16180_v27 = vpop.eup %16179  ;;  %v8527_v30 = vpop.xlane.xlu0 %8526 }
0x16c3   :  { %16183 = vrcp.f32 %v8527_v30  ;;  %v8518_v25 = vpop.xlane.xlu1 %8517  ;;  %v8538_v12 = vmul.f32 %v16180_v27, %v18498_v22 }
0x16c4   :  { %16185 = vrcp.f32 %v8518_v25 }
0x16c5   :  { %15496 = vmatmul.mubr.msk.f32.vlgmr.msra.gmra.mrb[114].mxu1 %vm89_vm7, %v8538_v12 }
0x16c6   :  { %15504 = vmatpush3.msra.mxu1 %v18402_v16  ;;  %15505 = vmatprep.mubr.msk.f32.mxu1 %vm16383_vm6, %v19678_v42  ;;  %v9363_v29 = vpop.permute.xlu0 %9362 }
0x16c7   :  { %v8524_v35 = vpop.xlane.xlu1 %8523  ;;  %15513 = vmatprep.subr.mxu1 %v19678_v42 }
0x16c8   :  { %16187 = vrcp.f32 %v8524_v35 }
0x16c9   :  { %v16182_v14 = vpop.eup %16181 }
0x16ca   :  { %v8541_v38 = vmul.f32 %v16182_v14, %v18502_v57  ;;  %v9521_v27 = vpop.permute.xlu0 %9520 }
0x16cc   :  { %15511 = vmatmul.mubr.msk.f32.vlgmr.msra.gmra.mrb[120].mxu0 %vm89_vm7, %v8541_v38 }
0x16cd   :  { %v16184_v41 = vpop.eup %16183  ;;  %15519 = vmatpush3.msra.mxu0 %v18404_v8  ;;  %15520 = vmatprep.mubr.msk.f32.mxu0 %vm16383_vm6, %v19678_v42 }
0x16ce   :  { %v16186_v22 = vpop.eup %16185  ;;  %v8543_v15 = vmul.f32 %v16184_v41, %v18506_v28  ;;  %15528 = vmatprep.subr.mxu0 %v19678_v42  ;;  %v9519_v30 = vpop.permute.xlu0 %9518 }
0x16cf   :  { %v8540_v52 = vmul.f32 %v16186_v22, %v18508_v1  ;;  %v9443_v1 = vpop.permute.xlu1 %9442 }
0x16d0   :  { %15521 = vmatmul.mubr.msk.f32.vlgmr.msra.gmra.mrb[122].mxu0 %vm89_vm7, %v8543_v15 }
0x16d1   :  { %15506 = vmatmul.mubr.msk.f32.vlgmr.msra.gmra.mrb[116].mxu1 %vm89_vm7, %v8540_v52  ;;  %15530 = vmatprep.mubr.msk.f32.mxu0 %vm16383_vm6, %v19678_v42 }
0x16d2   :  { %v16188_v57 = vpop.eup %16187  ;;  %15514 = vmatpush3.msra.mxu1 %v18406_v5  ;;  %15515 = vmatprep.mubr.msk.f32.mxu1 %vm16383_vm6, %v19678_v42 }
0x16d3   :  { %v8542_v28 = vmul.f32 %v16188_v57, %v18514_v36  ;;  %15523 = vmatprep.subr.mxu1 %v19678_v42  ;;  %v9441_v36 = vpop.permute.xlu1 %9440 }
0x16d4   :  { %15529 = vmatpush3.xpose.msk.msra.mxu0 %vm89_vm7, %v18538_v50  ;;  %v9677_v50 = vpop.permute.xlu0 %9676 }
0x16d5   :  { %15516 = vmatmul.mubr.msk.f32.vlgmr.msra.gmra.mrb[118].mxu1 %vm89_vm7, %v8542_v28  ;;  %15538 = vmatprep.subr.mxu0 %v19678_v42 }
0x16d6   :  { %15525 = vmatprep.mubr.msk.f32.mxu1 %vm16383_vm6, %v19678_v42 }
0x16d7   :  { %15531 = vmatmul.mubr.msk.f32.vlgmr.msra.gmra.mrb[124].mxu0 %vm89_vm7, %v18496_v54 }
0x16d8   :  { %15539 = vmatpush3.xpose.msk.msra.mxu0 %vm89_vm7, %v9365_v32  ;;  %15540 = vmatprep.mubr.msk.f32.mxu0 %vm16383_vm6, %v19678_v42 }
0x16d9   :  { %15524 = vmatpush3.xpose.msk.msra.mxu1 %vm89_vm7, %v18475_v17  ;;  %15548 = vmatprep.subr.mxu0 %v19678_v42  ;;  %v9599_v17 = vpop.permute.xlu1 %9598 }
0x16da   :  { %15533 = vmatprep.subr.mxu1 %v19678_v42 }
0x16db   :  { %15541 = vmatmul.mubr.msk.f32.vlgmr.msra.gmra.mrb[126].mxu0 %vm89_vm7, %v9363_v29 }
0x16dc   :  { %15526 = vmatmul.mubr.msk.f32.vlgmr.msra.gmra.mrb[120].mxu1 %vm89_vm7, %v18494_v49  ;;  %15549 = vmatpush3.xpose.msk.msra.mxu0 %vm89_vm7, %v9521_v27  ;;  %v9675_v49 = vpop.permute.xlu0 %9674 }
0x16dd   :  { %15534 = vmatpush3.xpose.msk.msra.mxu1 %vm89_vm7, %v18536_v24  ;;  %15550 = vmatprep.mubr.msk.f32.mxu0 %vm16383_vm6, %v19678_v42  ;;  %v9597_v54 = vpop.permute.xlu1 %9596 }
0x16de   :  { %15535 = vmatprep.mubr.msk.f32.mxu1 %vm16383_vm6, %v19678_v42  ;;  %15558 = vmatprep.subr.mxu0 %v19678_v42 }
0x16df   :  { %15551 = vmatmul.mubr.msk.f32.vlgmr.msra.gmra.mrb[128].mxu0 %vm89_vm7, %v9519_v30  ;;  %15543 = vmatprep.subr.mxu1 %v19678_v42 }
0x16e0   :  { %15536 = vmatmul.mubr.msk.f32.vlgmr.msra.gmra.mrb[122].mxu1 %vm89_vm7, %v9285_v31  ;;  %15559 = vmatpush3.xpose.msk.msra.mxu0 %vm89_vm7, %v9677_v50 }
0x16e1   :  { %15544 = vmatpush3.xpose.msk.msra.mxu1 %vm89_vm7, %v9443_v1  ;;  %15560 = vmatprep.mubr.msk.f32.mxu0 %vm16383_vm6, %v19678_v42 }
0x16e2   :  { %15545 = vmatprep.mubr.msk.f32.mxu1 %vm16383_vm6, %v19678_v42  ;;  %15553 = vmatprep.subr.mxu1 %v19678_v42 }
0x16e3   :  { %15561 = vmatmul.mubr.msk.f32.vlgmr.msra.gmra.mrb[130].mxu0 %vm89_vm7, %v9675_v49  ;;  %15568 = vmatprep.subr.mxu0 %v19678_v42 }
0x16e4   :  { %15546 = vmatmul.mubr.msk.f32.vlgmr.msra.gmra.mrb[124].mxu1 %vm89_vm7, %v9441_v36  ;;  %15570 = vmatprep.mubr.msk.f32.mxu0 %vm16383_vm6, %v19678_v42 }
0x16e5   :  { %15554 = vmatpush3.xpose.msk.msra.mxu1 %vm89_vm7, %v9599_v17  ;;  %15555 = vmatprep.mubr.msk.f32.mxu1 %vm16383_vm6, %v19678_v42 }
0x16e6   :  { %15563 = vmatprep.subr.mxu1 %v19678_v42 }
0x16e8   :  { %15556 = vmatmul.mubr.msk.f32.vlgmr.msra.gmra.mrb[126].mxu1 %vm89_vm7, %v9597_v54 }
0x16e9   :  { %15565 = vmatprep.mubr.msk.f32.mxu1 %vm16383_vm6, %v19678_v42 }
0x1763   :  { %v18629_v24 = vpop.f32.mrb[112].mxu1 }
0x1764   :  { %19726 = vst [vmem:[#allocation21_spill] sm:$0xff] %v18629_v24  ;;  %v15487_v31 = vpop.f32.mrb[113].mxu1 }
0x176a   :  { %v18631_v32 = vpop.f32.mrb[116].mxu0 }
0x176b   :  { %19727 = vst [vmem:[#allocation20_spill] sm:$0xff] %v18631_v32  ;;  %v15492_v25 = vpop.f32.mrb[117].mxu0 }
0x176e   :  { %v18633_v12 = vpop.f32.mrb[118].mxu0 }
0x176f   :  { %19728 = vst [vmem:[#allocation23_spill] sm:$0xff] %v18633_v12  ;;  %v15502_v35 = vpop.f32.mrb[119].mxu0 }
0x1798   :  { %v18635_v14 = vpop.f32.mrb[114].mxu1 }
0x1799   :  { %19729 = vst [vmem:[#allocation22_spill] sm:$0xff] %v18635_v14  ;;  %v15497_v29 = vpop.f32.mrb[115].mxu1 }
0x179f   :  { %v18637_v38 = vpop.f32.mrb[120].mxu0 }
0x17a0   :  { %19730 = vst [vmem:[#allocation24_spill] sm:$0xff] %v18637_v38  ;;  %v15512_v41 = vpop.f32.mrb[121].mxu0 }
0x17a3   :  { %v18639_v22 = vpop.f32.mrb[122].mxu0 }
0x17a4   :  { %19731 = vst [vmem:[#allocation10_spill] sm:$0xff] %v18639_v22  ;;  %v18641_v15 = vpop.f32.mrb[116].mxu1  ;;  %v15522_v52 = vpop.f32.mrb[123].mxu0 }
0x17a5   :  { %19732 = vst [vmem:[#allocation9_spill] sm:$0xff] %v18641_v15  ;;  %v15507_v27 = vpop.f32.mrb[117].mxu1 }
0x17a8   :  { %v18643_v57 = vpop.f32.mrb[118].mxu1 }
0x17a9   :  { %19733 = vst [vmem:[#allocation11_spill] sm:$0xff] %v18643_v57  ;;  %v15517_v28 = vpop.f32.mrb[119].mxu1 }
0x17aa   :  { %v9280_v1 = vpop.f32.mrb[124].mxu0 }
0x17ab   :  { %v9753_v30 = vmul.f32 0.35355338, %v9280_v1  ;;  %v15532_v36 = vpop.f32.mrb[125].mxu0 }
0x17ad   :  { %v9761_v50 = vadd.f32 %v18424_v55, %v9753_v30 }
0x17ae   :  { %v9436_v17 = vpop.f32.mrb[126].mxu0 }
0x17af   :  { %v9202_v49 = vpop.f32.mrb[120].mxu1  ;;  %v15542_v54 = vpop.f32.mrb[127].mxu0  ;;  %v9771_v31 = vsel %vm89_vm7, %v9761_v50, -inf  ;;  %v9755_v52 = vmul.f32 0.35355338, %v9436_v17 }
0x17b0   :  { %v9752_v25 = vmul.f32 0.35355338, %v9202_v49  ;;  %9772 = vmax.xlane.f32.xlu0 %v9771_v31  ;;  %v15527_v35 = vpop.f32.mrb[121].mxu1 }
0x17b1   :  { %v9763_v36 = vadd.f32 %v18418_v59, %v9755_v52 }
0x17b2   :  { %v9760_v29 = vadd.f32 %v18411_v33, %v9752_v25  ;;  %v9592_v41 = vpop.f32.mrb[128].mxu0 }
0x17b3   :  { %v9358_v27 = vpop.f32.mrb[122].mxu1  ;;  %v15552_v63 = vpop.f32.mrb[129].mxu0  ;;  %v9757_v31 = vmul.f32 0.35355338, %v9592_v41 }
0x17b4   :  { %v9754_v28 = vmul.f32 0.35355338, %v9358_v27  ;;  %v15537_v51 = vpop.f32.mrb[123].mxu1  ;;  %v9768_v1 = vsel %vm89_vm7, %v9760_v29, -inf }
0x17b5   :  { %9769 = vmax.xlane.f32.xlu1 %v9768_v1  ;;  %v9777_v51 = vsel %vm89_vm7, %v9763_v36, -inf  ;;  %v9765_v25 = vadd.f32 %v18437_v47, %v9757_v31 }
0x17b6   :  { %v9762_v55 = vadd.f32 %v18431_v34, %v9754_v28  ;;  %v9748_v30 = vpop.f32.mrb[130].mxu0 }
0x17b7   :  { %v9514_v54 = vpop.f32.mrb[124].mxu1  ;;  %v15562_v49 = vpop.f32.mrb[131].mxu0  ;;  %v9759_v27 = vmul.f32 0.35355338, %v9748_v30  ;;  %v9783_v52 = vsel %vm89_vm7, %v9765_v25, -inf }
0x17b8   :  { %v9756_v35 = vmul.f32 0.35355338, %v9514_v54  ;;  %v15547_v7 = vpop.f32.mrb[125].mxu1  ;;  %v9774_v33 = vsel %vm89_vm7, %v9762_v55, -inf }
0x17b9   :  { %9775 = vmax.xlane.f32.xlu0 %v9774_v33  ;;  %v9767_v7 = vadd.f32 %v18447_v23, %v9759_v27 }
0x17ba   :  { %v9764_v63 = vadd.f32 %v18462_v46, %v9756_v35 }
0x17bb   :  { %v9670_v17 = vpop.f32.mrb[126].mxu1  ;;  %v9789_v54 = vsel %vm89_vm7, %v9767_v7, -inf }
0x17bc   :  { %v9758_v34 = vmul.f32 0.35355338, %v9670_v17  ;;  %v15557_v28 = vpop.f32.mrb[127].mxu1  ;;  %v9780_v59 = vsel %vm89_vm7, %v9764_v63, -inf }
0x17bd   :  { %9778 = vmax.xlane.f32.xlu0 %v9777_v51  ;;  %9781 = vmax.xlane.f32.xlu1 %v9780_v59 }
0x17be   :  { %v9766_v41 = vadd.f32 %v18468_v60, %v9758_v34 }
0x17c0   :  { %v9786_v1 = vsel %vm89_vm7, %v9766_v41, -inf }
0x17c1   :  { %9784 = vmax.xlane.f32.xlu0 %v9783_v52  ;;  %9787 = vmax.xlane.f32.xlu1 %v9786_v1 }
0x17c5   :  { %9790 = vmax.xlane.f32.xlu0 %v9789_v54 }
0x17d2   :  { %9857 = vrot.lane.b32.xlu1 %v18389_v61, %s16386_s5 }
0x17d6   :  { %10011 = vrot.lane.b32.xlu1 %v18391_v2, %s16386_s5 }
0x17da   :  { %10088 = vrot.lane.b32.xlu1 %v18384_v44, %s16386_s5 }
0x17db   :  { %9934 = vrot.lane.b32.xlu0 %v18364_v19, %s16386_s5 }
0x17de   :  { %10165 = vrot.lane.b32.xlu1 %v18402_v16, %s16386_s5 }
0x17df   :  { %10242 = vrot.lane.b32.xlu0 %v18399_v53, %s16386_s5 }
0x17e2   :  { %10319 = vrot.lane.b32.xlu1 %v18406_v5, %s16386_s5 }
0x17e3   :  { %10396 = vrot.lane.b32.xlu0 %v18404_v8, %s16386_s5  ;;  %s19735_s5 = smov 104  }
0x17e6   :  { %10474 = vrot.lane.b32.xlu1 %v18287_v40, %s19734_s7 }
0x17e7   :  { %10552 = vrot.lane.b32.xlu0 %v18299_v3, %s19734_s7 }
0x17ea   :  { %10472 = vrot.lane.b32.xlu1 %v18294_v6, %s19734_s7 }
0x17eb   :  { %10550 = vrot.lane.b32.xlu0 %v18313_v21, %s19734_s7 }
0x17ee   :  { %10630 = vrot.lane.b32.xlu1 %v18319_v45, %s19734_s7 }
0x17ef   :  { %10708 = vrot.lane.b32.xlu0 %v18296_v37, %s19734_s7 }
0x17f2   :  { %10628 = vrot.lane.b32.xlu1 %v18335_v20, %s19734_s7 }
0x183d   :  { %v9773_v47 = vpop.xlane.xlu0 %9772 }
0x183e   :  { %v9793_v23 = vsub.f32 %v9761_v50, %v9773_v47 }
0x1840   :  { %v9802_v60 = vmul.f32 1.442695, %v9793_v23 }
0x1842   :  { %16189 = vpow2.f32 %v9802_v60  ;;  %v9770_v30 = vpop.xlane.xlu1 %9769 }
0x1843   :  { %v9792_v49 = vsub.f32 %v9760_v29, %v9770_v30 }
0x1845   :  { %v9800_v31 = vmul.f32 1.442695, %v9792_v49 }
0x1846   :  { %v9776_v35 = vpop.xlane.xlu0 %9775 }
0x1847   :  { %16191 = vpow2.f32 %v9800_v31  ;;  %v9794_v33 = vsub.f32 %v9762_v55, %v9776_v35 }
0x1849   :  { %v9804_v17 = vmul.f32 1.442695, %v9794_v33 }
0x184a   :  { %v9779_v51 = vpop.xlane.xlu0 %9778  ;;  %v9782_v27 = vpop.xlane.xlu1 %9781 }
0x184b   :  { %16193 = vpow2.f32 %v9804_v17  ;;  %v9795_v34 = vsub.f32 %v9763_v36, %v9779_v51  ;;  %v9796_v28 = vsub.f32 %v9764_v63, %v9782_v27 }
0x184c   :  { %v18691_v59 = vpop.eup %16189 }
0x184d   :  { %v9806_v52 = vmul.f32 1.442695, %v9795_v34  ;;  %v9808_v1 = vmul.f32 1.442695, %v9796_v28  ;;  %v9819_v50 = vsel %vm89_vm7, %v18691_v59, 0.0 }
0x184e   :  { %9820 = vadd.xlane.f32.xlu0 %v9819_v50  ;;  %v9785_v54 = vpop.xlane.xlu0 %9784  ;;  %v9788_v29 = vpop.xlane.xlu1 %9787 }
0x184f   :  { %16195 = vpow2.f32 %v9806_v52  ;;  %v9797_v47 = vsub.f32 %v9765_v25, %v9785_v54  ;;  %v9798_v23 = vsub.f32 %v9766_v41, %v9788_v29 }
0x1850   :  { %16197 = vpow2.f32 %v9808_v1 }
0x1851   :  { %v18695_v55 = vpop.eup %16191  ;;  %v9810_v60 = vmul.f32 1.442695, %v9797_v47  ;;  %v9812_v30 = vmul.f32 1.442695, %v9798_v23 }
0x1852   :  { %v9791_v36 = vpop.xlane.xlu0 %9790  ;;  %v9858_v63 = vpop.permute.xlu1 %9857  ;;  %v9816_v49 = vsel %vm89_vm7, %v18695_v55, 0.0 }
0x1853   :  { %16199 = vpow2.f32 %v9810_v60  ;;  %v9799_v31 = vsub.f32 %v9767_v7, %v9791_v36  ;;  %9817 = vadd.xlane.f32.xlu1 %v9816_v49  ;;  %15564 = vmatpush3.msra.mxu1 %v9858_v63 }
0x1854   :  { %16201 = vpow2.f32 %v9812_v30  ;;  %15573 = vmatprep.subr.mxu1 %v19678_v42 }
0x1855   :  { %v18700_v35 = vpop.eup %16193  ;;  %v9814_v25 = vmul.f32 1.442695, %v9799_v31 }
0x1856   :  { %v9935_v41 = vpop.permute.xlu0 %9934  ;;  %v9822_v33 = vsel %vm89_vm7, %v18700_v35, 0.0  ;;  %v10012_v29 = vpop.permute.xlu1 %10011 }
0x1857   :  { %16203 = vpow2.f32 %v9814_v25  ;;  %15569 = vmatpush3.msra.mxu0 %v9935_v41  ;;  %9823 = vadd.xlane.f32.xlu1 %v9822_v33 }
0x1858   :  { %15578 = vmatprep.subr.mxu0 %v19678_v42 }
0x1859   :  { %v18705_v17 = vpop.eup %16195 }
0x185a   :  { %v18707_v7 = vpop.eup %16197  ;;  %v9825_v51 = vsel %vm89_vm7, %v18705_v17, 0.0  ;;  %v10089_v47 = vpop.permute.xlu1 %10088 }
0x185b   :  { %9826 = vadd.xlane.f32.xlu0 %v9825_v51  ;;  %v9828_v27 = vsel %vm89_vm7, %v18707_v7, 0.0  ;;  %v10243_v60 = vpop.permute.xlu0 %10242 }
0x185c   :  { %9829 = vadd.xlane.f32.xlu1 %v9828_v27 }
0x185d   :  { %v18713_v34 = vpop.eup %16199 }
0x185e   :  { %v18715_v28 = vpop.eup %16201  ;;  %v9831_v52 = vsel %vm89_vm7, %v18713_v34, 0.0  ;;  %v10166_v23 = vpop.permute.xlu1 %10165 }
0x185f   :  { %9832 = vadd.xlane.f32.xlu0 %v9831_v52  ;;  %v9834_v1 = vsel %vm89_vm7, %v18715_v28, 0.0  ;;  %v18769_v30 = vpop.permute.xlu0 %10396 }
0x1860   :  { %9835 = vadd.xlane.f32.xlu1 %v9834_v1 }
0x1861   :  { %v18721_v50 = vpop.eup %16203 }
0x1862   :  { %v9837_v54 = vsel %vm89_vm7, %v18721_v50, 0.0 }
0x1863   :  { %9838 = vadd.xlane.f32.xlu0 %v9837_v54  ;;  %v18773_v63 = vpop.permute.xlu0 %10552 }
0x1871   :  { %10786 = vrot.lane.b32.xlu1 %v18342_v9, %s19734_s7 }
0x1875   :  { %10784 = vrot.lane.b32.xlu1 %v18362_v58, %s19734_s7 }
0x1879   :  { %10942 = vrot.lane.b32.xlu1 %v18369_v18, %s19734_s7  ;;  %10706 = vrot.lane.b32.xlu0 %v18306_v48, %s19734_s7 }
0x187d   :  { %10940 = vrot.lane.b32.xlu1 %v18382_v13, %s19734_s7  ;;  %10864 = vrot.lane.b32.xlu0 %v18315_v39, %s19734_s7 }
0x1881   :  { %11200 = vrot.lane.b32.xlu1 %v18389_v61, %s19734_s7  ;;  %10862 = vrot.lane.b32.xlu0 %v18328_v0, %s19734_s7 }
0x1885   :  { %11352 = vrot.lane.b32.xlu1 %v18391_v2, %s19734_s7  ;;  %11020 = vrot.lane.b32.xlu0 %v18337_v62, %s19734_s7 }
0x1889   :  { %11428 = vrot.lane.b32.xlu1 %v18384_v44, %s19734_s7  ;;  %11018 = vrot.lane.b32.xlu0 %v18355_v10, %s19734_s7 }
0x188d   :  { %11504 = vrot.lane.b32.xlu1 %v18402_v16, %s19734_s7  ;;  %11276 = vrot.lane.b32.xlu0 %v18364_v19, %s19734_s7 }
0x1891   :  { %11656 = vrot.lane.b32.xlu1 %v18406_v5, %s19734_s7  ;;  %11580 = vrot.lane.b32.xlu0 %v18399_v53, %s19734_s7 }
0x1895   :  { %11810 = vrot.lane.b32.xlu1 %v18287_v40, %s19735_s5  ;;  %11732 = vrot.lane.b32.xlu0 %v18404_v8, %s19734_s7  ;;  %v10320_v40 = vpop.permute.xlu1 %10319 }
0x1899   :  { %11808 = vrot.lane.b32.xlu1 %v18294_v6, %s19735_s5  ;;  %11888 = vrot.lane.b32.xlu0 %v18299_v3, %s19735_s5  ;;  %v18771_v36 = vpop.permute.xlu1 %10474  ;;  %v18777_v3 = vpop.permute.xlu0 %10550 }
0x189d   :  { %11966 = vrot.lane.b32.xlu1 %v18319_v45, %s19735_s5  ;;  %11886 = vrot.lane.b32.xlu0 %v18313_v21, %s19735_s5  ;;  %v18775_v6 = vpop.permute.xlu1 %10472  ;;  %v18781_v45 = vpop.permute.xlu0 %10708 }
0x18a1   :  { %v18779_v49 = vpop.permute.xlu1 %10630 }
0x18a5   :  { %v18783_v31 = vpop.permute.xlu1 %10628 }
0x18db   :  { %v9821_v21 = vpop.xlane.xlu0 %9820 }
0x18dc   :  { %16205 = vrcp.f32 %v9821_v21 }
0x18e0   :  { %v9818_v25 = vpop.xlane.xlu1 %9817 }
0x18e1   :  { %16207 = vrcp.f32 %v9818_v25 }
0x18e4   :  { %v9824_v41 = vpop.xlane.xlu1 %9823 }
0x18e5   :  { %16209 = vrcp.f32 %v9824_v41 }
0x18e6   :  { %v16206_v33 = vpop.eup %16205 }
0x18e7   :  { %v9849_v51 = vmul.f32 %v16206_v33, %v18691_v59 }
0x18e8   :  { %v9827_v27 = vpop.xlane.xlu0 %9826 }
0x18e9   :  { %16211 = vrcp.f32 %v9827_v27  ;;  %v9830_v52 = vpop.xlane.xlu1 %9829  ;;  %15571 = vmatmul.mubr.msk.f32.vlgmr.msra.gmra.mrb[132].mxu0 %vm89_vm7, %v9849_v51 }
0x18ea   :  { %16213 = vrcp.f32 %v9830_v52  ;;  %15579 = vmatpush3.msra.mxu0 %v10089_v47  ;;  %15580 = vmatprep.mubr.msk.f32.mxu0 %vm16383_vm6, %v19678_v42 }
0x18eb   :  { %v16208_v1 = vpop.eup %16207  ;;  %15588 = vmatprep.subr.mxu0 %v19678_v42 }
0x18ec   :  { %v9833_v54 = vpop.xlane.xlu0 %9832  ;;  %v9848_v21 = vmul.f32 %v16208_v1, %v18695_v55 }
0x18ed   :  { %16215 = vrcp.f32 %v9833_v54  ;;  %v9836_v25 = vpop.xlane.xlu1 %9835 }
0x18ee   :  { %16217 = vrcp.f32 %v9836_v25  ;;  %15566 = vmatmul.mubr.msk.f32.vlgmr.msra.gmra.mrb[128].mxu1 %vm89_vm7, %v9848_v21 }
0x18ef   :  { %v16210_v59 = vpop.eup %16209  ;;  %15574 = vmatpush3.msra.mxu1 %v10012_v29  ;;  %15575 = vmatprep.mubr.msk.f32.mxu1 %vm16383_vm6, %v19678_v42 }
0x18f0   :  { %v9839_v47 = vpop.xlane.xlu0 %9838  ;;  %15583 = vmatprep.subr.mxu1 %v19678_v42  ;;  %v9850_v41 = vmul.f32 %v16210_v59, %v18700_v35 }
0x18f1   :  { %16219 = vrcp.f32 %v9839_v47  ;;  %v10787_v52 = vpop.permute.xlu1 %10786 }
0x18f2   :  { %15576 = vmatmul.mubr.msk.f32.vlgmr.msra.gmra.mrb[130].mxu1 %vm89_vm7, %v9850_v41 }
0x18f3   :  { %v16212_v33 = vpop.eup %16211  ;;  %15584 = vmatpush3.msra.mxu1 %v10166_v23  ;;  %15585 = vmatprep.mubr.msk.f32.mxu1 %vm16383_vm6, %v19678_v42 }
0x18f4   :  { %v16214_v55 = vpop.eup %16213  ;;  %v10707_v51 = vpop.permute.xlu0 %10706  ;;  %15593 = vmatprep.subr.mxu1 %v19678_v42  ;;  %v9851_v29 = vmul.f32 %v16212_v33, %v18705_v17 }
0x18f5   :  { %v9852_v27 = vmul.f32 %v16214_v55, %v18707_v7 }
0x18f6   :  { %15581 = vmatmul.mubr.msk.f32.vlgmr.msra.gmra.mrb[134].mxu0 %vm89_vm7, %v9851_v29 }
0x18f7   :  { %v16216_v35 = vpop.eup %16215  ;;  %15586 = vmatmul.mubr.msk.f32.vlgmr.msra.gmra.mrb[132].mxu1 %vm89_vm7, %v9852_v27  ;;  %15589 = vmatpush3.msra.mxu0 %v10243_v60  ;;  %v10785_v60 = vpop.permute.xlu1 %10784 }
0x18f8   :  { %v16218_v1 = vpop.eup %16217  ;;  %15594 = vmatpush3.msra.mxu1 %v10320_v40  ;;  %15590 = vmatprep.mubr.msk.f32.mxu0 %vm16383_vm6, %v19678_v42  ;;  %v9853_v23 = vmul.f32 %v16216_v35, %v18713_v34  ;;  %v10865_v54 = vpop.permute.xlu0 %10864 }
0x18f9   :  { %15595 = vmatprep.mubr.msk.f32.mxu1 %vm16383_vm6, %v19678_v42  ;;  %15598 = vmatprep.subr.mxu0 %v19678_v42  ;;  %v9854_v17 = vmul.f32 %v16218_v1, %v18715_v28 }
0x18fa   :  { %15591 = vmatmul.mubr.msk.f32.vlgmr.msra.gmra.mrb[136].mxu0 %vm89_vm7, %v9853_v23  ;;  %15603 = vmatprep.subr.mxu1 %v19678_v42 }
0x18fb   :  { %v16220_v7 = vpop.eup %16219  ;;  %15596 = vmatmul.mubr.msk.f32.vlgmr.msra.gmra.mrb[134].mxu1 %vm89_vm7, %v9854_v17  ;;  %15599 = vmatpush3.msra.mxu0 %v18769_v30  ;;  %v10943_v40 = vpop.permute.xlu1 %10942  ;;  %v18892_v17 = vld [vmem:[%s19677_s27] ss:$0 sm:$0xff] }
0x18fc   :  { %15600 = vmatprep.mubr.msk.f32.mxu0 %vm16383_vm6, %v19678_v42  ;;  %v9855_v34 = vmul.f32 %v16220_v7, %v18721_v50  ;;  %15605 = vmatprep.mubr.msk.f32.mxu1 %vm16383_vm6, %v19678_v42  ;;  %v10863_v28 = vpop.permute.xlu0 %10862 }
0x18fd   :  { %15608 = vmatprep.subr.mxu0 %v19678_v42 }
0x18fe   :  { %15601 = vmatmul.mubr.msk.f32.vlgmr.msra.gmra.mrb[138].mxu0 %vm89_vm7, %v9855_v34 }
0x18ff   :  { %15604 = vmatpush3.xpose.msk.msra.mxu1 %vm89_vm7, %v18771_v36  ;;  %15610 = vmatprep.mubr.msk.f32.mxu0 %vm16383_vm6, %v19678_v42  ;;  %v10941_v30 = vpop.permute.xlu1 %10940 }
0x1900   :  { %15613 = vmatprep.subr.mxu1 %v19678_v42  ;;  %v11021_v50 = vpop.permute.xlu0 %11020 }
0x1902   :  { %15606 = vmatmul.mubr.msk.f32.vlgmr.msra.gmra.mrb[136].mxu1 %vm89_vm7, %v18775_v6  ;;  %15609 = vmatpush3.xpose.msk.msra.mxu0 %vm89_vm7, %v18773_v63 }
0x1903   :  { %15614 = vmatpush3.xpose.msk.msra.mxu1 %vm89_vm7, %v18779_v49  ;;  %15615 = vmatprep.mubr.msk.f32.mxu1 %vm16383_vm6, %v19678_v42  ;;  %v11201_v63 = vpop.permute.xlu1 %11200 }
0x1904   :  { %15618 = vmatprep.subr.mxu0 %v19678_v42  ;;  %15623 = vmatprep.subr.mxu1 %v19678_v42  ;;  %v11019_v36 = vpop.permute.xlu0 %11018 }
0x1905   :  { %15611 = vmatmul.mubr.msk.f32.vlgmr.msra.gmra.mrb[140].mxu0 %vm89_vm7, %v18777_v3 }
0x1906   :  { %15616 = vmatmul.mubr.msk.f32.vlgmr.msra.gmra.mrb[138].mxu1 %vm89_vm7, %v18783_v31  ;;  %15619 = vmatpush3.xpose.msk.msra.mxu0 %vm89_vm7, %v18781_v45 }
0x1907   :  { %15624 = vmatpush3.xpose.msk.msra.mxu1 %vm89_vm7, %v10787_v52  ;;  %15620 = vmatprep.mubr.msk.f32.mxu0 %vm16383_vm6, %v19678_v42 }
0x1908   :  { %15625 = vmatprep.mubr.msk.f32.mxu1 %vm16383_vm6, %v19678_v42  ;;  %15628 = vmatprep.subr.mxu0 %v19678_v42  ;;  %v11277_v6 = vpop.permute.xlu0 %11276 }
0x1909   :  { %15621 = vmatmul.mubr.msk.f32.vlgmr.msra.gmra.mrb[142].mxu0 %vm89_vm7, %v10707_v51  ;;  %15633 = vmatprep.subr.mxu1 %v19678_v42 }
0x190a   :  { %15626 = vmatmul.mubr.msk.f32.vlgmr.msra.gmra.mrb[140].mxu1 %vm89_vm7, %v10785_v60  ;;  %15629 = vmatpush3.xpose.msk.msra.mxu0 %vm89_vm7, %v10865_v54 }
0x190b   :  { %15634 = vmatpush3.xpose.msk.msra.mxu1 %vm89_vm7, %v10943_v40  ;;  %15630 = vmatprep.mubr.msk.f32.mxu0 %vm16383_vm6, %v19678_v42 }
0x190c   :  { %15635 = vmatprep.mubr.msk.f32.mxu1 %vm16383_vm6, %v19678_v42  ;;  %15638 = vmatprep.subr.mxu0 %v19678_v42 }
0x190d   :  { %15631 = vmatmul.mubr.msk.f32.vlgmr.msra.gmra.mrb[144].mxu0 %vm89_vm7, %v10863_v28  ;;  %15643 = vmatprep.subr.mxu1 %v19678_v42 }
0x190e   :  { %15636 = vmatmul.mubr.msk.f32.vlgmr.msra.gmra.mrb[142].mxu1 %vm89_vm7, %v10941_v30  ;;  %15639 = vmatpush3.xpose.msk.msra.mxu0 %vm89_vm7, %v11021_v50 }
0x190f   :  { %15644 = vmatpush3.msra.mxu1 %v11201_v63  ;;  %15640 = vmatprep.mubr.msk.f32.mxu0 %vm16383_vm6, %v19678_v42  ;;  %v18902_v63 = vld [vmem:[%s19677_s27 + $0x1] ss:$0 sm:$0xff] }
0x1910   :  { %15648 = vmatprep.subr.mxu0 %v19678_v42  ;;  %15645 = vmatprep.mubr.msk.f32.mxu1 %vm16383_vm6, %v19678_v42 }
0x1911   :  { %15641 = vmatmul.mubr.msk.f32.vlgmr.msra.gmra.mrb[146].mxu0 %vm89_vm7, %v11019_v36  ;;  %15653 = vmatprep.subr.mxu1 %v19678_v42 }
0x1912   :  { %15649 = vmatpush3.msra.mxu0 %v11277_v6  ;;  %15650 = vmatprep.mubr.msk.f32.mxu0 %vm16383_vm6, %v19678_v42 }
0x1913   :  { %15658 = vmatprep.subr.mxu0 %v19678_v42 }
0x19bc   :  { %v18873_v3 = vpop.f32.mrb[132].mxu0 }
0x19bd   :  { %v15572_v49 = vpop.f32.mrb[133].mxu0 }
0x19c1   :  { %v18875_v45 = vpop.f32.mrb[128].mxu1 }
0x19c2   :  { %v15567_v31 = vpop.f32.mrb[129].mxu1 }
0x19c3   :  { %v18908_v31 = vld [vmem:[%s19677_s27 + $0x2] ss:$0 sm:$0xff] }
0x19c5   :  { %v18877_v21 = vpop.f32.mrb[130].mxu1 }
0x19c6   :  { %v15577_v25 = vpop.f32.mrb[131].mxu1 }
0x19c9   :  { %v18879_v59 = vpop.f32.mrb[134].mxu0 }
0x19ca   :  { %19736 = vst [vmem:[#allocation12_spill] sm:$0xff] %v18879_v59  ;;  %v18881_v47 = vpop.f32.mrb[132].mxu1  ;;  %v15582_v41 = vpop.f32.mrb[135].mxu0 }
0x19cb   :  { %v15587_v33 = vpop.f32.mrb[133].mxu1 }
0x19cd   :  { %v18883_v55 = vpop.f32.mrb[136].mxu0 }
0x19ce   :  { %19737 = vst [vmem:[#allocation13_spill] sm:$0xff] %v18883_v55  ;;  %v18885_v51 = vpop.f32.mrb[134].mxu1  ;;  %v15592_v29 = vpop.f32.mrb[137].mxu0 }
0x19cf   :  { %19738 = vst [vmem:[#allocation14_spill] sm:$0xff] %v18885_v51  ;;  %v15597_v27 = vpop.f32.mrb[135].mxu1 }
0x19d1   :  { %v18887_v52 = vpop.f32.mrb[138].mxu0 }
0x19d2   :  { %19739 = vst [vmem:[#allocation15_spill] sm:$0xff] %v18887_v52  ;;  %v15602_v35 = vpop.f32.mrb[139].mxu0 }
0x19d5   :  { %v10546_v1 = vpop.f32.mrb[136].mxu1 }
0x19d6   :  { %v11096_v23 = vmul.f32 0.35355338, %v10546_v1  ;;  %v15607_v54 = vpop.f32.mrb[137].mxu1 }
0x19d8   :  { %v18895_v7 = vadd.f32 %v18892_v17, %v11096_v23  ;;  %v10624_v60 = vpop.f32.mrb[140].mxu0 }
0x19d9   :  { %v11097_v34 = vmul.f32 0.35355338, %v10624_v60  ;;  %v10702_v28 = vpop.f32.mrb[138].mxu1  ;;  %v15612_v40 = vpop.f32.mrb[141].mxu0  ;;  %v18918_v60 = vld [vmem:[%s19677_s27 + $0x3] ss:$0 sm:$0xff] }
0x19da   :  { %v11098_v50 = vmul.f32 0.35355338, %v10702_v28  ;;  %v15617_v30 = vpop.f32.mrb[139].mxu1  ;;  %v11112_v36 = vsel %vm89_vm7, %v18895_v7, -inf }
0x19db   :  { %v11105_v6 = vadd.f32 %v18902_v63, %v11097_v34  ;;  %11113 = vmax.xlane.f32.xlu1 %v11112_v36 }
0x19dc   :  { %v10780_v49 = vpop.f32.mrb[142].mxu0  ;;  %v18911_v25 = vadd.f32 %v18908_v31, %v11098_v50 }
0x19dd   :  { %v11099_v41 = vmul.f32 0.35355338, %v10780_v49  ;;  %v10858_v33 = vpop.f32.mrb[140].mxu1  ;;  %v15622_v29 = vpop.f32.mrb[143].mxu0  ;;  %v11115_v27 = vsel %vm89_vm7, %v11105_v6, -inf }
0x19de   :  { %v11100_v35 = vmul.f32 0.35355338, %v10858_v33  ;;  %v15627_v1 = vpop.f32.mrb[141].mxu1  ;;  %11116 = vmax.xlane.f32.xlu0 %v11115_v27  ;;  %v11118_v30 = vsel %vm89_vm7, %v18911_v25, -inf  ;;  %v18935_v27 = vld [vmem:[%s19677_s27 + $0x5] ss:$0 sm:$0xff] }
0x19df   :  { %v11107_v34 = vadd.f32 %v18918_v60, %v11099_v41 }
0x19e0   :  { %v11108_v23 = vadd.f32 %v18462_v46, %v11100_v35  ;;  %v10936_v54 = vpop.f32.mrb[144].mxu0  ;;  %v18927_v46 = vld [vmem:[%s19677_s27 + $0x6] ss:$0 sm:$0xff] }
0x19e1   :  { %v11101_v28 = vmul.f32 0.35355338, %v10936_v54  ;;  %v11014_v40 = vpop.f32.mrb[142].mxu1  ;;  %v15632_v50 = vpop.f32.mrb[145].mxu0 }
0x19e2   :  { %v11102_v36 = vmul.f32 0.35355338, %v11014_v40  ;;  %v15637_v49 = vpop.f32.mrb[143].mxu1  ;;  %11119 = vmax.xlane.f32.xlu0 %v11118_v30  ;;  %v11124_v33 = vsel %vm89_vm7, %v11108_v23, -inf  ;;  %v11121_v40 = vsel %vm89_vm7, %v11107_v34, -inf }
0x19e3   :  { %11125 = vmax.xlane.f32.xlu1 %v11124_v33  ;;  %v11109_v35 = vadd.f32 %v18935_v27, %v11101_v28  ;;  %v18944_v30 = vld [vmem:[%s19677_s27 + $0x7] ss:$0 sm:$0xff]  ;;  %v18956_v33 = vpop.permute.xlu1 %11352 }
0x19e4   :  { %v18930_v29 = vadd.f32 %v18927_v46, %v11102_v36  ;;  %v11092_v41 = vpop.f32.mrb[146].mxu0 }
0x19e5   :  { %v11103_v1 = vmul.f32 0.35355338, %v11092_v41  ;;  %v15642_v54 = vpop.f32.mrb[147].mxu0  ;;  %v11127_v49 = vsel %vm89_vm7, %v11109_v35, -inf }
0x19e6   :  { %11122 = vmax.xlane.f32.xlu0 %v11121_v40  ;;  %v11130_v50 = vsel %vm89_vm7, %v18930_v29, -inf  ;;  %v18964_v40 = vpop.permute.xlu0 %11580 }
0x19e7   :  { %11131 = vmax.xlane.f32.xlu1 %v11130_v50  ;;  %v18947_v36 = vadd.f32 %v18944_v30, %v11103_v1  ;;  %v18958_v41 = vpop.permute.xlu1 %11428 }
0x19e9   :  { %v11133_v28 = vsel %vm89_vm7, %v18947_v36, -inf }
0x19ea   :  { %11128 = vmax.xlane.f32.xlu0 %v11127_v49  ;;  %v18968_v49 = vpop.permute.xlu0 %11732 }
0x19eb   :  { %v18960_v54 = vpop.permute.xlu1 %11504 }
0x19ee   :  { %11134 = vmax.xlane.f32.xlu0 %v11133_v28 }
0x19ef   :  { %v18962_v1 = vpop.permute.xlu1 %11656 }
0x19f3   :  { %v18966_v50 = vpop.permute.xlu1 %11810 }
0x19f7   :  { %v18970_v28 = vpop.permute.xlu1 %11808 }
0x19f8   :  { %11964 = vrot.lane.b32.xlu1 %v18335_v20, %s19735_s5  ;;  %v18972_v20 = vpop.permute.xlu0 %11888 }
0x19fb   :  { %v18974_v43 = vpop.permute.xlu1 %11966 }
0x1a04   :  { %12044 = vrot.lane.b32.xlu0 %v18296_v37, %s19735_s5  ;;  %v18976_v37 = vpop.permute.xlu0 %11886 }
0x1a68   :  { %v11114_v4 = vpop.xlane.xlu1 %11113 }
0x1a69   :  { %v11136_v56 = vsub.f32 %v18895_v7, %v11114_v4 }
0x1a6b   :  { %v11144_v11 = vmul.f32 1.442695, %v11136_v56  ;;  %v11117_v26 = vpop.xlane.xlu0 %11116 }
0x1a6c   :  { %v11137_v22 = vsub.f32 %v11105_v6, %v11117_v26 }
0x1a6d   :  { %16221 = vpow2.f32 %v11144_v11 }
0x1a6e   :  { %v11146_v57 = vmul.f32 1.442695, %v11137_v22 }
0x1a6f   :  { %v11120_v38 = vpop.xlane.xlu0 %11119 }
0x1a70   :  { %16223 = vpow2.f32 %v11146_v57  ;;  %v11138_v15 = vsub.f32 %v18911_v25, %v11120_v38  ;;  %v11126_v12 = vpop.xlane.xlu1 %11125 }
0x1a71   :  { %v11140_v14 = vsub.f32 %v11108_v23, %v11126_v12 }
0x1a72   :  { %v11148_v32 = vmul.f32 1.442695, %v11138_v15 }
0x1a73   :  { %v11152_v24 = vmul.f32 1.442695, %v11140_v14  ;;  %v11123_v52 = vpop.xlane.xlu0 %11122 }
0x1a74   :  { %16225 = vpow2.f32 %v11148_v32  ;;  %v11139_v55 = vsub.f32 %v11107_v34, %v11123_v52  ;;  %v11132_v52 = vpop.xlane.xlu1 %11131 }
0x1a75   :  { %16227 = vpow2.f32 %v11152_v24  ;;  %v11142_v7 = vsub.f32 %v18930_v29, %v11132_v52 }
0x1a76   :  { %v11150_v51 = vmul.f32 1.442695, %v11139_v55 }
0x1a77   :  { %v16222_v59 = vpop.eup %16221  ;;  %v11129_v4 = vpop.xlane.xlu0 %11128  ;;  %v11156_v25 = vmul.f32 1.442695, %v11142_v7 }
0x1a78   :  { %16229 = vpow2.f32 %v11150_v51  ;;  %v11141_v56 = vsub.f32 %v11109_v35, %v11129_v4  ;;  %v11160_v11 = vsel %vm89_vm7, %v16222_v59, 0.0 }
0x1a79   :  { %11161 = vadd.xlane.f32.xlu1 %v11160_v11 }
0x1a7a   :  { %v16224_v26 = vpop.eup %16223  ;;  %v11154_v22 = vmul.f32 1.442695, %v11141_v56 }
0x1a7b   :  { %v11163_v38 = vsel %vm89_vm7, %v16224_v26, 0.0  ;;  %v11135_v6 = vpop.xlane.xlu0 %11134 }
0x1a7c   :  { %16231 = vpow2.f32 %v11154_v22  ;;  %11164 = vadd.xlane.f32.xlu0 %v11163_v38  ;;  %v11143_v23 = vsub.f32 %v18947_v36, %v11135_v6 }
0x1a7d   :  { %16233 = vpow2.f32 %v11156_v25 }
0x1a7e   :  { %v16226_v12 = vpop.eup %16225  ;;  %v11158_v34 = vmul.f32 1.442695, %v11143_v23 }
0x1a7f   :  { %v11166_v14 = vsel %vm89_vm7, %v16226_v12, 0.0  ;;  %v18983_v32 = vpop.eup %16227 }
0x1a80   :  { %11167 = vadd.xlane.f32.xlu1 %v11166_v14  ;;  %v11172_v57 = vsel %vm89_vm7, %v18983_v32, 0.0  ;;  %16235 = vpow2.f32 %v11158_v34 }
0x1a82   :  { %v18985_v24 = vpop.eup %16229 }
0x1a83   :  { %v11169_v15 = vsel %vm89_vm7, %v18985_v24, 0.0 }
0x1a84   :  { %11170 = vadd.xlane.f32.xlu0 %v11169_v15  ;;  %11173 = vadd.xlane.f32.xlu1 %v11172_v57 }
0x1a86   :  { %v18991_v55 = vpop.eup %16231 }
0x1a87   :  { %v11175_v51 = vsel %vm89_vm7, %v18991_v55, 0.0  ;;  %v19001_v35 = vpop.eup %16233 }
0x1a88   :  { %11176 = vadd.xlane.f32.xlu0 %v11175_v51  ;;  %v11178_v4 = vsel %vm89_vm7, %v19001_v35, 0.0 }
0x1a8a   :  { %v19005_v56 = vpop.eup %16235 }
0x1a95   :  { %12122 = vrot.lane.b32.xlu1 %v18342_v9, %s19735_s5  ;;  %v19023_v9 = vpop.permute.xlu1 %11964 }
0x1a9e   :  { %12042 = vrot.lane.b32.xlu0 %v18306_v48, %s19735_s5  ;;  %v11181_v48 = vsel %vm89_vm7, %v19005_v56, 0.0 }
0x1ab9   :  { %11179 = vadd.xlane.f32.xlu1 %v11178_v4 }
0x1abd   :  { %11182 = vadd.xlane.f32.xlu0 %v11181_v48 }
0x1aca   :  { %12120 = vrot.lane.b32.xlu1 %v18362_v58, %s19735_s5  ;;  %v19025_v58 = vpop.permute.xlu0 %12044 }
0x1ace   :  { %12278 = vrot.lane.b32.xlu1 %v18369_v18, %s19735_s5 }
0x1ad2   :  { %12276 = vrot.lane.b32.xlu1 %v18382_v13, %s19735_s5 }
0x1ad3   :  { %12200 = vrot.lane.b32.xlu0 %v18315_v39, %s19735_s5 }
0x1ad7   :  { %12198 = vrot.lane.b32.xlu0 %v18328_v0, %s19735_s5 }
0x1adb   :  { %12356 = vrot.lane.b32.xlu0 %v18337_v62, %s19735_s5 }
0x1adf   :  { %12354 = vrot.lane.b32.xlu0 %v18355_v10, %s19735_s5 }
0x1b06   :  { %v11162_v18 = vpop.xlane.xlu1 %11161 }
0x1b07   :  { %16237 = vrcp.f32 %v11162_v18 }
0x1b09   :  { %v11165_v29 = vpop.xlane.xlu0 %11164 }
0x1b0a   :  { %16239 = vrcp.f32 %v11165_v29 }
0x1b0d   :  { %v11168_v13 = vpop.xlane.xlu1 %11167 }
0x1b0e   :  { %16241 = vrcp.f32 %v11168_v13 }
0x1b11   :  { %v16238_v39 = vpop.eup %16237  ;;  %v11171_v36 = vpop.xlane.xlu0 %11170 }
0x1b12   :  { %v11174_v11 = vpop.xlane.xlu1 %11173  ;;  %v11192_v0 = vmul.f32 %v16238_v39, %v16222_v59  ;;  %16243 = vrcp.f32 %v11171_v36 }
0x1b13   :  { %16245 = vrcp.f32 %v11174_v11 }
0x1b14   :  { %v16240_v62 = vpop.eup %16239  ;;  %15646 = vmatmul.mubr.msk.f32.vlgmr.msra.gmra.mrb[144].mxu1 %vm89_vm7, %v11192_v0 }
0x1b15   :  { %15654 = vmatpush3.msra.mxu1 %v18956_v33  ;;  %v11177_v10 = vpop.xlane.xlu0 %11176  ;;  %v11193_v22 = vmul.f32 %v16240_v62, %v16224_v26  ;;  %15655 = vmatprep.mubr.msk.f32.mxu1 %vm16383_vm6, %v19678_v42 }
0x1b16   :  { %16247 = vrcp.f32 %v11177_v10  ;;  %15663 = vmatprep.subr.mxu1 %v19678_v42 }
0x1b17   :  { %15651 = vmatmul.mubr.msk.f32.vlgmr.msra.gmra.mrb[148].mxu0 %vm89_vm7, %v11193_v22 }
0x1b18   :  { %v16242_v38 = vpop.eup %16241  ;;  %15659 = vmatpush3.msra.mxu0 %v18958_v41  ;;  %15660 = vmatprep.mubr.msk.f32.mxu0 %vm16383_vm6, %v19678_v42 }
0x1b19   :  { %v11194_v59 = vmul.f32 %v16242_v38, %v16226_v12  ;;  %15668 = vmatprep.subr.mxu0 %v19678_v42 }
0x1b1b   :  { %15656 = vmatmul.mubr.msk.f32.vlgmr.msra.gmra.mrb[146].mxu1 %vm89_vm7, %v11194_v59 }
0x1b1c   :  { %v16244_v33 = vpop.eup %16243  ;;  %15664 = vmatpush3.msra.mxu1 %v18960_v54  ;;  %15665 = vmatprep.mubr.msk.f32.mxu1 %vm16383_vm6, %v19678_v42  ;;  %v12123_v54 = vpop.permute.xlu1 %12122 }
0x1b1d   :  { %v16246_v26 = vpop.eup %16245  ;;  %v11195_v14 = vmul.f32 %v16244_v33, %v18985_v24  ;;  %15673 = vmatprep.subr.mxu1 %v19678_v42 }
0x1b1e   :  { %v11196_v41 = vmul.f32 %v16246_v26, %v18983_v32 }
0x1b1f   :  { %15661 = vmatmul.mubr.msk.f32.vlgmr.msra.gmra.mrb[150].mxu0 %vm89_vm7, %v11195_v14 }
0x1b20   :  { %v16248_v12 = vpop.eup %16247  ;;  %15666 = vmatmul.mubr.msk.f32.vlgmr.msra.gmra.mrb[148].mxu1 %vm89_vm7, %v11196_v41  ;;  %15669 = vmatpush3.msra.mxu0 %v18964_v40 }
0x1b21   :  { %v11197_v15 = vmul.f32 %v16248_v12, %v18991_v55  ;;  %15674 = vmatpush3.msra.mxu1 %v18962_v1  ;;  %15670 = vmatprep.mubr.msk.f32.mxu0 %vm16383_vm6, %v19678_v42  ;;  %v12043_v1 = vpop.permute.xlu0 %12042 }
0x1b22   :  { %15678 = vmatprep.subr.mxu0 %v19678_v42  ;;  %15675 = vmatprep.mubr.msk.f32.mxu1 %vm16383_vm6, %v19678_v42 }
0x1b23   :  { %15671 = vmatmul.mubr.msk.f32.vlgmr.msra.gmra.mrb[152].mxu0 %vm89_vm7, %v11197_v15  ;;  %15683 = vmatprep.subr.mxu1 %v19678_v42 }
0x1b24   :  { %15679 = vmatpush3.msra.mxu0 %v18968_v49  ;;  %15680 = vmatprep.mubr.msk.f32.mxu0 %vm16383_vm6, %v19678_v42 }
0x1b25   :  { %15688 = vmatprep.subr.mxu0 %v19678_v42 }
0x1b46   :  { %v11180_v40 = vpop.xlane.xlu1 %11179 }
0x1b47   :  { %16249 = vrcp.f32 %v11180_v40 }
0x1b4a   :  { %v11183_v32 = vpop.xlane.xlu0 %11182  ;;  %v12121_v52 = vpop.permute.xlu1 %12120 }
0x1b4b   :  { %16251 = vrcp.f32 %v11183_v32 }
0x1b4e   :  { %v12201_v51 = vpop.permute.xlu0 %12200 }
0x1b51   :  { %v16250_v24 = vpop.eup %16249 }
0x1b52   :  { %v11198_v57 = vmul.f32 %v16250_v24, %v19001_v35 }
0x1b54   :  { %15676 = vmatmul.mubr.msk.f32.vlgmr.msra.gmra.mrb[150].mxu1 %vm89_vm7, %v11198_v57 }
0x1b55   :  { %v16252_v55 = vpop.eup %16251  ;;  %15684 = vmatpush3.xpose.msk.msra.mxu1 %vm89_vm7, %v18966_v50  ;;  %15685 = vmatprep.mubr.msk.f32.mxu1 %vm16383_vm6, %v19678_v42  ;;  %v12199_v50 = vpop.permute.xlu0 %12198 }
0x1b56   :  { %v11199_v49 = vmul.f32 %v16252_v55, %v19005_v56  ;;  %15693 = vmatprep.subr.mxu1 %v19678_v42  ;;  %v16357_v55 = vld [vmem:[%s19677_s27 + $0x4] ss:$0 sm:$0xff]  ;;  %s19740_s27 = smov 8  }
0x1b58   :  { %15681 = vmatmul.mubr.msk.f32.vlgmr.msra.gmra.mrb[154].mxu0 %vm89_vm7, %v11199_v49  ;;  %15686 = vmatmul.mubr.msk.f32.vlgmr.msra.gmra.mrb[152].mxu1 %vm89_vm7, %v18970_v28  ;;  %v12279_v28 = vpop.permute.xlu1 %12278 }
0x1b59   :  { %15689 = vmatpush3.xpose.msk.msra.mxu0 %vm89_vm7, %v18972_v20  ;;  %15694 = vmatpush3.xpose.msk.msra.mxu1 %vm89_vm7, %v18974_v43  ;;  %v12357_v43 = vpop.permute.xlu0 %12356 }
0x1b5a   :  { %15690 = vmatprep.mubr.msk.f32.mxu0 %vm16383_vm6, %v19678_v42  ;;  %15695 = vmatprep.mubr.msk.f32.mxu1 %vm16383_vm6, %v19678_v42 }
0x1b5b   :  { %15698 = vmatprep.subr.mxu0 %v19678_v42  ;;  %15703 = vmatprep.subr.mxu1 %v19678_v42 }
0x1b5c   :  { %15691 = vmatmul.mubr.msk.f32.vlgmr.msra.gmra.mrb[156].mxu0 %vm89_vm7, %v18976_v37  ;;  %15696 = vmatmul.mubr.msk.f32.vlgmr.msra.gmra.mrb[154].mxu1 %vm89_vm7, %v19023_v9  ;;  %v12277_v20 = vpop.permute.xlu1 %12276 }
0x1b5d   :  { %15699 = vmatpush3.xpose.msk.msra.mxu0 %vm89_vm7, %v19025_v58  ;;  %15704 = vmatpush3.xpose.msk.msra.mxu1 %vm89_vm7, %v12123_v54  ;;  %v12355_v37 = vpop.permute.xlu0 %12354 }
0x1b5e   :  { %15700 = vmatprep.mubr.msk.f32.mxu0 %vm16383_vm6, %v19678_v42  ;;  %15705 = vmatprep.mubr.msk.f32.mxu1 %vm16383_vm6, %v19678_v42 }
0x1b5f   :  { %15708 = vmatprep.subr.mxu0 %v19678_v42  ;;  %15713 = vmatprep.subr.mxu1 %v19678_v42 }
0x1b60   :  { %15701 = vmatmul.mubr.msk.f32.vlgmr.msra.gmra.mrb[158].mxu0 %vm89_vm7, %v12043_v1  ;;  %15706 = vmatmul.mubr.msk.f32.vlgmr.msra.gmra.mrb[156].mxu1 %vm89_vm7, %v12121_v52 }
0x1b61   :  { %15709 = vmatpush3.xpose.msk.msra.mxu0 %vm89_vm7, %v12201_v51  ;;  %15714 = vmatpush3.xpose.msk.msra.mxu1 %vm89_vm7, %v12279_v28 }
0x1b62   :  { %15710 = vmatprep.mubr.msk.f32.mxu0 %vm16383_vm6, %v19678_v42  ;;  %15715 = vmatprep.mubr.msk.f32.mxu1 %vm16383_vm6, %v19678_v42 }
0x1b63   :  { %15718 = vmatprep.subr.mxu0 %v19678_v42  ;;  %15723 = vmatprep.subr.mxu1 %v19678_v42 }
0x1b64   :  { %15711 = vmatmul.mubr.msk.f32.vlgmr.msra.gmra.mrb[160].mxu0 %vm89_vm7, %v12199_v50  ;;  %15716 = vmatmul.mubr.msk.f32.vlgmr.msra.gmra.mrb[158].mxu1 %vm89_vm7, %v12277_v20 }
0x1b65   :  { %15719 = vmatpush3.xpose.msk.msra.mxu0 %vm89_vm7, %v12357_v43  ;;  %15720 = vmatprep.mubr.msk.f32.mxu0 %vm16383_vm6, %v19678_v42 }
0x1b66   :  { %15728 = vmatprep.subr.mxu0 %v19678_v42  ;;  %15725 = vmatprep.mubr.msk.f32.mxu1 %vm16383_vm6, %v19678_v42 }
0x1b68   :  { %15721 = vmatmul.mubr.msk.f32.vlgmr.msra.gmra.mrb[162].mxu0 %vm89_vm7, %v12355_v37 }
0x1b69   :  { %15730 = vmatprep.mubr.msk.f32.mxu0 %vm16383_vm6, %v19678_v42 }
0x1be7   :  { %v19115_v7 = vpop.f32.mrb[144].mxu1 }
0x1be8   :  { %v15647_v6 = vpop.f32.mrb[145].mxu1 }
0x1bea   :  { %v19117_v25 = vpop.f32.mrb[148].mxu0 }
0x1beb   :  { %v15652_v23 = vpop.f32.mrb[149].mxu0 }
0x1bee   :  { %v19119_v34 = vpop.f32.mrb[146].mxu1 }
0x1bef   :  { %v15657_v35 = vpop.f32.mrb[147].mxu1 }
0x1bf2   :  { %v19121_v4 = vpop.f32.mrb[150].mxu0 }
0x1bf3   :  { %v19123_v56 = vpop.f32.mrb[148].mxu1  ;;  %v15662_v48 = vpop.f32.mrb[151].mxu0 }
0x1bf4   :  { %v15667_v9 = vpop.f32.mrb[149].mxu1 }
0x1bf6   :  { %v19125_v58 = vpop.f32.mrb[152].mxu0 }
0x1bf7   :  { %v15672_v18 = vpop.f32.mrb[153].mxu0 }
0x1c27   :  { %v19127_v29 = vpop.f32.mrb[150].mxu1 }
0x1c28   :  { %v15677_v13 = vpop.f32.mrb[151].mxu1 }
0x1c2b   :  { %v19129_v39 = vpop.f32.mrb[154].mxu0  ;;  %v11882_v36 = vpop.f32.mrb[152].mxu1 }
0x1c2c   :  { %v12432_v11 = vmul.f32 0.35355338, %v11882_v36  ;;  %v15682_v0 = vpop.f32.mrb[155].mxu0  ;;  %v15687_v62 = vpop.f32.mrb[153].mxu1 }
0x1c2e   :  { %v12440_v10 = vadd.f32 %v18892_v17, %v12432_v11 }
0x1c2f   :  { %v11960_v22 = vpop.f32.mrb[156].mxu0  ;;  %v12038_v38 = vpop.f32.mrb[154].mxu1 }
0x1c30   :  { %v12433_v59 = vmul.f32 0.35355338, %v11960_v22  ;;  %v15692_v33 = vpop.f32.mrb[157].mxu0  ;;  %v15697_v26 = vpop.f32.mrb[155].mxu1  ;;  %v12434_v14 = vmul.f32 0.35355338, %v12038_v38 }
0x1c31   :  { %v12448_v41 = vsel %vm89_vm7, %v12440_v10, -inf }
0x1c32   :  { %v12441_v12 = vadd.f32 %v18902_v63, %v12433_v59  ;;  %12449 = vmax.xlane.f32.xlu1 %v12448_v41  ;;  %v12442_v24 = vadd.f32 %v18908_v31, %v12434_v14 }
0x1c33   :  { %v12116_v15 = vpop.f32.mrb[158].mxu0  ;;  %v12194_v54 = vpop.f32.mrb[156].mxu1 }
0x1c34   :  { %v12436_v1 = vmul.f32 0.35355338, %v12194_v54  ;;  %v15702_v40 = vpop.f32.mrb[159].mxu0  ;;  %v15707_v32 = vpop.f32.mrb[157].mxu1  ;;  %v12435_v57 = vmul.f32 0.35355338, %v12116_v15 }
0x1c35   :  { %v12451_v17 = vsel %vm89_vm7, %v12441_v12, -inf  ;;  %v12454_v37 = vsel %vm89_vm7, %v12442_v24, -inf }
0x1c36   :  { %v12444_v51 = vadd.f32 %v16357_v55, %v12436_v1  ;;  %12452 = vmax.xlane.f32.xlu0 %v12451_v17  ;;  %v12443_v43 = vadd.f32 %v18918_v60, %v12435_v57 }
0x1c37   :  { %v12272_v49 = vpop.f32.mrb[160].mxu0  ;;  %v12350_v52 = vpop.f32.mrb[158].mxu1 }
0x1c38   :  { %v12438_v63 = vmul.f32 0.35355338, %v12350_v52  ;;  %v15712_v50 = vpop.f32.mrb[161].mxu0  ;;  %v15717_v28 = vpop.f32.mrb[159].mxu1  ;;  %v12437_v20 = vmul.f32 0.35355338, %v12272_v49 }
0x1c39   :  { %v12460_v31 = vsel %vm89_vm7, %v12444_v51, -inf  ;;  %v12457_v13 = vsel %vm89_vm7, %v12443_v43, -inf }
0x1c3a   :  { %v12446_v6 = vadd.f32 %v18927_v46, %v12438_v63  ;;  %12455 = vmax.xlane.f32.xlu0 %v12454_v37  ;;  %12461 = vmax.xlane.f32.xlu1 %v12460_v31  ;;  %v12445_v9 = vadd.f32 %v18935_v27, %v12437_v20 }
0x1c3b   :  { %v12428_v23 = vpop.f32.mrb[162].mxu0 }
0x1c3c   :  { %v15722_v35 = vpop.f32.mrb[163].mxu0  ;;  %v12466_v48 = vsel %vm89_vm7, %v12446_v6, -inf  ;;  %v12439_v18 = vmul.f32 0.35355338, %v12428_v23  ;;  %v12463_v36 = vsel %vm89_vm7, %v12445_v9, -inf }
0x1c3e   :  { %12458 = vmax.xlane.f32.xlu0 %v12457_v13  ;;  %12467 = vmax.xlane.f32.xlu1 %v12466_v48  ;;  %v12447_v60 = vadd.f32 %v18944_v30, %v12439_v18 }
0x1c40   :  { %v12469_v46 = vsel %vm89_vm7, %v12447_v60, -inf }
0x1c42   :  { %12464 = vmax.xlane.f32.xlu0 %v12463_v36 }
0x1c46   :  { %12470 = vmax.xlane.f32.xlu0 %v12469_v46 }
0x1c4f   :  { %12536 = vrot.lane.b32.xlu1 %v18389_v61, %s19735_s5 }
0x1c53   :  { %12688 = vrot.lane.b32.xlu1 %v18391_v2, %s19735_s5 }
0x1c57   :  { %12764 = vrot.lane.b32.xlu1 %v18384_v44, %s19735_s5 }
0x1c5b   :  { %12840 = vrot.lane.b32.xlu1 %v18402_v16, %s19735_s5 }
0x1c5c   :  { %12612 = vrot.lane.b32.xlu0 %v18364_v19, %s19735_s5 }
0x1c60   :  { %12916 = vrot.lane.b32.xlu0 %v18399_v53, %s19735_s5 }
0x1cbf   :  { %v12450_v27 = vpop.xlane.xlu1 %12449 }
0x1cc0   :  { %v12472_v30 = vsub.f32 %v12440_v10, %v12450_v27 }
0x1cc2   :  { %v12480_v11 = vmul.f32 1.442695, %v12472_v30 }
0x1cc3   :  { %v12453_v0 = vpop.xlane.xlu0 %12452 }
0x1cc4   :  { %16253 = vpow2.f32 %v12480_v11  ;;  %v12473_v61 = vsub.f32 %v12441_v12, %v12453_v0 }
0x1cc6   :  { %v12482_v62 = vmul.f32 1.442695, %v12473_v61 }
0x1cc7   :  { %v12456_v2 = vpop.xlane.xlu0 %12455  ;;  %v12462_v22 = vpop.xlane.xlu1 %12461 }
0x1cc8   :  { %16255 = vpow2.f32 %v12482_v62  ;;  %v12474_v44 = vsub.f32 %v12442_v24, %v12456_v2  ;;  %v12476_v38 = vsub.f32 %v12444_v51, %v12462_v22 }
0x1cca   :  { %v12484_v59 = vmul.f32 1.442695, %v12474_v44  ;;  %v12488_v16 = vmul.f32 1.442695, %v12476_v38 }
0x1ccb   :  { %v12459_v33 = vpop.xlane.xlu0 %12458  ;;  %v12468_v26 = vpop.xlane.xlu1 %12467 }
0x1ccc   :  { %16257 = vpow2.f32 %v12484_v59  ;;  %v12475_v19 = vsub.f32 %v12443_v43, %v12459_v33  ;;  %v12478_v14 = vsub.f32 %v12446_v6, %v12468_v26  ;;  %v14395_v26 = vld [vmem:[%s19597_s12 + $0x20] sm:$0xff] }
0x1ccd   :  { %16259 = vpow2.f32 %v12488_v16 }
0x1cce   :  { %v19161_v53 = vpop.eup %16253  ;;  %v12486_v10 = vmul.f32 1.442695, %v12475_v19  ;;  %v12492_v41 = vmul.f32 1.442695, %v12478_v14  ;;  %v14396_v19 = vld [vmem:[%s19597_s12 + $0x28] sm:$0xff] }
0x1ccf   :  { %v12465_v15 = vpop.xlane.xlu0 %12464  ;;  %v12537_v12 = vpop.permute.xlu1 %12536  ;;  %v12496_v54 = vsel %vm89_vm7, %v19161_v53, 0.0  ;;  %v15935_v14 = vpack.c.bf16 %v14396_v19, %v14395_v26 }
0x1cd0   :  { %16261 = vpow2.f32 %v12486_v10  ;;  %v12477_v1 = vsub.f32 %v12445_v9, %v12465_v15  ;;  %12497 = vadd.xlane.f32.xlu1 %v12496_v54  ;;  %15724 = vmatpush3.msra.mxu1 %v12537_v12 }
0x1cd1   :  { %15733 = vmatprep.subr.mxu1 %v19678_v42  ;;  %16263 = vpow2.f32 %v12492_v41 }
0x1cd2   :  { %v19166_v40 = vpop.eup %16255  ;;  %v12490_v32 = vmul.f32 1.442695, %v12477_v1 }
0x1cd3   :  { %v12471_v24 = vpop.xlane.xlu0 %12470  ;;  %v12499_v57 = vsel %vm89_vm7, %v19166_v40, 0.0 }
0x1cd4   :  { %16265 = vpow2.f32 %v12490_v32  ;;  %v12479_v17 = vsub.f32 %v12447_v60, %v12471_v24  ;;  %12500 = vadd.xlane.f32.xlu0 %v12499_v57 }
0x1cd6   :  { %v19170_v55 = vpop.eup %16257  ;;  %v12494_v51 = vmul.f32 1.442695, %v12479_v17 }
0x1cd7   :  { %v12613_v49 = vpop.permute.xlu0 %12612  ;;  %v12502_v52 = vsel %vm89_vm7, %v19170_v55, 0.0  ;;  %v19174_v63 = vpop.eup %16259 }
0x1cd8   :  { %16267 = vpow2.f32 %v12494_v51  ;;  %15729 = vmatpush3.msra.mxu0 %v12613_v49  ;;  %12503 = vadd.xlane.f32.xlu1 %v12502_v52  ;;  %v12508_v43 = vsel %vm89_vm7, %v19174_v63, 0.0 }
0x1cd9   :  { %15738 = vmatprep.subr.mxu0 %v19678_v42 }
0x1cda   :  { %v19177_v50 = vpop.eup %16261 }
0x1cdb   :  { %v12505_v28 = vsel %vm89_vm7, %v19177_v50, 0.0  ;;  %v19183_v20 = vpop.eup %16263 }
0x1cdc   :  { %12506 = vadd.xlane.f32.xlu0 %v12505_v28  ;;  %12509 = vadd.xlane.f32.xlu1 %v12508_v43  ;;  %v12514_v6 = vsel %vm89_vm7, %v19183_v20, 0.0 }
0x1cde   :  { %v19185_v37 = vpop.eup %16265 }
0x1cdf   :  { %v12511_v31 = vsel %vm89_vm7, %v19185_v37, 0.0 }
0x1ce0   :  { %12512 = vadd.xlane.f32.xlu0 %v12511_v31  ;;  %12515 = vadd.xlane.f32.xlu1 %v12514_v6 }
0x1ce2   :  { %v19191_v23 = vpop.eup %16267 }
0x1ce3   :  { %v12517_v35 = vsel %vm89_vm7, %v19191_v23, 0.0 }
0x1ce4   :  { %12518 = vadd.xlane.f32.xlu0 %v12517_v35 }
0x1cf1   :  { %12992 = vrot.lane.b32.xlu1 %v18406_v5, %s19735_s5  ;;  %v19742_v5 = vld [vmem:[#allocation12_spill] sm:$0xff] }
0x1cf5   :  { %13152 = vrot.lane.b32.xlu1 %v18875_v45, %s19740_s27  ;;  %v19745_v45 = vld [vmem:[#allocation15_spill] sm:$0xff] }
0x1cf9   :  { %13184 = vrot.lane.b32.xlu1 %v19115_v7, %s19741_s24 }
0x1cfa   :  { %13068 = vrot.lane.b32.xlu0 %v18404_v8, %s19735_s5  ;;  %v19743_v8 = vld [vmem:[#allocation14_spill] sm:$0xff] }
0x1cfd   :  { %13156 = vrot.lane.b32.xlu1 %v18877_v21, %s19740_s27  ;;  %v12689_v21 = vpop.permute.xlu1 %12688 }
0x1cfe   :  { %13154 = vrot.lane.b32.xlu0 %v18873_v3, %s19740_s27  ;;  %v19744_v3 = vld [vmem:[#allocation13_spill] sm:$0xff] }
0x1d01   :  { %13188 = vrot.lane.b32.xlu1 %v19119_v34, %s19741_s24 }
0x1d02   :  { %13186 = vrot.lane.b32.xlu0 %v19117_v25, %s19741_s24  ;;  %v12917_v25 = vpop.permute.xlu0 %12916 }
0x1d05   :  { %13160 = vrot.lane.b32.xlu1 %v18881_v47, %s19740_s27  ;;  %v12765_v47 = vpop.permute.xlu1 %12764 }
0x1d06   :  { %13158 = vrot.lane.b32.xlu0 %v19742_v5, %s19740_s27 }
0x1d09   :  { %13192 = vrot.lane.b32.xlu1 %v19123_v56, %s19741_s24  ;;  %v12841_v7 = vpop.permute.xlu1 %12840 }
0x1d0a   :  { %13190 = vrot.lane.b32.xlu0 %v19121_v4, %s19741_s24 }
0x1d0d   :  { %13164 = vrot.lane.b32.xlu1 %v19743_v8, %s19740_s27 }
0x1d0e   :  { %13162 = vrot.lane.b32.xlu0 %v19744_v3, %s19740_s27 }
0x1d11   :  { %13196 = vrot.lane.b32.xlu1 %v19127_v29, %s19741_s24 }
0x1d12   :  { %13194 = vrot.lane.b32.xlu0 %v19125_v58, %s19741_s24 }
0x1d16   :  { %13166 = vrot.lane.b32.xlu0 %v19745_v45, %s19740_s27 }
0x1d1a   :  { %13198 = vrot.lane.b32.xlu0 %v19129_v39, %s19741_s24 }
0x1d5d   :  { %v12498_v34 = vpop.xlane.xlu1 %12497 }
0x1d5e   :  { %16269 = vrcp.f32 %v12498_v34 }
0x1d61   :  { %v12501_v4 = vpop.xlane.xlu0 %12500 }
0x1d62   :  { %16271 = vrcp.f32 %v12501_v4 }
0x1d65   :  { %v12504_v56 = vpop.xlane.xlu1 %12503 }
0x1d66   :  { %16273 = vrcp.f32 %v12504_v56 }
0x1d68   :  { %v16270_v29 = vpop.eup %16269 }
0x1d69   :  { %v12528_v48 = vmul.f32 %v16270_v29, %v19161_v53  ;;  %v12507_v58 = vpop.xlane.xlu0 %12506  ;;  %v12510_v9 = vpop.xlane.xlu1 %12509  ;;  %v14397_v53 = vld [vmem:[%s19597_s12 + $0x30] sm:$0xff] }
0x1d6a   :  { %16275 = vrcp.f32 %v12507_v58  ;;  %v19748_v58 = vld [vmem:[#allocation20_spill] sm:$0xff] }
0x1d6b   :  { %16277 = vrcp.f32 %v12510_v9  ;;  %15726 = vmatmul.mubr.msk.f32.vlgmr.msra.gmra.mrb[160].mxu1 %vm89_vm7, %v12528_v48 }
0x1d6c   :  { %v16272_v39 = vpop.eup %16271  ;;  %15734 = vmatpush3.msra.mxu1 %v12689_v21  ;;  %15735 = vmatprep.mubr.msk.f32.mxu1 %vm16383_vm6, %v19678_v42 }
0x1d6d   :  { %v12529_v18 = vmul.f32 %v16272_v39, %v19166_v40  ;;  %v12513_v13 = vpop.xlane.xlu0 %12512  ;;  %v12516_v60 = vpop.xlane.xlu1 %12515  ;;  %15743 = vmatprep.subr.mxu1 %v19678_v42 }
0x1d6e   :  { %16279 = vrcp.f32 %v12513_v13 }
0x1d6f   :  { %16281 = vrcp.f32 %v12516_v60  ;;  %15731 = vmatmul.mubr.msk.f32.vlgmr.msra.gmra.mrb[164].mxu0 %vm89_vm7, %v12529_v18  ;;  %v19749_v60 = vld [vmem:[#allocation22_spill] sm:$0xff] }
0x1d70   :  { %v16274_v36 = vpop.eup %16273  ;;  %15739 = vmatpush3.msra.mxu0 %v12765_v47  ;;  %15740 = vmatprep.mubr.msk.f32.mxu0 %vm16383_vm6, %v19678_v42 }
0x1d71   :  { %v12530_v46 = vmul.f32 %v16274_v36, %v19170_v55  ;;  %v12519_v27 = vpop.xlane.xlu0 %12518  ;;  %15748 = vmatprep.subr.mxu0 %v19678_v42  ;;  %v12993_v2 = vpop.permute.xlu1 %12992 }
0x1d72   :  { %16283 = vrcp.f32 %v12519_v27 }
0x1d73   :  { %15736 = vmatmul.mubr.msk.f32.vlgmr.msra.gmra.mrb[162].mxu1 %vm89_vm7, %v12530_v46 }
0x1d74   :  { %v16276_v30 = vpop.eup %16275  ;;  %15744 = vmatpush3.msra.mxu1 %v12841_v7  ;;  %15745 = vmatprep.mubr.msk.f32.mxu1 %vm16383_vm6, %v19678_v42 }
0x1d75   :  { %v16278_v11 = vpop.eup %16277  ;;  %v12531_v0 = vmul.f32 %v16276_v30, %v19177_v50  ;;  %15753 = vmatprep.subr.mxu1 %v19678_v42  ;;  %v13069_v59 = vpop.permute.xlu0 %13068 }
0x1d76   :  { %v12532_v61 = vmul.f32 %v16278_v11, %v19174_v63  ;;  %v13153_v28 = vpop.permute.xlu1 %13152  ;;  %v19750_v11 = vld [vmem:[#allocation23_spill] sm:$0xff] }
0x1d77   :  { %15741 = vmatmul.mubr.msk.f32.vlgmr.msra.gmra.mrb[166].mxu0 %vm89_vm7, %v12531_v0 }
0x1d78   :  { %v16280_v62 = vpop.eup %16279  ;;  %15746 = vmatmul.mubr.msk.f32.vlgmr.msra.gmra.mrb[164].mxu1 %vm89_vm7, %v12532_v61  ;;  %15749 = vmatpush3.msra.mxu0 %v12917_v25  ;;  %v19747_v25 = vld [vmem:[#allocation21_spill] sm:$0xff] }
0x1d79   :  { %v16282_v22 = vpop.eup %16281  ;;  %v12533_v44 = vmul.f32 %v16280_v62, %v19185_v37  ;;  %15754 = vmatpush3.msra.mxu1 %v12993_v2  ;;  %15750 = vmatprep.mubr.msk.f32.mxu0 %vm16383_vm6, %v19678_v42  ;;  %v13155_v43 = vpop.permute.xlu0 %13154  ;;  %v13240_v34 = vsel %vm89_vm7, %v19747_v25, %v13153_v28  ;;  %v19751_v62 = vld [vmem:[#allocation9_spill] sm:$0xff] }
0x1d7a   :  { %v12534_v38 = vmul.f32 %v16282_v22, %v19183_v20  ;;  %15755 = vmatprep.mubr.msk.f32.mxu1 %vm16383_vm6, %v19678_v42  ;;  %15758 = vmatprep.subr.mxu0 %v19678_v42  ;;  %v13185_v20 = vpop.permute.xlu1 %13184  ;;  %v13241_v9 = vsel %vm89_vm7, %v19748_v58, %v13155_v43  ;;  %v19760_v58 = vld [vmem:[#allocation17_spill] sm:$0xff] }
0x1d7b   :  { %15751 = vmatmul.mubr.msk.f32.vlgmr.msra.gmra.mrb[168].mxu0 %vm89_vm7, %v12533_v44  ;;  %15936 = vmatprep.subr.bf16.mxu1 %v15935_v14  ;;  %v13248_v4 = vsel %vm6298_vm11, %v13240_v34, %v13185_v20  ;;  %v19759_v34 = vld [vmem:[#allocation29_spill] sm:$0xff] }
0x1d7c   :  { %v16284_v16 = vpop.eup %16283  ;;  %15756 = vmatmul.mubr.msk.f32.vlgmr.msra.gmra.mrb[166].mxu1 %vm89_vm7, %v12534_v38  ;;  %15759 = vmatpush3.msra.mxu0 %v13069_v59 }
0x1d7d   :  { %v12535_v33 = vmul.f32 %v16284_v16, %v19191_v23  ;;  %15760 = vmatprep.mubr.msk.f32.mxu0 %vm16383_vm6, %v19678_v42  ;;  %15938 = vmatpush3.bf16.msra.mxu1 %v15935_v14  ;;  %v14398_v42 = vld [vmem:[%s19597_s12 + $0x38] sm:$0xff]  ;;  %v13187_v37 = vpop.permute.xlu0 %13186  ;;  %v19753_v14 = vld [vmem:[#allocation11_spill] sm:$0xff] }
0x1d7e   :  { %v15939_v10 = vpack.c.bf16 %v14398_v42, %v14397_v53  ;;  %v13157_v31 = vpop.permute.xlu1 %13156  ;;  %v13249_v39 = vsel %vm6298_vm11, %v13241_v9, %v13187_v37 }
0x1d7f   :  { %15761 = vmatmul.mubr.msk.f32.vlgmr.msra.gmra.mrb[170].mxu0 %vm89_vm7, %v12535_v33  ;;  %v13242_v36 = vsel %vm89_vm7, %v19749_v60, %v13157_v31  ;;  %v19752_v33 = vld [vmem:[#allocation24_spill] sm:$0xff]  ;;  %v19761_v60 = vld [vmem:[#allocation18_spill] sm:$0xff] }
0x1d80   :  { %15940 = vmatprep.subr.bf16.mxu1 %v15939_v10 }
0x1d81   :  { %15942 = vmatpush3.bf16.msra.mxu1 %v15939_v10  ;;  %v13159_v6 = vpop.permute.xlu0 %13158 }
0x1d82   :  { %v13189_v23 = vpop.permute.xlu1 %13188  ;;  %v13243_v0 = vsel %vm89_vm7, %v19750_v11, %v13159_v6 }
0x1d83   :  { %v13250_v46 = vsel %vm6298_vm11, %v13242_v36, %v13189_v23 }
0x1d85   :  { %v13191_v35 = vpop.permute.xlu0 %13190 }
0x1d86   :  { %v13161_v5 = vpop.permute.xlu1 %13160  ;;  %v13251_v61 = vsel %vm6298_vm11, %v13243_v0, %v13191_v35  ;;  %v19757_v35 = vld [vmem:[#allocation27_spill] sm:$0xff] }
0x1d87   :  { %v13244_v2 = vsel %vm89_vm7, %v19751_v62, %v13161_v5 }
0x1d89   :  { %v13163_v8 = vpop.permute.xlu0 %13162 }
0x1d8a   :  { %v13193_v3 = vpop.permute.xlu1 %13192  ;;  %v13245_v26 = vsel %vm89_vm7, %v19752_v33, %v13163_v8 }
0x1d8b   :  { %v13252_v44 = vsel %vm6298_vm11, %v13244_v2, %v13193_v3  ;;  %v19758_v3 = vld [vmem:[#allocation28_spill] sm:$0xff] }
0x1d8d   :  { %v13195_v45 = vpop.permute.xlu0 %13194 }
0x1d8e   :  { %v13165_v21 = vpop.permute.xlu1 %13164  ;;  %v13253_v19 = vsel %vm6298_vm11, %v13245_v26, %v13195_v45 }
0x1d8f   :  { %v13246_v53 = vsel %vm89_vm7, %v19753_v14, %v13165_v21 }
0x1d91   :  { %v13167_v47 = vpop.permute.xlu0 %13166 }
0x1d92   :  { %v13197_v7 = vpop.permute.xlu1 %13196 }
0x1d93   :  { %v13254_v10 = vsel %vm6298_vm11, %v13246_v53, %v13197_v7 }
0x1d95   :  { %v13199_v56 = vpop.permute.xlu0 %13198 }
0x1e3e   :  { %v12608_v41 = vpop.f32.mrb[160].mxu1 }
0x1e3f   :  { %13216 = vrot.lane.b32.xlu1 %v12608_v41, %s19746_s2  ;;  %v15727_v15 = vpop.f32.mrb[161].mxu1 }
0x1e42   :  { %v12684_v12 = vpop.f32.mrb[164].mxu0 }
0x1e43   :  { %13218 = vrot.lane.b32.xlu0 %v12684_v12, %s19746_s2  ;;  %v15732_v54 = vpop.f32.mrb[165].mxu0 }
0x1e44   :  { %v19754_v54 = vld [vmem:[#allocation10_spill] sm:$0xff] }
0x1e46   :  { %v12760_v1 = vpop.f32.mrb[162].mxu1 }
0x1e47   :  { %13220 = vrot.lane.b32.xlu1 %v12760_v1, %s19746_s2  ;;  %v15737_v40 = vpop.f32.mrb[163].mxu1  ;;  %v13247_v1 = vsel %vm89_vm7, %v19754_v54, %v13167_v47 }
0x1e48   :  { %v13255_v40 = vsel %vm6298_vm11, %v13247_v1, %v13199_v56 }
0x1e4a   :  { %v12836_v32 = vpop.f32.mrb[166].mxu0 }
0x1e4b   :  { %v12912_v24 = vpop.f32.mrb[164].mxu1  ;;  %13222 = vrot.lane.b32.xlu0 %v12836_v32, %s19746_s2  ;;  %v15742_v57 = vpop.f32.mrb[167].mxu0 }
0x1e4c   :  { %13224 = vrot.lane.b32.xlu1 %v12912_v24, %s19746_s2  ;;  %v15747_v17 = vpop.f32.mrb[165].mxu1  ;;  %v14400_v57 = vld [vmem:[%s19598_s13 + $0x1] ss:$0 sm:$0xff] }
0x1e4e   :  { %v12988_v55 = vpop.f32.mrb[168].mxu0 }
0x1e4f   :  { %v13064_v51 = vpop.f32.mrb[166].mxu1  ;;  %13226 = vrot.lane.b32.xlu0 %v12988_v55, %s19746_s2  ;;  %v15752_v49 = vpop.f32.mrb[169].mxu0 }
0x1e50   :  { %13228 = vrot.lane.b32.xlu1 %v13064_v51, %s19746_s2  ;;  %v15757_v52 = vpop.f32.mrb[167].mxu1 }
0x1e51   :  { %v19755_v52 = vld [vmem:[#allocation26_spill] sm:$0xff] }
0x1e52   :  { %v13140_v63 = vpop.f32.mrb[170].mxu0 }
0x1e53   :  { %13230 = vrot.lane.b32.xlu0 %v13140_v63, %s19746_s2  ;;  %v15762_v50 = vpop.f32.mrb[171].mxu0 }
0x1e54   :  { %v19756_v50 = vld [vmem:[#allocation25_spill] sm:$0xff] }
0x1eb1   :  { %v13217_v29 = vpop.permute.xlu1 %13216 }
0x1eb2   :  { %v13256_v48 = vsel %vm6307_vm12, %v13248_v4, %v13217_v29 }
0x1eb3   :  { %15771 = vmatprep.mubr.msk.f32.mxu1 %vm209_vm9, %v13256_v48 }
0x1eb5   :  { %v13219_v18 = vpop.permute.xlu0 %13218 }
0x1eb6   :  { %v13257_v13 = vsel %vm6307_vm12, %v13249_v39, %v13219_v18 }
0x1eb7   :  { %15772 = vmatmul.mubr.msk.f32.vlgmr.msra.gmra.mrb[168].mxu1 %vm209_vm9, %v13257_v13 }
0x1eb9   :  { %v13221_v27 = vpop.permute.xlu1 %13220 }
0x1eba   :  { %v13258_v30 = vsel %vm6307_vm12, %v13250_v46, %v13221_v27  ;;  %v19762_v46 = vld [vmem:[#allocation19_spill] sm:$0xff] }
0x1ebb   :  { %15774 = vmatprep.mubr.msk.f32.mxu1 %vm209_vm9, %v13258_v30 }
0x1ebd   :  { %v13223_v22 = vpop.permute.xlu0 %13222 }
0x1ebe   :  { %v13259_v38 = vsel %vm6307_vm12, %v13251_v61, %v13223_v22  ;;  %v13225_v59 = vpop.permute.xlu1 %13224 }
0x1ebf   :  { %v13260_v16 = vsel %vm6307_vm12, %v13252_v44, %v13225_v59  ;;  %15775 = vmatmul.mubr.msk.f32.gmra.mrb[170].mxu1 %vm209_vm9, %v13259_v38 }
0x1ec0   :  { %15777 = vmatprep.mubr.msk.f32.mxu1 %vm209_vm9, %v13260_v16 }
0x1ec1   :  { %v13227_v42 = vpop.permute.xlu0 %13226 }
0x1ec2   :  { %v13261_v41 = vsel %vm6307_vm12, %v13253_v19, %v13227_v42  ;;  %v13229_v15 = vpop.permute.xlu1 %13228 }
0x1ec3   :  { %v13262_v12 = vsel %vm6307_vm12, %v13254_v10, %v13229_v15  ;;  %15778 = vmatmul.mubr.msk.f32.gmra.mrb[172].mxu1 %vm209_vm9, %v13261_v41 }
0x1ec4   :  { %15780 = vmatprep.mubr.msk.f32.mxu1 %vm209_vm9, %v13262_v12 }
0x1ec5   :  { %v13231_v32 = vpop.permute.xlu0 %13230 }
0x1ec6   :  { %v13263_v24 = vsel %vm6307_vm12, %v13255_v40, %v13231_v32 }
0x1ec7   :  { %15781 = vmatmul.mubr.msk.f32.gmra.mrb[174].mxu1 %vm209_vm9, %v13263_v24 }
0x1f8a   :  { %v15773_v17 = vpop.f32.mrb[168].mxu1 }
0x1f8b   :  { %v13373_v55 = vadd.f32 %v15773_v17, %v14400_v57  ;;  %v13367_v51 = vpop.f32.mrb[169].mxu1 }
0x1f8c   :  { %v13368_v49 = vadd.f32 %v14400_v57, %v13367_v51 }
0x1f8d   :  { %v13407_v63 = vadd.f32 %v13373_v55, %v19755_v52 }
0x1f8e   :  { %v13406_v28 = vadd.f32 %v13368_v49, %v19756_v50 }
0x1f8f   :  { %v13421_v43 = vsel %vm209_vm9, %v13407_v63, 0.0 }
0x1f90   :  { %13422 = vadd.xlane.f32.xlu0 %v13421_v43  ;;  %v13418_v20 = vsel %vm209_vm9, %v13406_v28, 0.0 }
0x1f91   :  { %13419 = vadd.xlane.f32.xlu1 %v13418_v20 }
0x1f92   :  { %v15776_v37 = vpop.f32.mrb[170].mxu1 }
0x1f93   :  { %v13383_v31 = vadd.f32 %v15776_v37, %v14400_v57  ;;  %v13377_v6 = vpop.f32.mrb[171].mxu1 }
0x1f94   :  { %v13378_v23 = vadd.f32 %v14400_v57, %v13377_v6 }
0x1f95   :  { %v13409_v45 = vadd.f32 %v13383_v31, %v19758_v3  ;;  %v14414_v3 = vld [vmem:[%s19601_s16 + $0x28] sm:$0xff] }
0x1f96   :  { %v13408_v5 = vadd.f32 %v13378_v23, %v19757_v35  ;;  %v15779_v8 = vpop.f32.mrb[172].mxu1 }
0x1f97   :  { %v13387_v21 = vpop.f32.mrb[173].mxu1  ;;  %v13393_v47 = vadd.f32 %v15779_v8, %v14400_v57  ;;  %v13427_v48 = vsel %vm209_vm9, %v13409_v45, 0.0  ;;  %v14413_v8 = vld [vmem:[%s19601_s16 + $0x20] sm:$0xff] }
0x1f98   :  { %v13388_v7 = vadd.f32 %v14400_v57, %v13387_v21  ;;  %v13424_v25 = vsel %vm209_vm9, %v13408_v5, 0.0  ;;  %v14415_v21 = vld [vmem:[%s19601_s16 + $0x30] sm:$0xff] }
0x1f99   :  { %13425 = vadd.xlane.f32.xlu0 %v13424_v25  ;;  %v13411_v9 = vadd.f32 %v13393_v47, %v19760_v58  ;;  %v14416_v47 = vld [vmem:[%s19601_s16 + $0x38] sm:$0xff] }
0x1f9a   :  { %v13410_v4 = vadd.f32 %v13388_v7, %v19759_v34  ;;  %v15782_v56 = vpop.f32.mrb[174].mxu1  ;;  %v15947_v7 = vpack.c.bf16 %v14416_v47, %v14415_v21  ;;  %v14429_v21 = vld [vmem:[%s19603_s18 + $0x50] sm:$0xff]  ;;  %v14430_v47 = vld [vmem:[%s19603_s18 + $0x58] sm:$0xff] }
0x1f9b   :  { %v13397_v29 = vpop.f32.mrb[175].mxu1  ;;  %v13403_v39 = vadd.f32 %v15782_v56, %v14400_v57  ;;  %v13433_v30 = vsel %vm209_vm9, %v13411_v9, 0.0 }
0x1f9c   :  { %v13398_v18 = vadd.f32 %v14400_v57, %v13397_v29  ;;  %v13430_v13 = vsel %vm209_vm9, %v13410_v4, 0.0 }
0x1f9d   :  { %13428 = vadd.xlane.f32.xlu0 %v13427_v48  ;;  %13431 = vadd.xlane.f32.xlu1 %v13430_v13  ;;  %v13413_v27 = vadd.f32 %v13403_v39, %v19762_v46 }
0x1f9e   :  { %v13412_v36 = vadd.f32 %v13398_v18, %v19761_v60 }
0x1f9f   :  { %v13439_v0 = vsel %vm209_vm9, %v13413_v27, 0.0 }
0x1fa0   :  { %v13436_v11 = vsel %vm209_vm9, %v13412_v36, 0.0 }
0x1fa1   :  { %13434 = vadd.xlane.f32.xlu0 %v13433_v30  ;;  %13437 = vadd.xlane.f32.xlu1 %v13436_v11 }
0x1fa5   :  { %13440 = vadd.xlane.f32.xlu0 %v13439_v0 }
0x201d   :  { %v13423_v61 = vpop.xlane.xlu0 %13422 }
0x201e   :  { %v13443_v62 = vmul.f32 0.03125, %v13423_v61  ;;  %v13420_v2 = vpop.xlane.xlu1 %13419 }
0x201f   :  { %v13442_v22 = vmul.f32 0.03125, %v13420_v2 }
0x2020   :  { %v19342_v44 = vsub.f32 %v13407_v63, %v13443_v62 }
0x2021   :  { %v19344_v38 = vsub.f32 %v13406_v28, %v13442_v22 }
0x2022   :  { %v13459_v59 = vmul.f32 %v19342_v44, %v19342_v44 }
0x2023   :  { %v13458_v16 = vmul.f32 %v19344_v38, %v19344_v38 }
0x2024   :  { %v13469_v33 = vsel %vm209_vm9, %v13459_v59, 0.0 }
0x2025   :  { %13470 = vadd.xlane.f32.xlu0 %v13469_v33  ;;  %v13466_v26 = vsel %vm209_vm9, %v13458_v16, 0.0  ;;  %v14412_v33 = vld [vmem:[%s19600_s15 + $0x1] ss:$0 sm:$0xff] }
0x2026   :  { %v13426_v19 = vpop.xlane.xlu0 %13425  ;;  %13467 = vadd.xlane.f32.xlu1 %v13466_v26 }
0x2027   :  { %v13444_v14 = vmul.f32 0.03125, %v13426_v19 }
0x2029   :  { %v19352_v53 = vsub.f32 %v13408_v5, %v13444_v14 }
0x202a   :  { %v13429_v42 = vpop.xlane.xlu0 %13428  ;;  %v13432_v10 = vpop.xlane.xlu1 %13431 }
0x202b   :  { %v13445_v41 = vmul.f32 0.03125, %v13429_v42  ;;  %v13446_v15 = vmul.f32 0.03125, %v13432_v10  ;;  %v13460_v12 = vmul.f32 %v19352_v53, %v19352_v53 }
0x202d   :  { %v19356_v54 = vsub.f32 %v13409_v45, %v13445_v41  ;;  %v19358_v1 = vsub.f32 %v13410_v4, %v13446_v15  ;;  %v13472_v40 = vsel %vm209_vm9, %v13460_v12, 0.0  ;;  %v15943_v45 = vpack.c.bf16 %v14414_v3, %v14413_v8  ;;  %v14427_v3 = vld [vmem:[%s19603_s18 + $0x40] sm:$0xff] }
0x202e   :  { %v13435_v32 = vpop.xlane.xlu0 %13434  ;;  %13473 = vadd.xlane.f32.xlu1 %v13472_v40  ;;  %v13438_v24 = vpop.xlane.xlu1 %13437 }
0x202f   :  { %v13447_v57 = vmul.f32 0.03125, %v13435_v32  ;;  %v13448_v17 = vmul.f32 0.03125, %v13438_v24  ;;  %v13461_v55 = vmul.f32 %v19356_v54, %v19356_v54  ;;  %v13462_v51 = vmul.f32 %v19358_v1, %v19358_v1  ;;  %15944 = vmatprep.subr.bf16.mxu0 %v15943_v45 }
0x2030   :  { %15946 = vmatpush3.bf16.msra.mxu0 %v15943_v45 }
0x2031   :  { %v19365_v49 = vsub.f32 %v13411_v9, %v13447_v57  ;;  %v19367_v52 = vsub.f32 %v13412_v36, %v13448_v17  ;;  %v13475_v63 = vsel %vm209_vm9, %v13461_v55, 0.0  ;;  %v13478_v50 = vsel %vm209_vm9, %v13462_v51, 0.0  ;;  %15948 = vmatprep.subr.bf16.mxu0 %v15947_v7 }
0x2032   :  { %13476 = vadd.xlane.f32.xlu0 %v13475_v63  ;;  %v13441_v28 = vpop.xlane.xlu0 %13440  ;;  %13479 = vadd.xlane.f32.xlu1 %v13478_v50 }
0x2033   :  { %v13449_v43 = vmul.f32 0.03125, %v13441_v28  ;;  %v13463_v20 = vmul.f32 %v19365_v49, %v19365_v49  ;;  %v13464_v37 = vmul.f32 %v19367_v52, %v19367_v52 }
0x2034   :  { %15950 = vmatpush3.bf16.msra.mxu0 %v15947_v7  ;;  %v15955_v7 = vpack.c.bf16 %v14430_v47, %v14429_v21 }
0x2035   :  { %v19375_v31 = vsub.f32 %v13413_v27, %v13449_v43  ;;  %v13481_v6 = vsel %vm209_vm9, %v13463_v20, 0.0  ;;  %v13484_v23 = vsel %vm209_vm9, %v13464_v37, 0.0  ;;  %v14411_v27 = vld [vmem:[%s19599_s14 + $0x1] ss:$0 sm:$0xff] }
0x2036   :  { %13482 = vadd.xlane.f32.xlu0 %v13481_v6  ;;  %13485 = vadd.xlane.f32.xlu1 %v13484_v23 }
0x2037   :  { %v13465_v35 = vmul.f32 %v19375_v31, %v19375_v31 }
0x2039   :  { %v13487_v5 = vsel %vm209_vm9, %v13465_v35, 0.0 }
0x203a   :  { %13488 = vadd.xlane.f32.xlu0 %v13487_v5 }
0x20b2   :  { %v13471_v25 = vpop.xlane.xlu0 %13470 }
0x20b3   :  { %v13491_v34 = vmul.f32 0.03125, %v13471_v25  ;;  %v13468_v4 = vpop.xlane.xlu1 %13467  ;;  %v14431_v25 = vld [vmem:[%s19603_s18 + $0x60] sm:$0xff] }
0x20b4   :  { %v13490_v56 = vmul.f32 0.03125, %v13468_v4 }
0x20b5   :  { %v13499_v29 = vadd.f32 1e-12, %v13491_v34  ;;  %v14432_v34 = vld [vmem:[%s19603_s18 + $0x68] sm:$0xff] }
0x20b6   :  { %v13498_v48 = vadd.f32 1e-12, %v13490_v56  ;;  %v15959_v4 = vpack.c.bf16 %v14432_v34, %v14431_v25  ;;  %v14433_v56 = vld [vmem:[%s19603_s18 + $0x70] sm:$0xff] }
0x20b7   :  { %16285 = vrsqrt.f32 %v13499_v29  ;;  %v14434_v29 = vld [vmem:[%s19603_s18 + $0x78] sm:$0xff] }
0x20b8   :  { %16287 = vrsqrt.f32 %v13498_v48  ;;  %v15963_v48 = vpack.c.bf16 %v14434_v29, %v14433_v56 }
0x20bb   :  { %v13474_v58 = vpop.xlane.xlu1 %13473 }
0x20bc   :  { %v13492_v9 = vmul.f32 0.03125, %v13474_v58  ;;  %v14418_v58 = vld [vmem:[%s19602_s17 + $0x1] ss:$0 sm:$0xff] }
0x20be   :  { %v13500_v39 = vadd.f32 1e-12, %v13492_v9 }
0x20bf   :  { %v13477_v18 = vpop.xlane.xlu0 %13476  ;;  %v13480_v13 = vpop.xlane.xlu1 %13479 }
0x20c0   :  { %16289 = vrsqrt.f32 %v13500_v39  ;;  %v13493_v60 = vmul.f32 0.03125, %v13477_v18  ;;  %v13494_v36 = vmul.f32 0.03125, %v13480_v13 }
0x20c1   :  { %v16286_v46 = vpop.eup %16285 }
0x20c2   :  { %v16288_v30 = vpop.eup %16287  ;;  %v13515_v11 = vmul.f32 %v16286_v46, %v19342_v44  ;;  %v13501_v0 = vadd.f32 1e-12, %v13493_v60  ;;  %v13502_v61 = vadd.f32 1e-12, %v13494_v36 }
0x20c3   :  { %v13483_v62 = vpop.xlane.xlu0 %13482  ;;  %v13486_v2 = vpop.xlane.xlu1 %13485  ;;  %v13514_v22 = vmul.f32 %v16288_v30, %v19344_v38 }
0x20c4   :  { %16291 = vrsqrt.f32 %v13501_v0  ;;  %v13495_v59 = vmul.f32 0.03125, %v13483_v62  ;;  %v13496_v16 = vmul.f32 0.03125, %v13486_v2  ;;  %v13529_v26 = vmul.f32 %v14411_v27, %v13515_v11 }
0x20c5   :  { %16293 = vrsqrt.f32 %v13502_v61  ;;  %v13528_v19 = vmul.f32 %v14411_v27, %v13514_v22 }
0x20c6   :  { %v13503_v14 = vadd.f32 1e-12, %v13495_v59  ;;  %v13504_v42 = vadd.f32 1e-12, %v13496_v16  ;;  %v19404_v15 = vadd.f32 %v14412_v33, %v13529_v26 }
0x20c7   :  { %v13489_v10 = vpop.xlane.xlu0 %13488  ;;  %v19402_v44 = vadd.f32 %v14412_v33, %v13528_v19 }
0x20c8   :  { %16295 = vrsqrt.f32 %v13503_v14  ;;  %v13497_v41 = vmul.f32 0.03125, %v13489_v10 }
0x20c9   :  { %16297 = vrsqrt.f32 %v13504_v42  ;;  %15791 = vmatprep.mubr.msk.f32.mxu0 %vm209_vm9, %v19402_v44 }
0x20ca   :  { %v16290_v38 = vpop.eup %16289  ;;  %v13505_v12 = vadd.f32 1e-12, %v13497_v41  ;;  %15792 = vmatmul.mubr.msk.f32.vlgmr.msra.gmra.mrb[172].mxu0 %vm209_vm9, %v19404_v15 }
0x20cb   :  { %v13516_v40 = vmul.f32 %v16290_v38, %v19352_v53 }
0x20cc   :  { %16299 = vrsqrt.f32 %v13505_v12 }
0x20cd   :  { %v13530_v32 = vmul.f32 %v14411_v27, %v13516_v40 }
0x20ce   :  { %v16292_v24 = vpop.eup %16291 }
0x20cf   :  { %v16294_v57 = vpop.eup %16293  ;;  %v19411_v17 = vadd.f32 %v14412_v33, %v13530_v32  ;;  %v13517_v55 = vmul.f32 %v16292_v24, %v19356_v54 }
0x20d0   :  { %v13518_v51 = vmul.f32 %v16294_v57, %v19358_v1 }
0x20d1   :  { %15794 = vmatprep.mubr.msk.f32.mxu0 %vm209_vm9, %v19411_v17  ;;  %v13531_v63 = vmul.f32 %v14411_v27, %v13517_v55 }
0x20d2   :  { %v16296_v50 = vpop.eup %16295  ;;  %v13532_v28 = vmul.f32 %v14411_v27, %v13518_v51 }
0x20d3   :  { %v16298_v43 = vpop.eup %16297  ;;  %v19417_v20 = vadd.f32 %v14412_v33, %v13531_v63  ;;  %v13519_v53 = vmul.f32 %v16296_v50, %v19365_v49 }
0x20d4   :  { %v19420_v37 = vadd.f32 %v14412_v33, %v13532_v28  ;;  %v13520_v6 = vmul.f32 %v16298_v43, %v19367_v52 }
0x20d5   :  { %15795 = vmatmul.mubr.msk.f32.gmra.mrb[174].mxu0 %vm209_vm9, %v19417_v20  ;;  %v13533_v54 = vmul.f32 %v14411_v27, %v13519_v53 }
0x20d6   :  { %v16300_v1 = vpop.eup %16299  ;;  %15797 = vmatprep.mubr.msk.f32.mxu0 %vm209_vm9, %v19420_v37  ;;  %v13534_v23 = vmul.f32 %v14411_v27, %v13520_v6 }
0x20d7   :  { %v19427_v35 = vadd.f32 %v14412_v33, %v13533_v54  ;;  %v13521_v5 = vmul.f32 %v16300_v1, %v19375_v31  ;;  %v14428_v31 = vld [vmem:[%s19603_s18 + $0x48] sm:$0xff] }
0x20d8   :  { %v19430_v8 = vadd.f32 %v14412_v33, %v13534_v23  ;;  %v15951_v45 = vpack.c.bf16 %v14428_v31, %v14427_v3 }
0x20d9   :  { %15798 = vmatmul.mubr.msk.f32.gmra.mrb[176].mxu0 %vm209_vm9, %v19427_v35  ;;  %v13535_v49 = vmul.f32 %v14411_v27, %v13521_v5 }
0x20da   :  { %15800 = vmatprep.mubr.msk.f32.mxu0 %vm209_vm9, %v19430_v8  ;;  %15952 = vmatprep.subr.bf16.mxu1 %v15951_v45 }
0x20db   :  { %v19436_v52 = vadd.f32 %v14412_v33, %v13535_v49  ;;  %15954 = vmatpush3.bf16.msra.mxu1 %v15951_v45 }
0x20dc   :  { %15956 = vmatprep.subr.bf16.mxu1 %v15955_v7 }
0x20dd   :  { %15801 = vmatmul.mubr.msk.f32.gmra.mrb[178].mxu0 %vm209_vm9, %v19436_v52 }
0x20df   :  { %15958 = vmatpush3.bf16.msra.mxu1 %v15955_v7 }
0x20e0   :  { %15960 = vmatprep.subr.bf16.mxu1 %v15959_v4 }
0x20e3   :  { %15962 = vmatpush3.bf16.msra.mxu1 %v15959_v4 }
0x20e4   :  { %15964 = vmatprep.subr.bf16.mxu1 %v15963_v48 }
0x20e7   :  { %15966 = vmatpush3.bf16.msra.mxu1 %v15963_v48 }
0x219d   :  { %v15793_v9 = vpop.f32.mrb[172].mxu0 }
0x219e   :  { %v13659_v39 = vadd.f32 %v15793_v9, %v14418_v58  ;;  %v13653_v18 = vpop.f32.mrb[173].mxu0 }
0x219f   :  { %v13654_v13 = vadd.f32 %v14418_v58, %v13653_v18 }
0x21a0   :  { %v13701_v60 = vmul.f32 0.044715, %v13659_v39  ;;  %v13693_v29 = vmul.f32 0.5, %v13659_v39 }
0x21a1   :  { %v13700_v36 = vmul.f32 0.044715, %v13654_v13  ;;  %v13692_v31 = vmul.f32 0.5, %v13654_v13 }
0x21a2   :  { %v13709_v46 = vmul.f32 %v13701_v60, %v13659_v39 }
0x21a3   :  { %v13708_v27 = vmul.f32 %v13700_v36, %v13654_v13 }
0x21a4   :  { %v13717_v30 = vmul.f32 %v13709_v46, %v13659_v39 }
0x21a5   :  { %v13716_v11 = vmul.f32 %v13708_v27, %v13654_v13 }
0x21a6   :  { %v13725_v0 = vadd.f32 %v13717_v30, %v13659_v39 }
0x21a7   :  { %v13724_v61 = vadd.f32 %v13716_v11, %v13654_v13 }
0x21a8   :  { %v13733_v62 = vmul.f32 0.7978846, %v13725_v0  ;;  %v15796_v2 = vpop.f32.mrb[174].mxu0 }
0x21a9   :  { %v19467_v22 = vadd.f32 %v15796_v2, %v14418_v58  ;;  %v13663_v59 = vpop.f32.mrb[175].mxu0  ;;  %v13732_v16 = vmul.f32 0.7978846, %v13724_v61 }
0x21aa   :  { %16301 = vtanh.f32 %v13733_v62  ;;  %v13664_v33 = vadd.f32 %v14418_v58, %v13663_v59 }
0x21ab   :  { %v13703_v26 = vmul.f32 0.044715, %v19467_v22  ;;  %16303 = vtanh.f32 %v13732_v16  ;;  %v13695_v2 = vmul.f32 0.5, %v19467_v22 }
0x21ac   :  { %v13702_v19 = vmul.f32 0.044715, %v13664_v33  ;;  %v15799_v14 = vpop.f32.mrb[176].mxu0  ;;  %v13694_v61 = vmul.f32 0.5, %v13664_v33 }
0x21ad   :  { %v13711_v42 = vmul.f32 %v13703_v26, %v19467_v22  ;;  %v19471_v10 = vadd.f32 %v15799_v14, %v14418_v58  ;;  %v13673_v41 = vpop.f32.mrb[177].mxu0 }
0x21ae   :  { %v13710_v38 = vmul.f32 %v13702_v19, %v13664_v33  ;;  %v13674_v12 = vadd.f32 %v14418_v58, %v13673_v41 }
0x21af   :  { %v13719_v40 = vmul.f32 %v13711_v42, %v19467_v22  ;;  %v13705_v32 = vmul.f32 0.044715, %v19471_v10 }
0x21b0   :  { %v13718_v24 = vmul.f32 %v13710_v38, %v13664_v33  ;;  %v13704_v57 = vmul.f32 0.044715, %v13674_v12  ;;  %v15802_v55 = vpop.f32.mrb[178].mxu0  ;;  %v13696_v42 = vmul.f32 0.5, %v13674_v12  ;;  %v13697_v38 = vmul.f32 0.5, %v19471_v10 }
0x21b1   :  { %v13727_v51 = vadd.f32 %v13719_v40, %v19467_v22  ;;  %v13713_v63 = vmul.f32 %v13705_v32, %v19471_v10  ;;  %v19477_v50 = vadd.f32 %v15802_v55, %v14418_v58  ;;  %v13683_v28 = vpop.f32.mrb[179].mxu0 }
0x21b2   :  { %v13726_v43 = vadd.f32 %v13718_v24, %v13664_v33  ;;  %v13712_v53 = vmul.f32 %v13704_v57, %v13674_v12  ;;  %v13684_v6 = vadd.f32 %v14418_v58, %v13683_v28 }
0x21b3   :  { %v13721_v54 = vmul.f32 %v13713_v63, %v19471_v10  ;;  %v13707_v1 = vmul.f32 0.044715, %v19477_v50  ;;  %v13735_v23 = vmul.f32 0.7978846, %v13727_v51  ;;  %v13699_v51 = vmul.f32 0.5, %v19477_v50 }
0x21b4   :  { %v16302_v5 = vpop.eup %16301  ;;  %v13720_v49 = vmul.f32 %v13712_v53, %v13674_v12  ;;  %v13706_v3 = vmul.f32 0.044715, %v13684_v6  ;;  %v13734_v45 = vmul.f32 0.7978846, %v13726_v43  ;;  %v13698_v22 = vmul.f32 0.5, %v13684_v6 }
0x21b5   :  { %v16304_v21 = vpop.eup %16303  ;;  %v13749_v47 = vadd.f32 1.0, %v16302_v5  ;;  %v13729_v7 = vadd.f32 %v13721_v54, %v19471_v10  ;;  %v13715_v25 = vmul.f32 %v13707_v1, %v19477_v50  ;;  %16305 = vtanh.f32 %v13735_v23  ;;  %v14436_v10 = vld [vmem:[%s19604_s19 + $0x1] ss:$0 sm:$0xff] }
0x21b6   :  { %v13728_v34 = vadd.f32 %v13720_v49, %v13674_v12  ;;  %v13714_v4 = vmul.f32 %v13706_v3, %v13684_v6  ;;  %v13748_v56 = vadd.f32 1.0, %v16304_v21  ;;  %16307 = vtanh.f32 %v13734_v45 }
0x21b7   :  { %v13723_v48 = vmul.f32 %v13715_v25, %v19477_v50  ;;  %v13737_v58 = vmul.f32 0.7978846, %v13729_v7  ;;  %v13757_v13 = vmul.f32 %v13749_v47, %v13693_v29 }
0x21b8   :  { %v13722_v9 = vmul.f32 %v13714_v4, %v13684_v6  ;;  %v13756_v18 = vmul.f32 %v13748_v56, %v13692_v31  ;;  %v13736_v60 = vmul.f32 0.7978846, %v13728_v34 }
0x21b9   :  { %v13731_v36 = vadd.f32 %v13723_v48, %v19477_v50  ;;  %16309 = vtanh.f32 %v13737_v58 }
0x21ba   :  { %v13730_v46 = vadd.f32 %v13722_v9, %v13684_v6  ;;  %15819 = vmatprep.mubr.msk.f32.mxu1 %vm6826_vm13, %v13756_v18  ;;  %16311 = vtanh.f32 %v13736_v60 }
0x21bb   :  { %15820 = vmatmul.mubr.msk.f32.vlgmr.msra.gmra.mrb[176].mxu1 %vm6826_vm13, %v13757_v13  ;;  %v13739_v27 = vmul.f32 0.7978846, %v13731_v36 }
0x21bc   :  { %v13738_v30 = vmul.f32 0.7978846, %v13730_v46 }
0x21bd   :  { %16313 = vtanh.f32 %v13739_v27 }
0x21be   :  { %16315 = vtanh.f32 %v13738_v30 }
0x21bf   :  { %v16306_v39 = vpop.eup %16305 }
0x21c0   :  { %v16308_v11 = vpop.eup %16307  ;;  %v13751_v0 = vadd.f32 1.0, %v16306_v39 }
0x21c1   :  { %v13750_v62 = vadd.f32 1.0, %v16308_v11 }
0x21c2   :  { %v13759_v19 = vmul.f32 %v13751_v0, %v13695_v2 }
0x21c3   :  { %v16310_v59 = vpop.eup %16309  ;;  %v13758_v16 = vmul.f32 %v13750_v62, %v13694_v61 }
0x21c4   :  { %v16312_v26 = vpop.eup %16311  ;;  %v13753_v14 = vadd.f32 1.0, %v16310_v59 }
0x21c5   :  { %15822 = vmatprep.mubr.msk.f32.mxu1 %vm6826_vm13, %v13758_v16  ;;  %v13752_v41 = vadd.f32 1.0, %v16312_v26 }
0x21c6   :  { %15823 = vmatmul.mubr.msk.f32.gmra.mrb[178].mxu1 %vm6826_vm13, %v13759_v19  ;;  %v13761_v33 = vmul.f32 %v13753_v14, %v13697_v38 }
0x21c7   :  { %v16314_v40 = vpop.eup %16313  ;;  %v13760_v32 = vmul.f32 %v13752_v41, %v13696_v42 }
0x21c8   :  { %v16316_v24 = vpop.eup %16315  ;;  %v13755_v57 = vadd.f32 1.0, %v16314_v40 }
0x21c9   :  { %15825 = vmatprep.mubr.msk.f32.mxu1 %vm6826_vm13, %v13760_v32  ;;  %v13754_v55 = vadd.f32 1.0, %v16316_v24 }
0x21ca   :  { %15826 = vmatmul.mubr.msk.f32.gmra.mrb[180].mxu1 %vm6826_vm13, %v13761_v33  ;;  %v13763_v12 = vmul.f32 %v13755_v57, %v13699_v51 }
0x21cb   :  { %v13762_v63 = vmul.f32 %v13754_v55, %v13698_v22 }
0x21cd   :  { %15828 = vmatprep.mubr.msk.f32.mxu1 %vm6826_vm13, %v13762_v63 }
0x21ce   :  { %15829 = vmatmul.mubr.msk.f32.gmra.mrb[182].mxu1 %vm6826_vm13, %v13763_v12 }
0x228e   :  { %v15821_v28 = vpop.f32.mrb[176].mxu1 }
0x228f   :  { %v13877_v43 = vadd.f32 %v15821_v28, %v14436_v10  ;;  %v13871_v53 = vpop.f32.mrb[177].mxu1 }
0x2290   :  { %v13872_v54 = vadd.f32 %v14436_v10, %v13871_v53 }
0x2291   :  { %v13911_v6 = vadd.f32 %v13877_v43, %v19404_v15 }
0x2292   :  { %v13910_v1 = vadd.f32 %v13872_v54, %v19402_v44 }
0x2293   :  { %v13925_v50 = vsel %vm209_vm9, %v13911_v6, 0.0 }
0x2294   :  { %13926 = vadd.xlane.f32.xlu0 %v13925_v50  ;;  %v13922_v23 = vsel %vm209_vm9, %v13910_v1, 0.0 }
0x2295   :  { %13923 = vadd.xlane.f32.xlu1 %v13922_v23 }
0x2299   :  { %v15824_v5 = vpop.f32.mrb[178].mxu1 }
0x229a   :  { %v13887_v49 = vadd.f32 %v15824_v5, %v14436_v10  ;;  %v13881_v3 = vpop.f32.mrb[179].mxu1 }
0x229b   :  { %v13882_v31 = vadd.f32 %v14436_v10, %v13881_v3 }
0x229c   :  { %v13913_v45 = vadd.f32 %v13887_v49, %v19417_v20 }
0x229d   :  { %v13912_v21 = vadd.f32 %v13882_v31, %v19411_v17  ;;  %v15827_v47 = vpop.f32.mrb[180].mxu1 }
0x229e   :  { %v13897_v7 = vadd.f32 %v15827_v47, %v14436_v10  ;;  %v13891_v25 = vpop.f32.mrb[181].mxu1  ;;  %v13931_v15 = vsel %vm209_vm9, %v13913_v45, 0.0 }
0x229f   :  { %v13892_v44 = vadd.f32 %v14436_v10, %v13891_v25  ;;  %13932 = vadd.xlane.f32.xlu0 %v13931_v15  ;;  %v13928_v34 = vsel %vm209_vm9, %v13912_v21, 0.0 }
0x22a0   :  { %v13915_v4 = vadd.f32 %v13897_v7, %v19427_v35  ;;  %13929 = vadd.xlane.f32.xlu1 %v13928_v34 }
0x22a1   :  { %v13914_v56 = vadd.f32 %v13892_v44, %v19420_v37  ;;  %v15830_v29 = vpop.f32.mrb[182].mxu1 }
0x22a2   :  { %v13907_v48 = vadd.f32 %v15830_v29, %v14436_v10  ;;  %v13901_v58 = vpop.f32.mrb[183].mxu1  ;;  %v13937_v20 = vsel %vm209_vm9, %v13915_v4, 0.0 }
0x22a3   :  { %v13902_v17 = vadd.f32 %v14436_v10, %v13901_v58  ;;  %13938 = vadd.xlane.f32.xlu0 %v13937_v20  ;;  %v13934_v9 = vsel %vm209_vm9, %v13914_v56, 0.0 }
0x22a4   :  { %v13917_v18 = vadd.f32 %v13907_v48, %v19436_v52  ;;  %13935 = vadd.xlane.f32.xlu1 %v13934_v9  ;;  %v14448_v9 = vld [vmem:[%s19606_s21 + $0x1] ss:$0 sm:$0xff] }
0x22a5   :  { %v13916_v60 = vadd.f32 %v13902_v17, %v19430_v8 }
0x22a6   :  { %v13943_v13 = vsel %vm209_vm9, %v13917_v18, 0.0 }
0x22a7   :  { %13944 = vadd.xlane.f32.xlu0 %v13943_v13  ;;  %v13940_v35 = vsel %vm209_vm9, %v13916_v60, 0.0 }
0x22a8   :  { %13941 = vadd.xlane.f32.xlu1 %v13940_v35 }
0x2321   :  { %v13927_v37 = vpop.xlane.xlu0 %13926 }
0x2322   :  { %v13947_v36 = vmul.f32 0.03125, %v13927_v37  ;;  %v13924_v46 = vpop.xlane.xlu1 %13923 }
0x2323   :  { %v13946_v27 = vmul.f32 0.03125, %v13924_v46 }
0x2324   :  { %v13955_v30 = vsub.f32 %v13911_v6, %v13947_v36 }
0x2325   :  { %v19515_v39 = vsub.f32 %v13910_v1, %v13946_v27 }
0x2326   :  { %v13963_v11 = vmul.f32 %v13955_v30, %v13955_v30 }
0x2327   :  { %v13962_v52 = vmul.f32 %v19515_v39, %v19515_v39 }
0x2328   :  { %v13973_v0 = vsel %vm209_vm9, %v13963_v11, 0.0 }
0x2329   :  { %13974 = vadd.xlane.f32.xlu0 %v13973_v0  ;;  %v13970_v8 = vsel %vm209_vm9, %v13962_v52, 0.0 }
0x232a   :  { %13971 = vadd.xlane.f32.xlu1 %v13970_v8 }
0x232c   :  { %v13933_v61 = vpop.xlane.xlu0 %13932 }
0x232d   :  { %v13949_v62 = vmul.f32 0.03125, %v13933_v61  ;;  %v13930_v2 = vpop.xlane.xlu1 %13929 }
0x232e   :  { %v13948_v59 = vmul.f32 0.03125, %v13930_v2 }
0x232f   :  { %v19521_v16 = vsub.f32 %v13913_v45, %v13949_v62 }
0x2330   :  { %v19523_v26 = vsub.f32 %v13912_v21, %v13948_v59  ;;  %v13939_v19 = vpop.xlane.xlu0 %13938 }
0x2331   :  { %v13951_v14 = vmul.f32 0.03125, %v13939_v19  ;;  %v13936_v42 = vpop.xlane.xlu1 %13935  ;;  %v13965_v41 = vmul.f32 %v19521_v16, %v19521_v16 }
0x2332   :  { %v13950_v38 = vmul.f32 0.03125, %v13936_v42  ;;  %v13964_v40 = vmul.f32 %v19523_v26, %v19523_v26 }
0x2333   :  { %v19529_v32 = vsub.f32 %v13915_v4, %v13951_v14  ;;  %v13979_v24 = vsel %vm209_vm9, %v13965_v41, 0.0  ;;  %v14447_v4 = vld [vmem:[%s19605_s20 + $0x1] ss:$0 sm:$0xff]  ;;  %s16392_s20 = smov [#allocation2]  }
0x2334   :  { %v19532_v33 = vsub.f32 %v13914_v56, %v13950_v38  ;;  %13980 = vadd.xlane.f32.xlu0 %v13979_v24  ;;  %v13945_v57 = vpop.xlane.xlu0 %13944  ;;  %v13976_v22 = vsel %vm209_vm9, %v13964_v40, 0.0  ;;  %s14067_s21 = sshll.u32 %s16392_s20, 4  ;;  %s14068_s21 = int_to_ptr.vmem [resolvable:$true] %s14067_s21 }
0x2335   :  { %v13953_v55 = vmul.f32 0.03125, %v13945_v57  ;;  %13977 = vadd.xlane.f32.xlu1 %v13976_v22  ;;  %v13942_v51 = vpop.xlane.xlu1 %13941  ;;  %v13967_v63 = vmul.f32 %v19529_v32, %v19529_v32  ;;  %s16358_s30 = scalar_lea.vmem %s14068_s21, 1024  ;;  %p16363_p1 = scmp.lt.s32.totalorder %s14068_s21, %s14068_s21 }
0x2336   :  { %v13952_v12 = vmul.f32 0.03125, %v13942_v51  ;;  %v13966_v10 = vmul.f32 %v19532_v33, %v19532_v33  ;;  %p16359_p0 = scmp.ne.s32.totalorder %s14068_s21, %s16358_s30  ;;  %p16364_p2 = scmp.lt.s32.totalorder %s16358_s30, %s16358_s30 }
0x2337   :  { %v19539_v28 = vsub.f32 %v13917_v18, %v13953_v55  ;;  %v13985_v43 = vsel %vm209_vm9, %v13967_v63, 0.0 }
0x2338   :  { %v19542_v53 = vsub.f32 %v13916_v60, %v13952_v12  ;;  %13986 = vadd.xlane.f32.xlu0 %v13985_v43  ;;  %v13982_v54 = vsel %vm209_vm9, %v13966_v10, 0.0  ;;  %p16365_p3 = por %p16364_p2, %p16363_p1 }
0x2339   :  { %13983 = vadd.xlane.f32.xlu1 %v13982_v54  ;;  %v13969_v6 = vmul.f32 %v19539_v28, %v19539_v28 }
0x233a   :  { %v13968_v1 = vmul.f32 %v19542_v53, %v19542_v53  ;;  %p16366_p4 = pnand %p16365_p3, %p16359_p0 }
0x233b   :  { %v13991_v50 = vsel %vm209_vm9, %v13969_v6, 0.0 }
0x233c   :  { %13992 = vadd.xlane.f32.xlu0 %v13991_v50  ;;  %v13988_v23 = vsel %vm209_vm9, %v13968_v1, 0.0 }
0x233d   :  { %13989 = vadd.xlane.f32.xlu1 %v13988_v23 }
0x23b6   :  { %v13975_v5 = vpop.xlane.xlu0 %13974 }
0x23b7   :  { %v13995_v49 = vmul.f32 0.03125, %v13975_v5  ;;  %v13972_v3 = vpop.xlane.xlu1 %13971 }
0x23b8   :  { %v13994_v31 = vmul.f32 0.03125, %v13972_v3 }
0x23b9   :  { %v14003_v45 = vadd.f32 1e-12, %v13995_v49 }
0x23ba   :  { %v14002_v21 = vadd.f32 1e-12, %v13994_v31 }
0x23bb   :  { %16317 = vrsqrt.f32 %v14003_v45 }
0x23bc   :  { %16319 = vrsqrt.f32 %v14002_v21 }
0x23c1   :  { %v13981_v47 = vpop.xlane.xlu0 %13980 }
0x23c2   :  { %v13997_v7 = vmul.f32 0.03125, %v13981_v47  ;;  %v13978_v25 = vpop.xlane.xlu1 %13977 }
0x23c3   :  { %v13996_v15 = vmul.f32 0.03125, %v13978_v25 }
0x23c4   :  { %v14005_v44 = vadd.f32 1e-12, %v13997_v7 }
0x23c5   :  { %v16318_v34 = vpop.eup %16317  ;;  %v14004_v56 = vadd.f32 1e-12, %v13996_v15  ;;  %v13987_v29 = vpop.xlane.xlu0 %13986 }
0x23c6   :  { %v16320_v48 = vpop.eup %16319  ;;  %v14019_v58 = vmul.f32 %v16318_v34, %v13955_v30  ;;  %16321 = vrsqrt.f32 %v14005_v44  ;;  %v13999_v20 = vmul.f32 0.03125, %v13987_v29  ;;  %v13984_v17 = vpop.xlane.xlu1 %13983 }
0x23c7   :  { %v14018_v18 = vmul.f32 %v16320_v48, %v19515_v39  ;;  %16323 = vrsqrt.f32 %v14004_v56  ;;  %v13998_v60 = vmul.f32 0.03125, %v13984_v17 }
0x23c8   :  { %v14033_v13 = vmul.f32 %v14447_v4, %v14019_v58  ;;  %v14007_v35 = vadd.f32 1e-12, %v13999_v20 }
0x23c9   :  { %v14032_v37 = vmul.f32 %v14447_v4, %v14018_v18  ;;  %v14006_v36 = vadd.f32 1e-12, %v13998_v60  ;;  %v13993_v46 = vpop.xlane.xlu0 %13992 }
0x23ca   :  { %v14047_v27 = vadd.f32 %v14448_v9, %v14033_v13  ;;  %16325 = vrsqrt.f32 %v14007_v35  ;;  %v14001_v11 = vmul.f32 0.03125, %v13993_v46  ;;  %v13990_v30 = vpop.xlane.xlu1 %13989 }
0x23cb   :  { %v14046_v52 = vadd.f32 %v14448_v9, %v14032_v37  ;;  %16327 = vrsqrt.f32 %v14006_v36  ;;  %v14000_v0 = vmul.f32 0.03125, %v13990_v30 }
0x23cc   :  { %14055 = vst.msk [vmem:[#allocation2 + $0x8] sm:$0xff] %vm209_vm9, %v14047_v27  ;;  %v14009_v8 = vadd.f32 1e-12, %v14001_v11 }
0x23cd   :  { %14054 = vst.msk [vmem:[#allocation2] sm:$0xff] %vm209_vm9, %v14046_v52  ;;  %v14008_v39 = vadd.f32 1e-12, %v14000_v0 }
0x23ce   :  { %16329 = vrsqrt.f32 %v14009_v8 }
0x23cf   :  { %16331 = vrsqrt.f32 %v14008_v39 }
0x23d0   :  { %v16322_v61 = vpop.eup %16321 }
0x23d1   :  { %v16324_v62 = vpop.eup %16323  ;;  %v14021_v2 = vmul.f32 %v16322_v61, %v19521_v16 }
0x23d2   :  { %v14020_v59 = vmul.f32 %v16324_v62, %v19523_v26 }
0x23d3   :  { %v14035_v19 = vmul.f32 %v14447_v4, %v14021_v2 }
0x23d4   :  { %v16326_v14 = vpop.eup %16325  ;;  %v14034_v42 = vmul.f32 %v14447_v4, %v14020_v59 }
0x23d5   :  { %v16328_v41 = vpop.eup %16327  ;;  %v14049_v38 = vadd.f32 %v14448_v9, %v14035_v19  ;;  %v14023_v40 = vmul.f32 %v16326_v14, %v19529_v32 }
0x23d6   :  { %v14048_v24 = vadd.f32 %v14448_v9, %v14034_v42  ;;  %v14022_v57 = vmul.f32 %v16328_v41, %v19532_v33 }
0x23d7   :  { %14057 = vst.msk [vmem:[#allocation2 + $0x18] sm:$0xff] %vm209_vm9, %v14049_v38  ;;  %v14037_v22 = vmul.f32 %v14447_v4, %v14023_v40 }
0x23d8   :  { %v16330_v55 = vpop.eup %16329  ;;  %14056 = vst.msk [vmem:[#allocation2 + $0x10] sm:$0xff] %vm209_vm9, %v14048_v24  ;;  %v14036_v51 = vmul.f32 %v14447_v4, %v14022_v57 }
0x23d9   :  { %v16332_v16 = vpop.eup %16331  ;;  %v14051_v63 = vadd.f32 %v14448_v9, %v14037_v22  ;;  %v14025_v26 = vmul.f32 %v16330_v55, %v19539_v28 }
0x23da   :  { %v14050_v12 = vadd.f32 %v14448_v9, %v14036_v51  ;;  %v14024_v10 = vmul.f32 %v16332_v16, %v19542_v53 }
0x23db   :  { %14059 = vst.msk [vmem:[#allocation2 + $0x28] sm:$0xff] %vm209_vm9, %v14051_v63  ;;  %v14039_v32 = vmul.f32 %v14447_v4, %v14025_v26 }
0x23dc   :  { %14058 = vst.msk [vmem:[#allocation2 + $0x20] sm:$0xff] %vm209_vm9, %v14050_v12  ;;  %v14038_v33 = vmul.f32 %v14447_v4, %v14024_v10 }
0x23dd   :  { %v14053_v43 = vadd.f32 %v14448_v9, %v14039_v32 }
0x23de   :  { %v14052_v54 = vadd.f32 %v14448_v9, %v14038_v33 }
0x23df   :  { %14061 = vst.msk [vmem:[#allocation2 + $0x38] sm:$0xff] %vm209_vm9, %v14053_v43 }
0x23e0   :  { %14060 = vst.msk [vmem:[#allocation2 + $0x30] sm:$0xff] %vm209_vm9, %v14052_v54 }
0x23e1   :  { %16369 = shalt.err (!%p16366_p4)
}
0x23e2   :  { %s16370_s14 = scalar_lea.hbm %s19607_s22, 1024 }
0x23e3   :  { %p16371_p5 = scmp.ne.s32.totalorder %s19607_s22, %s16370_s14  ;;  %p16374_p6 = scmp.lt.u32.totalorder %s16370_s14, %s19607_s22 }
0x23e5   :  { %p16376_p7 = pnand %p16374_p6, %p16371_p5 }
0x23e7   :  { %16379 = shalt.err (!%p16376_p7)
}
0x23e8   :  { %s16393_s25 = smov 128  }
0x23e9   :  { %14073 = dma.vmem_to_hbm [thread:$0]  %s14068_s21, 1024, %s19607_s22, [#allocation3], %s16393_s25, %s16393_s25, %s19740_s27  }
0x23ea   :  { %16380 = dma.done.wait [#allocation3], 1024  }
0x23eb   :  { %16381 = vsyncadd [#allocation3], 4294966272 }
0x23ec   :  { %14077 = vsyncpa [#allocation3], 1 }

</bundles_post_ra>
